<compile_context>
chip_gen: v7x
topology: tpu7x:2x2x1
jax: 0.10.0
libtpu: 0.0.40
codegen_flags: <defaults>
</compile_context>

<pallas_src>
import functools

import jax
import jax.numpy as jnp
from jax.experimental import pallas as pl
from jax.experimental.pallas import tpu as pltpu

_BN_EPS = 1e-5
_LRELU_SLOPE = 0.1
_LANES = 128
_VMEM_LIMIT_BYTES = 48 * 1024 * 1024   # below v7x's 64 MiB physical VMEM
_VMEM_BUDGET_BYTES = 40 * 1024 * 1024  # wrapper-side sanity budget


def _round_up(x, m):
    return ((x + m - 1) // m) * m


def _bn_lrelu(y, gamma, beta, inv_m):
    """Training-mode BN (batch stats over rows), folded scale/shift + LeakyReLU.

    y: (M, Cpad) f32 conv output; gamma/beta: (1, Cpad) f32 (zero-padded).
    """
    mean = jnp.sum(y, axis=0, keepdims=True) * inv_m
    centered = y - mean
    var = jnp.sum(centered * centered, axis=0, keepdims=True) * inv_m  # biased var
    scale = gamma * jax.lax.rsqrt(var + _BN_EPS)       # rsqrt -> EUP (free slot)
    z = centered * scale + beta                        # one FMA per element
    return jnp.where(z > 0, z, _LRELU_SLOPE * z)       # LeakyReLU(0.1)


def _fused_block_kernel(x_ref, w1_ref, w2_ref, g1_ref, b1_ref, g2_ref, b2_ref,
                        o_ref, *pad_refs,
                        n, h, w, cpad, k1, p1, k2, p2, frequency, mxu_dtype):
    """frequency x (conv1+BN+LReLU, conv2+BN+LReLU), fully VMEM resident."""
    m_rows = n * h * w
    inv_m = 1.0 / m_rows

    # Optional zero-padded activation scratch buffers (only for k > 1 layers).
    pads = list(pad_refs)
    pad1 = pads.pop(0) if k1 > 1 else None
    pad2 = pads.pop(0) if k2 > 1 else None

    # Zero the halo once; the interior is overwritten every iteration.
    for pref in (pad1, pad2):
        if pref is not None:
            pref[...] = jnp.zeros(pref.shape, pref.dtype)

    def conv_same(a, w_ref, pad_ref, k, p):
        """Stride-1 'same' conv as k*k shifted (M,Cpad)@(Cpad,Cpad) MXU matmuls."""
        if k == 1:
            return jnp.dot(a.astype(mxu_dtype), w_ref[0],
                           preferred_element_type=jnp.float32)
        # Scratch kept in f32: sublane-offset window loads/stores stay on the
        # well-supported 32-bit path; taps are cast to bf16 at the MXU boundary.
        pad_ref[:, pl.ds(p, h), pl.ds(p, w), :] = (
            a.astype(pad_ref.dtype).reshape(n, h, w, cpad))
        acc = jnp.zeros((m_rows, cpad), jnp.float32)
        for ki in range(k):
            for kj in range(k):
                tap = pad_ref[:, pl.ds(ki, h), pl.ds(kj, w), :]
                tap = tap.reshape(m_rows, cpad).astype(mxu_dtype)
                acc = acc + jnp.dot(tap, w_ref[ki * k + kj],
                                    preferred_element_type=jnp.float32)
        return acc

    a = x_ref[...].reshape(m_rows, cpad)          # lane-dense (M, 128*) operand
    for _ in range(frequency):                    # statically unrolled
        y1 = conv_same(a, w1_ref, pad1, k1, p1)
        a = _bn_lrelu(y1, g1_ref[...], b1_ref[...], inv_m)   # f32
        y2 = conv_same(a, w2_ref, pad2, k2, p2)
        a = _bn_lrelu(y2, g2_ref[...], b2_ref[...], inv_m)   # f32

    o_ref[...] = a.reshape(n, h, w, cpad).astype(o_ref.dtype)  # 128-lane store


def _pack_conv_weight(w_oikk, cpad, mxu_dtype):
    """PyTorch (Cout, Cin, kh, kw) -> (kh*kw, cpad, cpad), zero-padded, bf16."""
    c_out, c_in, k, _ = w_oikk.shape
    w2 = jnp.transpose(w_oikk, (2, 3, 1, 0)).reshape(k * k, c_in, c_out)
    w2 = jnp.pad(w2, ((0, 0), (0, cpad - c_in), (0, cpad - c_out)))
    return w2.astype(mxu_dtype)


def _pack_vec(v, cpad):
    """(C,) -> (1, cpad) f32, zero-padded (keeps padded channels exactly 0)."""
    return jnp.pad(v.astype(jnp.float32), (0, cpad - v.shape[0])).reshape(1, cpad)


def repetitive_block(x_nchw, params, cfg1, cfg2, frequency,
                     mxu_dtype=jnp.bfloat16):
    """RepetitiveBlock.forward, NCHW in / NCHW out, one fused pallas_call."""
    n, c_in, h, w = x_nchw.shape
    k1, s1, p1 = cfg1
    k2, s2, p2 = cfg2
    f1, c1 = params["w1"].shape[:2]
    f2, c2 = params["w2"].shape[:2]
    assert c1 == c_in and c2 == f1, "channel plumbing mismatch"
    # TODO(synk): fused path covers stride-1 size-preserving ('same') convs only
    # (what YOLOv1 RepetitiveBlocks use); general stride/padding needs per-layer
    # output-size bookkeeping and strided in-kernel gathers.
    assert s1 == 1 and s2 == 1, "fused kernel assumes stride 1"
    assert 2 * p1 == k1 - 1 and 2 * p2 == k2 - 1, "fused kernel assumes 'same' padding"

    cpad = _round_up(max(c_in, f1, f2), _LANES)
    itemsize = jnp.dtype(mxu_dtype).itemsize
    m_rows = n * h * w

    # --- VMEM footprint check (sized against v7x's 64 MiB physical VMEM) ---
    est = m_rows * cpad * (itemsize + 4)                          # input + f32 output
    est += (k1 * k1 + k2 * k2) * cpad * cpad * itemsize           # packed weights
    est += 4 * cpad * 4                                           # gamma / beta
    for k, p in ((k1, p1), (k2, p2)):
        if k > 1:
            est += n * (h + 2 * p) * (w + 2 * p) * cpad * 4       # f32 pad scratch
    est += 4 * m_rows * cpad * 4                                  # live f32 temporaries
    est *= 2                                                      # double-buffer headroom
    assert est < _VMEM_BUDGET_BYTES, (
        "activation too large for the fused VMEM-resident kernel; "
        "TODO(synk): M-tiled grid with two-pass BatchNorm needed")

    # --- lane-dense packing (done once; never re-packed inside the freq loop) ---
    x_nhwc = jnp.transpose(x_nchw, (0, 2, 3, 1))
    x_p = jnp.pad(x_nhwc, ((0, 0), (0, 0), (0, 0), (0, cpad - c_in))).astype(mxu_dtype)
    w1p = _pack_conv_weight(params["w1"], cpad, mxu_dtype)
    w2p = _pack_conv_weight(params["w2"], cpad, mxu_dtype)
    g1p, b1p = _pack_vec(params["g1"], cpad), _pack_vec(params["b1"], cpad)
    g2p, b2p = _pack_vec(params["g2"], cpad), _pack_vec(params["b2"], cpad)

    scratch_shapes = []
    for k, p in ((k1, p1), (k2, p2)):
        if k > 1:
            scratch_shapes.append(
                pltpu.VMEM((n, h + 2 * p, w + 2 * p, cpad), jnp.float32))

    kernel = functools.partial(
        _fused_block_kernel, n=n, h=h, w=w, cpad=cpad,
        k1=k1, p1=p1, k2=k2, p2=p2, frequency=frequency, mxu_dtype=mxu_dtype)

    flops = 2 * frequency * m_rows * cpad * cpad * (k1 * k1 + k2 * k2)
    bytes_accessed = (x_p.size * itemsize + (w1p.size + w2p.size) * itemsize
                      + 4 * cpad * 4 + m_rows * cpad * 4)

    def full(shape):
        return pl.BlockSpec(shape, lambda i: (0,) * len(shape))

    out = pl.pallas_call(
        kernel,
        out_shape=jax.ShapeDtypeStruct((n, h, w, cpad), jnp.float32),
        grid=(1,),
        in_specs=[full(x_p.shape), full(w1p.shape), full(w2p.shape),
                  full(g1p.shape), full(b1p.shape), full(g2p.shape), full(b2p.shape)],
        out_specs=full((n, h, w, cpad)),
        scratch_shapes=scratch_shapes,
        compiler_params=pltpu.CompilerParams(
            dimension_semantics=("arbitrary",),
            vmem_limit_bytes=_VMEM_LIMIT_BYTES),
        cost_estimate=pl.CostEstimate(
            flops=flops, transcendentals=2 * frequency * cpad,
            bytes_accessed=bytes_accessed),
    )(x_p, w1p, w2p, g1p, b1p, g2p, b2p)

    out = out[..., :f2]                              # drop zero-padded channels
    return jnp.transpose(out, (0, 3, 1, 2))          # NHWC -> NCHW


# ----------------------- pure-JAX reference (for sanity) -----------------------
def _ref_mini_block(x_nchw, w, gamma, beta, stride, pad):
    y = jax.lax.conv_general_dilated(
        x_nchw, w, window_strides=(stride, stride),
        padding=((pad, pad), (pad, pad)),
        dimension_numbers=("NCHW", "OIHW", "NCHW"))
    mean = jnp.mean(y, axis=(0, 2, 3), keepdims=True)
    var = jnp.mean((y - mean) ** 2, axis=(0, 2, 3), keepdims=True)
    z = (y - mean) * jax.lax.rsqrt(var + _BN_EPS)
    z = z * gamma.reshape(1, -1, 1, 1) + beta.reshape(1, -1, 1, 1)
    return jnp.where(z > 0, z, _LRELU_SLOPE * z)


def _ref_repetitive_block(x, params, cfg1, cfg2, frequency):
    for _ in range(frequency):
        x = _ref_mini_block(x, params["w1"], params["g1"], params["b1"], cfg1[1], cfg1[2])
        x = _ref_mini_block(x, params["w2"], params["g2"], params["b2"], cfg2[1], cfg2[2])
    return x


if __name__ == "__main__":
    # YOLOv1-style repetitive block: 1x1 reduce then 3x3 expand, repeated.
    in_channels_1, num_filters_1, k1, s1, p1 = 8, 4, 1, 1, 0
    in_channels_2, num_filters_2, k2, s2, p2 = 4, 8, 3, 1, 1
    frequency = 2

    key = jax.random.PRNGKey(0)
    kx, kw1, kw2, kg1, kb1, kg2, kb2 = jax.random.split(key, 7)

    x = jax.random.normal(kx, (2, in_channels_1, 16, 16), dtype=jnp.float32)
    params = {
        "w1": 0.1 * jax.random.normal(kw1, (num_filters_1, in_channels_1, k1, k1), jnp.float32),
        "g1": 1.0 + 0.1 * jax.random.normal(kg1, (num_filters_1,), jnp.float32),
        "b1": 0.1 * jax.random.normal(kb1, (num_filters_1,), jnp.float32),
        "w2": 0.1 * jax.random.normal(kw2, (num_filters_2, in_channels_2, k2, k2), jnp.float32),
        "g2": 1.0 + 0.1 * jax.random.normal(kg2, (num_filters_2,), jnp.float32),
        "b2": 0.1 * jax.random.normal(kb2, (num_filters_2,), jnp.float32),
    }
    cfg1 = (k1, s1, p1)
    cfg2 = (k2, s2, p2)

    run_bf16 = jax.jit(functools.partial(
        repetitive_block, cfg1=cfg1, cfg2=cfg2, frequency=frequency,
        mxu_dtype=jnp.bfloat16))
    run_f32 = jax.jit(functools.partial(
        repetitive_block, cfg1=cfg1, cfg2=cfg2, frequency=frequency,
        mxu_dtype=jnp.float32))

    out_bf16 = jax.block_until_ready(run_bf16(x, params))
    out_f32 = jax.block_until_ready(run_f32(x, params))

    ref = _ref_repetitive_block(x, params, cfg1, cfg2, frequency)
    assert out_bf16.shape == (2, num_filters_2, 16, 16), out_bf16.shape
    assert jnp.allclose(out_f32, ref, rtol=1e-2, atol=1e-2), "f32 path mismatch vs reference"
    assert jnp.allclose(out_bf16, ref, rtol=5e-2, atol=5e-2), "bf16 path mismatch vs reference"

    print("KERNEL_OK")
</pallas_src>

<mosaic_0001>
module attributes {stable_mosaic.version = 11 : i64} {
  func.func @_fused_block_kernel(%arg0: i32, %arg1: memref<2x16x16x128xbf16, #tpu.memory_space<vmem>>, %arg2: memref<1x128x128xbf16, #tpu.memory_space<vmem>>, %arg3: memref<9x128x128xbf16, #tpu.memory_space<vmem>>, %arg4: memref<1x128xf32, #tpu.memory_space<vmem>>, %arg5: memref<1x128xf32, #tpu.memory_space<vmem>>, %arg6: memref<1x128xf32, #tpu.memory_space<vmem>>, %arg7: memref<1x128xf32, #tpu.memory_space<vmem>>, %arg8: memref<2x16x16x128xf32, #tpu.memory_space<vmem>>, %arg9: memref<2x18x18x128xf32, #tpu.memory_space<vmem>>) attributes {dimension_semantics = [#tpu.dimension_semantics<arbitrary>], iteration_bounds = array<i64: 1>, scalar_prefetch = 0 : i64, scratch_operands = 1 : i64, tpu.core_type = #tpu.core_type<tc>, window_params = [{pipeline_mode = #tpu.pipeline_mode<synchronous>, transform_indices = @transform_0, window_bounds = array<i64: 2, 16, 16, 128>}, {pipeline_mode = #tpu.pipeline_mode<synchronous>, transform_indices = @transform_1, window_bounds = array<i64: 1, 128, 128>}, {pipeline_mode = #tpu.pipeline_mode<synchronous>, transform_indices = @transform_2, window_bounds = array<i64: 9, 128, 128>}, {pipeline_mode = #tpu.pipeline_mode<synchronous>, transform_indices = @transform_3, window_bounds = array<i64: 1, 128>}, {pipeline_mode = #tpu.pipeline_mode<synchronous>, transform_indices = @transform_4, window_bounds = array<i64: 1, 128>}, {pipeline_mode = #tpu.pipeline_mode<synchronous>, transform_indices = @transform_5, window_bounds = array<i64: 1, 128>}, {pipeline_mode = #tpu.pipeline_mode<synchronous>, transform_indices = @transform_6, window_bounds = array<i64: 1, 128>}, {pipeline_mode = #tpu.pipeline_mode<synchronous>, transform_indices = @transform_7, window_bounds = array<i64: 2, 16, 16, 128>}]} {
    %cst = arith.constant 0.000000e+00 : f32
    %0 = vector.broadcast %cst : f32 to vector<2x18x18x128xf32>
    %c0 = arith.constant 0 : index
    %c0_0 = arith.constant 0 : index
    %c0_1 = arith.constant 0 : index
    %c0_2 = arith.constant 0 : index
    %1 = vector.load %arg9[%c0, %c0_0, %c0_1, %c0_2] : memref<2x18x18x128xf32, #tpu.memory_space<vmem>>, vector<2x18x18x128xf32>
    tpu.vector_store %arg9[%c0, %c0_0, %c0_1, %c0_2], %0 {strides = array<i32>} : memref<2x18x18x128xf32, #tpu.memory_space<vmem>>, vector<2x18x18x128xf32>,
    %c0_3 = arith.constant 0 : index
    %c0_4 = arith.constant 0 : index
    %c0_5 = arith.constant 0 : index
    %c0_6 = arith.constant 0 : index
    %2 = vector.load %arg1[%c0_3, %c0_4, %c0_5, %c0_6] : memref<2x16x16x128xbf16, #tpu.memory_space<vmem>>, vector<2x16x16x128xbf16>
    %3 = vector.shape_cast %2 : vector<2x16x16x128xbf16> to vector<512x128xbf16>
    %c0_7 = arith.constant 0 : index
    %c0_8 = arith.constant 0 : index
    %c0_9 = arith.constant 0 : index
    %4 = vector.load %arg2[%c0_7, %c0_8, %c0_9] : memref<1x128x128xbf16, #tpu.memory_space<vmem>>, vector<1x128x128xbf16>
    %5 = vector.shape_cast %4 : vector<1x128x128xbf16> to vector<128x128xbf16>
    %cst_10 = arith.constant dense<0.000000e+00> : vector<512x128xf32>
    %6 = tpu.matmul %3, %5, %cst_10 {dimension_numbers = #tpu.dot_dimension_numbers<[1], [0], [0], [1], [0, 0, 1, 1], [], []>} : vector<512x128xbf16>, vector<128x128xbf16>, vector<512x128xf32> -> vector<512x128xf32>
    %c0_11 = arith.constant 0 : index
    %c0_12 = arith.constant 0 : index
    %7 = vector.load %arg4[%c0_11, %c0_12] : memref<1x128xf32, #tpu.memory_space<vmem>>, vector<1x128xf32>
    %c0_13 = arith.constant 0 : index
    %c0_14 = arith.constant 0 : index
    %8 = vector.load %arg5[%c0_13, %c0_14] : memref<1x128xf32, #tpu.memory_space<vmem>>, vector<1x128xf32>
    %cst_15 = arith.constant dense<0.000000e+00> : vector<128xf32>
    %9 = vector.multi_reduction <add>, %6, %cst_15 [0] : vector<512x128xf32> to vector<128xf32>
    %10 = vector.shape_cast %9 : vector<128xf32> to vector<1x128xf32>
    %cst_16 = arith.constant 0.001953125 : f32
    %11 = vector.broadcast %cst_16 : f32 to vector<1x128xf32>
    %12 = arith.mulf %10, %11 : vector<1x128xf32>
    %13 = vector.broadcast %12 : vector<1x128xf32> to vector<512x128xf32>
    %14 = arith.subf %6, %13 : vector<512x128xf32>
    %15 = arith.mulf %14, %14 : vector<512x128xf32>
    %cst_17 = arith.constant dense<0.000000e+00> : vector<128xf32>
    %16 = vector.multi_reduction <add>, %15, %cst_17 [0] : vector<512x128xf32> to vector<128xf32>
    %17 = vector.shape_cast %16 : vector<128xf32> to vector<1x128xf32>
    %cst_18 = arith.constant 0.001953125 : f32
    %18 = vector.broadcast %cst_18 : f32 to vector<1x128xf32>
    %19 = arith.mulf %17, %18 : vector<1x128xf32>
    %cst_19 = arith.constant 9.99999974E-6 : f32
    %20 = vector.broadcast %cst_19 : f32 to vector<1x128xf32>
    %21 = arith.addf %19, %20 : vector<1x128xf32>
    %22 = math.rsqrt %21 : vector<1x128xf32>
    %23 = arith.mulf %7, %22 : vector<1x128xf32>
    %24 = vector.broadcast %23 : vector<1x128xf32> to vector<512x128xf32>
    %25 = arith.mulf %14, %24 : vector<512x128xf32>
    %26 = vector.broadcast %8 : vector<1x128xf32> to vector<512x128xf32>
    %27 = arith.addf %25, %26 : vector<512x128xf32>
    %cst_20 = arith.constant 0.000000e+00 : f32
    %28 = vector.broadcast %cst_20 : f32 to vector<512x128xf32>
    %29 = arith.cmpf ogt, %27, %28 : vector<512x128xf32>
    %cst_21 = arith.constant 1.000000e-01 : f32
    %30 = vector.broadcast %cst_21 : f32 to vector<512x128xf32>
    %31 = arith.mulf %30, %27 : vector<512x128xf32>
    %32 = arith.select %29, %27, %31 : vector<512x128xi1>, vector<512x128xf32>
    %33 = vector.shape_cast %32 : vector<512x128xf32> to vector<2x16x16x128xf32>
    %c0_22 = arith.constant 0 : index
    %c1 = arith.constant 1 : index
    %c1_23 = arith.constant 1 : index
    %c0_24 = arith.constant 0 : index
    %34 = vector.load %arg9[%c0_22, %c1, %c1_23, %c0_24] : memref<2x18x18x128xf32, #tpu.memory_space<vmem>>, vector<2x16x16x128xf32>
    tpu.vector_store %arg9[%c0_22, %c1, %c1_23, %c0_24], %33 {strides = array<i32>} : memref<2x18x18x128xf32, #tpu.memory_space<vmem>>, vector<2x16x16x128xf32>,
    %cst_25 = arith.constant 0.000000e+00 : f32
    %35 = vector.broadcast %cst_25 : f32 to vector<512x128xf32>
    %c0_26 = arith.constant 0 : index
    %c0_27 = arith.constant 0 : index
    %c0_28 = arith.constant 0 : index
    %c0_29 = arith.constant 0 : index
    %36 = vector.load %arg9[%c0_26, %c0_27, %c0_28, %c0_29] : memref<2x18x18x128xf32, #tpu.memory_space<vmem>>, vector<2x16x16x128xf32>
    %37 = vector.shape_cast %36 : vector<2x16x16x128xf32> to vector<512x128xf32>
    %38 = arith.truncf %37 : vector<512x128xf32> to vector<512x128xbf16>
    %c0_30 = arith.constant 0 : index
    %c0_31 = arith.constant 0 : index
    %c0_32 = arith.constant 0 : index
    %39 = vector.load %arg3[%c0_30, %c0_31, %c0_32] : memref<9x128x128xbf16, #tpu.memory_space<vmem>>, vector<1x128x128xbf16>
    %40 = vector.shape_cast %39 : vector<1x128x128xbf16> to vector<128x128xbf16>
    %cst_33 = arith.constant dense<0.000000e+00> : vector<512x128xf32>
    %41 = tpu.matmul %38, %40, %cst_33 {dimension_numbers = #tpu.dot_dimension_numbers<[1], [0], [0], [1], [0, 0, 1, 1], [], []>} : vector<512x128xbf16>, vector<128x128xbf16>, vector<512x128xf32> -> vector<512x128xf32>
    %42 = arith.addf %35, %41 : vector<512x128xf32>
    %c0_34 = arith.constant 0 : index
    %c0_35 = arith.constant 0 : index
    %c1_36 = arith.constant 1 : index
    %c0_37 = arith.constant 0 : index
    %43 = vector.load %arg9[%c0_34, %c0_35, %c1_36, %c0_37] : memref<2x18x18x128xf32, #tpu.memory_space<vmem>>, vector<2x16x16x128xf32>
    %44 = vector.shape_cast %43 : vector<2x16x16x128xf32> to vector<512x128xf32>
    %45 = arith.truncf %44 : vector<512x128xf32> to vector<512x128xbf16>
    %c1_38 = arith.constant 1 : index
    %c0_39 = arith.constant 0 : index
    %c0_40 = arith.constant 0 : index
    %46 = vector.load %arg3[%c1_38, %c0_39, %c0_40] : memref<9x128x128xbf16, #tpu.memory_space<vmem>>, vector<1x128x128xbf16>
    %47 = vector.shape_cast %46 : vector<1x128x128xbf16> to vector<128x128xbf16>
    %cst_41 = arith.constant dense<0.000000e+00> : vector<512x128xf32>
    %48 = tpu.matmul %45, %47, %cst_41 {dimension_numbers = #tpu.dot_dimension_numbers<[1], [0], [0], [1], [0, 0, 1, 1], [], []>} : vector<512x128xbf16>, vector<128x128xbf16>, vector<512x128xf32> -> vector<512x128xf32>
    %49 = arith.addf %42, %48 : vector<512x128xf32>
    %c0_42 = arith.constant 0 : index
    %c0_43 = arith.constant 0 : index
    %c2 = arith.constant 2 : index
    %c0_44 = arith.constant 0 : index
    %50 = vector.load %arg9[%c0_42, %c0_43, %c2, %c0_44] : memref<2x18x18x128xf32, #tpu.memory_space<vmem>>, vector<2x16x16x128xf32>
    %51 = vector.shape_cast %50 : vector<2x16x16x128xf32> to vector<512x128xf32>
    %52 = arith.truncf %51 : vector<512x128xf32> to vector<512x128xbf16>
    %c2_45 = arith.constant 2 : index
    %c0_46 = arith.constant 0 : index
    %c0_47 = arith.constant 0 : index
    %53 = vector.load %arg3[%c2_45, %c0_46, %c0_47] : memref<9x128x128xbf16, #tpu.memory_space<vmem>>, vector<1x128x128xbf16>
    %54 = vector.shape_cast %53 : vector<1x128x128xbf16> to vector<128x128xbf16>
    %cst_48 = arith.constant dense<0.000000e+00> : vector<512x128xf32>
    %55 = tpu.matmul %52, %54, %cst_48 {dimension_numbers = #tpu.dot_dimension_numbers<[1], [0], [0], [1], [0, 0, 1, 1], [], []>} : vector<512x128xbf16>, vector<128x128xbf16>, vector<512x128xf32> -> vector<512x128xf32>
    %56 = arith.addf %49, %55 : vector<512x128xf32>
    %c0_49 = arith.constant 0 : index
    %c1_50 = arith.constant 1 : index
    %c0_51 = arith.constant 0 : index
    %c0_52 = arith.constant 0 : index
    %57 = vector.load %arg9[%c0_49, %c1_50, %c0_51, %c0_52] : memref<2x18x18x128xf32, #tpu.memory_space<vmem>>, vector<2x16x16x128xf32>
    %58 = vector.shape_cast %57 : vector<2x16x16x128xf32> to vector<512x128xf32>
    %59 = arith.truncf %58 : vector<512x128xf32> to vector<512x128xbf16>
    %c3 = arith.constant 3 : index
    %c0_53 = arith.constant 0 : index
    %c0_54 = arith.constant 0 : index
    %60 = vector.load %arg3[%c3, %c0_53, %c0_54] : memref<9x128x128xbf16, #tpu.memory_space<vmem>>, vector<1x128x128xbf16>
    %61 = vector.shape_cast %60 : vector<1x128x128xbf16> to vector<128x128xbf16>
    %cst_55 = arith.constant dense<0.000000e+00> : vector<512x128xf32>
    %62 = tpu.matmul %59, %61, %cst_55 {dimension_numbers = #tpu.dot_dimension_numbers<[1], [0], [0], [1], [0, 0, 1, 1], [], []>} : vector<512x128xbf16>, vector<128x128xbf16>, vector<512x128xf32> -> vector<512x128xf32>
    %63 = arith.addf %56, %62 : vector<512x128xf32>
    %c0_56 = arith.constant 0 : index
    %c1_57 = arith.constant 1 : index
    %c1_58 = arith.constant 1 : index
    %c0_59 = arith.constant 0 : index
    %64 = vector.load %arg9[%c0_56, %c1_57, %c1_58, %c0_59] : memref<2x18x18x128xf32, #tpu.memory_space<vmem>>, vector<2x16x16x128xf32>
    %65 = vector.shape_cast %64 : vector<2x16x16x128xf32> to vector<512x128xf32>
    %66 = arith.truncf %65 : vector<512x128xf32> to vector<512x128xbf16>
    %c4 = arith.constant 4 : index
    %c0_60 = arith.constant 0 : index
    %c0_61 = arith.constant 0 : index
    %67 = vector.load %arg3[%c4, %c0_60, %c0_61] : memref<9x128x128xbf16, #tpu.memory_space<vmem>>, vector<1x128x128xbf16>
    %68 = vector.shape_cast %67 : vector<1x128x128xbf16> to vector<128x128xbf16>
    %cst_62 = arith.constant dense<0.000000e+00> : vector<512x128xf32>
    %69 = tpu.matmul %66, %68, %cst_62 {dimension_numbers = #tpu.dot_dimension_numbers<[1], [0], [0], [1], [0, 0, 1, 1], [], []>} : vector<512x128xbf16>, vector<128x128xbf16>, vector<512x128xf32> -> vector<512x128xf32>
    %70 = arith.addf %63, %69 : vector<512x128xf32>
    %c0_63 = arith.constant 0 : index
    %c1_64 = arith.constant 1 : index
    %c2_65 = arith.constant 2 : index
    %c0_66 = arith.constant 0 : index
    %71 = vector.load %arg9[%c0_63, %c1_64, %c2_65, %c0_66] : memref<2x18x18x128xf32, #tpu.memory_space<vmem>>, vector<2x16x16x128xf32>
    %72 = vector.shape_cast %71 : vector<2x16x16x128xf32> to vector<512x128xf32>
    %73 = arith.truncf %72 : vector<512x128xf32> to vector<512x128xbf16>
    %c5 = arith.constant 5 : index
    %c0_67 = arith.constant 0 : index
    %c0_68 = arith.constant 0 : index
    %74 = vector.load %arg3[%c5, %c0_67, %c0_68] : memref<9x128x128xbf16, #tpu.memory_space<vmem>>, vector<1x128x128xbf16>
    %75 = vector.shape_cast %74 : vector<1x128x128xbf16> to vector<128x128xbf16>
    %cst_69 = arith.constant dense<0.000000e+00> : vector<512x128xf32>
    %76 = tpu.matmul %73, %75, %cst_69 {dimension_numbers = #tpu.dot_dimension_numbers<[1], [0], [0], [1], [0, 0, 1, 1], [], []>} : vector<512x128xbf16>, vector<128x128xbf16>, vector<512x128xf32> -> vector<512x128xf32>
    %77 = arith.addf %70, %76 : vector<512x128xf32>
    %c0_70 = arith.constant 0 : index
    %c2_71 = arith.constant 2 : index
    %c0_72 = arith.constant 0 : index
    %c0_73 = arith.constant 0 : index
    %78 = vector.load %arg9[%c0_70, %c2_71, %c0_72, %c0_73] : memref<2x18x18x128xf32, #tpu.memory_space<vmem>>, vector<2x16x16x128xf32>
    %79 = vector.shape_cast %78 : vector<2x16x16x128xf32> to vector<512x128xf32>
    %80 = arith.truncf %79 : vector<512x128xf32> to vector<512x128xbf16>
    %c6 = arith.constant 6 : index
    %c0_74 = arith.constant 0 : index
    %c0_75 = arith.constant 0 : index
    %81 = vector.load %arg3[%c6, %c0_74, %c0_75] : memref<9x128x128xbf16, #tpu.memory_space<vmem>>, vector<1x128x128xbf16>
    %82 = vector.shape_cast %81 : vector<1x128x128xbf16> to vector<128x128xbf16>
    %cst_76 = arith.constant dense<0.000000e+00> : vector<512x128xf32>
    %83 = tpu.matmul %80, %82, %cst_76 {dimension_numbers = #tpu.dot_dimension_numbers<[1], [0], [0], [1], [0, 0, 1, 1], [], []>} : vector<512x128xbf16>, vector<128x128xbf16>, vector<512x128xf32> -> vector<512x128xf32>
    %84 = arith.addf %77, %83 : vector<512x128xf32>
    %c0_77 = arith.constant 0 : index
    %c2_78 = arith.constant 2 : index
    %c1_79 = arith.constant 1 : index
    %c0_80 = arith.constant 0 : index
    %85 = vector.load %arg9[%c0_77, %c2_78, %c1_79, %c0_80] : memref<2x18x18x128xf32, #tpu.memory_space<vmem>>, vector<2x16x16x128xf32>
    %86 = vector.shape_cast %85 : vector<2x16x16x128xf32> to vector<512x128xf32>
    %87 = arith.truncf %86 : vector<512x128xf32> to vector<512x128xbf16>
    %c7 = arith.constant 7 : index
    %c0_81 = arith.constant 0 : index
    %c0_82 = arith.constant 0 : index
    %88 = vector.load %arg3[%c7, %c0_81, %c0_82] : memref<9x128x128xbf16, #tpu.memory_space<vmem>>, vector<1x128x128xbf16>
    %89 = vector.shape_cast %88 : vector<1x128x128xbf16> to vector<128x128xbf16>
    %cst_83 = arith.constant dense<0.000000e+00> : vector<512x128xf32>
    %90 = tpu.matmul %87, %89, %cst_83 {dimension_numbers = #tpu.dot_dimension_numbers<[1], [0], [0], [1], [0, 0, 1, 1], [], []>} : vector<512x128xbf16>, vector<128x128xbf16>, vector<512x128xf32> -> vector<512x128xf32>
    %91 = arith.addf %84, %90 : vector<512x128xf32>
    %c0_84 = arith.constant 0 : index
    %c2_85 = arith.constant 2 : index
    %c2_86 = arith.constant 2 : index
    %c0_87 = arith.constant 0 : index
    %92 = vector.load %arg9[%c0_84, %c2_85, %c2_86, %c0_87] : memref<2x18x18x128xf32, #tpu.memory_space<vmem>>, vector<2x16x16x128xf32>
    %93 = vector.shape_cast %92 : vector<2x16x16x128xf32> to vector<512x128xf32>
    %94 = arith.truncf %93 : vector<512x128xf32> to vector<512x128xbf16>
    %c8 = arith.constant 8 : index
    %c0_88 = arith.constant 0 : index
    %c0_89 = arith.constant 0 : index
    %95 = vector.load %arg3[%c8, %c0_88, %c0_89] : memref<9x128x128xbf16, #tpu.memory_space<vmem>>, vector<1x128x128xbf16>
    %96 = vector.shape_cast %95 : vector<1x128x128xbf16> to vector<128x128xbf16>
    %cst_90 = arith.constant dense<0.000000e+00> : vector<512x128xf32>
    %97 = tpu.matmul %94, %96, %cst_90 {dimension_numbers = #tpu.dot_dimension_numbers<[1], [0], [0], [1], [0, 0, 1, 1], [], []>} : vector<512x128xbf16>, vector<128x128xbf16>, vector<512x128xf32> -> vector<512x128xf32>
    %98 = arith.addf %91, %97 : vector<512x128xf32>
    %c0_91 = arith.constant 0 : index
    %c0_92 = arith.constant 0 : index
    %99 = vector.load %arg6[%c0_91, %c0_92] : memref<1x128xf32, #tpu.memory_space<vmem>>, vector<1x128xf32>
    %c0_93 = arith.constant 0 : index
    %c0_94 = arith.constant 0 : index
    %100 = vector.load %arg7[%c0_93, %c0_94] : memref<1x128xf32, #tpu.memory_space<vmem>>, vector<1x128xf32>
    %cst_95 = arith.constant dense<0.000000e+00> : vector<128xf32>
    %101 = vector.multi_reduction <add>, %98, %cst_95 [0] : vector<512x128xf32> to vector<128xf32>
    %102 = vector.shape_cast %101 : vector<128xf32> to vector<1x128xf32>
    %cst_96 = arith.constant 0.001953125 : f32
    %103 = vector.broadcast %cst_96 : f32 to vector<1x128xf32>
    %104 = arith.mulf %102, %103 : vector<1x128xf32>
    %105 = vector.broadcast %104 : vector<1x128xf32> to vector<512x128xf32>
    %106 = arith.subf %98, %105 : vector<512x128xf32>
    %107 = arith.mulf %106, %106 : vector<512x128xf32>
    %cst_97 = arith.constant dense<0.000000e+00> : vector<128xf32>
    %108 = vector.multi_reduction <add>, %107, %cst_97 [0] : vector<512x128xf32> to vector<128xf32>
    %109 = vector.shape_cast %108 : vector<128xf32> to vector<1x128xf32>
    %cst_98 = arith.constant 0.001953125 : f32
    %110 = vector.broadcast %cst_98 : f32 to vector<1x128xf32>
    %111 = arith.mulf %109, %110 : vector<1x128xf32>
    %cst_99 = arith.constant 9.99999974E-6 : f32
    %112 = vector.broadcast %cst_99 : f32 to vector<1x128xf32>
    %113 = arith.addf %111, %112 : vector<1x128xf32>
    %114 = math.rsqrt %113 : vector<1x128xf32>
    %115 = arith.mulf %99, %114 : vector<1x128xf32>
    %116 = vector.broadcast %115 : vector<1x128xf32> to vector<512x128xf32>
    %117 = arith.mulf %106, %116 : vector<512x128xf32>
    %118 = vector.broadcast %100 : vector<1x128xf32> to vector<512x128xf32>
    %119 = arith.addf %117, %118 : vector<512x128xf32>
    %cst_100 = arith.constant 0.000000e+00 : f32
    %120 = vector.broadcast %cst_100 : f32 to vector<512x128xf32>
    %121 = arith.cmpf ogt, %119, %120 : vector<512x128xf32>
    %cst_101 = arith.constant 1.000000e-01 : f32
    %122 = vector.broadcast %cst_101 : f32 to vector<512x128xf32>
    %123 = arith.mulf %122, %119 : vector<512x128xf32>
    %124 = arith.select %121, %119, %123 : vector<512x128xi1>, vector<512x128xf32>
    %125 = arith.truncf %124 : vector<512x128xf32> to vector<512x128xbf16>
    %c0_102 = arith.constant 0 : index
    %c0_103 = arith.constant 0 : index
    %c0_104 = arith.constant 0 : index
    %126 = vector.load %arg2[%c0_102, %c0_103, %c0_104] : memref<1x128x128xbf16, #tpu.memory_space<vmem>>, vector<1x128x128xbf16>
    %127 = vector.shape_cast %126 : vector<1x128x128xbf16> to vector<128x128xbf16>
    %cst_105 = arith.constant dense<0.000000e+00> : vector<512x128xf32>
    %128 = tpu.matmul %125, %127, %cst_105 {dimension_numbers = #tpu.dot_dimension_numbers<[1], [0], [0], [1], [0, 0, 1, 1], [], []>} : vector<512x128xbf16>, vector<128x128xbf16>, vector<512x128xf32> -> vector<512x128xf32>
    %c0_106 = arith.constant 0 : index
    %c0_107 = arith.constant 0 : index
    %129 = vector.load %arg4[%c0_106, %c0_107] : memref<1x128xf32, #tpu.memory_space<vmem>>, vector<1x128xf32>
    %c0_108 = arith.constant 0 : index
    %c0_109 = arith.constant 0 : index
    %130 = vector.load %arg5[%c0_108, %c0_109] : memref<1x128xf32, #tpu.memory_space<vmem>>, vector<1x128xf32>
    %cst_110 = arith.constant dense<0.000000e+00> : vector<128xf32>
    %131 = vector.multi_reduction <add>, %128, %cst_110 [0] : vector<512x128xf32> to vector<128xf32>
    %132 = vector.shape_cast %131 : vector<128xf32> to vector<1x128xf32>
    %cst_111 = arith.constant 0.001953125 : f32
    %133 = vector.broadcast %cst_111 : f32 to vector<1x128xf32>
    %134 = arith.mulf %132, %133 : vector<1x128xf32>
    %135 = vector.broadcast %134 : vector<1x128xf32> to vector<512x128xf32>
    %136 = arith.subf %128, %135 : vector<512x128xf32>
    %137 = arith.mulf %136, %136 : vector<512x128xf32>
    %cst_112 = arith.constant dense<0.000000e+00> : vector<128xf32>
    %138 = vector.multi_reduction <add>, %137, %cst_112 [0] : vector<512x128xf32> to vector<128xf32>
    %139 = vector.shape_cast %138 : vector<128xf32> to vector<1x128xf32>
    %cst_113 = arith.constant 0.001953125 : f32
    %140 = vector.broadcast %cst_113 : f32 to vector<1x128xf32>
    %141 = arith.mulf %139, %140 : vector<1x128xf32>
    %cst_114 = arith.constant 9.99999974E-6 : f32
    %142 = vector.broadcast %cst_114 : f32 to vector<1x128xf32>
    %143 = arith.addf %141, %142 : vector<1x128xf32>
    %144 = math.rsqrt %143 : vector<1x128xf32>
    %145 = arith.mulf %129, %144 : vector<1x128xf32>
    %146 = vector.broadcast %145 : vector<1x128xf32> to vector<512x128xf32>
    %147 = arith.mulf %136, %146 : vector<512x128xf32>
    %148 = vector.broadcast %130 : vector<1x128xf32> to vector<512x128xf32>
    %149 = arith.addf %147, %148 : vector<512x128xf32>
    %cst_115 = arith.constant 0.000000e+00 : f32
    %150 = vector.broadcast %cst_115 : f32 to vector<512x128xf32>
    %151 = arith.cmpf ogt, %149, %150 : vector<512x128xf32>
    %cst_116 = arith.constant 1.000000e-01 : f32
    %152 = vector.broadcast %cst_116 : f32 to vector<512x128xf32>
    %153 = arith.mulf %152, %149 : vector<512x128xf32>
    %154 = arith.select %151, %149, %153 : vector<512x128xi1>, vector<512x128xf32>
    %155 = vector.shape_cast %154 : vector<512x128xf32> to vector<2x16x16x128xf32>
    %c0_117 = arith.constant 0 : index
    %c1_118 = arith.constant 1 : index
    %c1_119 = arith.constant 1 : index
    %c0_120 = arith.constant 0 : index
    %156 = vector.load %arg9[%c0_117, %c1_118, %c1_119, %c0_120] : memref<2x18x18x128xf32, #tpu.memory_space<vmem>>, vector<2x16x16x128xf32>
    tpu.vector_store %arg9[%c0_117, %c1_118, %c1_119, %c0_120], %155 {strides = array<i32>} : memref<2x18x18x128xf32, #tpu.memory_space<vmem>>, vector<2x16x16x128xf32>,
    %cst_121 = arith.constant 0.000000e+00 : f32
    %157 = vector.broadcast %cst_121 : f32 to vector<512x128xf32>
    %c0_122 = arith.constant 0 : index
    %c0_123 = arith.constant 0 : index
    %c0_124 = arith.constant 0 : index
    %c0_125 = arith.constant 0 : index
    %158 = vector.load %arg9[%c0_122, %c0_123, %c0_124, %c0_125] : memref<2x18x18x128xf32, #tpu.memory_space<vmem>>, vector<2x16x16x128xf32>
    %159 = vector.shape_cast %158 : vector<2x16x16x128xf32> to vector<512x128xf32>
    %160 = arith.truncf %159 : vector<512x128xf32> to vector<512x128xbf16>
    %c0_126 = arith.constant 0 : index
    %c0_127 = arith.constant 0 : index
    %c0_128 = arith.constant 0 : index
    %161 = vector.load %arg3[%c0_126, %c0_127, %c0_128] : memref<9x128x128xbf16, #tpu.memory_space<vmem>>, vector<1x128x128xbf16>
    %162 = vector.shape_cast %161 : vector<1x128x128xbf16> to vector<128x128xbf16>
    %cst_129 = arith.constant dense<0.000000e+00> : vector<512x128xf32>
    %163 = tpu.matmul %160, %162, %cst_129 {dimension_numbers = #tpu.dot_dimension_numbers<[1], [0], [0], [1], [0, 0, 1, 1], [], []>} : vector<512x128xbf16>, vector<128x128xbf16>, vector<512x128xf32> -> vector<512x128xf32>
    %164 = arith.addf %157, %163 : vector<512x128xf32>
    %c0_130 = arith.constant 0 : index
    %c0_131 = arith.constant 0 : index
    %c1_132 = arith.constant 1 : index
    %c0_133 = arith.constant 0 : index
    %165 = vector.load %arg9[%c0_130, %c0_131, %c1_132, %c0_133] : memref<2x18x18x128xf32, #tpu.memory_space<vmem>>, vector<2x16x16x128xf32>
    %166 = vector.shape_cast %165 : vector<2x16x16x128xf32> to vector<512x128xf32>
    %167 = arith.truncf %166 : vector<512x128xf32> to vector<512x128xbf16>
    %c1_134 = arith.constant 1 : index
    %c0_135 = arith.constant 0 : index
    %c0_136 = arith.constant 0 : index
    %168 = vector.load %arg3[%c1_134, %c0_135, %c0_136] : memref<9x128x128xbf16, #tpu.memory_space<vmem>>, vector<1x128x128xbf16>
    %169 = vector.shape_cast %168 : vector<1x128x128xbf16> to vector<128x128xbf16>
    %cst_137 = arith.constant dense<0.000000e+00> : vector<512x128xf32>
    %170 = tpu.matmul %167, %169, %cst_137 {dimension_numbers = #tpu.dot_dimension_numbers<[1], [0], [0], [1], [0, 0, 1, 1], [], []>} : vector<512x128xbf16>, vector<128x128xbf16>, vector<512x128xf32> -> vector<512x128xf32>
    %171 = arith.addf %164, %170 : vector<512x128xf32>
    %c0_138 = arith.constant 0 : index
    %c0_139 = arith.constant 0 : index
    %c2_140 = arith.constant 2 : index
    %c0_141 = arith.constant 0 : index
    %172 = vector.load %arg9[%c0_138, %c0_139, %c2_140, %c0_141] : memref<2x18x18x128xf32, #tpu.memory_space<vmem>>, vector<2x16x16x128xf32>
    %173 = vector.shape_cast %172 : vector<2x16x16x128xf32> to vector<512x128xf32>
    %174 = arith.truncf %173 : vector<512x128xf32> to vector<512x128xbf16>
    %c2_142 = arith.constant 2 : index
    %c0_143 = arith.constant 0 : index
    %c0_144 = arith.constant 0 : index
    %175 = vector.load %arg3[%c2_142, %c0_143, %c0_144] : memref<9x128x128xbf16, #tpu.memory_space<vmem>>, vector<1x128x128xbf16>
    %176 = vector.shape_cast %175 : vector<1x128x128xbf16> to vector<128x128xbf16>
    %cst_145 = arith.constant dense<0.000000e+00> : vector<512x128xf32>
    %177 = tpu.matmul %174, %176, %cst_145 {dimension_numbers = #tpu.dot_dimension_numbers<[1], [0], [0], [1], [0, 0, 1, 1], [], []>} : vector<512x128xbf16>, vector<128x128xbf16>, vector<512x128xf32> -> vector<512x128xf32>
    %178 = arith.addf %171, %177 : vector<512x128xf32>
    %c0_146 = arith.constant 0 : index
    %c1_147 = arith.constant 1 : index
    %c0_148 = arith.constant 0 : index
    %c0_149 = arith.constant 0 : index
    %179 = vector.load %arg9[%c0_146, %c1_147, %c0_148, %c0_149] : memref<2x18x18x128xf32, #tpu.memory_space<vmem>>, vector<2x16x16x128xf32>
    %180 = vector.shape_cast %179 : vector<2x16x16x128xf32> to vector<512x128xf32>
    %181 = arith.truncf %180 : vector<512x128xf32> to vector<512x128xbf16>
    %c3_150 = arith.constant 3 : index
    %c0_151 = arith.constant 0 : index
    %c0_152 = arith.constant 0 : index
    %182 = vector.load %arg3[%c3_150, %c0_151, %c0_152] : memref<9x128x128xbf16, #tpu.memory_space<vmem>>, vector<1x128x128xbf16>
    %183 = vector.shape_cast %182 : vector<1x128x128xbf16> to vector<128x128xbf16>
    %cst_153 = arith.constant dense<0.000000e+00> : vector<512x128xf32>
    %184 = tpu.matmul %181, %183, %cst_153 {dimension_numbers = #tpu.dot_dimension_numbers<[1], [0], [0], [1], [0, 0, 1, 1], [], []>} : vector<512x128xbf16>, vector<128x128xbf16>, vector<512x128xf32> -> vector<512x128xf32>
    %185 = arith.addf %178, %184 : vector<512x128xf32>
    %c0_154 = arith.constant 0 : index
    %c1_155 = arith.constant 1 : index
    %c1_156 = arith.constant 1 : index
    %c0_157 = arith.constant 0 : index
    %186 = vector.load %arg9[%c0_154, %c1_155, %c1_156, %c0_157] : memref<2x18x18x128xf32, #tpu.memory_space<vmem>>, vector<2x16x16x128xf32>
    %187 = vector.shape_cast %186 : vector<2x16x16x128xf32> to vector<512x128xf32>
    %188 = arith.truncf %187 : vector<512x128xf32> to vector<512x128xbf16>
    %c4_158 = arith.constant 4 : index
    %c0_159 = arith.constant 0 : index
    %c0_160 = arith.constant 0 : index
    %189 = vector.load %arg3[%c4_158, %c0_159, %c0_160] : memref<9x128x128xbf16, #tpu.memory_space<vmem>>, vector<1x128x128xbf16>
    %190 = vector.shape_cast %189 : vector<1x128x128xbf16> to vector<128x128xbf16>
    %cst_161 = arith.constant dense<0.000000e+00> : vector<512x128xf32>
    %191 = tpu.matmul %188, %190, %cst_161 {dimension_numbers = #tpu.dot_dimension_numbers<[1], [0], [0], [1], [0, 0, 1, 1], [], []>} : vector<512x128xbf16>, vector<128x128xbf16>, vector<512x128xf32> -> vector<512x128xf32>
    %192 = arith.addf %185, %191 : vector<512x128xf32>
    %c0_162 = arith.constant 0 : index
    %c1_163 = arith.constant 1 : index
    %c2_164 = arith.constant 2 : index
    %c0_165 = arith.constant 0 : index
    %193 = vector.load %arg9[%c0_162, %c1_163, %c2_164, %c0_165] : memref<2x18x18x128xf32, #tpu.memory_space<vmem>>, vector<2x16x16x128xf32>
    %194 = vector.shape_cast %193 : vector<2x16x16x128xf32> to vector<512x128xf32>
    %195 = arith.truncf %194 : vector<512x128xf32> to vector<512x128xbf16>
    %c5_166 = arith.constant 5 : index
    %c0_167 = arith.constant 0 : index
    %c0_168 = arith.constant 0 : index
    %196 = vector.load %arg3[%c5_166, %c0_167, %c0_168] : memref<9x128x128xbf16, #tpu.memory_space<vmem>>, vector<1x128x128xbf16>
    %197 = vector.shape_cast %196 : vector<1x128x128xbf16> to vector<128x128xbf16>
    %cst_169 = arith.constant dense<0.000000e+00> : vector<512x128xf32>
    %198 = tpu.matmul %195, %197, %cst_169 {dimension_numbers = #tpu.dot_dimension_numbers<[1], [0], [0], [1], [0, 0, 1, 1], [], []>} : vector<512x128xbf16>, vector<128x128xbf16>, vector<512x128xf32> -> vector<512x128xf32>
    %199 = arith.addf %192, %198 : vector<512x128xf32>
    %c0_170 = arith.constant 0 : index
    %c2_171 = arith.constant 2 : index
    %c0_172 = arith.constant 0 : index
    %c0_173 = arith.constant 0 : index
    %200 = vector.load %arg9[%c0_170, %c2_171, %c0_172, %c0_173] : memref<2x18x18x128xf32, #tpu.memory_space<vmem>>, vector<2x16x16x128xf32>
    %201 = vector.shape_cast %200 : vector<2x16x16x128xf32> to vector<512x128xf32>
    %202 = arith.truncf %201 : vector<512x128xf32> to vector<512x128xbf16>
    %c6_174 = arith.constant 6 : index
    %c0_175 = arith.constant 0 : index
    %c0_176 = arith.constant 0 : index
    %203 = vector.load %arg3[%c6_174, %c0_175, %c0_176] : memref<9x128x128xbf16, #tpu.memory_space<vmem>>, vector<1x128x128xbf16>
    %204 = vector.shape_cast %203 : vector<1x128x128xbf16> to vector<128x128xbf16>
    %cst_177 = arith.constant dense<0.000000e+00> : vector<512x128xf32>
    %205 = tpu.matmul %202, %204, %cst_177 {dimension_numbers = #tpu.dot_dimension_numbers<[1], [0], [0], [1], [0, 0, 1, 1], [], []>} : vector<512x128xbf16>, vector<128x128xbf16>, vector<512x128xf32> -> vector<512x128xf32>
    %206 = arith.addf %199, %205 : vector<512x128xf32>
    %c0_178 = arith.constant 0 : index
    %c2_179 = arith.constant 2 : index
    %c1_180 = arith.constant 1 : index
    %c0_181 = arith.constant 0 : index
    %207 = vector.load %arg9[%c0_178, %c2_179, %c1_180, %c0_181] : memref<2x18x18x128xf32, #tpu.memory_space<vmem>>, vector<2x16x16x128xf32>
    %208 = vector.shape_cast %207 : vector<2x16x16x128xf32> to vector<512x128xf32>
    %209 = arith.truncf %208 : vector<512x128xf32> to vector<512x128xbf16>
    %c7_182 = arith.constant 7 : index
    %c0_183 = arith.constant 0 : index
    %c0_184 = arith.constant 0 : index
    %210 = vector.load %arg3[%c7_182, %c0_183, %c0_184] : memref<9x128x128xbf16, #tpu.memory_space<vmem>>, vector<1x128x128xbf16>
    %211 = vector.shape_cast %210 : vector<1x128x128xbf16> to vector<128x128xbf16>
    %cst_185 = arith.constant dense<0.000000e+00> : vector<512x128xf32>
    %212 = tpu.matmul %209, %211, %cst_185 {dimension_numbers = #tpu.dot_dimension_numbers<[1], [0], [0], [1], [0, 0, 1, 1], [], []>} : vector<512x128xbf16>, vector<128x128xbf16>, vector<512x128xf32> -> vector<512x128xf32>
    %213 = arith.addf %206, %212 : vector<512x128xf32>
    %c0_186 = arith.constant 0 : index
    %c2_187 = arith.constant 2 : index
    %c2_188 = arith.constant 2 : index
    %c0_189 = arith.constant 0 : index
    %214 = vector.load %arg9[%c0_186, %c2_187, %c2_188, %c0_189] : memref<2x18x18x128xf32, #tpu.memory_space<vmem>>, vector<2x16x16x128xf32>
    %215 = vector.shape_cast %214 : vector<2x16x16x128xf32> to vector<512x128xf32>
    %216 = arith.truncf %215 : vector<512x128xf32> to vector<512x128xbf16>
    %c8_190 = arith.constant 8 : index
    %c0_191 = arith.constant 0 : index
    %c0_192 = arith.constant 0 : index
    %217 = vector.load %arg3[%c8_190, %c0_191, %c0_192] : memref<9x128x128xbf16, #tpu.memory_space<vmem>>, vector<1x128x128xbf16>
    %218 = vector.shape_cast %217 : vector<1x128x128xbf16> to vector<128x128xbf16>
    %cst_193 = arith.constant dense<0.000000e+00> : vector<512x128xf32>
    %219 = tpu.matmul %216, %218, %cst_193 {dimension_numbers = #tpu.dot_dimension_numbers<[1], [0], [0], [1], [0, 0, 1, 1], [], []>} : vector<512x128xbf16>, vector<128x128xbf16>, vector<512x128xf32> -> vector<512x128xf32>
    %220 = arith.addf %213, %219 : vector<512x128xf32>
    %c0_194 = arith.constant 0 : index
    %c0_195 = arith.constant 0 : index
    %221 = vector.load %arg6[%c0_194, %c0_195] : memref<1x128xf32, #tpu.memory_space<vmem>>, vector<1x128xf32>
    %c0_196 = arith.constant 0 : index
    %c0_197 = arith.constant 0 : index
    %222 = vector.load %arg7[%c0_196, %c0_197] : memref<1x128xf32, #tpu.memory_space<vmem>>, vector<1x128xf32>
    %cst_198 = arith.constant dense<0.000000e+00> : vector<128xf32>
    %223 = vector.multi_reduction <add>, %220, %cst_198 [0] : vector<512x128xf32> to vector<128xf32>
    %224 = vector.shape_cast %223 : vector<128xf32> to vector<1x128xf32>
    %cst_199 = arith.constant 0.001953125 : f32
    %225 = vector.broadcast %cst_199 : f32 to vector<1x128xf32>
    %226 = arith.mulf %224, %225 : vector<1x128xf32>
    %227 = vector.broadcast %226 : vector<1x128xf32> to vector<512x128xf32>
    %228 = arith.subf %220, %227 : vector<512x128xf32>
    %229 = arith.mulf %228, %228 : vector<512x128xf32>
    %cst_200 = arith.constant dense<0.000000e+00> : vector<128xf32>
    %230 = vector.multi_reduction <add>, %229, %cst_200 [0] : vector<512x128xf32> to vector<128xf32>
    %231 = vector.shape_cast %230 : vector<128xf32> to vector<1x128xf32>
    %cst_201 = arith.constant 0.001953125 : f32
    %232 = vector.broadcast %cst_201 : f32 to vector<1x128xf32>
    %233 = arith.mulf %231, %232 : vector<1x128xf32>
    %cst_202 = arith.constant 9.99999974E-6 : f32
    %234 = vector.broadcast %cst_202 : f32 to vector<1x128xf32>
    %235 = arith.addf %233, %234 : vector<1x128xf32>
    %236 = math.rsqrt %235 : vector<1x128xf32>
    %237 = arith.mulf %221, %236 : vector<1x128xf32>
    %238 = vector.broadcast %237 : vector<1x128xf32> to vector<512x128xf32>
    %239 = arith.mulf %228, %238 : vector<512x128xf32>
    %240 = vector.broadcast %222 : vector<1x128xf32> to vector<512x128xf32>
    %241 = arith.addf %239, %240 : vector<512x128xf32>
    %cst_203 = arith.constant 0.000000e+00 : f32
    %242 = vector.broadcast %cst_203 : f32 to vector<512x128xf32>
    %243 = arith.cmpf ogt, %241, %242 : vector<512x128xf32>
    %cst_204 = arith.constant 1.000000e-01 : f32
    %244 = vector.broadcast %cst_204 : f32 to vector<512x128xf32>
    %245 = arith.mulf %244, %241 : vector<512x128xf32>
    %246 = arith.select %243, %241, %245 : vector<512x128xi1>, vector<512x128xf32>
    %247 = vector.shape_cast %246 : vector<512x128xf32> to vector<2x16x16x128xf32>
    %c0_205 = arith.constant 0 : index
    %c0_206 = arith.constant 0 : index
    %c0_207 = arith.constant 0 : index
    %c0_208 = arith.constant 0 : index
    %248 = vector.load %arg8[%c0_205, %c0_206, %c0_207, %c0_208] : memref<2x16x16x128xf32, #tpu.memory_space<vmem>>, vector<2x16x16x128xf32>
    tpu.vector_store %arg8[%c0_205, %c0_206, %c0_207, %c0_208], %247 {strides = array<i32>} : memref<2x16x16x128xf32, #tpu.memory_space<vmem>>, vector<2x16x16x128xf32>,
    return
  }
  func.func @transform_0(%arg0: i32) -> (i32, i32, i32, i32) {
    %c0_i32 = arith.constant 0 : i32
    %c0_i32_0 = arith.constant 0 : i32
    %c0_i32_1 = arith.constant 0 : i32
    %c0_i32_2 = arith.constant 0 : i32
    %c0_i32_3 = arith.constant 0 : i32
    return %c0_i32, %c0_i32_0, %c0_i32_1, %c0_i32_2 : i32, i32, i32, i32
  }
  func.func @transform_1(%arg0: i32) -> (i32, i32, i32) {
    %c0_i32 = arith.constant 0 : i32
    %c0_i32_0 = arith.constant 0 : i32
    %c0_i32_1 = arith.constant 0 : i32
    %c0_i32_2 = arith.constant 0 : i32
    return %c0_i32, %c0_i32_0, %c0_i32_1 : i32, i32, i32
  }
  func.func @transform_2(%arg0: i32) -> (i32, i32, i32) {
    %c0_i32 = arith.constant 0 : i32
    %c0_i32_0 = arith.constant 0 : i32
    %c0_i32_1 = arith.constant 0 : i32
    %c0_i32_2 = arith.constant 0 : i32
    return %c0_i32, %c0_i32_0, %c0_i32_1 : i32, i32, i32
  }
  func.func @transform_3(%arg0: i32) -> (i32, i32) {
    %c0_i32 = arith.constant 0 : i32
    %c0_i32_0 = arith.constant 0 : i32
    %c0_i32_1 = arith.constant 0 : i32
    return %c0_i32, %c0_i32_0 : i32, i32
  }
  func.func @transform_4(%arg0: i32) -> (i32, i32) {
    %c0_i32 = arith.constant 0 : i32
    %c0_i32_0 = arith.constant 0 : i32
    %c0_i32_1 = arith.constant 0 : i32
    return %c0_i32, %c0_i32_0 : i32, i32
  }
  func.func @transform_5(%arg0: i32) -> (i32, i32) {
    %c0_i32 = arith.constant 0 : i32
    %c0_i32_0 = arith.constant 0 : i32
    %c0_i32_1 = arith.constant 0 : i32
    return %c0_i32, %c0_i32_0 : i32, i32
  }
  func.func @transform_6(%arg0: i32) -> (i32, i32) {
    %c0_i32 = arith.constant 0 : i32
    %c0_i32_0 = arith.constant 0 : i32
    %c0_i32_1 = arith.constant 0 : i32
    return %c0_i32, %c0_i32_0 : i32, i32
  }
  func.func @transform_7(%arg0: i32) -> (i32, i32, i32, i32) {
    %c0_i32 = arith.constant 0 : i32
    %c0_i32_0 = arith.constant 0 : i32
    %c0_i32_1 = arith.constant 0 : i32
    %c0_i32_2 = arith.constant 0 : i32
    %c0_i32_3 = arith.constant 0 : i32
    return %c0_i32, %c0_i32_0, %c0_i32_1, %c0_i32_2 : i32, i32, i32, i32
  }
}

</mosaic_0001>

<bundles_post_ra>
// kernel: repetitive_block.1
= control target key start
LH: loop header
LB: loop body
LE: loop exit
PB: predicated region body
PF: predicated region fallthrough
CT: control target
= control target key end

     0   :  { %v16814_v9 = vmov 0.0   ;;  %s24591_s1 = inlined_call_operand.vmem [shape: bf16[1,128,128], index: 1, kind: input, shape index: {}]   ;;  %s24592_s0 = inlined_call_operand.vmem [shape: bf16[2,16,16,128], index: 0, kind: input, shape index: {}]   ;;  %s24593_s2 = inlined_call_operand.vmem [shape: bf16[9,128,128], index: 2, kind: input, shape index: {}]   ;;  %s24594_s3 = inlined_call_operand.vmem [shape: f32[1,128], index: 3, kind: input, shape index: {}]   ;;  %s24595_s4 = inlined_call_operand.vmem [shape: f32[1,128], index: 4, kind: input, shape index: {}]   ;;  %s24596_s5 = inlined_call_operand.vmem [shape: f32[1,128], index: 5, kind: input, shape index: {}]   ;;  %s24597_s6 = inlined_call_operand.vmem [shape: f32[1,128], index: 6, kind: input, shape index: {}]   ;;  %s24598_s7 = inlined_call_operand.vmem [shape: f32[2,16,16,128], index: 7, kind: output, shape index: {}]  }
   0x1   :  { %v16610_v0 = vld [vmem:[%s24591_s1] sm:$0xff]   ;;  %v16611_v1 = vld [vmem:[%s24591_s1 + $0x8] sm:$0xff]   ;;  %v16612_v2 = vld [vmem:[%s24591_s1 + $0x10] sm:$0xff]   ;;  %33 = vst [vmem:[#allocation2 + $0x30] sm:$0xff] %v16814_v9 }
   0x2   :  { %13985 = vmatprep.subr.bf16.mxu1 %v16610_v0  ;;  %v16613_v3 = vld [vmem:[%s24591_s1 + $0x18] sm:$0xff]   ;;  %v16618_v4 = vld [vmem:[%s24592_s0] sm:$0xff]   ;;  %v16615_v6 = vld [vmem:[%s24591_s1 + $0x28] sm:$0xff]   ;;  %34 = vst [vmem:[#allocation2 + $0x38] sm:$0xff] %v16814_v9 }
   0x3   :  { %13986 = vmatpush3.bf16.msra.mxu1 %v16610_v0  ;;  %14001 = vmatprep.mubr.bf16.mxu1 %v16618_v4  ;;  %v16614_v5 = vld [vmem:[%s24591_s1 + $0x20] sm:$0xff]   ;;  %v16616_v7 = vld [vmem:[%s24591_s1 + $0x30] sm:$0xff]   ;;  %v16882_v8 = vld [vmem:[%s24591_s1 + $0x38] sm:$0xff]   ;;  %27 = vst [vmem:[#allocation2] sm:$0xff] %v16814_v9 }
   0x4   :  { %13987 = vmatprep.subr.bf16.mxu1 %v16611_v1  ;;  %28 = vst [vmem:[#allocation2 + $0x8] sm:$0xff] %v16814_v9  ;;  %29 = vst [vmem:[#allocation2 + $0x10] sm:$0x3] %v16814_v9  ;;  %v16619_v10 = vld [vmem:[%s24592_s0 + $0x8] sm:$0xff]   ;;  %v16620_v11 = vld [vmem:[%s24592_s0 + $0x10] sm:$0xff]  }
   0x5   :  { %30 = vst [vmem:[#allocation2 + $0x18] sm:$0xff] %v16814_v9  ;;  %31 = vst [vmem:[#allocation2 + $0x20] sm:$0xff] %v16814_v9  ;;  %v16621_v12 = vld [vmem:[%s24592_s0 + $0x18] sm:$0xff]   ;;  %v16622_v13 = vld [vmem:[%s24592_s0 + $0x20] sm:$0xff]  }
   0x6   :  { %32 = vst [vmem:[#allocation2 + $0x28] sm:$0x3] %v16814_v9  ;;  %35 = vst [vmem:[#allocation2 + $0x40] sm:$0x3] %v16814_v9  ;;  %v16623_v14 = vld [vmem:[%s24592_s0 + $0x28] sm:$0xff]   ;;  %v16624_v15 = vld [vmem:[%s24592_s0 + $0x30] sm:$0xff]  }
   0x7   :  { %13988 = vmatpush3.bf16.msra.mxu1 %v16611_v1  ;;  %36 = vst [vmem:[#allocation2 + $0x48] sm:$0xff] %v16814_v9  ;;  %37 = vst [vmem:[#allocation2 + $0x50] sm:$0xff] %v16814_v9  ;;  %v16625_v16 = vld [vmem:[%s24592_s0 + $0x38] sm:$0xff]   ;;  %v16626_v17 = vld [vmem:[%s24592_s0 + $0x40] sm:$0xff]  }
   0x8   :  { %13989 = vmatprep.subr.bf16.mxu1 %v16612_v2  ;;  %38 = vst [vmem:[#allocation2 + $0x58] sm:$0x3] %v16814_v9  ;;  %39 = vst [vmem:[#allocation2 + $0x60] sm:$0xff] %v16814_v9  ;;  %v16627_v18 = vld [vmem:[%s24592_s0 + $0x48] sm:$0xff]   ;;  %v16628_v19 = vld [vmem:[%s24592_s0 + $0x50] sm:$0xff]  }
   0x9   :  { %40 = vst [vmem:[#allocation2 + $0x68] sm:$0xff] %v16814_v9  ;;  %41 = vst [vmem:[#allocation2 + $0x70] sm:$0x3] %v16814_v9  ;;  %v16629_v20 = vld [vmem:[%s24592_s0 + $0x58] sm:$0xff]   ;;  %v16630_v21 = vld [vmem:[%s24592_s0 + $0x60] sm:$0xff]  }
   0xa   :  { %42 = vst [vmem:[#allocation2 + $0x78] sm:$0xff] %v16814_v9  ;;  %43 = vst [vmem:[#allocation2 + $0x80] sm:$0xff] %v16814_v9  ;;  %v16631_v22 = vld [vmem:[%s24592_s0 + $0x68] sm:$0xff]   ;;  %v16632_v23 = vld [vmem:[%s24592_s0 + $0x70] sm:$0xff]  }
   0xb   :  { %13990 = vmatpush3.bf16.msra.mxu1 %v16612_v2  ;;  %44 = vst [vmem:[#allocation2 + $0x88] sm:$0x3] %v16814_v9  ;;  %45 = vst [vmem:[#allocation2 + $0x90] sm:$0xff] %v16814_v9  ;;  %v16633_v24 = vld [vmem:[%s24592_s0 + $0x78] sm:$0xff]   ;;  %v16634_v25 = vld [vmem:[%s24592_s0 + $0x80] sm:$0xff]  }
   0xc   :  { %13991 = vmatprep.subr.bf16.mxu1 %v16613_v3  ;;  %46 = vst [vmem:[#allocation2 + $0x98] sm:$0xff] %v16814_v9  ;;  %47 = vst [vmem:[#allocation2 + $0xa0] sm:$0x3] %v16814_v9  ;;  %v16635_v26 = vld [vmem:[%s24592_s0 + $0x88] sm:$0xff]   ;;  %v16636_v27 = vld [vmem:[%s24592_s0 + $0x90] sm:$0xff]  }
   0xd   :  { %48 = vst [vmem:[#allocation2 + $0xa8] sm:$0xff] %v16814_v9  ;;  %49 = vst [vmem:[#allocation2 + $0xb0] sm:$0xff] %v16814_v9  ;;  %v16637_v28 = vld [vmem:[%s24592_s0 + $0x98] sm:$0xff]   ;;  %v16638_v29 = vld [vmem:[%s24592_s0 + $0xa0] sm:$0xff]  }
   0xe   :  { %50 = vst [vmem:[#allocation2 + $0xb8] sm:$0x3] %v16814_v9  ;;  %51 = vst [vmem:[#allocation2 + $0xc0] sm:$0xff] %v16814_v9  ;;  %v16639_v30 = vld [vmem:[%s24592_s0 + $0xa8] sm:$0xff]   ;;  %v16640_v31 = vld [vmem:[%s24592_s0 + $0xb0] sm:$0xff]  }
   0xf   :  { %13992 = vmatpush3.bf16.msra.mxu1 %v16613_v3  ;;  %52 = vst [vmem:[#allocation2 + $0xc8] sm:$0xff] %v16814_v9  ;;  %53 = vst [vmem:[#allocation2 + $0xd0] sm:$0x3] %v16814_v9  ;;  %v16641_v32 = vld [vmem:[%s24592_s0 + $0xb8] sm:$0xff]   ;;  %v16642_v33 = vld [vmem:[%s24592_s0 + $0xc0] sm:$0xff]  }
  0x10   :  { %13993 = vmatprep.subr.bf16.mxu1 %v16614_v5  ;;  %54 = vst [vmem:[#allocation2 + $0xd8] sm:$0xff] %v16814_v9  ;;  %55 = vst [vmem:[#allocation2 + $0xe0] sm:$0xff] %v16814_v9  ;;  %v16643_v34 = vld [vmem:[%s24592_s0 + $0xc8] sm:$0xff]   ;;  %v16644_v35 = vld [vmem:[%s24592_s0 + $0xd0] sm:$0xff]  }
  0x11   :  { %56 = vst [vmem:[#allocation2 + $0xe8] sm:$0x3] %v16814_v9  ;;  %57 = vst [vmem:[#allocation2 + $0xf0] sm:$0xff] %v16814_v9  ;;  %v16645_v36 = vld [vmem:[%s24592_s0 + $0xd8] sm:$0xff]   ;;  %v16646_v37 = vld [vmem:[%s24592_s0 + $0xe0] sm:$0xff]  }
  0x12   :  { %58 = vst [vmem:[#allocation2 + $0xf8] sm:$0xff] %v16814_v9  ;;  %59 = vst [vmem:[#allocation2 + $0x100] sm:$0x3] %v16814_v9  ;;  %v16647_v38 = vld [vmem:[%s24592_s0 + $0xe8] sm:$0xff]   ;;  %v16648_v39 = vld [vmem:[%s24592_s0 + $0xf0] sm:$0xff]  }
  0x13   :  { %13994 = vmatpush3.bf16.msra.mxu1 %v16614_v5  ;;  %60 = vst [vmem:[#allocation2 + $0x108] sm:$0xff] %v16814_v9  ;;  %61 = vst [vmem:[#allocation2 + $0x110] sm:$0xff] %v16814_v9  ;;  %v16649_v40 = vld [vmem:[%s24592_s0 + $0xf8] sm:$0xff]  }
  0x14   :  { %13995 = vmatprep.subr.bf16.mxu1 %v16615_v6  ;;  %62 = vst [vmem:[#allocation2 + $0x118] sm:$0x3] %v16814_v9  ;;  %63 = vst [vmem:[#allocation2 + $0x120] sm:$0xff] %v16814_v9 }
  0x15   :  { %64 = vst [vmem:[#allocation2 + $0x128] sm:$0xff] %v16814_v9  ;;  %65 = vst [vmem:[#allocation2 + $0x130] sm:$0x3] %v16814_v9 }
  0x16   :  { %66 = vst [vmem:[#allocation2 + $0x138] sm:$0xff] %v16814_v9  ;;  %67 = vst [vmem:[#allocation2 + $0x140] sm:$0xff] %v16814_v9 }
  0x17   :  { %13996 = vmatpush3.bf16.msra.mxu1 %v16615_v6  ;;  %68 = vst [vmem:[#allocation2 + $0x148] sm:$0x3] %v16814_v9  ;;  %69 = vst [vmem:[#allocation2 + $0x150] sm:$0xff] %v16814_v9 }
  0x18   :  { %13997 = vmatprep.subr.bf16.mxu1 %v16616_v7  ;;  %70 = vst [vmem:[#allocation2 + $0x158] sm:$0xff] %v16814_v9  ;;  %71 = vst [vmem:[#allocation2 + $0x160] sm:$0x3] %v16814_v9 }
  0x19   :  { %72 = vst [vmem:[#allocation2 + $0x168] sm:$0xff] %v16814_v9  ;;  %73 = vst [vmem:[#allocation2 + $0x170] sm:$0xff] %v16814_v9 }
  0x1a   :  { %74 = vst [vmem:[#allocation2 + $0x178] sm:$0x3] %v16814_v9  ;;  %75 = vst [vmem:[#allocation2 + $0x180] sm:$0xff] %v16814_v9 }
  0x1b   :  { %13998 = vmatpush3.bf16.msra.mxu1 %v16616_v7  ;;  %76 = vst [vmem:[#allocation2 + $0x188] sm:$0xff] %v16814_v9  ;;  %77 = vst [vmem:[#allocation2 + $0x190] sm:$0x3] %v16814_v9 }
  0x1c   :  { %78 = vst [vmem:[#allocation2 + $0x198] sm:$0xff] %v16814_v9  ;;  %79 = vst [vmem:[#allocation2 + $0x1a0] sm:$0xff] %v16814_v9  ;;  %13999 = vmatprep.subr.bf16.mxu1 %v16882_v8 }
  0x1d   :  { %80 = vst [vmem:[#allocation2 + $0x1a8] sm:$0x3] %v16814_v9  ;;  %81 = vst [vmem:[#allocation2 + $0x1b0] sm:$0xff] %v16814_v9 }
  0x1e   :  { %82 = vst [vmem:[#allocation2 + $0x1b8] sm:$0xff] %v16814_v9  ;;  %83 = vst [vmem:[#allocation2 + $0x1c0] sm:$0x3] %v16814_v9 }
  0x1f   :  { %84 = vst [vmem:[#allocation2 + $0x1c8] sm:$0xff] %v16814_v9  ;;  %85 = vst [vmem:[#allocation2 + $0x1d0] sm:$0xff] %v16814_v9  ;;  %14000 = vmatpush3.bf16.msra.mxu1 %v16882_v8 }
  0x20   :  { %86 = vst [vmem:[#allocation2 + $0x1d8] sm:$0x3] %v16814_v9  ;;  %87 = vst [vmem:[#allocation2 + $0x1e0] sm:$0xff] %v16814_v9 }
  0x21   :  { %88 = vst [vmem:[#allocation2 + $0x1e8] sm:$0xff] %v16814_v9  ;;  %89 = vst [vmem:[#allocation2 + $0x1f0] sm:$0x3] %v16814_v9 }
  0x22   :  { %90 = vst [vmem:[#allocation2 + $0x1f8] sm:$0xff] %v16814_v9  ;;  %91 = vst [vmem:[#allocation2 + $0x200] sm:$0xff] %v16814_v9  ;;  %14002 = vmatmul.mubr.bf16.vlgmr.msra.gmra.mrb[0].mxu1 %v16619_v10 }
  0x23   :  { %92 = vst [vmem:[#allocation2 + $0x208] sm:$0x3] %v16814_v9  ;;  %93 = vst [vmem:[#allocation2 + $0x210] sm:$0xff] %v16814_v9  ;;  %14005 = vmatprep.mubr.bf16.mxu1 %v16620_v11 }
  0x24   :  { %94 = vst [vmem:[#allocation2 + $0x218] sm:$0xff] %v16814_v9  ;;  %95 = vst [vmem:[#allocation2 + $0x220] sm:$0x3] %v16814_v9 }
  0x25   :  { %96 = vst [vmem:[#allocation2 + $0x228] sm:$0xff] %v16814_v9  ;;  %97 = vst [vmem:[#allocation2 + $0x230] sm:$0xff] %v16814_v9 }
  0x26   :  { %98 = vst [vmem:[#allocation2 + $0x238] sm:$0x3] %v16814_v9  ;;  %99 = vst [vmem:[#allocation2 + $0x240] sm:$0xff] %v16814_v9 }
  0x27   :  { %100 = vst [vmem:[#allocation2 + $0x248] sm:$0xff] %v16814_v9  ;;  %101 = vst [vmem:[#allocation2 + $0x250] sm:$0x3] %v16814_v9 }
  0x28   :  { %102 = vst [vmem:[#allocation2 + $0x258] sm:$0xff] %v16814_v9  ;;  %103 = vst [vmem:[#allocation2 + $0x260] sm:$0xff] %v16814_v9 }
  0x29   :  { %104 = vst [vmem:[#allocation2 + $0x268] sm:$0x3] %v16814_v9  ;;  %105 = vst [vmem:[#allocation2 + $0x270] sm:$0xff] %v16814_v9 }
  0x2a   :  { %106 = vst [vmem:[#allocation2 + $0x278] sm:$0xff] %v16814_v9  ;;  %107 = vst [vmem:[#allocation2 + $0x280] sm:$0x3] %v16814_v9  ;;  %14006 = vmatmul.mubr.bf16.gmra.mrb[4].mxu1 %v16621_v12 }
  0x2b   :  { %108 = vst [vmem:[#allocation2 + $0x288] sm:$0xff] %v16814_v9  ;;  %109 = vst [vmem:[#allocation2 + $0x290] sm:$0xff] %v16814_v9  ;;  %14009 = vmatprep.mubr.bf16.mxu1 %v16622_v13 }
  0x2c   :  { %110 = vst [vmem:[#allocation2 + $0x298] sm:$0x3] %v16814_v9  ;;  %111 = vst [vmem:[#allocation2 + $0x2a0] sm:$0xff] %v16814_v9 }
  0x2d   :  { %112 = vst [vmem:[#allocation2 + $0x2a8] sm:$0xff] %v16814_v9  ;;  %113 = vst [vmem:[#allocation2 + $0x2b0] sm:$0x3] %v16814_v9 }
  0x2e   :  { %114 = vst [vmem:[#allocation2 + $0x2b8] sm:$0xff] %v16814_v9  ;;  %115 = vst [vmem:[#allocation2 + $0x2c0] sm:$0xff] %v16814_v9 }
  0x2f   :  { %116 = vst [vmem:[#allocation2 + $0x2c8] sm:$0x3] %v16814_v9  ;;  %117 = vst [vmem:[#allocation2 + $0x2d0] sm:$0xff] %v16814_v9 }
  0x30   :  { %118 = vst [vmem:[#allocation2 + $0x2d8] sm:$0xff] %v16814_v9  ;;  %119 = vst [vmem:[#allocation2 + $0x2e0] sm:$0x3] %v16814_v9 }
  0x31   :  { %120 = vst [vmem:[#allocation2 + $0x2e8] sm:$0xff] %v16814_v9  ;;  %121 = vst [vmem:[#allocation2 + $0x2f0] sm:$0xff] %v16814_v9 }
  0x32   :  { %122 = vst [vmem:[#allocation2 + $0x2f8] sm:$0x3] %v16814_v9  ;;  %123 = vst [vmem:[#allocation2 + $0x300] sm:$0xff] %v16814_v9  ;;  %14010 = vmatmul.mubr.bf16.gmra.mrb[8].mxu1 %v16623_v14 }
  0x33   :  { %124 = vst [vmem:[#allocation2 + $0x308] sm:$0xff] %v16814_v9  ;;  %125 = vst [vmem:[#allocation2 + $0x310] sm:$0x3] %v16814_v9  ;;  %14013 = vmatprep.mubr.bf16.mxu1 %v16624_v15 }
  0x34   :  { %126 = vst [vmem:[#allocation2 + $0x318] sm:$0xff] %v16814_v9  ;;  %127 = vst [vmem:[#allocation2 + $0x320] sm:$0xff] %v16814_v9 }
  0x35   :  { %128 = vst [vmem:[#allocation2 + $0x328] sm:$0x3] %v16814_v9  ;;  %129 = vst [vmem:[#allocation2 + $0x330] sm:$0xff] %v16814_v9 }
  0x36   :  { %130 = vst [vmem:[#allocation2 + $0x338] sm:$0xff] %v16814_v9  ;;  %131 = vst [vmem:[#allocation2 + $0x340] sm:$0x3] %v16814_v9 }
  0x37   :  { %132 = vst [vmem:[#allocation2 + $0x348] sm:$0xff] %v16814_v9  ;;  %133 = vst [vmem:[#allocation2 + $0x350] sm:$0xff] %v16814_v9 }
  0x38   :  { %134 = vst [vmem:[#allocation2 + $0x358] sm:$0x3] %v16814_v9 }
  0x3a   :  { %14014 = vmatmul.mubr.bf16.gmra.mrb[12].mxu1 %v16625_v16 }
  0x3b   :  { %14017 = vmatprep.mubr.bf16.mxu1 %v16626_v17 }
  0x42   :  { %14018 = vmatmul.mubr.bf16.gmra.mrb[16].mxu1 %v16627_v18 }
  0x43   :  { %14021 = vmatprep.mubr.bf16.mxu1 %v16628_v19 }
  0x4a   :  { %14022 = vmatmul.mubr.bf16.gmra.mrb[20].mxu1 %v16629_v20 }
  0x4b   :  { %14025 = vmatprep.mubr.bf16.mxu1 %v16630_v21 }
  0x52   :  { %14026 = vmatmul.mubr.bf16.gmra.mrb[24].mxu1 %v16631_v22 }
  0x53   :  { %14029 = vmatprep.mubr.bf16.mxu1 %v16632_v23 }
  0x5a   :  { %14030 = vmatmul.mubr.bf16.gmra.mrb[28].mxu1 %v16633_v24 }
  0x5b   :  { %14033 = vmatprep.mubr.bf16.mxu1 %v16634_v25 }
  0x62   :  { %14034 = vmatmul.mubr.bf16.gmra.mrb[32].mxu1 %v16635_v26 }
  0x63   :  { %14037 = vmatprep.mubr.bf16.mxu1 %v16636_v27 }
  0x6a   :  { %14038 = vmatmul.mubr.bf16.gmra.mrb[36].mxu1 %v16637_v28 }
  0x6b   :  { %14041 = vmatprep.mubr.bf16.mxu1 %v16638_v29 }
  0x72   :  { %14042 = vmatmul.mubr.bf16.gmra.mrb[40].mxu1 %v16639_v30 }
  0x73   :  { %14045 = vmatprep.mubr.bf16.mxu1 %v16640_v31 }
  0x7a   :  { %14046 = vmatmul.mubr.bf16.gmra.mrb[44].mxu1 %v16641_v32 }
  0x7b   :  { %14049 = vmatprep.mubr.bf16.mxu1 %v16642_v33 }
  0x82   :  { %14050 = vmatmul.mubr.bf16.gmra.mrb[48].mxu1 %v16643_v34 }
  0x83   :  { %14053 = vmatprep.mubr.bf16.mxu1 %v16644_v35 }
  0x8a   :  { %14054 = vmatmul.mubr.bf16.gmra.mrb[52].mxu1 %v16645_v36 }
  0x8b   :  { %14057 = vmatprep.mubr.bf16.mxu1 %v16646_v37 }
  0x92   :  { %14058 = vmatmul.mubr.bf16.gmra.mrb[56].mxu1 %v16647_v38 }
  0x93   :  { %14061 = vmatprep.mubr.bf16.mxu1 %v16648_v39 }
  0x9a   :  { %14062 = vmatmul.mubr.bf16.gmra.mrb[60].mxu1 %v16649_v40 }
  0xf5   :  { %v17087_v41 = vpop.f32.mrb[0].mxu1 }
  0xf6   :  { %v17089_v42 = vpop.f32.mrb[1].mxu1 }
  0xf7   :  { %v17091_v43 = vpop.f32.mrb[2].mxu1 }
  0xf8   :  { %v17093_v44 = vpop.f32.mrb[3].mxu1 }
  0xf9   :  { %v746_v45 = vadd.f32 %v17093_v44, %v17089_v42 }
  0xfb   :  { %v747_v46 = vadd.f32 %v17087_v41, %v746_v45 }
  0xfd   :  { %v17098_v47 = vpop.f32.mrb[4].mxu1  ;;  %v748_v48 = vadd.f32 %v17091_v43, %v747_v46 }
  0xfe   :  { %v17101_v49 = vpop.f32.mrb[5].mxu1 }
  0xff   :  { %v749_v50 = vadd.f32 %v748_v48, %v17101_v49  ;;  %v17104_v51 = vpop.f32.mrb[6].mxu1 }
 0x100   :  { %v17106_v52 = vpop.f32.mrb[7].mxu1 }
 0x101   :  { %v750_v53 = vadd.f32 %v749_v50, %v17106_v52 }
 0x103   :  { %v751_v54 = vadd.f32 %v17098_v47, %v750_v53 }
 0x105   :  { %v17110_v55 = vpop.f32.mrb[8].mxu1  ;;  %v752_v56 = vadd.f32 %v17104_v51, %v751_v54 }
 0x106   :  { %v17113_v57 = vpop.f32.mrb[9].mxu1 }
 0x107   :  { %v753_v58 = vadd.f32 %v752_v56, %v17113_v57  ;;  %v17116_v59 = vpop.f32.mrb[10].mxu1 }
 0x108   :  { %v17118_v60 = vpop.f32.mrb[11].mxu1 }
 0x109   :  { %v754_v61 = vadd.f32 %v753_v58, %v17118_v60 }
 0x10b   :  { %v755_v62 = vadd.f32 %v17110_v55, %v754_v61 }
 0x10d   :  { %v17122_v63 = vpop.f32.mrb[12].mxu1  ;;  %v756_v0 = vadd.f32 %v17116_v59, %v755_v62 }
 0x10e   :  { %v17125_v1 = vpop.f32.mrb[13].mxu1 }
 0x10f   :  { %v757_v2 = vadd.f32 %v756_v0, %v17125_v1  ;;  %v17128_v3 = vpop.f32.mrb[14].mxu1 }
 0x110   :  { %v17130_v4 = vpop.f32.mrb[15].mxu1 }
 0x111   :  { %v758_v5 = vadd.f32 %v757_v2, %v17130_v4 }
 0x113   :  { %v759_v6 = vadd.f32 %v17122_v63, %v758_v5 }
 0x115   :  { %v17134_v7 = vpop.f32.mrb[16].mxu1  ;;  %v760_v8 = vadd.f32 %v17128_v3, %v759_v6 }
 0x116   :  { %v17137_v9 = vpop.f32.mrb[17].mxu1 }
 0x117   :  { %v761_v10 = vadd.f32 %v760_v8, %v17137_v9  ;;  %v17140_v11 = vpop.f32.mrb[18].mxu1 }
 0x118   :  { %v17142_v12 = vpop.f32.mrb[19].mxu1 }
 0x119   :  { %v762_v13 = vadd.f32 %v761_v10, %v17142_v12 }
 0x11b   :  { %v763_v14 = vadd.f32 %v17134_v7, %v762_v13 }
 0x11d   :  { %v17146_v15 = vpop.f32.mrb[20].mxu1  ;;  %v764_v16 = vadd.f32 %v17140_v11, %v763_v14 }
 0x11e   :  { %v17149_v17 = vpop.f32.mrb[21].mxu1 }
 0x11f   :  { %v765_v18 = vadd.f32 %v764_v16, %v17149_v17  ;;  %v17152_v19 = vpop.f32.mrb[22].mxu1 }
 0x120   :  { %v17154_v20 = vpop.f32.mrb[23].mxu1 }
 0x121   :  { %v766_v21 = vadd.f32 %v765_v18, %v17154_v20 }
 0x123   :  { %v767_v22 = vadd.f32 %v17146_v15, %v766_v21 }
 0x125   :  { %v17158_v23 = vpop.f32.mrb[24].mxu1  ;;  %v768_v24 = vadd.f32 %v17152_v19, %v767_v22 }
 0x126   :  { %v17161_v25 = vpop.f32.mrb[25].mxu1 }
 0x127   :  { %v769_v26 = vadd.f32 %v768_v24, %v17161_v25  ;;  %v17164_v27 = vpop.f32.mrb[26].mxu1 }
 0x128   :  { %v17166_v28 = vpop.f32.mrb[27].mxu1 }
 0x129   :  { %v770_v29 = vadd.f32 %v769_v26, %v17166_v28 }
 0x12b   :  { %v771_v30 = vadd.f32 %v17158_v23, %v770_v29 }
 0x12d   :  { %v17170_v31 = vpop.f32.mrb[28].mxu1  ;;  %v772_v32 = vadd.f32 %v17164_v27, %v771_v30 }
 0x12e   :  { %v17173_v33 = vpop.f32.mrb[29].mxu1 }
 0x12f   :  { %v773_v34 = vadd.f32 %v772_v32, %v17173_v33  ;;  %v17176_v35 = vpop.f32.mrb[30].mxu1 }
 0x130   :  { %v17178_v36 = vpop.f32.mrb[31].mxu1 }
 0x131   :  { %v774_v37 = vadd.f32 %v773_v34, %v17178_v36 }
 0x133   :  { %v775_v38 = vadd.f32 %v17170_v31, %v774_v37 }
 0x135   :  { %v17182_v39 = vpop.f32.mrb[32].mxu1  ;;  %v776_v40 = vadd.f32 %v17176_v35, %v775_v38 }
 0x136   :  { %v17185_v45 = vpop.f32.mrb[33].mxu1 }
 0x137   :  { %v777_v46 = vadd.f32 %v776_v40, %v17185_v45  ;;  %v17188_v48 = vpop.f32.mrb[34].mxu1 }
 0x138   :  { %v17190_v50 = vpop.f32.mrb[35].mxu1 }
 0x139   :  { %v778_v53 = vadd.f32 %v777_v46, %v17190_v50 }
 0x13b   :  { %v779_v54 = vadd.f32 %v17182_v39, %v778_v53 }
 0x13d   :  { %v17194_v56 = vpop.f32.mrb[36].mxu1  ;;  %v780_v58 = vadd.f32 %v17188_v48, %v779_v54 }
 0x13e   :  { %v17197_v61 = vpop.f32.mrb[37].mxu1 }
 0x13f   :  { %v781_v62 = vadd.f32 %v780_v58, %v17197_v61  ;;  %v17200_v0 = vpop.f32.mrb[38].mxu1 }
 0x140   :  { %v17202_v2 = vpop.f32.mrb[39].mxu1 }
 0x141   :  { %v782_v5 = vadd.f32 %v781_v62, %v17202_v2 }
 0x143   :  { %v783_v6 = vadd.f32 %v17194_v56, %v782_v5 }
 0x145   :  { %v17206_v8 = vpop.f32.mrb[40].mxu1  ;;  %v784_v10 = vadd.f32 %v17200_v0, %v783_v6 }
 0x146   :  { %v17209_v13 = vpop.f32.mrb[41].mxu1 }
 0x147   :  { %v785_v14 = vadd.f32 %v784_v10, %v17209_v13  ;;  %v17212_v16 = vpop.f32.mrb[42].mxu1 }
 0x148   :  { %v17214_v18 = vpop.f32.mrb[43].mxu1 }
 0x149   :  { %v786_v21 = vadd.f32 %v785_v14, %v17214_v18 }
 0x14b   :  { %v787_v22 = vadd.f32 %v17206_v8, %v786_v21 }
 0x14d   :  { %v17218_v24 = vpop.f32.mrb[44].mxu1  ;;  %v788_v26 = vadd.f32 %v17212_v16, %v787_v22 }
 0x14e   :  { %v17221_v29 = vpop.f32.mrb[45].mxu1 }
 0x14f   :  { %v789_v30 = vadd.f32 %v788_v26, %v17221_v29  ;;  %v17224_v32 = vpop.f32.mrb[46].mxu1 }
 0x150   :  { %v17226_v34 = vpop.f32.mrb[47].mxu1 }
 0x151   :  { %v790_v37 = vadd.f32 %v789_v30, %v17226_v34 }
 0x153   :  { %v791_v38 = vadd.f32 %v17218_v24, %v790_v37 }
 0x155   :  { %v17230_v40 = vpop.f32.mrb[48].mxu1  ;;  %v792_v46 = vadd.f32 %v17224_v32, %v791_v38 }
 0x156   :  { %24882 = vst [vmem:[#allocation3_spill] sm:$0xff] %v17230_v40  ;;  %v17233_v53 = vpop.f32.mrb[49].mxu1 }
 0x157   :  { %24883 = vst [vmem:[#allocation4_spill] sm:$0xff] %v17233_v53  ;;  %v793_v54 = vadd.f32 %v792_v46, %v17233_v53  ;;  %v17236_v58 = vpop.f32.mrb[50].mxu1 }
 0x158   :  { %24884 = vst [vmem:[#allocation5_spill] sm:$0xff] %v17236_v58  ;;  %v17238_v62 = vpop.f32.mrb[51].mxu1 }
 0x159   :  { %24885 = vst [vmem:[#allocation6_spill] sm:$0xff] %v17238_v62  ;;  %v794_v5 = vadd.f32 %v793_v54, %v17238_v62 }
 0x15b   :  { %v795_v6 = vadd.f32 %v17230_v40, %v794_v5 }
 0x15d   :  { %v17242_v10 = vpop.f32.mrb[52].mxu1  ;;  %v796_v14 = vadd.f32 %v17236_v58, %v795_v6 }
 0x15e   :  { %24886 = vst [vmem:[#allocation7_spill] sm:$0xff] %v17242_v10  ;;  %v17245_v21 = vpop.f32.mrb[53].mxu1 }
 0x15f   :  { %24887 = vst [vmem:[#allocation8_spill] sm:$0xff] %v17245_v21  ;;  %v797_v22 = vadd.f32 %v796_v14, %v17245_v21  ;;  %v17248_v26 = vpop.f32.mrb[54].mxu1 }
 0x160   :  { %24888 = vst [vmem:[#allocation9_spill] sm:$0xff] %v17248_v26  ;;  %v17250_v30 = vpop.f32.mrb[55].mxu1 }
 0x161   :  { %24889 = vst [vmem:[#allocation10_spill] sm:$0xff] %v17250_v30  ;;  %v798_v37 = vadd.f32 %v797_v22, %v17250_v30 }
 0x163   :  { %v799_v38 = vadd.f32 %v17242_v10, %v798_v37 }
 0x165   :  { %v17254_v46 = vpop.f32.mrb[56].mxu1  ;;  %v800_v54 = vadd.f32 %v17248_v26, %v799_v38 }
 0x166   :  { %24890 = vst [vmem:[#allocation11_spill] sm:$0xff] %v17254_v46  ;;  %v17257_v5 = vpop.f32.mrb[57].mxu1 }
 0x167   :  { %24891 = vst [vmem:[#allocation12_spill] sm:$0xff] %v17257_v5  ;;  %v801_v6 = vadd.f32 %v800_v54, %v17257_v5  ;;  %v17260_v58 = vpop.f32.mrb[58].mxu1 }
 0x168   :  { %24892 = vst [vmem:[#allocation13_spill] sm:$0xff] %v17260_v58  ;;  %v17262_v40 = vpop.f32.mrb[59].mxu1 }
 0x169   :  { %24893 = vst [vmem:[#allocation14_spill] sm:$0xff] %v17262_v40  ;;  %v802_v14 = vadd.f32 %v801_v6, %v17262_v40 }
 0x16b   :  { %v803_v21 = vadd.f32 %v17254_v46, %v802_v14 }
 0x16d   :  { %v17266_v62 = vpop.f32.mrb[60].mxu1  ;;  %v804_v22 = vadd.f32 %v17260_v58, %v803_v21 }
 0x16e   :  { %v17269_v37 = vpop.f32.mrb[61].mxu1 }
 0x16f   :  { %24894 = vst [vmem:[#allocation15_spill] sm:$0xff] %v17269_v37  ;;  %v805_v38 = vadd.f32 %v804_v22, %v17269_v37  ;;  %v17272_v26 = vpop.f32.mrb[62].mxu1 }
 0x170   :  { %v17274_v10 = vpop.f32.mrb[63].mxu1 }
 0x171   :  { %v806_v54 = vadd.f32 %v805_v38, %v17274_v10 }
 0x173   :  { %v807_v5 = vadd.f32 %v17266_v62, %v806_v54  ;;  %v24918_v54 = vld [vmem:[#allocation5_spill] sm:$0xff] }
 0x175   :  { %v808_v6 = vadd.f32 %v17272_v26, %v807_v5  ;;  %v24916_v5 = vld [vmem:[#allocation3_spill] sm:$0xff] }
 0x177   :  { %v809_v40 = vrot.slane %v808_v6, 4 }
 0x179   :  { %v810_v14 = vadd.f32 %v809_v40, %v808_v6  ;;  %v24920_v6 = vld [vmem:[#allocation8_spill] sm:$0xff] }
 0x17b   :  { %v811_v46 = vrot.slane %v810_v14, 2 }
 0x17d   :  { %v812_v30 = vadd.f32 %v811_v46, %v810_v14  ;;  %v24914_v46 = vld [vmem:[#allocation6_spill] sm:$0xff] }
 0x17e   :  { %v24922_v14 = vld [vmem:[#allocation10_spill] sm:$0xff] }
 0x17f   :  { %v813_v53 = vrot.slane %v812_v30, 1 }
 0x181   :  { %v814_v21 = vadd.f32 %v813_v53, %v812_v30  ;;  %v24913_v30 = vld [vmem:[#allocation4_spill] sm:$0xff] }
 0x183   :  { %v17279_v58 = vmul.f32 0.001953125, %v814_v21 }
 0x185   :  { %v17283_v22 = vsub.f32 %v17089_v42, %v17279_v58  ;;  %v17287_v37 = vsub.f32 %v17093_v44, %v17279_v58  ;;  %v17291_v38 = vsub.f32 %v17087_v41, %v17279_v58  ;;  %v17295_v40 = vsub.f32 %v17091_v43, %v17279_v58 }
 0x186   :  { %v17299_v53 = vsub.f32 %v17101_v49, %v17279_v58  ;;  %v17303_v42 = vsub.f32 %v17106_v52, %v17279_v58  ;;  %v17307_v44 = vsub.f32 %v17098_v47, %v17279_v58  ;;  %v17311_v41 = vsub.f32 %v17104_v51, %v17279_v58 }
 0x187   :  { %24895 = vst [vmem:[#allocation16_spill] sm:$0xff] %v17283_v22  ;;  %24896 = vst [vmem:[#allocation17_spill] sm:$0xff] %v17287_v37  ;;  %v17315_v43 = vsub.f32 %v17113_v57, %v17279_v58  ;;  %v17319_v49 = vsub.f32 %v17118_v60, %v17279_v58  ;;  %v17323_v52 = vsub.f32 %v17110_v55, %v17279_v58 }
 0x188   :  { %24897 = vst [vmem:[#allocation18_spill] sm:$0xff] %v17291_v38  ;;  %24898 = vst [vmem:[#allocation19_spill] sm:$0xff] %v17311_v41  ;;  %v17327_v47 = vsub.f32 %v17116_v59, %v17279_v58  ;;  %v17331_v51 = vsub.f32 %v17125_v1, %v17279_v58  ;;  %v17335_v57 = vsub.f32 %v17130_v4, %v17279_v58 }
 0x189   :  { %24899 = vst [vmem:[#allocation20_spill] sm:$0xff] %v17315_v43  ;;  %24900 = vst [vmem:[#allocation21_spill] sm:$0xff] %v17319_v49  ;;  %v17339_v60 = vsub.f32 %v17122_v63, %v17279_v58  ;;  %v17343_v55 = vsub.f32 %v17128_v3, %v17279_v58  ;;  %v17347_v59 = vsub.f32 %v17137_v9, %v17279_v58 }
 0x18a   :  { %24901 = vst [vmem:[#allocation22_spill] sm:$0xff] %v17323_v52  ;;  %24902 = vst [vmem:[#allocation23_spill] sm:$0xff] %v17327_v47  ;;  %v17351_v1 = vsub.f32 %v17142_v12, %v17279_v58  ;;  %v17355_v4 = vsub.f32 %v17134_v7, %v17279_v58  ;;  %v17359_v63 = vsub.f32 %v17140_v11, %v17279_v58 }
 0x18b   :  { %24903 = vst [vmem:[#allocation24_spill] sm:$0xff] %v17331_v51  ;;  %24904 = vst [vmem:[#allocation25_spill] sm:$0xff] %v17335_v57  ;;  %v17363_v3 = vsub.f32 %v17149_v17, %v17279_v58  ;;  %v17367_v9 = vsub.f32 %v17154_v20, %v17279_v58  ;;  %v17371_v12 = vsub.f32 %v17146_v15, %v17279_v58 }
 0x18c   :  { %24905 = vst [vmem:[#allocation26_spill] sm:$0xff] %v17339_v60  ;;  %24906 = vst [vmem:[#allocation27_spill] sm:$0xff] %v17343_v55  ;;  %v17375_v7 = vsub.f32 %v17152_v19, %v17279_v58  ;;  %v17379_v11 = vsub.f32 %v17161_v25, %v17279_v58  ;;  %v17383_v17 = vsub.f32 %v17166_v28, %v17279_v58 }
 0x18d   :  { %24907 = vst [vmem:[#allocation28_spill] sm:$0xff] %v17347_v59  ;;  %24908 = vst [vmem:[#allocation29_spill] sm:$0xff] %v17351_v1  ;;  %v17387_v20 = vsub.f32 %v17158_v23, %v17279_v58  ;;  %v17391_v15 = vsub.f32 %v17164_v27, %v17279_v58  ;;  %v17395_v19 = vsub.f32 %v17173_v33, %v17279_v58 }
 0x18e   :  { %24909 = vst [vmem:[#allocation30_spill] sm:$0xff] %v17355_v4  ;;  %24910 = vst [vmem:[#allocation31_spill] sm:$0xff] %v17359_v63  ;;  %v17399_v25 = vsub.f32 %v17178_v36, %v17279_v58  ;;  %v17403_v28 = vsub.f32 %v17170_v31, %v17279_v58  ;;  %v17407_v23 = vsub.f32 %v17176_v35, %v17279_v58 }
 0x18f   :  { %24911 = vst [vmem:[#allocation32_spill] sm:$0xff] %v17363_v3  ;;  %24912 = vst [vmem:[#allocation33_spill] sm:$0xff] %v17367_v9  ;;  %v17411_v27 = vsub.f32 %v17185_v45, %v17279_v58  ;;  %v17415_v33 = vsub.f32 %v17190_v50, %v17279_v58  ;;  %v17419_v36 = vsub.f32 %v17182_v39, %v17279_v58 }
 0x190   :  { %v17423_v31 = vsub.f32 %v17188_v48, %v17279_v58  ;;  %v17427_v35 = vsub.f32 %v17197_v61, %v17279_v58  ;;  %v17431_v45 = vsub.f32 %v17202_v2, %v17279_v58  ;;  %v17435_v50 = vsub.f32 %v17194_v56, %v17279_v58 }
 0x191   :  { %v17439_v39 = vsub.f32 %v17200_v0, %v17279_v58  ;;  %v17443_v48 = vsub.f32 %v17209_v13, %v17279_v58  ;;  %v17447_v61 = vsub.f32 %v17214_v18, %v17279_v58  ;;  %v17451_v2 = vsub.f32 %v17206_v8, %v17279_v58 }
 0x192   :  { %v17455_v56 = vsub.f32 %v17212_v16, %v17279_v58  ;;  %v17459_v0 = vsub.f32 %v17221_v29, %v17279_v58  ;;  %v17463_v13 = vsub.f32 %v17226_v34, %v17279_v58  ;;  %v17467_v18 = vsub.f32 %v17218_v24, %v17279_v58 }
 0x193   :  { %v17471_v8 = vsub.f32 %v17224_v32, %v17279_v58  ;;  %v17475_v16 = vsub.f32 %v24913_v30, %v17279_v58  ;;  %v17479_v29 = vsub.f32 %v24914_v46, %v17279_v58  ;;  %v17483_v34 = vsub.f32 %v24916_v5, %v17279_v58  ;;  %v24924_v30 = vld [vmem:[#allocation7_spill] sm:$0xff] }
 0x194   :  { %v17487_v24 = vsub.f32 %v24918_v54, %v17279_v58  ;;  %v17491_v32 = vsub.f32 %v24920_v6, %v17279_v58  ;;  %v17495_v21 = vsub.f32 %v24922_v14, %v17279_v58  ;;  %v17499_v46 = vsub.f32 %v24924_v30, %v17279_v58 }
 0x195   :  { %24915 = vst [vmem:[#allocation4_spill] sm:$0xff] %v17479_v29  ;;  %24917 = vst [vmem:[#allocation6_spill] sm:$0xff] %v17483_v34  ;;  %v24926_v29 = vld [vmem:[#allocation9_spill] sm:$0xff]  ;;  %v24927_v34 = vld [vmem:[#allocation12_spill] sm:$0xff] }
 0x196   :  { %24919 = vst [vmem:[#allocation3_spill] sm:$0xff] %v17487_v24  ;;  %24921 = vst [vmem:[#allocation5_spill] sm:$0xff] %v17491_v32  ;;  %v17503_v5 = vsub.f32 %v24926_v29, %v17279_v58  ;;  %v17507_v54 = vsub.f32 %v24927_v34, %v17279_v58  ;;  %v24928_v24 = vld [vmem:[#allocation14_spill] sm:$0xff]  ;;  %v24929_v32 = vld [vmem:[#allocation11_spill] sm:$0xff]  ;;  %v17527_v34 = vsub.f32 %v17274_v10, %v17279_v58 }
 0x197   :  { %24923 = vst [vmem:[#allocation8_spill] sm:$0xff] %v17495_v21  ;;  %24925 = vst [vmem:[#allocation10_spill] sm:$0xff] %v17499_v46  ;;  %v17511_v6 = vsub.f32 %v24928_v24, %v17279_v58  ;;  %v17515_v14 = vsub.f32 %v24929_v32, %v17279_v58  ;;  %v24930_v21 = vld [vmem:[#allocation13_spill] sm:$0xff]  ;;  %v24932_v46 = vld [vmem:[#allocation15_spill] sm:$0xff]  ;;  %v17531_v24 = vsub.f32 %v17266_v62, %v17279_v58 }
 0x198   :  { %v17519_v30 = vsub.f32 %v24930_v21, %v17279_v58  ;;  %v17523_v29 = vsub.f32 %v24932_v46, %v17279_v58  ;;  %24934 = vst [vmem:[#allocation12_spill] sm:$0xff] %v17527_v34  ;;  %v17535_v32 = vsub.f32 %v17272_v26, %v17279_v58  ;;  %v880_v21 = vmul.f32 %v17283_v22, %v17283_v22 }
 0x199   :  { %24935 = vst [vmem:[#allocation14_spill] sm:$0xff] %v17531_v24  ;;  %v882_v46 = vmul.f32 %v17291_v38, %v17291_v38  ;;  %v883_v10 = vmul.f32 %v17295_v40, %v17295_v40  ;;  %v884_v62 = vmul.f32 %v17299_v53, %v17299_v53  ;;  %v885_v58 = vmul.f32 %v17303_v42, %v17303_v42 }
 0x19a   :  { %24931 = vst [vmem:[#allocation7_spill] sm:$0xff] %v17519_v30  ;;  %24933 = vst [vmem:[#allocation9_spill] sm:$0xff] %v17523_v29  ;;  %v881_v30 = vmul.f32 %v17287_v37, %v17287_v37  ;;  %v886_v22 = vmul.f32 %v17307_v44, %v17307_v44  ;;  %v887_v38 = vmul.f32 %v17311_v41, %v17311_v41  ;;  %v1018_v41 = vlaneseq }
 0x19c   :  { %v944_v29 = vadd.f32 %v881_v30, %v880_v21  ;;  %v888_v21 = vmul.f32 %v17315_v43, %v17315_v43 }
 0x19e   :  { %v945_v34 = vadd.f32 %v944_v29, %v882_v46  ;;  %v889_v46 = vmul.f32 %v17319_v49, %v17319_v49 }
 0x1a0   :  { %v946_v24 = vadd.f32 %v945_v34, %v883_v10  ;;  %v890_v10 = vmul.f32 %v17323_v52, %v17323_v52 }
 0x1a2   :  { %v947_v26 = vadd.f32 %v946_v24, %v884_v62  ;;  %v891_v62 = vmul.f32 %v17327_v47, %v17327_v47 }
 0x1a4   :  { %v948_v37 = vadd.f32 %v947_v26, %v885_v58  ;;  %v892_v26 = vmul.f32 %v17331_v51, %v17331_v51 }
 0x1a6   :  { %v949_v30 = vadd.f32 %v948_v37, %v886_v22  ;;  %v893_v22 = vmul.f32 %v17335_v57, %v17335_v57  ;;  %v24946_v57 = vld [vmem:[#allocation14_spill] sm:$0xff] }
 0x1a8   :  { %v950_v29 = vadd.f32 %v949_v30, %v887_v38  ;;  %v894_v30 = vmul.f32 %v17339_v60, %v17339_v60 }
 0x1aa   :  { %v951_v34 = vadd.f32 %v950_v29, %v888_v21  ;;  %v895_v29 = vmul.f32 %v17343_v55, %v17343_v55 }
 0x1ac   :  { %v952_v24 = vadd.f32 %v951_v34, %v889_v46  ;;  %v896_v34 = vmul.f32 %v17347_v59, %v17347_v59 }
 0x1ae   :  { %v953_v58 = vadd.f32 %v952_v24, %v890_v10  ;;  %v897_v24 = vmul.f32 %v17351_v1, %v17351_v1  ;;  %v1527_v1 = vld [vmem:[#allocation2 + $0x9] sm:$0xff] }
 0x1b0   :  { %v954_v37 = vadd.f32 %v953_v58, %v891_v62  ;;  %v898_v58 = vmul.f32 %v17355_v4, %v17355_v4  ;;  %v935_v4 = vmul.f32 %v17503_v5, %v17503_v5 }
 0x1b2   :  { %v955_v38 = vadd.f32 %v954_v37, %v892_v26  ;;  %v899_v37 = vmul.f32 %v17359_v63, %v17359_v63 }
 0x1b4   :  { %v956_v21 = vadd.f32 %v955_v38, %v893_v22  ;;  %v900_v38 = vmul.f32 %v17363_v3, %v17363_v3  ;;  %v24940_v3 = vld [vmem:[#allocation8_spill] sm:$0xff] }
 0x1b5   :  { %v933_v63 = vmul.f32 %v24940_v3, %v24940_v3 }
 0x1b6   :  { %v957_v46 = vadd.f32 %v956_v21, %v894_v30  ;;  %v901_v21 = vmul.f32 %v17367_v9, %v17367_v9 }
 0x1b8   :  { %v958_v10 = vadd.f32 %v957_v46, %v895_v29  ;;  %v902_v46 = vmul.f32 %v17371_v12, %v17371_v12 }
 0x1ba   :  { %v959_v62 = vadd.f32 %v958_v10, %v896_v34  ;;  %v903_v10 = vmul.f32 %v17375_v7, %v17375_v7 }
 0x1bc   :  { %v960_v26 = vadd.f32 %v959_v62, %v897_v24  ;;  %v904_v62 = vmul.f32 %v17379_v11, %v17379_v11 }
 0x1be   :  { %v961_v22 = vadd.f32 %v960_v26, %v898_v58  ;;  %v905_v26 = vmul.f32 %v17383_v17, %v17383_v17 }
 0x1c0   :  { %v962_v30 = vadd.f32 %v961_v22, %v899_v37  ;;  %v906_v22 = vmul.f32 %v17387_v20, %v17387_v20 }
 0x1c2   :  { %v963_v29 = vadd.f32 %v962_v30, %v900_v38  ;;  %v907_v30 = vmul.f32 %v17391_v15, %v17391_v15 }
 0x1c4   :  { %v964_v34 = vadd.f32 %v963_v29, %v901_v21  ;;  %v908_v29 = vmul.f32 %v17395_v19, %v17395_v19 }
 0x1c6   :  { %v965_v24 = vadd.f32 %v964_v34, %v902_v46  ;;  %v909_v34 = vmul.f32 %v17399_v25, %v17399_v25 }
 0x1c8   :  { %v966_v58 = vadd.f32 %v965_v24, %v903_v10  ;;  %v910_v24 = vmul.f32 %v17403_v28, %v17403_v28 }
 0x1ca   :  { %v967_v37 = vadd.f32 %v966_v58, %v904_v62  ;;  %v911_v58 = vmul.f32 %v17407_v23, %v17407_v23 }
 0x1cc   :  { %v968_v38 = vadd.f32 %v967_v37, %v905_v26  ;;  %v912_v37 = vmul.f32 %v17411_v27, %v17411_v27 }
 0x1ce   :  { %v969_v21 = vadd.f32 %v968_v38, %v906_v22  ;;  %v913_v38 = vmul.f32 %v17415_v33, %v17415_v33 }
 0x1d0   :  { %v970_v46 = vadd.f32 %v969_v21, %v907_v30  ;;  %v914_v21 = vmul.f32 %v17419_v36, %v17419_v36 }
 0x1d2   :  { %v971_v10 = vadd.f32 %v970_v46, %v908_v29  ;;  %v915_v46 = vmul.f32 %v17423_v31, %v17423_v31 }
 0x1d4   :  { %v972_v62 = vadd.f32 %v971_v10, %v909_v34  ;;  %v916_v10 = vmul.f32 %v17427_v35, %v17427_v35 }
 0x1d6   :  { %v973_v26 = vadd.f32 %v972_v62, %v910_v24  ;;  %v917_v62 = vmul.f32 %v17431_v45, %v17431_v45 }
 0x1d8   :  { %v974_v22 = vadd.f32 %v973_v26, %v911_v58  ;;  %v918_v26 = vmul.f32 %v17435_v50, %v17435_v50 }
 0x1da   :  { %v975_v30 = vadd.f32 %v974_v22, %v912_v37  ;;  %v919_v22 = vmul.f32 %v17439_v39, %v17439_v39 }
 0x1dc   :  { %v976_v29 = vadd.f32 %v975_v30, %v913_v38  ;;  %v920_v30 = vmul.f32 %v17443_v48, %v17443_v48 }
 0x1de   :  { %v977_v34 = vadd.f32 %v976_v29, %v914_v21  ;;  %v921_v29 = vmul.f32 %v17447_v61, %v17447_v61 }
 0x1e0   :  { %v978_v24 = vadd.f32 %v977_v34, %v915_v46  ;;  %v16650_v34 = vld [vmem:[%s24593_s2 + $0x40] sm:$0xff]  }
 0x1e1   :  { %14065 = vmatprep.subr.bf16.mxu1 %v16650_v34 }
 0x1e2   :  { %v979_v58 = vadd.f32 %v978_v24, %v916_v10  ;;  %v922_v10 = vmul.f32 %v17451_v2, %v17451_v2  ;;  %14066 = vmatpush3.bf16.msra.mxu1 %v16650_v34  ;;  %v927_v34 = vmul.f32 %v17471_v8, %v17471_v8 }
 0x1e4   :  { %v980_v37 = vadd.f32 %v979_v58, %v917_v62  ;;  %v923_v62 = vmul.f32 %v17455_v56, %v17455_v56 }
 0x1e6   :  { %v981_v38 = vadd.f32 %v980_v37, %v918_v26  ;;  %v16651_v26 = vld [vmem:[%s24593_s2 + $0x48] sm:$0xff]   ;;  %v924_v37 = vmul.f32 %v17459_v0, %v17459_v0 }
 0x1e7   :  { %14067 = vmatprep.subr.bf16.mxu1 %v16651_v26 }
 0x1e8   :  { %v982_v21 = vadd.f32 %v981_v38, %v919_v22  ;;  %14068 = vmatpush3.bf16.msra.mxu1 %v16651_v26  ;;  %v925_v38 = vmul.f32 %v17463_v13, %v17463_v13  ;;  %v24936_v26 = vld [vmem:[#allocation4_spill] sm:$0xff] }
 0x1ea   :  { %v983_v46 = vadd.f32 %v982_v21, %v920_v30  ;;  %v16652_v21 = vld [vmem:[%s24593_s2 + $0x50] sm:$0xff]  }
 0x1eb   :  { %14069 = vmatprep.subr.bf16.mxu1 %v16652_v21 }
 0x1ec   :  { %v984_v24 = vadd.f32 %v983_v46, %v921_v29  ;;  %v926_v29 = vmul.f32 %v17467_v18, %v17467_v18  ;;  %14070 = vmatpush3.bf16.msra.mxu1 %v16652_v21 }
 0x1ee   :  { %v985_v58 = vadd.f32 %v984_v24, %v922_v10  ;;  %v16653_v24 = vld [vmem:[%s24593_s2 + $0x58] sm:$0xff]  }
 0x1ef   :  { %14071 = vmatprep.subr.bf16.mxu1 %v16653_v24 }
 0x1f0   :  { %v986_v22 = vadd.f32 %v985_v58, %v923_v62  ;;  %v928_v62 = vmul.f32 %v17475_v16, %v17475_v16  ;;  %14072 = vmatpush3.bf16.msra.mxu1 %v16653_v24  ;;  %v24939_v24 = vld [vmem:[#allocation5_spill] sm:$0xff] }
 0x1f2   :  { %v987_v30 = vadd.f32 %v986_v22, %v924_v37  ;;  %v929_v37 = vmul.f32 %v24936_v26, %v24936_v26 }
 0x1f4   :  { %v988_v46 = vadd.f32 %v987_v30, %v925_v38  ;;  %v16654_v38 = vld [vmem:[%s24593_s2 + $0x60] sm:$0xff]   ;;  %v24937_v30 = vld [vmem:[#allocation6_spill] sm:$0xff] }
 0x1f5   :  { %v930_v21 = vmul.f32 %v24937_v30, %v24937_v30  ;;  %14073 = vmatprep.subr.bf16.mxu1 %v16654_v38 }
 0x1f6   :  { %v989_v10 = vadd.f32 %v988_v46, %v926_v29  ;;  %14074 = vmatpush3.bf16.msra.mxu1 %v16654_v38  ;;  %v24938_v46 = vld [vmem:[#allocation3_spill] sm:$0xff]  ;;  %v24941_v38 = vld [vmem:[#allocation10_spill] sm:$0xff] }
 0x1f7   :  { %v931_v9 = vmul.f32 %v24938_v46, %v24938_v46 }
 0x1f8   :  { %v990_v58 = vadd.f32 %v989_v10, %v927_v34  ;;  %v16655_v10 = vld [vmem:[%s24593_s2 + $0x68] sm:$0xff]  }
 0x1f9   :  { %14075 = vmatprep.subr.bf16.mxu1 %v16655_v10 }
 0x1fa   :  { %v991_v22 = vadd.f32 %v990_v58, %v928_v62  ;;  %v932_v62 = vmul.f32 %v24939_v24, %v24939_v24  ;;  %14076 = vmatpush3.bf16.msra.mxu1 %v16655_v10  ;;  %v936_v10 = vmul.f32 %v17507_v54, %v17507_v54 }
 0x1fc   :  { %v992_v29 = vadd.f32 %v991_v22, %v929_v37  ;;  %v16656_v22 = vld [vmem:[%s24593_s2 + $0x70] sm:$0xff]  }
 0x1fd   :  { %14077 = vmatprep.subr.bf16.mxu1 %v16656_v22 }
 0x1fe   :  { %v993_v34 = vadd.f32 %v992_v29, %v930_v21  ;;  %v934_v21 = vmul.f32 %v24941_v38, %v24941_v38  ;;  %14078 = vmatpush3.bf16.msra.mxu1 %v16656_v22  ;;  %v17680_v22 = vld [vmem:[%s24593_s2] sm:$0xff]  }
 0x1ff   :  { %24942 = vst [vmem:[#allocation11_spill] sm:$0xff] %v17680_v22 }
 0x200   :  { %v994_v58 = vadd.f32 %v993_v34, %v931_v9  ;;  %v16657_v34 = vld [vmem:[%s24593_s2 + $0x78] sm:$0xff]  }
 0x201   :  { %14079 = vmatprep.subr.bf16.mxu1 %v16657_v34 }
 0x202   :  { %v995_v37 = vadd.f32 %v994_v58, %v932_v62  ;;  %v1526_v58 = vld [vmem:[#allocation2 + $0x1] sm:$0xff]  ;;  %14080 = vmatpush3.bf16.msra.mxu1 %v16657_v34  ;;  %v24944_v34 = vld [vmem:[#allocation9_spill] sm:$0xff] }
 0x203   :  { %v1590_v59 = vpack.c.bf16 %v1527_v1, %v1526_v58  ;;  %14145 = vmatprep.subr.bf16.mxu1 %v17680_v22  ;;  %v940_v58 = vmul.f32 %v24944_v34, %v24944_v34 }
 0x204   :  { %v996_v29 = vadd.f32 %v995_v37, %v933_v63  ;;  %v937_v63 = vmul.f32 %v17511_v6, %v17511_v6 }
 0x205   :  { %14081 = vmatprep.mubr.bf16.mxu1 %v1590_v59  ;;  %v942_v59 = vmul.f32 %v24946_v57, %v24946_v57 }
 0x206   :  { %v997_v9 = vadd.f32 %v996_v29, %v934_v21  ;;  %v938_v21 = vmul.f32 %v17515_v14, %v17515_v14 }
 0x208   :  { %v998_v62 = vadd.f32 %v997_v9, %v935_v4  ;;  %v24943_v4 = vld [vmem:[#allocation7_spill] sm:$0xff] }
 0x209   :  { %v939_v9 = vmul.f32 %v24943_v4, %v24943_v4 }
 0x20a   :  { %v999_v37 = vadd.f32 %v998_v62, %v936_v10  ;;  %v24945_v62 = vld [vmem:[#allocation12_spill] sm:$0xff] }
 0x20b   :  { %v941_v55 = vmul.f32 %v24945_v62, %v24945_v62 }
 0x20c   :  { %v1000_v29 = vadd.f32 %v999_v37, %v937_v63  ;;  %v943_v63 = vmul.f32 %v17535_v32, %v17535_v32 }
 0x20e   :  { %v1001_v1 = vadd.f32 %v1000_v29, %v938_v21 }
 0x210   :  { %v1002_v10 = vadd.f32 %v1001_v1, %v939_v9 }
 0x212   :  { %v1003_v60 = vadd.f32 %v1002_v10, %v940_v58  ;;  %v1019_v58 = vshrl.u32 %v1018_v41, 7 }
 0x214   :  { %v1004_v51 = vadd.f32 %v1003_v60, %v941_v55  ;;  %v744_v60 = vld [vmem:[%s24594_s3] sm:$0x1]  ;;  %v17698_v55 = vsub.s32 0, %v1019_v58 }
 0x216   :  { %v1005_v37 = vadd.f32 %v1004_v51, %v942_v59  ;;  %24947 = vst [vmem:[#allocation13_spill] sm:$0xff] %v17698_v55 }
 0x218   :  { %v1006_v22 = vadd.f32 %v1005_v37, %v943_v63 }
 0x21a   :  { %v1007_v47 = vrot.slane %v1006_v22, 4 }
 0x21c   :  { %v1008_v52 = vadd.f32 %v1007_v47, %v1006_v22 }
 0x21e   :  { %v1009_v21 = vrot.slane %v1008_v52, 2 }
 0x220   :  { %v1010_v29 = vadd.f32 %v1009_v21, %v1008_v52 }
 0x222   :  { %v1011_v49 = vrot.slane %v1010_v29, 1 }
 0x224   :  { %v1012_v43 = vadd.f32 %v1011_v49, %v1010_v29  ;;  %v17706_v49 = vld [vmem:[%s24595_s4] ss:$0 sm:$0xff] }
 0x226   :  { %v1013_v9 = vmul.f32 0.001953125, %v1012_v43 }
 0x228   :  { %v1014_v1 = vadd.f32 1e-05, %v1013_v9 }
 0x22a   :  { %16802 = vrsqrt.f32 %v1014_v1 }
 0x234   :  { %v16803_v10 = vpop.eup %16802 }
 0x235   :  { %v1016_v51 = vmul.f32 %v16803_v10, %v744_v60 }
 0x237   :  { %v17701_v59 = vrot.slane %v1016_v51, %v17698_v55  ;;  %v24973_v55 = vld [vmem:[#allocation25_spill] sm:$0xff] }
 0x239   :  { %v1084_v43 = vmul.f32 %v17701_v59, %v24945_v62  ;;  %v1045_v22 = vmul.f32 %v17701_v59, %v17371_v12  ;;  %v1046_v63 = vmul.f32 %v17701_v59, %v17375_v7  ;;  %v1047_v37 = vmul.f32 %v17701_v59, %v17379_v11 }
 0x23a   :  { %v1048_v21 = vmul.f32 %v17701_v59, %v17383_v17  ;;  %v1049_v62 = vmul.f32 %v17701_v59, %v17387_v20  ;;  %v1050_v29 = vmul.f32 %v17701_v59, %v17391_v15  ;;  %v1051_v9 = vmul.f32 %v17701_v59, %v17395_v19 }
 0x23b   :  { %v1154_v41 = vadd.f32 %v17706_v49, %v1084_v43  ;;  %v1052_v12 = vmul.f32 %v17701_v59, %v17399_v25  ;;  %v1053_v7 = vmul.f32 %v17701_v59, %v17403_v28  ;;  %v1054_v11 = vmul.f32 %v17701_v59, %v17407_v23 }
 0x23c   :  { %v1055_v17 = vmul.f32 %v17701_v59, %v17411_v27  ;;  %v1056_v20 = vmul.f32 %v17701_v59, %v17415_v33  ;;  %v1057_v15 = vmul.f32 %v17701_v59, %v17419_v36  ;;  %v1058_v19 = vmul.f32 %v17701_v59, %v17423_v31 }
 0x23d   :  { %vm1218_vm0 = vcmp.gt.f32.partialorder %v1154_v41, 0.0  ;;  %v1282_v52 = vmul.f32 0.1, %v1154_v41  ;;  %v1059_v25 = vmul.f32 %v17701_v59, %v17427_v35  ;;  %v1060_v28 = vmul.f32 %v17701_v59, %v17431_v45 }
 0x23e   :  { %v1061_v23 = vmul.f32 %v17701_v59, %v17435_v50  ;;  %v1062_v27 = vmul.f32 %v17701_v59, %v17439_v39  ;;  %v1063_v33 = vmul.f32 %v17701_v59, %v17443_v48  ;;  %v1064_v36 = vmul.f32 %v17701_v59, %v17447_v61 }
 0x23f   :  { %v1346_v47 = vsel %vm1218_vm0, %v1154_v41, %v1282_v52  ;;  %v1065_v31 = vmul.f32 %v17701_v59, %v17451_v2  ;;  %v1066_v35 = vmul.f32 %v17701_v59, %v17455_v56  ;;  %v1067_v45 = vmul.f32 %v17701_v59, %v17459_v0 }
 0x240   :  { %1411 = vst [vmem:[#allocation2 + $0x321] sm:$0xff] %v1346_v47  ;;  %v1068_v50 = vmul.f32 %v17701_v59, %v17463_v13  ;;  %v1069_v39 = vmul.f32 %v17701_v59, %v17467_v18  ;;  %v1070_v48 = vmul.f32 %v17701_v59, %v17471_v8  ;;  %v1071_v61 = vmul.f32 %v17701_v59, %v17475_v16 }
 0x241   :  { %v1072_v2 = vmul.f32 %v17701_v59, %v24936_v26  ;;  %v1073_v56 = vmul.f32 %v17701_v59, %v24937_v30  ;;  %v1074_v0 = vmul.f32 %v17701_v59, %v24938_v46  ;;  %v1075_v13 = vmul.f32 %v17701_v59, %v24939_v24 }
 0x242   :  { %v1076_v18 = vmul.f32 %v17701_v59, %v24940_v3  ;;  %v1077_v8 = vmul.f32 %v17701_v59, %v24941_v38  ;;  %v1078_v16 = vmul.f32 %v17701_v59, %v17503_v5  ;;  %v1079_v26 = vmul.f32 %v17701_v59, %v17507_v54 }
 0x243   :  { %v1080_v30 = vmul.f32 %v17701_v59, %v17511_v6  ;;  %v1081_v46 = vmul.f32 %v17701_v59, %v17515_v14  ;;  %v1082_v24 = vmul.f32 %v17701_v59, %v24943_v4  ;;  %v1083_v3 = vmul.f32 %v17701_v59, %v24944_v34 }
 0x244   :  { %v1085_v38 = vmul.f32 %v17701_v59, %v24946_v57  ;;  %v1086_v5 = vmul.f32 %v17701_v59, %v17535_v32  ;;  %v17794_v54 = vadd.f32 %v17706_v49, %v1045_v22  ;;  %v17797_v6 = vadd.f32 %v17706_v49, %v1046_v63 }
 0x245   :  { %v17800_v14 = vadd.f32 %v17706_v49, %v1047_v37  ;;  %v17803_v4 = vadd.f32 %v17706_v49, %v1048_v21  ;;  %v17806_v34 = vadd.f32 %v17706_v49, %v1049_v62  ;;  %v17809_v57 = vadd.f32 %v17706_v49, %v1050_v29 }
 0x246   :  { %v17812_v32 = vadd.f32 %v17706_v49, %v1051_v9  ;;  %v17815_v1 = vadd.f32 %v17706_v49, %v1052_v12  ;;  %v17818_v58 = vadd.f32 %v17706_v49, %v1053_v7  ;;  %v17821_v60 = vadd.f32 %v17706_v49, %v1054_v11 }
 0x247   :  { %v17824_v10 = vadd.f32 %v17706_v49, %v1055_v17  ;;  %v17827_v51 = vadd.f32 %v17706_v49, %v1056_v20  ;;  %v17830_v43 = vadd.f32 %v17706_v49, %v1057_v15  ;;  %v17833_v41 = vadd.f32 %v17706_v49, %v1058_v19 }
 0x248   :  { %v17836_v52 = vadd.f32 %v17706_v49, %v1059_v25  ;;  %v17839_v47 = vadd.f32 %v17706_v49, %v1060_v28  ;;  %v17842_v22 = vadd.f32 %v17706_v49, %v1061_v23  ;;  %v17845_v63 = vadd.f32 %v17706_v49, %v1062_v27 }
 0x249   :  { %v17848_v37 = vadd.f32 %v17706_v49, %v1063_v33  ;;  %v17851_v21 = vadd.f32 %v17706_v49, %v1064_v36  ;;  %v17854_v62 = vadd.f32 %v17706_v49, %v1065_v31  ;;  %v17857_v29 = vadd.f32 %v17706_v49, %v1066_v35 }
 0x24a   :  { %v17860_v9 = vadd.f32 %v17706_v49, %v1067_v45  ;;  %v17863_v12 = vadd.f32 %v17706_v49, %v1068_v50  ;;  %v17866_v7 = vadd.f32 %v17706_v49, %v1069_v39  ;;  %v17869_v11 = vadd.f32 %v17706_v49, %v1070_v48  ;;  %v24964_v48 = vld [vmem:[#allocation16_spill] sm:$0xff] }
 0x24b   :  { %v17872_v17 = vadd.f32 %v17706_v49, %v1071_v61  ;;  %v17875_v20 = vadd.f32 %v17706_v49, %v1072_v2  ;;  %v17878_v15 = vadd.f32 %v17706_v49, %v1073_v56  ;;  %v17881_v19 = vadd.f32 %v17706_v49, %v1074_v0  ;;  %v24965_v2 = vld [vmem:[#allocation17_spill] sm:$0xff]  ;;  %v24966_v0 = vld [vmem:[#allocation18_spill] sm:$0xff] }
 0x24c   :  { %24948 = vst [vmem:[#allocation15_spill] sm:$0xff] %v17863_v12  ;;  %v17884_v25 = vadd.f32 %v17706_v49, %v1075_v13  ;;  %v17887_v28 = vadd.f32 %v17706_v49, %v1076_v18  ;;  %v17890_v23 = vadd.f32 %v17706_v49, %v1077_v8  ;;  %v17893_v27 = vadd.f32 %v17706_v49, %v1078_v16 }
 0x24d   :  { %24949 = vst [vmem:[#allocation4_spill] sm:$0xff] %v17872_v17  ;;  %24950 = vst [vmem:[#allocation6_spill] sm:$0xff] %v17875_v20  ;;  %v17896_v33 = vadd.f32 %v17706_v49, %v1079_v26  ;;  %v17899_v36 = vadd.f32 %v17706_v49, %v1080_v30  ;;  %v17902_v31 = vadd.f32 %v17706_v49, %v1081_v46  ;;  %v24967_v30 = vld [vmem:[#allocation19_spill] sm:$0xff] }
 0x24e   :  { %24951 = vst [vmem:[#allocation3_spill] sm:$0xff] %v17878_v15  ;;  %24952 = vst [vmem:[#allocation5_spill] sm:$0xff] %v17881_v19  ;;  %v17905_v35 = vadd.f32 %v17706_v49, %v1082_v24  ;;  %v17908_v45 = vadd.f32 %v17706_v49, %v1083_v3  ;;  %v17911_v50 = vadd.f32 %v17706_v49, %v1085_v38  ;;  %v24968_v24 = vld [vmem:[#allocation20_spill] sm:$0xff]  ;;  %v24969_v38 = vld [vmem:[#allocation21_spill] sm:$0xff] }
 0x24f   :  { %24953 = vst [vmem:[#allocation8_spill] sm:$0xff] %v17884_v25  ;;  %24954 = vst [vmem:[#allocation10_spill] sm:$0xff] %v17887_v28  ;;  %v17914_v39 = vadd.f32 %v17706_v49, %v1086_v5  ;;  %v1023_v61 = vmul.f32 %v17701_v59, %v24964_v48  ;;  %v1024_v56 = vmul.f32 %v17701_v59, %v24965_v2  ;;  %v24970_v48 = vld [vmem:[#allocation22_spill] sm:$0xff]  ;;  %v24971_v2 = vld [vmem:[#allocation23_spill] sm:$0xff] }
 0x250   :  { %24955 = vst [vmem:[#allocation7_spill] sm:$0xff] %v17890_v23  ;;  %24956 = vst [vmem:[#allocation9_spill] sm:$0xff] %v17893_v27  ;;  %v1025_v13 = vmul.f32 %v17701_v59, %v24966_v0  ;;  %v1026_v18 = vmul.f32 %v17701_v59, %v17295_v40  ;;  %v1027_v8 = vmul.f32 %v17701_v59, %v17299_v53  ;;  %v24972_v0 = vld [vmem:[#allocation24_spill] sm:$0xff]  ;;  %v24981_v27 = vld [vmem:[#allocation33_spill] sm:$0xff] }
 0x251   :  { %24957 = vst [vmem:[#allocation12_spill] sm:$0xff] %v17896_v33  ;;  %24958 = vst [vmem:[#allocation14_spill] sm:$0xff] %v17899_v36  ;;  %v1028_v16 = vmul.f32 %v17701_v59, %v17303_v42  ;;  %v1029_v26 = vmul.f32 %v17701_v59, %v17307_v44  ;;  %v1030_v46 = vmul.f32 %v17701_v59, %v24967_v30  ;;  %v24979_v36 = vld [vmem:[#allocation31_spill] sm:$0xff]  ;;  %v24980_v33 = vld [vmem:[#allocation32_spill] sm:$0xff] }
 0x252   :  { %24959 = vst [vmem:[#allocation34_spill] sm:$0xff] %v17902_v31  ;;  %24960 = vst [vmem:[#allocation35_spill] sm:$0xff] %v17905_v35  ;;  %v1031_v3 = vmul.f32 %v17701_v59, %v24968_v24  ;;  %v1032_v5 = vmul.f32 %v17701_v59, %v24969_v38  ;;  %v1033_v40 = vmul.f32 %v17701_v59, %v24970_v48  ;;  %v24977_v35 = vld [vmem:[#allocation29_spill] sm:$0xff]  ;;  %v24978_v31 = vld [vmem:[#allocation30_spill] sm:$0xff] }
 0x253   :  { %24961 = vst [vmem:[#allocation36_spill] sm:$0xff] %v17908_v45  ;;  %24962 = vst [vmem:[#allocation37_spill] sm:$0xff] %v17911_v50  ;;  %v1034_v53 = vmul.f32 %v17701_v59, %v24971_v2  ;;  %v1035_v42 = vmul.f32 %v17701_v59, %v24972_v0  ;;  %v1036_v44 = vmul.f32 %v17701_v59, %v24973_v55  ;;  %v24975_v50 = vld [vmem:[#allocation27_spill] sm:$0xff]  ;;  %v24976_v45 = vld [vmem:[#allocation28_spill] sm:$0xff] }
 0x254   :  { %24963 = vst [vmem:[#allocation38_spill] sm:$0xff] %v17914_v39  ;;  %v24974_v39 = vld [vmem:[#allocation26_spill] sm:$0xff]  ;;  %v1038_v24 = vmul.f32 %v17701_v59, %v24975_v50  ;;  %v1039_v38 = vmul.f32 %v17701_v59, %v24976_v45  ;;  %v1040_v48 = vmul.f32 %v17701_v59, %v24977_v35  ;;  %v1041_v2 = vmul.f32 %v17701_v59, %v24978_v31 }
 0x255   :  { %v1037_v30 = vmul.f32 %v17701_v59, %v24974_v39  ;;  %v1042_v0 = vmul.f32 %v17701_v59, %v24979_v36  ;;  %v1043_v55 = vmul.f32 %v17701_v59, %v24980_v33  ;;  %v1044_v39 = vmul.f32 %v17701_v59, %v24981_v27 }
 0x256   :  { %v1093_v50 = vadd.f32 %v17706_v49, %v1023_v61  ;;  %v1094_v23 = vadd.f32 %v17706_v49, %v1024_v56  ;;  %v1095_v45 = vadd.f32 %v17706_v49, %v1025_v13  ;;  %v1096_v35 = vadd.f32 %v17706_v49, %v1026_v18 }
 0x257   :  { %v1097_v28 = vadd.f32 %v17706_v49, %v1027_v8  ;;  %v17966_v31 = vadd.f32 %v17706_v49, %v1028_v16  ;;  %v17969_v36 = vadd.f32 %v17706_v49, %v1029_v26  ;;  %v17972_v33 = vadd.f32 %v17706_v49, %v1030_v46 }
 0x258   :  { %v17975_v59 = vadd.f32 %v17706_v49, %v1031_v3  ;;  %v17978_v27 = vadd.f32 %v17706_v49, %v1032_v5  ;;  %v17981_v61 = vadd.f32 %v17706_v49, %v1033_v40  ;;  %v17984_v56 = vadd.f32 %v17706_v49, %v1034_v53 }
 0x259   :  { %v17987_v13 = vadd.f32 %v17706_v49, %v1035_v42  ;;  %v17990_v18 = vadd.f32 %v17706_v49, %v1036_v44  ;;  %v17993_v8 = vadd.f32 %v17706_v49, %v1037_v30  ;;  %v17996_v16 = vadd.f32 %v17706_v49, %v1038_v24 }
 0x25a   :  { %v17999_v26 = vadd.f32 %v17706_v49, %v1039_v38  ;;  %v18002_v46 = vadd.f32 %v17706_v49, %v1040_v48  ;;  %v18005_v3 = vadd.f32 %v17706_v49, %v1041_v2  ;;  %v18008_v5 = vadd.f32 %v17706_v49, %v1042_v0 }
 0x25b   :  { %v18011_v40 = vadd.f32 %v17706_v49, %v1043_v55  ;;  %vm1157_vm1 = vcmp.gt.f32.partialorder %v1093_v50, 0.0  ;;  %vm1158_vm2 = vcmp.gt.f32.partialorder %v1094_v23, 0.0  ;;  %vm1159_vm3 = vcmp.gt.f32.partialorder %v1095_v45, 0.0 }
 0x25c   :  { %vm1160_vm4 = vcmp.gt.f32.partialorder %v1096_v35, 0.0  ;;  %vm1161_vm5 = vcmp.gt.f32.partialorder %v1097_v28, 0.0  ;;  %vm1162_vm6 = vcmp.gt.f32.partialorder %v17966_v31, 0.0  ;;  %vm1163_vm7 = vcmp.gt.f32.partialorder %v17969_v36, 0.0 }
 0x25d   :  { %vm1164_vm8 = vcmp.gt.f32.partialorder %v17972_v33, 0.0  ;;  %vm1165_vm9 = vcmp.gt.f32.partialorder %v17975_v59, 0.0  ;;  %vm1166_vm10 = vcmp.gt.f32.partialorder %v17978_v27, 0.0  ;;  %v1221_v53 = vmul.f32 0.1, %v1093_v50 }
 0x25e   :  { %v1222_v42 = vmul.f32 0.1, %v1094_v23  ;;  %v18019_v44 = vadd.f32 %v17706_v49, %v1044_v39  ;;  %vm1167_vm11 = vcmp.gt.f32.partialorder %v17981_v61, 0.0  ;;  %v1223_v30 = vmul.f32 0.1, %v1095_v45 }
 0x25f   :  { %v1224_v24 = vmul.f32 0.1, %v1096_v35  ;;  %v1225_v38 = vmul.f32 0.1, %v1097_v28  ;;  %vm1168_vm12 = vcmp.gt.f32.partialorder %v17984_v56, 0.0  ;;  %v18027_v55 = vsel %vm1157_vm1, %v1093_v50, %v1221_v53 }
 0x260   :  { %v1226_v48 = vmul.f32 0.1, %v17966_v31  ;;  %v1227_v2 = vmul.f32 0.1, %v17969_v36  ;;  %v1228_v0 = vmul.f32 0.1, %v17972_v33  ;;  %v18036_v19 = vsel %vm1158_vm2, %v1094_v23, %v1222_v42 }
 0x261   :  { %24982 = vst [vmem:[#allocation16_spill] sm:$0xff] %v18027_v55  ;;  %vm1169_vm13 = vcmp.gt.f32.partialorder %v17987_v13, 0.0  ;;  %v1229_v49 = vmul.f32 0.1, %v17975_v59  ;;  %v1230_v39 = vmul.f32 0.1, %v17978_v27  ;;  %v18050_v20 = vsel %vm1159_vm3, %v1095_v45, %v1223_v30 }
 0x262   :  { %v18033_v25 = vmul.f32 0.1, %v17981_v61  ;;  %24983 = vst [vmem:[#allocation17_spill] sm:$0xff] %v18036_v19  ;;  %1350 = vst [vmem:[#allocation2 + $0x19] sm:$0xff] %v18027_v55  ;;  %vm1170_vm14 = vcmp.gt.f32.partialorder %v17990_v18, 0.0  ;;  %vm1171_vm15 = vcmp.gt.f32.partialorder %v17993_v8, 0.0  ;;  %v18064_v17 = vsel %vm1160_vm4, %v1096_v35, %v1224_v24 }
 0x263   :  { %v18041_v15 = vmul.f32 0.1, %v17984_v56  ;;  %v18044_v50 = vmul.f32 0.1, %v17987_v13  ;;  %v18047_v53 = vmul.f32 0.1, %v17990_v18 }
 0x264   :  { %24984 = vst [vmem:[#allocation18_spill] sm:$0xff] %v18050_v20  ;;  %1351 = vst [vmem:[#allocation2 + $0x21] sm:$0xff] %v18036_v19  ;;  %v18055_v23 = vmul.f32 0.1, %v17993_v8  ;;  %v18058_v42 = vmul.f32 0.1, %v17996_v16 }
 0x265   :  { %v18061_v55 = vmul.f32 0.1, %v17999_v26  ;;  %24986 = vst [vmem:[#allocation20_spill] sm:$0xff] %v18064_v17  ;;  %1352 = vst [vmem:[#allocation2 + $0x31] sm:$0xff] %v18050_v20  ;;  %vm1172_vm0 = vcmp.gt.f32.partialorder %v17996_v16, 0.0  ;;  %vm1173_vm1 = vcmp.gt.f32.partialorder %v17999_v26, 0.0 }
 0x266   :  { %24985 = vst [vmem:[#allocation19_spill] sm:$0xff] %v18058_v42  ;;  %v18069_v45 = vmul.f32 0.1, %v18002_v46  ;;  %v18072_v30 = vmul.f32 0.1, %v18005_v3  ;;  %v18078_v42 = vsel %vm1161_vm5, %v1097_v28, %v1225_v38  ;;  %1353 = vst [vmem:[#allocation2 + $0x39] sm:$0xff] %v18064_v17 }
 0x267   :  { %v18075_v19 = vmul.f32 0.1, %v18008_v5  ;;  %24988 = vst [vmem:[#allocation22_spill] sm:$0xff] %v18078_v42  ;;  %v18083_v35 = vmul.f32 0.1, %v18011_v40  ;;  %1354 = vst [vmem:[#allocation2 + $0x49] sm:$0xff] %v18078_v42 }
 0x268   :  { %v18086_v24 = vmul.f32 0.1, %v18019_v44  ;;  %v18089_v20 = vmul.f32 0.1, %v17794_v54  ;;  %vm1174_vm2 = vcmp.gt.f32.partialorder %v18002_v46, 0.0  ;;  %vm1175_vm3 = vcmp.gt.f32.partialorder %v18005_v3, 0.0 }
 0x269   :  { %24987 = vst [vmem:[#allocation21_spill] sm:$0xff] %v18075_v19  ;;  %v18094_v19 = vsel %vm1162_vm6, %v17966_v31, %v1226_v48  ;;  %v18099_v28 = vmul.f32 0.1, %v17797_v6  ;;  %v18102_v38 = vmul.f32 0.1, %v17800_v14  ;;  %vm1176_vm4 = vcmp.gt.f32.partialorder %v18008_v5, 0.0 }
 0x26a   :  { %24989 = vst [vmem:[#allocation23_spill] sm:$0xff] %v18089_v20  ;;  %24990 = vst [vmem:[#allocation24_spill] sm:$0xff] %v18094_v19  ;;  %v18105_v17 = vmul.f32 0.1, %v17803_v4  ;;  %v18110_v20 = vsel %vm1163_vm7, %v17969_v36, %v1227_v2  ;;  %v18115_v31 = vmul.f32 0.1, %v17806_v34 }
 0x26b   :  { %24992 = vst [vmem:[#allocation26_spill] sm:$0xff] %v18110_v20  ;;  %1355 = vst [vmem:[#allocation2 + $0x51] sm:$0xff] %v18094_v19  ;;  %v18118_v48 = vmul.f32 0.1, %v17809_v57  ;;  %v18121_v42 = vmul.f32 0.1, %v17812_v32 }
 0x26c   :  { %24991 = vst [vmem:[#allocation25_spill] sm:$0xff] %v18105_v17  ;;  %v18126_v17 = vsel %vm1164_vm8, %v17972_v33, %v1228_v0  ;;  %1356 = vst [vmem:[#allocation2 + $0x61] sm:$0xff] %v18110_v20  ;;  %v18133_v36 = vmul.f32 0.1, %v17815_v1  ;;  %v18136_v2 = vmul.f32 0.1, %v17818_v58  ;;  %v18144_v33 = vsel %vm1165_vm9, %v17975_v59, %v1229_v49 }
 0x26d   :  { %24993 = vst [vmem:[#allocation27_spill] sm:$0xff] %v18126_v17  ;;  %v18139_v19 = vmul.f32 0.1, %v17821_v60  ;;  %24995 = vst [vmem:[#allocation29_spill] sm:$0xff] %v18144_v33  ;;  %vm1179_vm7 = vcmp.gt.f32.partialorder %v17794_v54, 0.0  ;;  %v18163_v59 = vsel %vm1166_vm10, %v17978_v27, %v1230_v39  ;;  %vm1183_vm9 = vcmp.gt.f32.partialorder %v17806_v34, 0.0 }
 0x26e   :  { %1357 = vst [vmem:[#allocation2 + $0x69] sm:$0xff] %v18126_v17  ;;  %v18152_v0 = vmul.f32 0.1, %v17824_v10  ;;  %v18155_v20 = vmul.f32 0.1, %v17827_v51  ;;  %24997 = vst [vmem:[#allocation31_spill] sm:$0xff] %v18163_v59  ;;  %v18183_v27 = vsel %vm1167_vm11, %v17981_v61, %v18033_v25  ;;  %v18203_v25 = vsel %vm1168_vm12, %v17984_v56, %v18041_v15 }
 0x26f   :  { %24994 = vst [vmem:[#allocation28_spill] sm:$0xff] %v18139_v19  ;;  %v18158_v19 = vmul.f32 0.1, %v17830_v43  ;;  %1358 = vst [vmem:[#allocation2 + $0x79] sm:$0xff] %v18144_v33  ;;  %v18171_v49 = vmul.f32 0.1, %v17833_v41  ;;  %v18223_v15 = vsel %vm1169_vm13, %v17987_v13, %v18044_v50  ;;  %v18243_v13 = vsel %vm1170_vm14, %v17990_v18, %v18047_v53 }
 0x270   :  { %v18174_v17 = vmul.f32 0.1, %v17836_v52  ;;  %24999 = vst [vmem:[#allocation33_spill] sm:$0xff] %v18183_v27  ;;  %1359 = vst [vmem:[#allocation2 + $0x81] sm:$0xff] %v18163_v59  ;;  %vm1187_vm10 = vcmp.gt.f32.partialorder %v17818_v58, 0.0  ;;  %vm1191_vm11 = vcmp.gt.f32.partialorder %v17830_v43, 0.0  ;;  %v18263_v18 = vsel %vm1171_vm15, %v17993_v8, %v18055_v23 }
 0x271   :  { %24996 = vst [vmem:[#allocation30_spill] sm:$0xff] %v18158_v19  ;;  %v18177_v19 = vmul.f32 0.1, %v17839_v47  ;;  %v18191_v39 = vmul.f32 0.1, %v17842_v22  ;;  %25001 = vst [vmem:[#allocation40_spill] sm:$0xff] %v18203_v25 }
 0x272   :  { %v18194_v33 = vmul.f32 0.1, %v17845_v63  ;;  %1360 = vst [vmem:[#allocation2 + $0x91] sm:$0xff] %v18183_v27  ;;  %v18211_v61 = vmul.f32 0.1, %v17851_v21  ;;  %25003 = vst [vmem:[#allocation42_spill] sm:$0xff] %v18223_v15 }
 0x273   :  { %24998 = vst [vmem:[#allocation32_spill] sm:$0xff] %v18177_v19  ;;  %v18197_v19 = vmul.f32 0.1, %v17848_v37  ;;  %v18214_v59 = vmul.f32 0.1, %v17854_v62  ;;  %1361 = vst [vmem:[#allocation2 + $0x99] sm:$0xff] %v18203_v25 }
 0x274   :  { %vm1195_vm12 = vcmp.gt.f32.partialorder %v17842_v22, 0.0  ;;  %v18231_v56 = vmul.f32 0.1, %v17860_v9  ;;  %v18234_v27 = vmul.f32 0.1, %v17863_v12  ;;  %25007 = vst [vmem:[#allocation46_spill] sm:$0xff] %v18243_v13 }
 0x275   :  { %25000 = vst [vmem:[#allocation39_spill] sm:$0xff] %v18197_v19  ;;  %v18217_v19 = vmul.f32 0.1, %v17857_v29  ;;  %1362 = vst [vmem:[#allocation2 + $0xa9] sm:$0xff] %v18223_v15  ;;  %vm1199_vm13 = vcmp.gt.f32.partialorder %v17854_v62, 0.0  ;;  %v25009_v25 = vld [vmem:[#allocation4_spill] sm:$0xff] }
 0x276   :  { %25004 = vst [vmem:[#allocation43_spill] sm:$0xff] %v18231_v56  ;;  %25005 = vst [vmem:[#allocation44_spill] sm:$0xff] %v18234_v27  ;;  %v18251_v50 = vmul.f32 0.1, %v17869_v11  ;;  %v25011_v27 = vld [vmem:[#allocation6_spill] sm:$0xff]  ;;  %vm1203_vm14 = vcmp.gt.f32.partialorder %v17866_v7, 0.0 }
 0x277   :  { %25002 = vst [vmem:[#allocation41_spill] sm:$0xff] %v18217_v19  ;;  %v18237_v19 = vmul.f32 0.1, %v17866_v7  ;;  %v18257_v56 = vmul.f32 0.1, %v25011_v27  ;;  %25013 = vst [vmem:[#allocation50_spill] sm:$0xff] %v18263_v18 }
 0x278   :  { %25008 = vst [vmem:[#allocation47_spill] sm:$0xff] %v18251_v50  ;;  %1363 = vst [vmem:[#allocation2 + $0xb1] sm:$0xff] %v18243_v13  ;;  %v25014_v53 = vld [vmem:[#allocation3_spill] sm:$0xff]  ;;  %v25018_v50 = vld [vmem:[#allocation8_spill] sm:$0xff]  ;;  %vm25039_vm8 = vcmp.gt.f32.partialorder %v18011_v40, 0.0 }
 0x279   :  { %25006 = vst [vmem:[#allocation45_spill] sm:$0xff] %v18237_v19  ;;  %v18254_v19 = vmul.f32 0.1, %v25009_v25  ;;  %25012 = vst [vmem:[#allocation49_spill] sm:$0xff] %v18257_v56  ;;  %v18271_v15 = vmul.f32 0.1, %v25014_v53 }
 0x27a   :  { %v25016_v56 = vld [vmem:[#allocation5_spill] sm:$0xff]  ;;  %v18277_v12 = vmul.f32 0.1, %v25018_v50  ;;  %v25020_v8 = vld [vmem:[#allocation19_spill] sm:$0xff]  ;;  %1364 = vst [vmem:[#allocation2 + $0xc1] sm:$0xff] %v18263_v18  ;;  %vm1207_vm15 = vcmp.gt.f32.partialorder %v25014_v53, 0.0 }
 0x27b   :  { %25010 = vst [vmem:[#allocation48_spill] sm:$0xff] %v18254_v19  ;;  %25015 = vst [vmem:[#allocation3_spill] sm:$0xff] %v18271_v15  ;;  %v18274_v19 = vmul.f32 0.1, %v25016_v56  ;;  %v18283_v23 = vsel %vm1172_vm0, %v17996_v16, %v25020_v8  ;;  %v25022_v13 = vld [vmem:[#allocation10_spill] sm:$0xff]  ;;  %v25026_v27 = vld [vmem:[#allocation9_spill] sm:$0xff]  ;;  %v18303_v16 = vsel %vm1173_vm1, %v17999_v26, %v18061_v55  ;;  %v18323_v26 = vsel %vm1174_vm2, %v18002_v46, %v18069_v45 }
 0x27c   :  { %25019 = vst [vmem:[#allocation8_spill] sm:$0xff] %v18277_v12  ;;  %25021 = vst [vmem:[#allocation19_spill] sm:$0xff] %v18283_v23  ;;  %v25024_v12 = vld [vmem:[#allocation7_spill] sm:$0xff]  ;;  %v18297_v25 = vmul.f32 0.1, %v25026_v27  ;;  %v25029_v8 = vld [vmem:[#allocation12_spill] sm:$0xff]  ;;  %v18343_v46 = vsel %vm1175_vm3, %v18005_v3, %v18072_v30 }
 0x27d   :  { %25017 = vst [vmem:[#allocation5_spill] sm:$0xff] %v18274_v19  ;;  %v18291_v19 = vmul.f32 0.1, %v25022_v13  ;;  %v18294_v15 = vmul.f32 0.1, %v25024_v12  ;;  %25028 = vst [vmem:[#allocation52_spill] sm:$0xff] %v18303_v16 }
 0x27e   :  { %25027 = vst [vmem:[#allocation9_spill] sm:$0xff] %v18297_v25  ;;  %1365 = vst [vmem:[#allocation2 + $0xc9] sm:$0xff] %v18283_v23  ;;  %vm1211_vm0 = vcmp.gt.f32.partialorder %v25024_v12, 0.0  ;;  %v25030_v18 = vld [vmem:[#allocation14_spill] sm:$0xff]  ;;  %v25034_v55 = vld [vmem:[#allocation35_spill] sm:$0xff]  ;;  %vm25040_vm3 = vcmp.gt.f32.partialorder %v18019_v44, 0.0 }
 0x27f   :  { %25023 = vst [vmem:[#allocation51_spill] sm:$0xff] %v18291_v19  ;;  %25025 = vst [vmem:[#allocation7_spill] sm:$0xff] %v18294_v15  ;;  %v18311_v15 = vmul.f32 0.1, %v25029_v8  ;;  %v18314_v25 = vmul.f32 0.1, %v25030_v18  ;;  %v18366_v3 = vsel %vm25040_vm3, %v18019_v44, %v18086_v24 }
 0x280   :  { %v25032_v13 = vld [vmem:[#allocation34_spill] sm:$0xff]  ;;  %1366 = vst [vmem:[#allocation2 + $0xd9] sm:$0xff] %v18303_v16  ;;  %vm1216_vm5 = vcmp.gt.f32.partialorder %v25034_v55, 0.0  ;;  %v25035_v23 = vld [vmem:[#allocation36_spill] sm:$0xff]  ;;  %v25036_v8 = vld [vmem:[#allocation37_spill] sm:$0xff]  ;;  %vm25045_vm3 = vcmp.gt.f32.partialorder %v17803_v4, 0.0 }
 0x281   :  { %25031 = vst [vmem:[#allocation53_spill] sm:$0xff] %v18314_v25  ;;  %v18317_v19 = vmul.f32 0.1, %v25032_v13  ;;  %vm1215_vm1 = vcmp.gt.f32.partialorder %v25032_v13, 0.0  ;;  %vm1217_vm6 = vcmp.gt.f32.partialorder %v25035_v23, 0.0  ;;  %1367 = vst [vmem:[#allocation2 + $0xe1] sm:$0xff] %v18323_v26 }
 0x282   :  { %v18331_v18 = vmul.f32 0.1, %v25034_v55  ;;  %v18337_v25 = vmul.f32 0.1, %v25036_v8  ;;  %v25037_v45 = vld [vmem:[#allocation38_spill] sm:$0xff]  ;;  %v25038_v55 = vld [vmem:[#allocation21_spill] sm:$0xff]  ;;  %v18360_v8 = vsel %vm25039_vm8, %v18011_v40, %v18083_v35 }
 0x283   :  { %25033 = vst [vmem:[#allocation34_spill] sm:$0xff] %v18317_v19  ;;  %v18334_v19 = vmul.f32 0.1, %v25035_v23  ;;  %vm1220_vm2 = vcmp.gt.f32.partialorder %v25037_v45, 0.0  ;;  %v18348_v16 = vmul.f32 0.1, %v25037_v45  ;;  %v18354_v23 = vsel %vm1176_vm4, %v18008_v5, %v25038_v55 }
 0x284   :  { %1368 = vst [vmem:[#allocation2 + $0xf1] sm:$0xff] %v18343_v46  ;;  %v25041_v30 = vld [vmem:[#allocation23_spill] sm:$0xff]  ;;  %vm25042_vm4 = vcmp.gt.f32.partialorder %v17797_v6, 0.0  ;;  %vm25043_vm8 = vcmp.gt.f32.partialorder %v17800_v14, 0.0  ;;  %v25044_v35 = vld [vmem:[#allocation25_spill] sm:$0xff]  ;;  %1369 = vst [vmem:[#allocation2 + $0xf9] sm:$0xff] %v18354_v23 }
 0x285   :  { %v18373_v5 = vsel %vm1179_vm7, %v17794_v54, %v25041_v30  ;;  %v18379_v40 = vsel %vm25042_vm4, %v17797_v6, %v18099_v28  ;;  %v18385_v44 = vsel %vm25043_vm8, %v17800_v14, %v18102_v38  ;;  %v18391_v24 = vsel %vm25045_vm3, %v17803_v4, %v25044_v35  ;;  %1370 = vst [vmem:[#allocation2 + $0x109] sm:$0xff] %v18360_v8  ;;  %v25079_v55 = vld [vmem:[#allocation5_spill] sm:$0xff]  ;;  %v25081_v35 = vld [vmem:[#allocation8_spill] sm:$0xff] }
 0x286   :  { %1371 = vst [vmem:[#allocation2 + $0x111] sm:$0xff] %v18366_v3  ;;  %v18400_v54 = vsel %vm1183_vm9, %v17806_v34, %v18115_v31  ;;  %vm25046_vm7 = vcmp.gt.f32.partialorder %v17809_v57, 0.0  ;;  %vm25047_vm4 = vcmp.gt.f32.partialorder %v17812_v32, 0.0  ;;  %vm25048_vm8 = vcmp.gt.f32.partialorder %v17815_v1, 0.0  ;;  %1372 = vst [vmem:[#allocation2 + $0x121] sm:$0xff] %v18373_v5  ;;  %v25066_v31 = vld [vmem:[#allocation44_spill] sm:$0xff] }
 0x287   :  { %v18406_v6 = vsel %vm25046_vm7, %v17809_v57, %v18118_v48  ;;  %v18412_v14 = vsel %vm25047_vm4, %v17812_v32, %v18121_v42  ;;  %v18418_v4 = vsel %vm25048_vm8, %v17815_v1, %v18133_v36  ;;  %1373 = vst [vmem:[#allocation2 + $0x129] sm:$0xff] %v18379_v40  ;;  %1374 = vst [vmem:[#allocation2 + $0x139] sm:$0xff] %v18385_v44  ;;  %v25049_v57 = vld [vmem:[#allocation28_spill] sm:$0xff]  ;;  %vm25050_vm9 = vcmp.gt.f32.partialorder %v17821_v60, 0.0  ;;  %v25067_v48 = vld [vmem:[#allocation15_spill] sm:$0xff] }
 0x288   :  { %1375 = vst [vmem:[#allocation2 + $0x141] sm:$0xff] %v18391_v24  ;;  %v1315_v34 = vsel %vm1187_vm10, %v17818_v58, %v18136_v2  ;;  %v1316_v32 = vsel %vm25050_vm9, %v17821_v60, %v25049_v57  ;;  %vm25051_vm3 = vcmp.gt.f32.partialorder %v17824_v10, 0.0  ;;  %vm25052_vm7 = vcmp.gt.f32.partialorder %v17827_v51, 0.0  ;;  %1376 = vst [vmem:[#allocation2 + $0x151] sm:$0xff] %v18400_v54  ;;  %v25053_v58 = vld [vmem:[#allocation30_spill] sm:$0xff]  ;;  %v25083_v57 = vld [vmem:[#allocation51_spill] sm:$0xff] }
 0x289   :  { %v18436_v1 = vsel %vm25051_vm3, %v17824_v10, %v18152_v0  ;;  %v18442_v42 = vsel %vm25052_vm7, %v17827_v51, %v18155_v20  ;;  %1377 = vst [vmem:[#allocation2 + $0x159] sm:$0xff] %v18406_v6  ;;  %1378 = vst [vmem:[#allocation2 + $0x169] sm:$0xff] %v18412_v14  ;;  %v18452_v60 = vsel %vm1191_vm11, %v17830_v43, %v25053_v58  ;;  %vm25054_vm10 = vcmp.gt.f32.partialorder %v17833_v41, 0.0  ;;  %v25056_v20 = vld [vmem:[#allocation32_spill] sm:$0xff] }
 0x28a   :  { %1379 = vst [vmem:[#allocation2 + $0x171] sm:$0xff] %v18418_v4  ;;  %v18458_v10 = vsel %vm25054_vm10, %v17833_v41, %v18171_v49  ;;  %vm25055_vm4 = vcmp.gt.f32.partialorder %v17836_v52, 0.0  ;;  %vm25057_vm8 = vcmp.gt.f32.partialorder %v17839_v47, 0.0  ;;  %1380 = vst [vmem:[#allocation2 + $0x181] sm:$0xff] %v1315_v34  ;;  %v18478_v43 = vsel %vm1195_vm12, %v17842_v22, %v18191_v39  ;;  %v25073_v0 = vld [vmem:[#allocation4_spill] sm:$0xff]  ;;  %v25075_v49 = vld [vmem:[#allocation49_spill] sm:$0xff] }
 0x28b   :  { %v18464_v51 = vsel %vm25055_vm4, %v17836_v52, %v18174_v17  ;;  %v18470_v28 = vsel %vm25057_vm8, %v17839_v47, %v25056_v20  ;;  %1381 = vst [vmem:[#allocation2 + $0x189] sm:$0xff] %v1316_v32  ;;  %1382 = vst [vmem:[#allocation2 + $0x1c9] sm:$0xff] %v18436_v1  ;;  %vm25058_vm11 = vcmp.gt.f32.partialorder %v17845_v63, 0.0  ;;  %v25059_v52 = vld [vmem:[#allocation39_spill] sm:$0xff]  ;;  %vm25060_vm9 = vcmp.gt.f32.partialorder %v17848_v37, 0.0  ;;  %v25076_v39 = vld [vmem:[#allocation6_spill] sm:$0xff] }
 0x28c   :  { %1383 = vst [vmem:[#allocation2 + $0x1d1] sm:$0xff] %v18442_v42  ;;  %v18484_v41 = vsel %vm25058_vm11, %v17845_v63, %v18194_v33  ;;  %v18490_v47 = vsel %vm25060_vm9, %v17848_v37, %v25059_v52  ;;  %vm25061_vm3 = vcmp.gt.f32.partialorder %v17851_v21, 0.0  ;;  %1384 = vst [vmem:[#allocation2 + $0x1e1] sm:$0xff] %v18452_v60  ;;  %v18506_v22 = vsel %vm1199_vm13, %v17854_v62, %v18214_v59  ;;  %v25062_v63 = vld [vmem:[#allocation41_spill] sm:$0xff]  ;;  %v25072_v33 = vld [vmem:[#allocation48_spill] sm:$0xff] }
 0x28d   :  { %v18496_v17 = vsel %vm25061_vm3, %v17851_v21, %v18211_v61  ;;  %1385 = vst [vmem:[#allocation2 + $0x1e9] sm:$0xff] %v18458_v10  ;;  %1386 = vst [vmem:[#allocation2 + $0x1f9] sm:$0xff] %v18464_v51  ;;  %vm25063_vm12 = vcmp.gt.f32.partialorder %v17857_v29, 0.0  ;;  %v25064_v21 = vld [vmem:[#allocation43_spill] sm:$0xff]  ;;  %vm25065_vm7 = vcmp.gt.f32.partialorder %v17860_v9, 0.0  ;;  %vm25068_vm10 = vcmp.gt.f32.partialorder %v25067_v48, 0.0 }
 0x28e   :  { %1387 = vst [vmem:[#allocation2 + $0x201] sm:$0xff] %v18470_v28  ;;  %v18512_v37 = vsel %vm25063_vm12, %v17857_v29, %v25062_v63  ;;  %v18518_v38 = vsel %vm25065_vm7, %v17860_v9, %v25064_v21  ;;  %v18524_v36 = vsel %vm25068_vm10, %v25067_v48, %v25066_v31  ;;  %1388 = vst [vmem:[#allocation2 + $0x211] sm:$0xff] %v18478_v43  ;;  %v25069_v62 = vld [vmem:[#allocation45_spill] sm:$0xff]  ;;  %v25070_v9 = vld [vmem:[#allocation47_spill] sm:$0xff]  ;;  %vm25071_vm13 = vcmp.gt.f32.partialorder %v17869_v11, 0.0 }
 0x28f   :  { %1389 = vst [vmem:[#allocation2 + $0x219] sm:$0xff] %v18484_v41  ;;  %1390 = vst [vmem:[#allocation2 + $0x229] sm:$0xff] %v18490_v47  ;;  %v18534_v29 = vsel %vm1203_vm14, %v17866_v7, %v25069_v62  ;;  %v18540_v2 = vsel %vm25071_vm13, %v17869_v11, %v25070_v9  ;;  %vm25074_vm4 = vcmp.gt.f32.partialorder %v25073_v0, 0.0  ;;  %vm25077_vm8 = vcmp.gt.f32.partialorder %v25076_v39, 0.0  ;;  %v25078_v7 = vld [vmem:[#allocation3_spill] sm:$0xff]  ;;  %v25084_v32 = vld [vmem:[#allocation10_spill] sm:$0xff] }
 0x290   :  { %1391 = vst [vmem:[#allocation2 + $0x231] sm:$0xff] %v18496_v17  ;;  %v18546_v59 = vsel %vm25074_vm4, %v25073_v0, %v25072_v33  ;;  %v18552_v61 = vsel %vm25077_vm8, %v25076_v39, %v25075_v49  ;;  %1392 = vst [vmem:[#allocation2 + $0x241] sm:$0xff] %v18506_v22  ;;  %v18562_v11 = vsel %vm1207_vm15, %v25014_v53, %v25078_v7  ;;  %vm25080_vm14 = vcmp.gt.f32.partialorder %v25016_v56, 0.0  ;;  %v25087_v53 = vld [vmem:[#allocation9_spill] sm:$0xff]  ;;  %v25089_v52 = vld [vmem:[#allocation12_spill] sm:$0xff] }
 0x291   :  { %1393 = vst [vmem:[#allocation2 + $0x249] sm:$0xff] %v18512_v37  ;;  %1394 = vst [vmem:[#allocation2 + $0x259] sm:$0xff] %v18518_v38  ;;  %v18568_v30 = vsel %vm25080_vm14, %v25016_v56, %v25079_v55  ;;  %vm25082_vm11 = vcmp.gt.f32.partialorder %v25018_v50, 0.0  ;;  %vm25085_vm9 = vcmp.gt.f32.partialorder %v25084_v32, 0.0  ;;  %v25086_v56 = vld [vmem:[#allocation7_spill] sm:$0xff]  ;;  %vm25088_vm15 = vcmp.gt.f32.partialorder %v25026_v27, 0.0 }
 0x292   :  { %1395 = vst [vmem:[#allocation2 + $0x261] sm:$0xff] %v18524_v36  ;;  %v18574_v34 = vsel %vm25082_vm11, %v25018_v50, %v25081_v35  ;;  %v18580_v58 = vsel %vm25085_vm9, %v25084_v32, %v25083_v57  ;;  %1396 = vst [vmem:[#allocation2 + $0x271] sm:$0xff] %v18534_v29  ;;  %v18590_v50 = vsel %vm1211_vm0, %v25024_v12, %v25086_v56  ;;  %vm25090_vm3 = vcmp.gt.f32.partialorder %v25089_v52, 0.0  ;;  %v25091_v21 = vld [vmem:[#allocation53_spill] sm:$0xff]  ;;  %v25092_v31 = vld [vmem:[#allocation14_spill] sm:$0xff] }
 0x293   :  { %1397 = vst [vmem:[#allocation2 + $0x279] sm:$0xff] %v18540_v2  ;;  %1398 = vst [vmem:[#allocation2 + $0x289] sm:$0xff] %v18546_v59  ;;  %v18596_v20 = vsel %vm25088_vm15, %v25026_v27, %v25087_v53  ;;  %v18602_v63 = vsel %vm25090_vm3, %v25089_v52, %v18311_v15  ;;  %vm25093_vm12 = vcmp.gt.f32.partialorder %v25092_v31, 0.0  ;;  %v25094_v12 = vld [vmem:[#allocation34_spill] sm:$0xff]  ;;  %v25095_v15 = vld [vmem:[#allocation35_spill] sm:$0xff]  ;;  %v1602_v57 = vpack.c.bf16 %v18379_v40, %v18373_v5 }
 0x294   :  { %1399 = vst [vmem:[#allocation2 + $0x291] sm:$0xff] %v18552_v61  ;;  %v18608_v48 = vsel %vm25093_vm12, %v25092_v31, %v25091_v21  ;;  %1400 = vst [vmem:[#allocation2 + $0x2a1] sm:$0xff] %v18562_v11  ;;  %v18618_v27 = vsel %vm1215_vm1, %v25032_v13, %v25094_v12  ;;  %v18624_v62 = vsel %vm1216_vm5, %v25095_v15, %v18331_v18  ;;  %v25096_v9 = vld [vmem:[#allocation36_spill] sm:$0xff]  ;;  %v25097_v0 = vld [vmem:[#allocation37_spill] sm:$0xff] }
 0x295   :  { %1401 = vst [vmem:[#allocation2 + $0x2a9] sm:$0xff] %v18568_v30  ;;  %1402 = vst [vmem:[#allocation2 + $0x2b9] sm:$0xff] %v18574_v34  ;;  %v18630_v33 = vsel %vm1217_vm6, %v25096_v9, %v18334_v19  ;;  %vm25098_vm0 = vcmp.gt.f32.partialorder %v25097_v0, 0.0  ;;  %v1348_v13 = vsel %vm1220_vm2, %v25037_v45, %v18348_v16  ;;  %v25099_v19 = vld [vmem:[#allocation16_spill] sm:$0xff]  ;;  %v25101_v39 = vld [vmem:[#allocation18_spill] sm:$0xff]  ;;  %v1600_v16 = vpack.c.bf16 %v18354_v23, %v18343_v46 }
 0x296   :  { %1403 = vst [vmem:[#allocation2 + $0x2c1] sm:$0xff] %v18580_v58  ;;  %v1347_v49 = vsel %vm25098_vm0, %v25097_v0, %v18337_v25  ;;  %1404 = vst [vmem:[#allocation2 + $0x2d1] sm:$0xff] %v18590_v50  ;;  %v25100_v25 = vld [vmem:[#allocation17_spill] sm:$0xff]  ;;  %v25102_v7 = vld [vmem:[#allocation20_spill] sm:$0xff]  ;;  %v1603_v32 = vpack.c.bf16 %v18391_v24, %v18385_v44  ;;  %v1604_v56 = vpack.c.bf16 %v18406_v6, %v18400_v54 }
 0x297   :  { %1405 = vst [vmem:[#allocation2 + $0x2d9] sm:$0xff] %v18596_v20  ;;  %1406 = vst [vmem:[#allocation2 + $0x2e9] sm:$0xff] %v18602_v63  ;;  %v1591_v18 = vpack.c.bf16 %v25100_v25, %v25099_v19  ;;  %v1592_v55 = vpack.c.bf16 %v25102_v7, %v25101_v39  ;;  %v16659_v35 = vld [vmem:[%s24593_s2 + $0x8] sm:$0xff]   ;;  %v25103_v45 = vld [vmem:[#allocation11_spill] sm:$0xff]  ;;  %v1605_v23 = vpack.c.bf16 %v18418_v4, %v18412_v14 }
 0x298   :  { %1407 = vst [vmem:[#allocation2 + $0x2f1] sm:$0xff] %v18608_v48  ;;  %1408 = vst [vmem:[#allocation2 + $0x301] sm:$0xff] %v18618_v27  ;;  %v16660_v53 = vld [vmem:[%s24593_s2 + $0x10] sm:$0xff]   ;;  %v1607_v46 = vpack.c.bf16 %v18442_v42, %v18436_v1  ;;  %v1608_v5 = vpack.c.bf16 %v18458_v10, %v18452_v60  ;;  %v1609_v40 = vpack.c.bf16 %v18470_v28, %v18464_v51  ;;  %v25104_v28 = vld [vmem:[#allocation22_spill] sm:$0xff] }
 0x299   :  { %1409 = vst [vmem:[#allocation2 + $0x309] sm:$0xff] %v18624_v62  ;;  %1410 = vst [vmem:[#allocation2 + $0x319] sm:$0xff] %v18630_v33  ;;  %14082 = vmatmul.mubr.bf16.vlgmr.msra.gmra.mrb[64].mxu1 %v1591_v18  ;;  %v1610_v44 = vpack.c.bf16 %v18484_v41, %v18478_v43  ;;  %v1611_v24 = vpack.c.bf16 %v18496_v17, %v18490_v47  ;;  %v1612_v54 = vpack.c.bf16 %v18512_v37, %v18506_v22  ;;  %v25105_v43 = vld [vmem:[#allocation24_spill] sm:$0xff]  ;;  %v16661_v47 = vld [vmem:[%s24593_s2 + $0x18] sm:$0xff]  }
 0x29a   :  { %1412 = vst [vmem:[#allocation2 + $0x331] sm:$0xff] %v1347_v49  ;;  %1413 = vst [vmem:[#allocation2 + $0x339] sm:$0xff] %v1348_v13  ;;  %14146 = vmatpush3.bf16.msra.mxu1 %v25103_v45  ;;  %14085 = vmatprep.mubr.bf16.mxu1 %v1592_v55  ;;  %v1613_v6 = vpack.c.bf16 %v18524_v36, %v18518_v38  ;;  %v1614_v14 = vpack.c.bf16 %v18540_v2, %v18534_v29  ;;  %v25106_v17 = vld [vmem:[#allocation26_spill] sm:$0xff]  ;;  %v25107_v22 = vld [vmem:[#allocation27_spill] sm:$0xff] }
 0x29b   :  { %14147 = vmatprep.subr.bf16.mxu1 %v16659_v35  ;;  %v1615_v4 = vpack.c.bf16 %v18552_v61, %v18546_v59  ;;  %v1616_v1 = vpack.c.bf16 %v18568_v30, %v18562_v11  ;;  %v1617_v42 = vpack.c.bf16 %v18580_v58, %v18574_v34  ;;  %v1618_v60 = vpack.c.bf16 %v18596_v20, %v18590_v50  ;;  %v16662_v38 = vld [vmem:[%s24593_s2 + $0x20] sm:$0xff]   ;;  %v25108_v36 = vld [vmem:[#allocation29_spill] sm:$0xff]  ;;  %v16663_v59 = vld [vmem:[%s24593_s2 + $0x28] sm:$0xff]  }
 0x29c   :  { %v1619_v10 = vpack.c.bf16 %v18608_v48, %v18602_v63  ;;  %v1620_v51 = vpack.c.bf16 %v18624_v62, %v18618_v27  ;;  %v1593_v41 = vpack.c.bf16 %v25105_v43, %v25104_v28  ;;  %v1594_v37 = vpack.c.bf16 %v25107_v22, %v25106_v17  ;;  %v25109_v29 = vld [vmem:[#allocation31_spill] sm:$0xff]  ;;  %v25110_v61 = vld [vmem:[#allocation33_spill] sm:$0xff]  ;;  %v25111_v11 = vld [vmem:[#allocation40_spill] sm:$0xff] }
 0x29d   :  { %v1595_v2 = vpack.c.bf16 %v25109_v29, %v25108_v36  ;;  %v1596_v30 = vpack.c.bf16 %v25111_v11, %v25110_v61  ;;  %v16664_v34 = vld [vmem:[%s24593_s2 + $0x30] sm:$0xff]   ;;  %v25112_v58 = vld [vmem:[#allocation42_spill] sm:$0xff]  ;;  %v25115_v21 = vld [vmem:[#allocation19_spill] sm:$0xff]  ;;  %v1601_v15 = vpack.c.bf16 %v18366_v3, %v18360_v8 }
 0x29e   :  { %14148 = vmatpush3.bf16.msra.mxu1 %v16659_v35  ;;  %v25113_v50 = vld [vmem:[#allocation46_spill] sm:$0xff]  ;;  %v16666_v48 = vld [vmem:[%s24593_s2 + $0x80] sm:$0xff]   ;;  %v25116_v12 = vld [vmem:[#allocation52_spill] sm:$0xff] }
 0x29f   :  { %14149 = vmatprep.subr.bf16.mxu1 %v16660_v53  ;;  %v1597_v20 = vpack.c.bf16 %v25113_v50, %v25112_v58  ;;  %v16665_v52 = vld [vmem:[%s24593_s2 + $0x38] sm:$0xff]   ;;  %v1599_v27 = vpack.c.bf16 %v18323_v26, %v25116_v12  ;;  %v1589_v8 = vld [vmem:[#allocation2 + $0x321] sm:$0xff]  ;;  %v1418_v25 = vld [vmem:[#allocation2 + $0x30] sm:$0xff] }
 0x2a0   :  { %v25114_v63 = vld [vmem:[#allocation50_spill] sm:$0xff]  ;;  %v16810_v26 = vld [vmem:[#allocation2] sm:$0xff]  ;;  %v1621_v49 = vpack.c.bf16 %v1589_v8, %v18630_v33  ;;  %v16667_v7 = vld [vmem:[%s24593_s2 + $0x88] sm:$0xff]  }
 0x2a1   :  { %14086 = vmatmul.mubr.bf16.gmra.mrb[68].mxu1 %v1593_v41  ;;  %v1598_v31 = vpack.c.bf16 %v25115_v21, %v25114_v63  ;;  %v1558_v62 = vld [vmem:[#allocation2 + $0x1b1] sm:$0xff]  ;;  %v1559_v9 = vld [vmem:[#allocation2 + $0x1b9] sm:$0xff]  ;;  %v18730_v3 = vpack.c.bf16 %v16810_v26, %v16810_v26  ;;  %v1420_v35 = vld [vmem:[#allocation2 + $0x48] sm:$0xff] }
 0x2a2   :  { %14089 = vmatprep.mubr.bf16.mxu1 %v1594_v37  ;;  %14150 = vmatpush3.bf16.msra.mxu1 %v16660_v53  ;;  %v1606_v0 = vpack.c.bf16 %v1559_v9, %v1558_v62  ;;  %v1416_v13 = vld [vmem:[#allocation2 + $0x18] sm:$0xff]  ;;  %v1417_v19 = vld [vmem:[#allocation2 + $0x20] sm:$0xff]  ;;  %v16668_v33 = vld [vmem:[%s24593_s2 + $0x90] sm:$0xff]  }
 0x2a3   :  { %14151 = vmatprep.subr.bf16.mxu1 %v16661_v47  ;;  %v1419_v18 = vld [vmem:[#allocation2 + $0x38] sm:$0xff]  ;;  %v18734_v39 = vpack.c.bf16 %v1417_v19, %v1416_v13  ;;  %v1422_v45 = vld [vmem:[#allocation2 + $0x60] sm:$0xff]  ;;  %v1434_v17 = vld [vmem:[#allocation2 + $0xf0] sm:$0xff] }
 0x2a4   :  { %v18739_v55 = vpack.c.bf16 %v1419_v18, %v1418_v25  ;;  %v18782_v43 = vld [vmem:[%s24593_s2 + $0xc0] sm:$0xff]   ;;  %v1432_v41 = vld [vmem:[#allocation2 + $0xd8] sm:$0xff]  ;;  %v1436_v36 = vld [vmem:[#allocation2 + $0x108] sm:$0xff] }
 0x2a5   :  { %v1435_v22 = vld [vmem:[#allocation2 + $0xf8] sm:$0xff]  ;;  %v1437_v29 = vld [vmem:[#allocation2 + $0x110] sm:$0xff]  ;;  %v1444_v63 = vld [vmem:[#allocation2 + $0x168] sm:$0xff] }
 0x2a6   :  { %14152 = vmatpush3.bf16.msra.mxu1 %v16661_v47  ;;  %v1433_v47 = vld [vmem:[#allocation2 + $0xe0] sm:$0xff]  ;;  %v18791_v61 = vpack.c.bf16 %v1437_v29, %v1436_v36  ;;  %v1442_v58 = vld [vmem:[#allocation2 + $0x150] sm:$0xff]  ;;  %v1443_v50 = vld [vmem:[#allocation2 + $0x158] sm:$0xff] }
 0x2a7   :  { %14153 = vmatprep.subr.bf16.mxu1 %v16662_v38  ;;  %v18784_v37 = vpack.c.bf16 %v1433_v47, %v1432_v41  ;;  %v1445_v21 = vld [vmem:[#allocation2 + $0x170] sm:$0xff]  ;;  %v1453_v8 = vld [vmem:[#allocation2 + $0x200] sm:$0xff]  ;;  %v1475_v29 = vld [vmem:[#allocation2 + $0x308] sm:$0xff] }
 0x2a8   :  { %v1449_v12 = vld [vmem:[#allocation2 + $0x1d0] sm:$0xff]  ;;  %v1458_v18 = vld [vmem:[#allocation2 + $0x240] sm:$0xff] }
 0x2a9   :  { %14090 = vmatmul.mubr.bf16.gmra.mrb[72].mxu1 %v1595_v2  ;;  %v1438_v2 = vld [vmem:[#allocation2 + $0x120] sm:$0xff]  ;;  %v1454_v26 = vld [vmem:[#allocation2 + $0x210] sm:$0xff] }
 0x2aa   :  { %14093 = vmatprep.mubr.bf16.mxu1 %v1596_v30  ;;  %14154 = vmatpush3.bf16.msra.mxu1 %v16662_v38  ;;  %v18787_v38 = vpack.c.bf16 %v1435_v22, %v1434_v17  ;;  %v1440_v30 = vld [vmem:[#allocation2 + $0x138] sm:$0xff]  ;;  %v1457_v25 = vld [vmem:[#allocation2 + $0x230] sm:$0xff]  ;;  %v1472_v17 = vld [vmem:[#allocation2 + $0x2e8] sm:$0xff] }
 0x2ab   :  { %14155 = vmatprep.subr.bf16.mxu1 %v16663_v59  ;;  %v1473_v22 = vld [vmem:[#allocation2 + $0x2f0] sm:$0xff]  ;;  %v1474_v36 = vld [vmem:[#allocation2 + $0x300] sm:$0xff] }
 0x2ae   :  { %14156 = vmatpush3.bf16.msra.mxu1 %v16663_v59  ;;  %v1439_v59 = vld [vmem:[#allocation2 + $0x128] sm:$0xff] }
 0x2af   :  { %14157 = vmatprep.subr.bf16.mxu1 %v16664_v34  ;;  %v18793_v11 = vpack.c.bf16 %v1439_v59, %v1438_v2  ;;  %v18843_v2 = vpack.c.bf16 %v1473_v22, %v1472_v17  ;;  %v18845_v59 = vpack.c.bf16 %v1475_v29, %v1474_v36  ;;  %v2328_v17 = vld [vmem:[#allocation2 + $0xb2] sm:$0xff]  ;;  %v2329_v22 = vld [vmem:[#allocation2 + $0xc2] sm:$0xff]  ;;  %v2330_v36 = vld [vmem:[#allocation2 + $0xca] sm:$0xff] }
 0x2b1   :  { %14094 = vmatmul.mubr.bf16.gmra.mrb[76].mxu1 %v1597_v20 }
 0x2b2   :  { %14097 = vmatprep.mubr.bf16.mxu1 %v1598_v31  ;;  %14158 = vmatpush3.bf16.msra.mxu1 %v16664_v34  ;;  %v1441_v34 = vld [vmem:[#allocation2 + $0x140] sm:$0xff]  ;;  %v18803_v31 = vpack.c.bf16 %v1445_v21, %v1444_v63 }
 0x2b3   :  { %14159 = vmatprep.subr.bf16.mxu1 %v16665_v52  ;;  %v18797_v20 = vpack.c.bf16 %v1441_v34, %v1440_v30  ;;  %v2313_v30 = vld [vmem:[#allocation2 + $0x2] sm:$0xff]  ;;  %v2314_v34 = vld [vmem:[#allocation2 + $0xa] sm:$0xff] }
 0x2b4   :  { %v2377_v63 = vpack.c.bf16 %v2314_v34, %v2313_v30  ;;  %v16681_v30 = vld [vmem:[%s24593_s2 + $0xf8] sm:$0xff]   ;;  %v18894_v34 = vpack.c.bf16 %v2330_v36, %v2329_v22 }
 0x2b6   :  { %14160 = vmatpush3.bf16.msra.mxu1 %v16665_v52  ;;  %v18799_v52 = vpack.c.bf16 %v1443_v50, %v1442_v58  ;;  %v1476_v58 = vld [vmem:[#allocation2 + $0x318] sm:$0xff]  ;;  %v1477_v50 = vld [vmem:[#allocation2 + $0x320] sm:$0xff] }
 0x2b7   :  { %14225 = vmatprep.subr.bf16.mxu1 %v16666_v48  ;;  %v18849_v21 = vpack.c.bf16 %v1477_v50, %v1476_v58  ;;  %v18901_v58 = vld [vmem:[%s24593_s2 + $0x100] sm:$0xff]  }
 0x2b8   :  { %v2331_v50 = vld [vmem:[#allocation2 + $0xda] sm:$0xff] }
 0x2b9   :  { %14098 = vmatmul.mubr.bf16.gmra.mrb[80].mxu1 %v1599_v27  ;;  %v1450_v27 = vld [vmem:[#allocation2 + $0x1e0] sm:$0xff] }
 0x2ba   :  { %14101 = vmatprep.mubr.bf16.mxu1 %v1600_v16  ;;  %v1421_v16 = vld [vmem:[#allocation2 + $0x50] sm:$0xff] }
 0x2c1   :  { %14102 = vmatmul.mubr.bf16.gmra.mrb[84].mxu1 %v1601_v15  ;;  %v1451_v15 = vld [vmem:[#allocation2 + $0x1e8] sm:$0xff] }
 0x2c2   :  { %14105 = vmatprep.mubr.bf16.mxu1 %v1602_v57  ;;  %v1423_v57 = vld [vmem:[#allocation2 + $0x68] sm:$0xff]  ;;  %v18809_v9 = vpack.c.bf16 %v1451_v15, %v1450_v27  ;;  %v2317_v27 = vld [vmem:[#allocation2 + $0x32] sm:$0xff]  ;;  %v2318_v15 = vld [vmem:[#allocation2 + $0x3a] sm:$0xff] }
 0x2c3   :  { %v18751_v53 = vpack.c.bf16 %v1423_v57, %v1422_v45  ;;  %v1461_v45 = vld [vmem:[#allocation2 + $0x260] sm:$0xff]  ;;  %v1462_v57 = vld [vmem:[#allocation2 + $0x270] sm:$0xff] }
 0x2c9   :  { %14106 = vmatmul.mubr.bf16.gmra.mrb[88].mxu1 %v1603_v32  ;;  %v18746_v32 = vpack.c.bf16 %v1421_v16, %v1420_v35  ;;  %v1460_v16 = vld [vmem:[#allocation2 + $0x258] sm:$0xff] }
 0x2ca   :  { %14109 = vmatprep.mubr.bf16.mxu1 %v1604_v56  ;;  %v16669_v56 = vld [vmem:[%s24593_s2 + $0x98] sm:$0xff]  }
 0x2d1   :  { %14110 = vmatmul.mubr.bf16.gmra.mrb[92].mxu1 %v1605_v23  ;;  %v16670_v23 = vld [vmem:[%s24593_s2 + $0xa0] sm:$0xff]  }
 0x2d2   :  { %14113 = vmatprep.mubr.bf16.mxu1 %v1606_v0  ;;  %v1452_v0 = vld [vmem:[#allocation2 + $0x1f8] sm:$0xff] }
 0x2d3   :  { %v18813_v13 = vpack.c.bf16 %v1453_v8, %v1452_v0  ;;  %v16675_v8 = vld [vmem:[%s24593_s2 + $0xc8] sm:$0xff]  }
 0x2d9   :  { %14114 = vmatmul.mubr.bf16.gmra.mrb[96].mxu1 %v1607_v46  ;;  %v1424_v46 = vld [vmem:[#allocation2 + $0x78] sm:$0xff] }
 0x2da   :  { %14117 = vmatprep.mubr.bf16.mxu1 %v1608_v5  ;;  %v1425_v5 = vld [vmem:[#allocation2 + $0x80] sm:$0xff] }
 0x2e1   :  { %14118 = vmatmul.mubr.bf16.gmra.mrb[100].mxu1 %v1609_v40  ;;  %v1426_v40 = vld [vmem:[#allocation2 + $0x90] sm:$0xff] }
 0x2e2   :  { %14121 = vmatprep.mubr.bf16.mxu1 %v1610_v44  ;;  %v1427_v44 = vld [vmem:[#allocation2 + $0x98] sm:$0xff] }
 0x2e9   :  { %14122 = vmatmul.mubr.bf16.gmra.mrb[104].mxu1 %v1611_v24  ;;  %v18758_v24 = vpack.c.bf16 %v1425_v5, %v1424_v46  ;;  %v1464_v5 = vld [vmem:[#allocation2 + $0x288] sm:$0xff] }
 0x2ea   :  { %14125 = vmatprep.mubr.bf16.mxu1 %v1612_v54  ;;  %v16671_v54 = vld [vmem:[%s24593_s2 + $0xa8] sm:$0xff]  }
 0x2f1   :  { %14126 = vmatmul.mubr.bf16.gmra.mrb[108].mxu1 %v1613_v6  ;;  %v18763_v6 = vpack.c.bf16 %v1427_v44, %v1426_v40  ;;  %v1465_v40 = vld [vmem:[#allocation2 + $0x290] sm:$0xff]  ;;  %v1466_v44 = vld [vmem:[#allocation2 + $0x2a0] sm:$0xff] }
 0x2f2   :  { %14129 = vmatprep.mubr.bf16.mxu1 %v1614_v14  ;;  %v16672_v14 = vld [vmem:[%s24593_s2 + $0xb0] sm:$0xff]  }
 0x2f9   :  { %14130 = vmatmul.mubr.bf16.gmra.mrb[112].mxu1 %v1615_v4  ;;  %v1428_v4 = vld [vmem:[#allocation2 + $0xa8] sm:$0xff] }
 0x2fa   :  { %14133 = vmatprep.mubr.bf16.mxu1 %v1616_v1  ;;  %v1429_v1 = vld [vmem:[#allocation2 + $0xb0] sm:$0xff] }
 0x301   :  { %14134 = vmatmul.mubr.bf16.gmra.mrb[116].mxu1 %v1617_v42  ;;  %v1430_v42 = vld [vmem:[#allocation2 + $0xc0] sm:$0xff] }
 0x302   :  { %14137 = vmatprep.mubr.bf16.mxu1 %v1618_v60  ;;  %v1431_v60 = vld [vmem:[#allocation2 + $0xc8] sm:$0xff] }
 0x303   :  { %v18775_v28 = vpack.c.bf16 %v1431_v60, %v1430_v42  ;;  %v1469_v42 = vld [vmem:[#allocation2 + $0x2c0] sm:$0xff]  ;;  %v1470_v60 = vld [vmem:[#allocation2 + $0x2d0] sm:$0xff] }
 0x309   :  { %14138 = vmatmul.mubr.bf16.gmra.mrb[120].mxu1 %v1619_v10  ;;  %v18770_v10 = vpack.c.bf16 %v1429_v1, %v1428_v4  ;;  %v1468_v1 = vld [vmem:[#allocation2 + $0x2b8] sm:$0xff] }
 0x30a   :  { %14141 = vmatprep.mubr.bf16.mxu1 %v1620_v51  ;;  %v16673_v51 = vld [vmem:[%s24593_s2 + $0xb8] sm:$0xff]   ;;  %v18837_v41 = vpack.c.bf16 %v1469_v42, %v1468_v1  ;;  %v16679_v1 = vld [vmem:[%s24593_s2 + $0xe8] sm:$0xff]  }
 0x311   :  { %14142 = vmatmul.mubr.bf16.gmra.mrb[124].mxu1 %v1621_v49  ;;  %v1455_v49 = vld [vmem:[#allocation2 + $0x218] sm:$0xff] }
 0x312   :  { %14161 = vmatprep.mubr.bf16.mxu1 %v18730_v3  ;;  %v18815_v19 = vpack.c.bf16 %v1455_v49, %v1454_v26  ;;  %v18857_v26 = vpack.c.bf16 %v2318_v15, %v2317_v27  ;;  %v16676_v49 = vld [vmem:[%s24593_s2 + $0xd0] sm:$0xff]  }
 0x319   :  { %14162 = vmatmul.mubr.bf16.vlgmr.msra.gmra.mrb[64].mxu1 %v18734_v39 }
 0x31a   :  { %14226 = vmatpush3.bf16.msra.mxu1 %v16666_v48  ;;  %14165 = vmatprep.mubr.bf16.mxu1 %v18739_v55  ;;  %v1448_v48 = vld [vmem:[#allocation2 + $0x1c8] sm:$0xff] }
 0x31b   :  { %14227 = vmatprep.subr.bf16.mxu1 %v16667_v7  ;;  %v18807_v62 = vpack.c.bf16 %v1449_v12, %v1448_v48  ;;  %v2315_v48 = vld [vmem:[#allocation2 + $0x1a] sm:$0xff]  ;;  %v2316_v12 = vld [vmem:[#allocation2 + $0x22] sm:$0xff] }
 0x31c   :  { %v18852_v0 = vpack.c.bf16 %v2316_v12, %v2315_v48  ;;  %v2333_v48 = vld [vmem:[#allocation2 + $0xf2] sm:$0xff]  ;;  %v2334_v12 = vld [vmem:[#allocation2 + $0xfa] sm:$0xff] }
 0x31d   :  { %v18906_v15 = vpack.c.bf16 %v2334_v12, %v2333_v48  ;;  %v2350_v48 = vld [vmem:[#allocation2 + $0x1ea] sm:$0xff] }
 0x31e   :  { %14228 = vmatpush3.bf16.msra.mxu1 %v16667_v7  ;;  %v1459_v7 = vld [vmem:[#allocation2 + $0x248] sm:$0xff] }
 0x31f   :  { %14229 = vmatprep.subr.bf16.mxu1 %v16668_v33  ;;  %v18821_v35 = vpack.c.bf16 %v1459_v7, %v1458_v18  ;;  %v2321_v18 = vld [vmem:[#allocation2 + $0x62] sm:$0xff]  ;;  %v2322_v7 = vld [vmem:[#allocation2 + $0x6a] sm:$0xff] }
 0x321   :  { %14166 = vmatmul.mubr.bf16.gmra.mrb[68].mxu1 %v18746_v32 }
 0x322   :  { %14169 = vmatprep.mubr.bf16.mxu1 %v18751_v53  ;;  %14230 = vmatpush3.bf16.msra.mxu1 %v16668_v33 }
 0x323   :  { %14231 = vmatprep.subr.bf16.mxu1 %v16669_v56 }
 0x326   :  { %14232 = vmatpush3.bf16.msra.mxu1 %v16669_v56  ;;  %v1463_v56 = vld [vmem:[#allocation2 + $0x278] sm:$0xff] }
 0x327   :  { %14233 = vmatprep.subr.bf16.mxu1 %v16670_v23  ;;  %v18827_v46 = vpack.c.bf16 %v1463_v56, %v1462_v57  ;;  %v16678_v57 = vld [vmem:[%s24593_s2 + $0xe0] sm:$0xff]  }
 0x328   :  { %v2323_v56 = vld [vmem:[#allocation2 + $0x7a] sm:$0xff] }
 0x329   :  { %14170 = vmatmul.mubr.bf16.gmra.mrb[72].mxu1 %v18758_v24 }
 0x32a   :  { %14173 = vmatprep.mubr.bf16.mxu1 %v18763_v6  ;;  %14234 = vmatpush3.bf16.msra.mxu1 %v16670_v23  ;;  %v18825_v23 = vpack.c.bf16 %v1461_v45, %v1460_v16  ;;  %v16677_v45 = vld [vmem:[%s24593_s2 + $0xd8] sm:$0xff]  }
 0x32b   :  { %14235 = vmatprep.subr.bf16.mxu1 %v16671_v54 }
 0x32e   :  { %14236 = vmatpush3.bf16.msra.mxu1 %v16671_v54  ;;  %v1467_v54 = vld [vmem:[#allocation2 + $0x2a8] sm:$0xff] }
 0x32f   :  { %14237 = vmatprep.subr.bf16.mxu1 %v16672_v14  ;;  %v18833_v4 = vpack.c.bf16 %v1467_v54, %v1466_v44  ;;  %v2326_v44 = vld [vmem:[#allocation2 + $0x9a] sm:$0xff] }
 0x331   :  { %14174 = vmatmul.mubr.bf16.gmra.mrb[76].mxu1 %v18770_v10 }
 0x332   :  { %14177 = vmatprep.mubr.bf16.mxu1 %v18775_v28  ;;  %14238 = vmatpush3.bf16.msra.mxu1 %v16672_v14  ;;  %v18831_v14 = vpack.c.bf16 %v1465_v40, %v1464_v5  ;;  %v2324_v5 = vld [vmem:[#allocation2 + $0x82] sm:$0xff]  ;;  %v2325_v40 = vld [vmem:[#allocation2 + $0x92] sm:$0xff] }
 0x333   :  { %14239 = vmatprep.subr.bf16.mxu1 %v16673_v51  ;;  %v18877_v54 = vpack.c.bf16 %v2324_v5, %v2323_v56  ;;  %v18882_v42 = vpack.c.bf16 %v2326_v44, %v2325_v40  ;;  %v2341_v56 = vld [vmem:[#allocation2 + $0x152] sm:$0xff]  ;;  %v2342_v5 = vld [vmem:[#allocation2 + $0x15a] sm:$0xff] }
 0x334   :  { %v18918_v44 = vpack.c.bf16 %v2342_v5, %v2341_v56  ;;  %v2355_v5 = vld [vmem:[#allocation2 + $0x22a] sm:$0xff] }
 0x336   :  { %14240 = vmatpush3.bf16.msra.mxu1 %v16673_v51  ;;  %v1471_v51 = vld [vmem:[#allocation2 + $0x2d8] sm:$0xff] }
 0x337   :  { %14305 = vmatprep.subr.bf16.mxu1 %v18782_v43  ;;  %v18839_v47 = vpack.c.bf16 %v1471_v51, %v1470_v60  ;;  %v16680_v60 = vld [vmem:[%s24593_s2 + $0xf0] sm:$0xff]  }
 0x338   :  { %v2327_v51 = vld [vmem:[#allocation2 + $0xaa] sm:$0xff] }
 0x339   :  { %14178 = vmatmul.mubr.bf16.gmra.mrb[80].mxu1 %v18784_v37  ;;  %v18889_v29 = vpack.c.bf16 %v2328_v17, %v2327_v51  ;;  %v2343_v51 = vld [vmem:[#allocation2 + $0x16a] sm:$0xff]  ;;  %v2344_v17 = vld [vmem:[#allocation2 + $0x172] sm:$0xff] }
 0x33a   :  { %14181 = vmatprep.mubr.bf16.mxu1 %v18787_v38  ;;  %v18922_v36 = vpack.c.bf16 %v2344_v17, %v2343_v51  ;;  %v2358_v51 = vld [vmem:[#allocation2 + $0x24a] sm:$0xff] }
 0x341   :  { %14182 = vmatmul.mubr.bf16.gmra.mrb[84].mxu1 %v18791_v61 }
 0x342   :  { %14185 = vmatprep.mubr.bf16.mxu1 %v18793_v11 }
 0x349   :  { %14186 = vmatmul.mubr.bf16.gmra.mrb[88].mxu1 %v18797_v20 }
 0x34a   :  { %14189 = vmatprep.mubr.bf16.mxu1 %v18799_v52 }
 0x351   :  { %14190 = vmatmul.mubr.bf16.gmra.mrb[92].mxu1 %v18803_v31 }
 0x352   :  { %14193 = vmatprep.mubr.bf16.mxu1 %v18730_v3  ;;  %v1456_v3 = vld [vmem:[#allocation2 + $0x228] sm:$0xff] }
 0x353   :  { %v18819_v33 = vpack.c.bf16 %v1457_v25, %v1456_v3  ;;  %v2319_v3 = vld [vmem:[#allocation2 + $0x4a] sm:$0xff]  ;;  %v2320_v25 = vld [vmem:[#allocation2 + $0x52] sm:$0xff] }
 0x354   :  { %v18865_v16 = vpack.c.bf16 %v2320_v25, %v2319_v3  ;;  %v2337_v3 = vld [vmem:[#allocation2 + $0x122] sm:$0xff]  ;;  %v2338_v25 = vld [vmem:[#allocation2 + $0x12a] sm:$0xff] }
 0x359   :  { %14194 = vmatmul.mubr.bf16.gmra.mrb[96].mxu1 %v18807_v62 }
 0x35a   :  { %14197 = vmatprep.mubr.bf16.mxu1 %v18809_v9 }
 0x361   :  { %14198 = vmatmul.mubr.bf16.gmra.mrb[100].mxu1 %v18813_v13 }
 0x362   :  { %14201 = vmatprep.mubr.bf16.mxu1 %v18815_v19 }
 0x369   :  { %14202 = vmatmul.mubr.bf16.gmra.mrb[104].mxu1 %v18819_v33 }
 0x36a   :  { %14205 = vmatprep.mubr.bf16.mxu1 %v18821_v35 }
 0x371   :  { %14206 = vmatmul.mubr.bf16.gmra.mrb[108].mxu1 %v18825_v23 }
 0x372   :  { %14209 = vmatprep.mubr.bf16.mxu1 %v18827_v46 }
 0x379   :  { %14210 = vmatmul.mubr.bf16.gmra.mrb[112].mxu1 %v18831_v14 }
 0x37a   :  { %14213 = vmatprep.mubr.bf16.mxu1 %v18833_v4 }
 0x381   :  { %14214 = vmatmul.mubr.bf16.gmra.mrb[116].mxu1 %v18837_v41 }
 0x382   :  { %14217 = vmatprep.mubr.bf16.mxu1 %v18839_v47 }
 0x389   :  { %14218 = vmatmul.mubr.bf16.gmra.mrb[120].mxu1 %v18843_v2 }
 0x38a   :  { %14221 = vmatprep.mubr.bf16.mxu1 %v18845_v59 }
 0x391   :  { %14222 = vmatmul.mubr.bf16.gmra.mrb[124].mxu1 %v18849_v21 }
 0x392   :  { %14241 = vmatprep.mubr.bf16.mxu1 %v2377_v63  ;;  %v2332_v63 = vld [vmem:[#allocation2 + $0xe2] sm:$0xff] }
 0x393   :  { %v18903_v27 = vpack.c.bf16 %v2332_v63, %v2331_v50  ;;  %v2348_v50 = vld [vmem:[#allocation2 + $0x1d2] sm:$0xff]  ;;  %v2349_v63 = vld [vmem:[#allocation2 + $0x1e2] sm:$0xff] }
 0x399   :  { %14242 = vmatmul.mubr.bf16.vlgmr.msra.gmra.mrb[64].mxu1 %v18852_v0 }
 0x39a   :  { %14306 = vmatpush3.bf16.msra.mxu1 %v18782_v43  ;;  %14245 = vmatprep.mubr.bf16.mxu1 %v18857_v26  ;;  %v18870_v43 = vpack.c.bf16 %v2322_v7, %v2321_v18  ;;  %v18912_v7 = vpack.c.bf16 %v2338_v25, %v2337_v3  ;;  %v2352_v3 = vld [vmem:[#allocation2 + $0x202] sm:$0xff]  ;;  %v2353_v25 = vld [vmem:[#allocation2 + $0x212] sm:$0xff] }
 0x39b   :  { %14307 = vmatprep.subr.bf16.mxu1 %v16675_v8 }
 0x39e   :  { %14308 = vmatpush3.bf16.msra.mxu1 %v16675_v8  ;;  %v2335_v8 = vld [vmem:[#allocation2 + $0x10a] sm:$0xff] }
 0x39f   :  { %14309 = vmatprep.subr.bf16.mxu1 %v16676_v49 }
 0x3a1   :  { %14246 = vmatmul.mubr.bf16.gmra.mrb[68].mxu1 %v18865_v16 }
 0x3a2   :  { %14249 = vmatprep.mubr.bf16.mxu1 %v18870_v43  ;;  %14310 = vmatpush3.bf16.msra.mxu1 %v16676_v49  ;;  %v2336_v49 = vld [vmem:[#allocation2 + $0x112] sm:$0xff] }
 0x3a3   :  { %14311 = vmatprep.subr.bf16.mxu1 %v16677_v45  ;;  %v18910_v18 = vpack.c.bf16 %v2336_v49, %v2335_v8  ;;  %v18927_v8 = vpack.c.bf16 %v2350_v48, %v2349_v63  ;;  %v2351_v49 = vld [vmem:[#allocation2 + $0x1fa] sm:$0xff]  ;;  %v2361_v63 = vld [vmem:[#allocation2 + $0x272] sm:$0xff] }
 0x3a4   :  { %v2362_v48 = vld [vmem:[#allocation2 + $0x27a] sm:$0xff] }
 0x3a6   :  { %14312 = vmatpush3.bf16.msra.mxu1 %v16677_v45  ;;  %v2339_v45 = vld [vmem:[#allocation2 + $0x13a] sm:$0xff] }
 0x3a7   :  { %14313 = vmatprep.subr.bf16.mxu1 %v16678_v57 }
 0x3a9   :  { %14250 = vmatmul.mubr.bf16.gmra.mrb[72].mxu1 %v18877_v54 }
 0x3aa   :  { %14253 = vmatprep.mubr.bf16.mxu1 %v18882_v42  ;;  %14314 = vmatpush3.bf16.msra.mxu1 %v16678_v57  ;;  %v2340_v57 = vld [vmem:[#allocation2 + $0x142] sm:$0xff] }
 0x3ab   :  { %14315 = vmatprep.subr.bf16.mxu1 %v16679_v1  ;;  %v18916_v40 = vpack.c.bf16 %v2340_v57, %v2339_v45  ;;  %v2354_v45 = vld [vmem:[#allocation2 + $0x21a] sm:$0xff]  ;;  %v18931_v57 = vpack.c.bf16 %v2352_v3, %v2351_v49  ;;  %v18945_v3 = vpack.c.bf16 %v2362_v48, %v2361_v63  ;;  %v2369_v63 = vld [vmem:[#allocation2 + $0x2d2] sm:$0xff] }
 0x3ac   :  { %v18933_v56 = vpack.c.bf16 %v2354_v45, %v2353_v25  ;;  %v2363_v25 = vld [vmem:[#allocation2 + $0x28a] sm:$0xff]  ;;  %v2364_v45 = vld [vmem:[#allocation2 + $0x292] sm:$0xff]  ;;  %v2370_v48 = vld [vmem:[#allocation2 + $0x2da] sm:$0xff] }
 0x3ad   :  { %25119 = vst [vmem:[#allocation23_spill] sm:$0xff] %v18945_v3 }
 0x3ae   :  { %14316 = vmatpush3.bf16.msra.mxu1 %v16679_v1  ;;  %v2345_v1 = vld [vmem:[#allocation2 + $0x1b2] sm:$0xff] }
 0x3af   :  { %14317 = vmatprep.subr.bf16.mxu1 %v16680_v60 }
 0x3b1   :  { %14254 = vmatmul.mubr.bf16.gmra.mrb[76].mxu1 %v18889_v29 }
 0x3b2   :  { %14257 = vmatprep.mubr.bf16.mxu1 %v18894_v34  ;;  %14318 = vmatpush3.bf16.msra.mxu1 %v16680_v60  ;;  %v2346_v60 = vld [vmem:[#allocation2 + $0x1ba] sm:$0xff] }
 0x3b3   :  { %14319 = vmatprep.subr.bf16.mxu1 %v16681_v30  ;;  %v2393_v22 = vpack.c.bf16 %v2346_v60, %v2345_v1  ;;  %v2356_v1 = vld [vmem:[#allocation2 + $0x232] sm:$0xff]  ;;  %v2357_v60 = vld [vmem:[#allocation2 + $0x242] sm:$0xff] }
 0x3b4   :  { %v18937_v17 = vpack.c.bf16 %v2356_v1, %v2355_v5  ;;  %v2365_v5 = vld [vmem:[#allocation2 + $0x2a2] sm:$0xff]  ;;  %v2366_v1 = vld [vmem:[#allocation2 + $0x2aa] sm:$0xff] }
 0x3b6   :  { %14320 = vmatpush3.bf16.msra.mxu1 %v16681_v30  ;;  %v2347_v30 = vld [vmem:[#allocation2 + $0x1ca] sm:$0xff] }
 0x3b7   :  { %14385 = vmatprep.subr.bf16.mxu1 %v18901_v58  ;;  %v18925_v12 = vpack.c.bf16 %v2348_v50, %v2347_v30  ;;  %v2359_v30 = vld [vmem:[#allocation2 + $0x25a] sm:$0xff]  ;;  %v2360_v50 = vld [vmem:[#allocation2 + $0x262] sm:$0xff] }
 0x3b8   :  { %v18943_v49 = vpack.c.bf16 %v2360_v50, %v2359_v30  ;;  %v2367_v30 = vld [vmem:[#allocation2 + $0x2ba] sm:$0xff]  ;;  %v2368_v50 = vld [vmem:[#allocation2 + $0x2c2] sm:$0xff] }
 0x3b9   :  { %14258 = vmatmul.mubr.bf16.gmra.mrb[80].mxu1 %v18903_v27 }
 0x3ba   :  { %14261 = vmatprep.mubr.bf16.mxu1 %v18906_v15  ;;  %25118 = vst [vmem:[#allocation21_spill] sm:$0xff] %v18943_v49 }
 0x3c1   :  { %14262 = vmatmul.mubr.bf16.gmra.mrb[84].mxu1 %v18910_v18 }
 0x3c2   :  { %14265 = vmatprep.mubr.bf16.mxu1 %v18912_v7 }
 0x3c9   :  { %14266 = vmatmul.mubr.bf16.gmra.mrb[88].mxu1 %v18916_v40 }
 0x3ca   :  { %14269 = vmatprep.mubr.bf16.mxu1 %v18918_v44 }
 0x3d1   :  { %14270 = vmatmul.mubr.bf16.gmra.mrb[92].mxu1 %v18922_v36 }
 0x3d2   :  { %14273 = vmatprep.mubr.bf16.mxu1 %v2393_v22  ;;  %v18939_v22 = vpack.c.bf16 %v2358_v51, %v2357_v60  ;;  %v18949_v60 = vpack.c.bf16 %v2364_v45, %v2363_v25  ;;  %v18951_v51 = vpack.c.bf16 %v2366_v1, %v2365_v5  ;;  %v2371_v25 = vld [vmem:[#allocation2 + $0x2ea] sm:$0xff]  ;;  %v2372_v45 = vld [vmem:[#allocation2 + $0x2f2] sm:$0xff]  ;;  %v2373_v5 = vld [vmem:[#allocation2 + $0x302] sm:$0xff] }
 0x3d3   :  { %v2374_v1 = vld [vmem:[#allocation2 + $0x30a] sm:$0xff] }
 0x3d4   :  { %25117 = vst [vmem:[#allocation38_spill] sm:$0xff] %v18939_v22  ;;  %25120 = vst [vmem:[#allocation25_spill] sm:$0xff] %v18949_v60 }
 0x3d9   :  { %14274 = vmatmul.mubr.bf16.gmra.mrb[96].mxu1 %v18925_v12 }
 0x3da   :  { %14277 = vmatprep.mubr.bf16.mxu1 %v18927_v8 }
 0x3e1   :  { %14278 = vmatmul.mubr.bf16.gmra.mrb[100].mxu1 %v18931_v57 }
 0x3e2   :  { %14281 = vmatprep.mubr.bf16.mxu1 %v18933_v56 }
 0x3e9   :  { %14282 = vmatmul.mubr.bf16.gmra.mrb[104].mxu1 %v18937_v17 }
 0x3ea   :  { %14285 = vmatprep.mubr.bf16.mxu1 %v18939_v22  ;;  %v18955_v22 = vpack.c.bf16 %v2368_v50, %v2367_v30  ;;  %v2375_v30 = vld [vmem:[#allocation2 + $0x31a] sm:$0xff]  ;;  %v2376_v50 = vld [vmem:[#allocation2 + $0x322] sm:$0xff] }
 0x3f1   :  { %14286 = vmatmul.mubr.bf16.gmra.mrb[108].mxu1 %v18943_v49  ;;  %v18957_v49 = vpack.c.bf16 %v2370_v48, %v2369_v63  ;;  %v18967_v63 = vpack.c.bf16 %v2376_v50, %v2375_v30  ;;  %v16683_v48 = vld [vmem:[%s24593_s2 + $0x108] sm:$0xff]   ;;  %v3354_v30 = vld [vmem:[#allocation2 + $0xb1] sm:$0xff] }
 0x3f2   :  { %14289 = vmatprep.mubr.bf16.mxu1 %v18945_v3  ;;  %v18961_v3 = vpack.c.bf16 %v2372_v45, %v2371_v25  ;;  %v16684_v25 = vld [vmem:[%s24593_s2 + $0x110] sm:$0xff]  }
 0x3f3   :  { %v3351_v45 = vld [vmem:[#allocation2 + $0x91] sm:$0xff] }
 0x3f9   :  { %14290 = vmatmul.mubr.bf16.gmra.mrb[112].mxu1 %v18949_v60  ;;  %v18963_v60 = vpack.c.bf16 %v2374_v1, %v2373_v5  ;;  %v3352_v5 = vld [vmem:[#allocation2 + $0x99] sm:$0xff]  ;;  %v3353_v1 = vld [vmem:[#allocation2 + $0xa9] sm:$0xff] }
 0x3fa   :  { %14293 = vmatprep.mubr.bf16.mxu1 %v18951_v51  ;;  %v19055_v50 = vpack.c.bf16 %v3352_v5, %v3351_v45 }
 0x401   :  { %14294 = vmatmul.mubr.bf16.gmra.mrb[116].mxu1 %v18955_v22 }
 0x402   :  { %14297 = vmatprep.mubr.bf16.mxu1 %v18957_v49 }
 0x409   :  { %14298 = vmatmul.mubr.bf16.gmra.mrb[120].mxu1 %v18961_v3 }
 0x40a   :  { %14301 = vmatprep.mubr.bf16.mxu1 %v18963_v60 }
 0x411   :  { %14302 = vmatmul.mubr.bf16.gmra.mrb[124].mxu1 %v18967_v63 }
 0x412   :  { %14321 = vmatprep.mubr.bf16.mxu1 %v18734_v39  ;;  %v16685_v39 = vld [vmem:[%s24593_s2 + $0x118] sm:$0xff]  }
 0x419   :  { %14322 = vmatmul.mubr.bf16.vlgmr.msra.gmra.mrb[64].mxu1 %v18739_v55  ;;  %v16686_v55 = vld [vmem:[%s24593_s2 + $0x120] sm:$0xff]  }
 0x41a   :  { %14386 = vmatpush3.bf16.msra.mxu1 %v18901_v58  ;;  %14325 = vmatprep.mubr.bf16.mxu1 %v18746_v32  ;;  %v16687_v32 = vld [vmem:[%s24593_s2 + $0x128] sm:$0xff]   ;;  %v16694_v58 = vld [vmem:[%s24593_s2 + $0x160] sm:$0xff]  }
 0x41b   :  { %14387 = vmatprep.subr.bf16.mxu1 %v16683_v48 }
 0x41e   :  { %14388 = vmatpush3.bf16.msra.mxu1 %v16683_v48  ;;  %v16695_v48 = vld [vmem:[%s24593_s2 + $0x168] sm:$0xff]  }
 0x41f   :  { %14389 = vmatprep.subr.bf16.mxu1 %v16684_v25 }
 0x421   :  { %14326 = vmatmul.mubr.bf16.gmra.mrb[68].mxu1 %v18751_v53  ;;  %v16688_v53 = vld [vmem:[%s24593_s2 + $0x130] sm:$0xff]  }
 0x422   :  { %14329 = vmatprep.mubr.bf16.mxu1 %v18758_v24  ;;  %14390 = vmatpush3.bf16.msra.mxu1 %v16684_v25  ;;  %v16689_v24 = vld [vmem:[%s24593_s2 + $0x138] sm:$0xff]   ;;  %v19060_v25 = vpack.c.bf16 %v3354_v30, %v3353_v1  ;;  %v3371_v1 = vld [vmem:[#allocation2 + $0x181] sm:$0xff]  ;;  %v3372_v30 = vld [vmem:[#allocation2 + $0x189] sm:$0xff] }
 0x423   :  { %14391 = vmatprep.subr.bf16.mxu1 %v16685_v39 }
 0x426   :  { %14392 = vmatpush3.bf16.msra.mxu1 %v16685_v39  ;;  %v16696_v39 = vld [vmem:[%s24593_s2 + $0x170] sm:$0xff]  }
 0x427   :  { %14393 = vmatprep.subr.bf16.mxu1 %v16686_v55 }
 0x429   :  { %14330 = vmatmul.mubr.bf16.gmra.mrb[72].mxu1 %v18763_v6  ;;  %v16690_v6 = vld [vmem:[%s24593_s2 + $0x140] sm:$0xff]  }
 0x42a   :  { %14333 = vmatprep.mubr.bf16.mxu1 %v18770_v10  ;;  %14394 = vmatpush3.bf16.msra.mxu1 %v16686_v55  ;;  %v2857_v10 = vld [vmem:[#allocation2 + $0x180] sm:$0xff] }
 0x42b   :  { %14395 = vmatprep.subr.bf16.mxu1 %v16687_v32  ;;  %v3355_v55 = vld [vmem:[#allocation2 + $0xc1] sm:$0xff] }
 0x42e   :  { %14396 = vmatpush3.bf16.msra.mxu1 %v16687_v32  ;;  %v3356_v32 = vld [vmem:[#allocation2 + $0xc9] sm:$0xff] }
 0x42f   :  { %14397 = vmatprep.subr.bf16.mxu1 %v16688_v53 }
 0x431   :  { %14334 = vmatmul.mubr.bf16.gmra.mrb[76].mxu1 %v18775_v28  ;;  %v2858_v28 = vld [vmem:[#allocation2 + $0x188] sm:$0xff] }
 0x432   :  { %14337 = vmatprep.mubr.bf16.mxu1 %v18784_v37  ;;  %14398 = vmatpush3.bf16.msra.mxu1 %v16688_v53  ;;  %v19010_v37 = vpack.c.bf16 %v2858_v28, %v2857_v10  ;;  %v3357_v53 = vld [vmem:[#allocation2 + $0xd9] sm:$0xff] }
 0x433   :  { %14399 = vmatprep.subr.bf16.mxu1 %v16689_v24  ;;  %v16697_v10 = vld [vmem:[%s24593_s2 + $0x178] sm:$0xff]  }
 0x436   :  { %14400 = vmatpush3.bf16.msra.mxu1 %v16689_v24  ;;  %v3358_v24 = vld [vmem:[#allocation2 + $0xe1] sm:$0xff] }
 0x437   :  { %14465 = vmatprep.subr.bf16.mxu1 %v16690_v6  ;;  %v19072_v28 = vpack.c.bf16 %v3358_v24, %v3357_v53  ;;  %v3375_v53 = vld [vmem:[#allocation2 + $0x1e1] sm:$0xff]  ;;  %v3376_v24 = vld [vmem:[#allocation2 + $0x1e9] sm:$0xff] }
 0x439   :  { %14338 = vmatmul.mubr.bf16.gmra.mrb[80].mxu1 %v18787_v38  ;;  %v2889_v38 = vld [vmem:[#allocation2 + $0x330] sm:$0xff] }
 0x43a   :  { %14341 = vmatprep.mubr.bf16.mxu1 %v18791_v61  ;;  %v2890_v61 = vld [vmem:[#allocation2 + $0x338] sm:$0xff] }
 0x441   :  { %14342 = vmatmul.mubr.bf16.gmra.mrb[84].mxu1 %v18793_v11  ;;  %v3341_v11 = vld [vmem:[#allocation2 + $0x19] sm:$0xff] }
 0x442   :  { %14345 = vmatprep.mubr.bf16.mxu1 %v18797_v20  ;;  %v3342_v20 = vld [vmem:[#allocation2 + $0x21] sm:$0xff] }
 0x449   :  { %14346 = vmatmul.mubr.bf16.gmra.mrb[88].mxu1 %v18799_v52  ;;  %v19028_v52 = vpack.c.bf16 %v2890_v61, %v2889_v38  ;;  %v19079_v38 = vld [vmem:[%s24593_s2 + $0x180] sm:$0xff]   ;;  %v3359_v61 = vld [vmem:[#allocation2 + $0xf1] sm:$0xff] }
 0x44a   :  { %14349 = vmatprep.mubr.bf16.mxu1 %v18803_v31  ;;  %v3405_v31 = vpack.c.bf16 %v3342_v20, %v3341_v11  ;;  %v3360_v11 = vld [vmem:[#allocation2 + $0xf9] sm:$0xff]  ;;  %v3361_v20 = vld [vmem:[#allocation2 + $0x109] sm:$0xff] }
 0x451   :  { %14350 = vmatmul.mubr.bf16.gmra.mrb[92].mxu1 %v19010_v37 }
 0x452   :  { %14353 = vmatprep.mubr.bf16.mxu1 %v18807_v62  ;;  %v3343_v62 = vld [vmem:[#allocation2 + $0x31] sm:$0xff] }
 0x459   :  { %14354 = vmatmul.mubr.bf16.gmra.mrb[96].mxu1 %v18809_v9  ;;  %v3344_v9 = vld [vmem:[#allocation2 + $0x39] sm:$0xff] }
 0x45a   :  { %14357 = vmatprep.mubr.bf16.mxu1 %v18813_v13  ;;  %v3345_v13 = vld [vmem:[#allocation2 + $0x49] sm:$0xff] }
 0x461   :  { %14358 = vmatmul.mubr.bf16.gmra.mrb[100].mxu1 %v18815_v19  ;;  %v3346_v19 = vld [vmem:[#allocation2 + $0x51] sm:$0xff] }
 0x462   :  { %14361 = vmatprep.mubr.bf16.mxu1 %v18819_v33  ;;  %v19031_v33 = vpack.c.bf16 %v3344_v9, %v3343_v62  ;;  %v19081_v62 = vpack.c.bf16 %v3360_v11, %v3359_v61  ;;  %v3378_v61 = vld [vmem:[#allocation2 + $0x201] sm:$0xff]  ;;  %v19103_v11 = vpack.c.bf16 %v3376_v24, %v3375_v53  ;;  %v3389_v53 = vld [vmem:[#allocation2 + $0x289] sm:$0xff]  ;;  %v3390_v24 = vld [vmem:[#allocation2 + $0x291] sm:$0xff] }
 0x469   :  { %14362 = vmatmul.mubr.bf16.gmra.mrb[104].mxu1 %v18821_v35  ;;  %v16691_v35 = vld [vmem:[%s24593_s2 + $0x148] sm:$0xff]  }
 0x46a   :  { %14365 = vmatprep.mubr.bf16.mxu1 %v18825_v23  ;;  %v19036_v23 = vpack.c.bf16 %v3346_v19, %v3345_v13  ;;  %v3363_v13 = vld [vmem:[#allocation2 + $0x121] sm:$0xff]  ;;  %v3364_v19 = vld [vmem:[#allocation2 + $0x129] sm:$0xff] }
 0x471   :  { %14366 = vmatmul.mubr.bf16.gmra.mrb[108].mxu1 %v18827_v46  ;;  %v16692_v46 = vld [vmem:[%s24593_s2 + $0x150] sm:$0xff]  }
 0x472   :  { %14369 = vmatprep.mubr.bf16.mxu1 %v18831_v14  ;;  %v3347_v14 = vld [vmem:[#allocation2 + $0x61] sm:$0xff] }
 0x479   :  { %14370 = vmatmul.mubr.bf16.gmra.mrb[112].mxu1 %v18833_v4  ;;  %v3348_v4 = vld [vmem:[#allocation2 + $0x69] sm:$0xff] }
 0x47a   :  { %14373 = vmatprep.mubr.bf16.mxu1 %v18837_v41  ;;  %v3349_v41 = vld [vmem:[#allocation2 + $0x79] sm:$0xff] }
 0x481   :  { %14374 = vmatmul.mubr.bf16.gmra.mrb[116].mxu1 %v18839_v47  ;;  %v3350_v47 = vld [vmem:[#allocation2 + $0x81] sm:$0xff] }
 0x482   :  { %14377 = vmatprep.mubr.bf16.mxu1 %v18843_v2  ;;  %v19043_v2 = vpack.c.bf16 %v3348_v4, %v3347_v14  ;;  %v19088_v14 = vpack.c.bf16 %v3364_v19, %v3363_v13  ;;  %v3380_v13 = vld [vmem:[#allocation2 + $0x219] sm:$0xff]  ;;  %v3381_v19 = vld [vmem:[#allocation2 + $0x229] sm:$0xff] }
 0x489   :  { %14378 = vmatmul.mubr.bf16.gmra.mrb[120].mxu1 %v18845_v59  ;;  %v16693_v59 = vld [vmem:[%s24593_s2 + $0x158] sm:$0xff]  }
 0x48a   :  { %14381 = vmatprep.mubr.bf16.mxu1 %v18849_v21  ;;  %v19048_v21 = vpack.c.bf16 %v3350_v47, %v3349_v41  ;;  %v3367_v41 = vld [vmem:[#allocation2 + $0x151] sm:$0xff]  ;;  %v3368_v47 = vld [vmem:[#allocation2 + $0x159] sm:$0xff] }
 0x48b   :  { %v19094_v45 = vpack.c.bf16 %v3368_v47, %v3367_v41  ;;  %v3383_v47 = vld [vmem:[#allocation2 + $0x241] sm:$0xff] }
 0x491   :  { %14382 = vmatmul.mubr.bf16.gmra.mrb[124].mxu1 %v19028_v52 }
 0x492   :  { %14401 = vmatprep.mubr.bf16.mxu1 %v3405_v31  ;;  %v3362_v31 = vld [vmem:[#allocation2 + $0x111] sm:$0xff] }
 0x493   :  { %v19084_v9 = vpack.c.bf16 %v3362_v31, %v3361_v20  ;;  %v3379_v31 = vld [vmem:[#allocation2 + $0x211] sm:$0xff] }
 0x499   :  { %14402 = vmatmul.mubr.bf16.vlgmr.msra.gmra.mrb[64].mxu1 %v19031_v33 }
 0x49a   :  { %14466 = vmatpush3.bf16.msra.mxu1 %v16690_v6  ;;  %14405 = vmatprep.mubr.bf16.mxu1 %v19036_v23  ;;  %v19067_v6 = vpack.c.bf16 %v3356_v32, %v3355_v55  ;;  %v19100_v55 = vpack.c.bf16 %v3372_v30, %v3371_v1  ;;  %v3386_v1 = vld [vmem:[#allocation2 + $0x261] sm:$0xff] }
 0x49b   :  { %14467 = vmatprep.subr.bf16.mxu1 %v16691_v35 }
 0x49e   :  { %14468 = vmatpush3.bf16.msra.mxu1 %v16691_v35  ;;  %v3365_v35 = vld [vmem:[#allocation2 + $0x139] sm:$0xff] }
 0x49f   :  { %14469 = vmatprep.subr.bf16.mxu1 %v16692_v46 }
 0x4a1   :  { %14406 = vmatmul.mubr.bf16.gmra.mrb[68].mxu1 %v19043_v2 }
 0x4a2   :  { %14409 = vmatprep.mubr.bf16.mxu1 %v19048_v21  ;;  %14470 = vmatpush3.bf16.msra.mxu1 %v16692_v46  ;;  %v3366_v46 = vld [vmem:[#allocation2 + $0x141] sm:$0xff] }
 0x4a3   :  { %14471 = vmatprep.subr.bf16.mxu1 %v16693_v59  ;;  %v19090_v4 = vpack.c.bf16 %v3366_v46, %v3365_v35  ;;  %v3382_v35 = vld [vmem:[#allocation2 + $0x231] sm:$0xff]  ;;  %v19109_v46 = vpack.c.bf16 %v3380_v13, %v3379_v31  ;;  %v3391_v31 = vld [vmem:[#allocation2 + $0x2a1] sm:$0xff]  ;;  %v3392_v13 = vld [vmem:[#allocation2 + $0x2a9] sm:$0xff] }
 0x4a4   :  { %v19111_v41 = vpack.c.bf16 %v3382_v35, %v3381_v19  ;;  %v3393_v19 = vld [vmem:[#allocation2 + $0x2b9] sm:$0xff]  ;;  %v3394_v35 = vld [vmem:[#allocation2 + $0x2c1] sm:$0xff] }
 0x4a6   :  { %14472 = vmatpush3.bf16.msra.mxu1 %v16693_v59  ;;  %v3369_v59 = vld [vmem:[#allocation2 + $0x169] sm:$0xff] }
 0x4a7   :  { %14473 = vmatprep.subr.bf16.mxu1 %v16694_v58 }
 0x4a9   :  { %14410 = vmatmul.mubr.bf16.gmra.mrb[72].mxu1 %v19055_v50 }
 0x4aa   :  { %14413 = vmatprep.mubr.bf16.mxu1 %v19060_v25  ;;  %14474 = vmatpush3.bf16.msra.mxu1 %v16694_v58  ;;  %v3370_v58 = vld [vmem:[#allocation2 + $0x171] sm:$0xff] }
 0x4ab   :  { %14475 = vmatprep.subr.bf16.mxu1 %v16695_v48  ;;  %v19096_v5 = vpack.c.bf16 %v3370_v58, %v3369_v59  ;;  %v3384_v59 = vld [vmem:[#allocation2 + $0x249] sm:$0xff]  ;;  %v3385_v58 = vld [vmem:[#allocation2 + $0x259] sm:$0xff] }
 0x4ac   :  { %v19115_v30 = vpack.c.bf16 %v3384_v59, %v3383_v47  ;;  %v19127_v47 = vpack.c.bf16 %v3392_v13, %v3391_v31  ;;  %v19129_v59 = vpack.c.bf16 %v3394_v35, %v3393_v19  ;;  %v3399_v31 = vld [vmem:[#allocation2 + $0x301] sm:$0xff]  ;;  %v3400_v13 = vld [vmem:[#allocation2 + $0x309] sm:$0xff]  ;;  %v3401_v19 = vld [vmem:[#allocation2 + $0x319] sm:$0xff] }
 0x4ad   :  { %v3402_v35 = vld [vmem:[#allocation2 + $0x321] sm:$0xff] }
 0x4ae   :  { %14476 = vmatpush3.bf16.msra.mxu1 %v16695_v48  ;;  %v3373_v48 = vld [vmem:[#allocation2 + $0x1c9] sm:$0xff]  ;;  %25122 = vst [vmem:[#allocation30_spill] sm:$0xff] %v19127_v47 }
 0x4af   :  { %14477 = vmatprep.subr.bf16.mxu1 %v16696_v39 }
 0x4b1   :  { %14414 = vmatmul.mubr.bf16.gmra.mrb[76].mxu1 %v19067_v6 }
 0x4b2   :  { %14417 = vmatprep.mubr.bf16.mxu1 %v19072_v28  ;;  %14478 = vmatpush3.bf16.msra.mxu1 %v16696_v39  ;;  %v3374_v39 = vld [vmem:[#allocation2 + $0x1d1] sm:$0xff] }
 0x4b3   :  { %14479 = vmatprep.subr.bf16.mxu1 %v16697_v10  ;;  %v3421_v32 = vpack.c.bf16 %v3374_v39, %v3373_v48  ;;  %v19117_v48 = vpack.c.bf16 %v3386_v1, %v3385_v58  ;;  %v3387_v39 = vld [vmem:[#allocation2 + $0x271] sm:$0xff]  ;;  %v3396_v1 = vld [vmem:[#allocation2 + $0x2d9] sm:$0xff] }
 0x4b4   :  { %v3395_v58 = vld [vmem:[#allocation2 + $0x2d1] sm:$0xff] }
 0x4b6   :  { %14480 = vmatpush3.bf16.msra.mxu1 %v16697_v10  ;;  %v3377_v10 = vld [vmem:[#allocation2 + $0x1f9] sm:$0xff] }
 0x4b7   :  { %14545 = vmatprep.subr.bf16.mxu1 %v19079_v38  ;;  %v19105_v20 = vpack.c.bf16 %v3378_v61, %v3377_v10  ;;  %v19123_v61 = vpack.c.bf16 %v3390_v24, %v3389_v53  ;;  %v19133_v53 = vpack.c.bf16 %v3396_v1, %v3395_v58  ;;  %v3403_v58 = vld [vmem:[#allocation2 + $0x331] sm:$0xff]  ;;  %v3404_v1 = vld [vmem:[#allocation2 + $0x339] sm:$0xff] }
 0x4b9   :  { %14418 = vmatmul.mubr.bf16.gmra.mrb[80].mxu1 %v19081_v62  ;;  %25121 = vst [vmem:[#allocation28_spill] sm:$0xff] %v19123_v61 }
 0x4ba   :  { %14421 = vmatprep.mubr.bf16.mxu1 %v19084_v9 }
 0x4c1   :  { %14422 = vmatmul.mubr.bf16.gmra.mrb[84].mxu1 %v19088_v14 }
 0x4c2   :  { %14425 = vmatprep.mubr.bf16.mxu1 %v19090_v4 }
 0x4c9   :  { %14426 = vmatmul.mubr.bf16.gmra.mrb[88].mxu1 %v19094_v45 }
 0x4ca   :  { %14429 = vmatprep.mubr.bf16.mxu1 %v19096_v5 }
 0x4d1   :  { %14430 = vmatmul.mubr.bf16.gmra.mrb[92].mxu1 %v19100_v55 }
 0x4d2   :  { %14433 = vmatprep.mubr.bf16.mxu1 %v3421_v32  ;;  %v3388_v32 = vld [vmem:[#allocation2 + $0x279] sm:$0xff] }
 0x4d3   :  { %v19121_v10 = vpack.c.bf16 %v3388_v32, %v3387_v39  ;;  %v3397_v39 = vld [vmem:[#allocation2 + $0x2e9] sm:$0xff]  ;;  %v3398_v32 = vld [vmem:[#allocation2 + $0x2f1] sm:$0xff] }
 0x4d4   :  { %v19135_v24 = vpack.c.bf16 %v3398_v32, %v3397_v39  ;;  %v19145_v39 = vpack.c.bf16 %v3404_v1, %v3403_v58  ;;  %v16699_v32 = vld [vmem:[%s24593_s2 + $0x188] sm:$0xff]   ;;  %v4379_v58 = vld [vmem:[#allocation2 + $0x98] sm:$0xff] }
 0x4d9   :  { %14434 = vmatmul.mubr.bf16.gmra.mrb[96].mxu1 %v19103_v11 }
 0x4da   :  { %14437 = vmatprep.mubr.bf16.mxu1 %v19105_v20 }
 0x4e1   :  { %14438 = vmatmul.mubr.bf16.gmra.mrb[100].mxu1 %v19109_v46 }
 0x4e2   :  { %14441 = vmatprep.mubr.bf16.mxu1 %v19111_v41 }
 0x4e9   :  { %14442 = vmatmul.mubr.bf16.gmra.mrb[104].mxu1 %v19115_v30 }
 0x4ea   :  { %14445 = vmatprep.mubr.bf16.mxu1 %v19117_v48 }
 0x4f1   :  { %14446 = vmatmul.mubr.bf16.gmra.mrb[108].mxu1 %v19121_v10 }
 0x4f2   :  { %14449 = vmatprep.mubr.bf16.mxu1 %v19123_v61  ;;  %v19139_v61 = vpack.c.bf16 %v3400_v13, %v3399_v31  ;;  %v16700_v31 = vld [vmem:[%s24593_s2 + $0x190] sm:$0xff]   ;;  %v4376_v13 = vld [vmem:[#allocation2 + $0x78] sm:$0xff] }
 0x4f9   :  { %14450 = vmatmul.mubr.bf16.gmra.mrb[112].mxu1 %v19127_v47  ;;  %v19141_v47 = vpack.c.bf16 %v3402_v35, %v3401_v19  ;;  %v4377_v19 = vld [vmem:[#allocation2 + $0x80] sm:$0xff]  ;;  %v4378_v35 = vld [vmem:[#allocation2 + $0x90] sm:$0xff] }
 0x4fa   :  { %14453 = vmatprep.mubr.bf16.mxu1 %v19129_v59  ;;  %v4437_v1 = vpack.c.bf16 %v4377_v19, %v4376_v13  ;;  %v4394_v13 = vld [vmem:[#allocation2 + $0x150] sm:$0xff]  ;;  %v4395_v19 = vld [vmem:[#allocation2 + $0x158] sm:$0xff] }
 0x501   :  { %14454 = vmatmul.mubr.bf16.gmra.mrb[116].mxu1 %v19133_v53 }
 0x502   :  { %14457 = vmatprep.mubr.bf16.mxu1 %v19135_v24 }
 0x509   :  { %14458 = vmatmul.mubr.bf16.gmra.mrb[120].mxu1 %v19139_v61 }
 0x50a   :  { %14461 = vmatprep.mubr.bf16.mxu1 %v19141_v47 }
 0x511   :  { %14462 = vmatmul.mubr.bf16.gmra.mrb[124].mxu1 %v19145_v39 }
 0x512   :  { %14481 = vmatprep.mubr.bf16.mxu1 %v18852_v0  ;;  %v16701_v0 = vld [vmem:[%s24593_s2 + $0x198] sm:$0xff]  }
 0x519   :  { %14482 = vmatmul.mubr.bf16.vlgmr.msra.gmra.mrb[64].mxu1 %v18857_v26  ;;  %v16702_v26 = vld [vmem:[%s24593_s2 + $0x1a0] sm:$0xff]  }
 0x51a   :  { %14546 = vmatpush3.bf16.msra.mxu1 %v19079_v38  ;;  %14485 = vmatprep.mubr.bf16.mxu1 %v18865_v16  ;;  %v16703_v16 = vld [vmem:[%s24593_s2 + $0x1a8] sm:$0xff]  }
 0x51b   :  { %14547 = vmatprep.subr.bf16.mxu1 %v16699_v32 }
 0x51e   :  { %14548 = vmatpush3.bf16.msra.mxu1 %v16699_v32  ;;  %v16709_v32 = vld [vmem:[%s24593_s2 + $0x1d8] sm:$0xff]  }
 0x51f   :  { %14549 = vmatprep.subr.bf16.mxu1 %v16700_v31 }
 0x521   :  { %14486 = vmatmul.mubr.bf16.gmra.mrb[68].mxu1 %v18870_v43  ;;  %v16704_v43 = vld [vmem:[%s24593_s2 + $0x1b0] sm:$0xff]  }
 0x522   :  { %14489 = vmatprep.mubr.bf16.mxu1 %v18877_v54  ;;  %14550 = vmatpush3.bf16.msra.mxu1 %v16700_v31  ;;  %v16705_v54 = vld [vmem:[%s24593_s2 + $0x1b8] sm:$0xff]   ;;  %v4438_v31 = vpack.c.bf16 %v4379_v58, %v4378_v35  ;;  %v4446_v58 = vpack.c.bf16 %v4395_v19, %v4394_v13  ;;  %v4418_v13 = vld [vmem:[#allocation2 + $0x2a0] sm:$0xff]  ;;  %v4419_v19 = vld [vmem:[#allocation2 + $0x2a8] sm:$0xff] }
 0x523   :  { %14551 = vmatprep.subr.bf16.mxu1 %v16701_v0 }
 0x526   :  { %14552 = vmatpush3.bf16.msra.mxu1 %v16701_v0  ;;  %v16710_v0 = vld [vmem:[%s24593_s2 + $0x1e0] sm:$0xff]  }
 0x527   :  { %14553 = vmatprep.subr.bf16.mxu1 %v16702_v26 }
 0x529   :  { %14490 = vmatmul.mubr.bf16.gmra.mrb[72].mxu1 %v18882_v42  ;;  %v16706_v42 = vld [vmem:[%s24593_s2 + $0x1c0] sm:$0xff]  }
 0x52a   :  { %14493 = vmatprep.mubr.bf16.mxu1 %v18889_v29  ;;  %14554 = vmatpush3.bf16.msra.mxu1 %v16702_v26  ;;  %v3885_v29 = vld [vmem:[#allocation2 + $0x182] sm:$0xff] }
 0x52b   :  { %14555 = vmatprep.subr.bf16.mxu1 %v16703_v16  ;;  %v4380_v26 = vld [vmem:[#allocation2 + $0xa8] sm:$0xff] }
 0x52e   :  { %14556 = vmatpush3.bf16.msra.mxu1 %v16703_v16  ;;  %v4381_v16 = vld [vmem:[#allocation2 + $0xb0] sm:$0xff] }
 0x52f   :  { %14557 = vmatprep.subr.bf16.mxu1 %v16704_v43 }
 0x531   :  { %14494 = vmatmul.mubr.bf16.gmra.mrb[76].mxu1 %v18894_v34  ;;  %v3886_v34 = vld [vmem:[#allocation2 + $0x18a] sm:$0xff] }
 0x532   :  { %14497 = vmatprep.mubr.bf16.mxu1 %v18903_v27  ;;  %14558 = vmatpush3.bf16.msra.mxu1 %v16704_v43  ;;  %v19188_v27 = vpack.c.bf16 %v3886_v34, %v3885_v29  ;;  %v4382_v43 = vld [vmem:[#allocation2 + $0xc0] sm:$0xff]  ;;  %v16711_v29 = vld [vmem:[%s24593_s2 + $0x1e8] sm:$0xff]  }
 0x533   :  { %14559 = vmatprep.subr.bf16.mxu1 %v16705_v54 }
 0x536   :  { %14560 = vmatpush3.bf16.msra.mxu1 %v16705_v54  ;;  %v4383_v54 = vld [vmem:[#allocation2 + $0xc8] sm:$0xff] }
 0x537   :  { %14625 = vmatprep.subr.bf16.mxu1 %v16706_v42  ;;  %v4440_v34 = vpack.c.bf16 %v4383_v54, %v4382_v43  ;;  %v4403_v43 = vld [vmem:[#allocation2 + $0x1e8] sm:$0xff] }
 0x539   :  { %14498 = vmatmul.mubr.bf16.gmra.mrb[80].mxu1 %v18906_v15  ;;  %v25123_v15 = vld [vmem:[#allocation38_spill] sm:$0xff] }
 0x53a   :  { %14501 = vmatprep.mubr.bf16.mxu1 %v18910_v18  ;;  %v25124_v18 = vld [vmem:[#allocation21_spill] sm:$0xff] }
 0x541   :  { %14502 = vmatmul.mubr.bf16.gmra.mrb[84].mxu1 %v18912_v7  ;;  %v25125_v7 = vld [vmem:[#allocation23_spill] sm:$0xff] }
 0x542   :  { %14505 = vmatprep.mubr.bf16.mxu1 %v18916_v40  ;;  %v25126_v40 = vld [vmem:[#allocation25_spill] sm:$0xff] }
 0x549   :  { %14506 = vmatmul.mubr.bf16.gmra.mrb[88].mxu1 %v18918_v44  ;;  %v3917_v44 = vld [vmem:[#allocation2 + $0x332] sm:$0xff] }
 0x54a   :  { %14509 = vmatprep.mubr.bf16.mxu1 %v18922_v36  ;;  %v3918_v36 = vld [vmem:[#allocation2 + $0x33a] sm:$0xff] }
 0x551   :  { %14510 = vmatmul.mubr.bf16.gmra.mrb[92].mxu1 %v19188_v27 }
 0x552   :  { %14513 = vmatprep.mubr.bf16.mxu1 %v18925_v12  ;;  %v4370_v12 = vld [vmem:[#allocation2 + $0x30] sm:$0xff] }
 0x559   :  { %14514 = vmatmul.mubr.bf16.gmra.mrb[96].mxu1 %v18927_v8  ;;  %v4371_v8 = vld [vmem:[#allocation2 + $0x38] sm:$0xff] }
 0x55a   :  { %14517 = vmatprep.mubr.bf16.mxu1 %v18931_v57  ;;  %v19206_v57 = vpack.c.bf16 %v3918_v36, %v3917_v44  ;;  %v4387_v44 = vld [vmem:[#allocation2 + $0xf8] sm:$0xff] }
 0x561   :  { %14518 = vmatmul.mubr.bf16.gmra.mrb[100].mxu1 %v18933_v56  ;;  %v4434_v56 = vpack.c.bf16 %v4371_v8, %v4370_v12  ;;  %v16713_v12 = vld [vmem:[%s24593_s2 + $0x1f8] sm:$0xff]  }
 0x562   :  { %14521 = vmatprep.mubr.bf16.mxu1 %v18937_v17  ;;  %v4372_v17 = vld [vmem:[#allocation2 + $0x48] sm:$0xff] }
 0x569   :  { %14522 = vmatmul.mubr.bf16.gmra.mrb[104].mxu1 %v25123_v15  ;;  %v16712_v15 = vld [vmem:[%s24593_s2 + $0x1f0] sm:$0xff]  }
 0x56a   :  { %14525 = vmatprep.mubr.bf16.mxu1 %v25124_v18  ;;  %v4384_v18 = vld [vmem:[#allocation2 + $0xd8] sm:$0xff] }
 0x571   :  { %14526 = vmatmul.mubr.bf16.gmra.mrb[108].mxu1 %v25125_v7  ;;  %v4385_v7 = vld [vmem:[#allocation2 + $0xe0] sm:$0xff] }
 0x572   :  { %14529 = vmatprep.mubr.bf16.mxu1 %v25126_v40  ;;  %v4386_v40 = vld [vmem:[#allocation2 + $0xf0] sm:$0xff]  ;;  %v4441_v36 = vpack.c.bf16 %v4385_v7, %v4384_v18 }
 0x573   :  { %v4442_v8 = vpack.c.bf16 %v4387_v44, %v4386_v40  ;;  %v4408_v40 = vld [vmem:[#allocation2 + $0x228] sm:$0xff]  ;;  %v4409_v44 = vld [vmem:[#allocation2 + $0x230] sm:$0xff] }
 0x579   :  { %14530 = vmatmul.mubr.bf16.gmra.mrb[112].mxu1 %v18951_v51  ;;  %v4374_v51 = vld [vmem:[#allocation2 + $0x60] sm:$0xff] }
 0x57a   :  { %14533 = vmatprep.mubr.bf16.mxu1 %v18955_v22  ;;  %v4373_v22 = vld [vmem:[#allocation2 + $0x50] sm:$0xff] }
 0x57b   :  { %v4435_v38 = vpack.c.bf16 %v4373_v22, %v4372_v17  ;;  %v4388_v17 = vld [vmem:[#allocation2 + $0x108] sm:$0xff]  ;;  %v4389_v22 = vld [vmem:[#allocation2 + $0x110] sm:$0xff] }
 0x581   :  { %14534 = vmatmul.mubr.bf16.gmra.mrb[116].mxu1 %v18957_v49  ;;  %v4375_v49 = vld [vmem:[#allocation2 + $0x68] sm:$0xff] }
 0x582   :  { %14537 = vmatprep.mubr.bf16.mxu1 %v18961_v3  ;;  %v16707_v3 = vld [vmem:[%s24593_s2 + $0x1c8] sm:$0xff]  }
 0x589   :  { %14538 = vmatmul.mubr.bf16.gmra.mrb[120].mxu1 %v18963_v60  ;;  %v4436_v60 = vpack.c.bf16 %v4375_v49, %v4374_v51  ;;  %v4390_v51 = vld [vmem:[#allocation2 + $0x120] sm:$0xff]  ;;  %v4391_v49 = vld [vmem:[#allocation2 + $0x128] sm:$0xff] }
 0x58a   :  { %14541 = vmatprep.mubr.bf16.mxu1 %v18967_v63  ;;  %v16708_v63 = vld [vmem:[%s24593_s2 + $0x1d0] sm:$0xff]  }
 0x591   :  { %14542 = vmatmul.mubr.bf16.gmra.mrb[124].mxu1 %v19206_v57 }
 0x592   :  { %14561 = vmatprep.mubr.bf16.mxu1 %v4434_v56  ;;  %v19233_v56 = vld [vmem:[%s24593_s2 + $0x200] sm:$0xff]  }
 0x599   :  { %14562 = vmatmul.mubr.bf16.vlgmr.msra.gmra.mrb[64].mxu1 %v4435_v38  ;;  %v4443_v38 = vpack.c.bf16 %v4389_v22, %v4388_v17  ;;  %v4412_v17 = vld [vmem:[#allocation2 + $0x258] sm:$0xff]  ;;  %v4413_v22 = vld [vmem:[#allocation2 + $0x260] sm:$0xff] }
 0x59a   :  { %14626 = vmatpush3.bf16.msra.mxu1 %v16706_v42  ;;  %14565 = vmatprep.mubr.bf16.mxu1 %v4436_v60  ;;  %v4439_v42 = vpack.c.bf16 %v4381_v16, %v4380_v26  ;;  %v4392_v60 = vld [vmem:[#allocation2 + $0x138] sm:$0xff]  ;;  %v4402_v16 = vld [vmem:[#allocation2 + $0x1e0] sm:$0xff] }
 0x59b   :  { %14627 = vmatprep.subr.bf16.mxu1 %v16707_v3  ;;  %v4450_v54 = vpack.c.bf16 %v4403_v43, %v4402_v16 }
 0x59e   :  { %14628 = vmatpush3.bf16.msra.mxu1 %v16707_v3  ;;  %v4444_v3 = vpack.c.bf16 %v4391_v49, %v4390_v51  ;;  %v4414_v51 = vld [vmem:[#allocation2 + $0x270] sm:$0xff]  ;;  %v4415_v49 = vld [vmem:[#allocation2 + $0x278] sm:$0xff] }
 0x59f   :  { %14629 = vmatprep.subr.bf16.mxu1 %v16708_v63 }
 0x5a1   :  { %14566 = vmatmul.mubr.bf16.gmra.mrb[68].mxu1 %v4437_v1  ;;  %v4396_v1 = vld [vmem:[#allocation2 + $0x168] sm:$0xff] }
 0x5a2   :  { %14569 = vmatprep.mubr.bf16.mxu1 %v4438_v31  ;;  %14630 = vmatpush3.bf16.msra.mxu1 %v16708_v63  ;;  %v4393_v63 = vld [vmem:[#allocation2 + $0x140] sm:$0xff] }
 0x5a3   :  { %14631 = vmatprep.subr.bf16.mxu1 %v16709_v32  ;;  %v4445_v35 = vpack.c.bf16 %v4393_v63, %v4392_v60  ;;  %v4416_v60 = vld [vmem:[#allocation2 + $0x288] sm:$0xff]  ;;  %v4417_v63 = vld [vmem:[#allocation2 + $0x290] sm:$0xff] }
 0x5a6   :  { %14632 = vmatpush3.bf16.msra.mxu1 %v16709_v32  ;;  %v4397_v32 = vld [vmem:[#allocation2 + $0x170] sm:$0xff] }
 0x5a7   :  { %14633 = vmatprep.subr.bf16.mxu1 %v16710_v0  ;;  %v4447_v31 = vpack.c.bf16 %v4397_v32, %v4396_v1  ;;  %v4420_v1 = vld [vmem:[#allocation2 + $0x2b8] sm:$0xff]  ;;  %v4421_v32 = vld [vmem:[#allocation2 + $0x2c0] sm:$0xff] }
 0x5a8   :  { %v4459_v16 = vpack.c.bf16 %v4421_v32, %v4420_v1  ;;  %v5420_v32 = vld [vmem:[#allocation2 + $0x13a] sm:$0xff] }
 0x5a9   :  { %14570 = vmatmul.mubr.bf16.gmra.mrb[72].mxu1 %v4439_v42  ;;  %v4404_v42 = vld [vmem:[#allocation2 + $0x1f8] sm:$0xff] }
 0x5aa   :  { %14573 = vmatprep.mubr.bf16.mxu1 %v4440_v34  ;;  %14634 = vmatpush3.bf16.msra.mxu1 %v16710_v0  ;;  %v16811_v0 = vld [vmem:[#allocation2] sm:$0xff]  ;;  %v4406_v34 = vld [vmem:[#allocation2 + $0x210] sm:$0xff] }
 0x5ab   :  { %14635 = vmatprep.subr.bf16.mxu1 %v16711_v29  ;;  %v4449_v26 = vpack.c.bf16 %v16811_v0, %v16811_v0  ;;  %v4423_v0 = vld [vmem:[#allocation2 + $0x2d8] sm:$0xff] }
 0x5ae   :  { %14636 = vmatpush3.bf16.msra.mxu1 %v16711_v29  ;;  %v4405_v29 = vld [vmem:[#allocation2 + $0x200] sm:$0xff] }
 0x5af   :  { %14637 = vmatprep.subr.bf16.mxu1 %v16712_v15  ;;  %v4451_v18 = vpack.c.bf16 %v4405_v29, %v4404_v42  ;;  %v4425_v42 = vld [vmem:[#allocation2 + $0x2f0] sm:$0xff]  ;;  %v4426_v29 = vld [vmem:[#allocation2 + $0x300] sm:$0xff] }
 0x5b1   :  { %14574 = vmatmul.mubr.bf16.gmra.mrb[76].mxu1 %v4441_v36  ;;  %v4410_v36 = vld [vmem:[#allocation2 + $0x240] sm:$0xff] }
 0x5b2   :  { %14577 = vmatprep.mubr.bf16.mxu1 %v4442_v8  ;;  %14638 = vmatpush3.bf16.msra.mxu1 %v16712_v15  ;;  %v4407_v15 = vld [vmem:[#allocation2 + $0x218] sm:$0xff] }
 0x5b3   :  { %14639 = vmatprep.subr.bf16.mxu1 %v16713_v12  ;;  %v4452_v7 = vpack.c.bf16 %v4407_v15, %v4406_v34  ;;  %v4427_v34 = vld [vmem:[#allocation2 + $0x308] sm:$0xff] }
 0x5b6   :  { %14640 = vmatpush3.bf16.msra.mxu1 %v16713_v12  ;;  %v4411_v12 = vld [vmem:[#allocation2 + $0x248] sm:$0xff] }
 0x5b7   :  { %14705 = vmatprep.subr.bf16.mxu1 %v19233_v56  ;;  %v4454_v8 = vpack.c.bf16 %v4411_v12, %v4410_v36  ;;  %v16715_v36 = vld [vmem:[%s24593_s2 + $0x208] sm:$0xff]   ;;  %v16716_v12 = vld [vmem:[%s24593_s2 + $0x210] sm:$0xff]  }
 0x5b9   :  { %14578 = vmatmul.mubr.bf16.gmra.mrb[80].mxu1 %v4443_v38  ;;  %v4455_v38 = vpack.c.bf16 %v4413_v22, %v4412_v17  ;;  %v5412_v22 = vld [vmem:[#allocation2 + $0xda] sm:$0xff] }
 0x5ba   :  { %14581 = vmatprep.mubr.bf16.mxu1 %v4444_v3  ;;  %v4456_v3 = vpack.c.bf16 %v4415_v49, %v4414_v51  ;;  %v5413_v51 = vld [vmem:[#allocation2 + $0xe2] sm:$0xff]  ;;  %v5414_v49 = vld [vmem:[#allocation2 + $0xf2] sm:$0xff] }
 0x5c1   :  { %14582 = vmatmul.mubr.bf16.gmra.mrb[84].mxu1 %v4445_v35  ;;  %v4457_v35 = vpack.c.bf16 %v4417_v63, %v4416_v60  ;;  %v5416_v63 = vld [vmem:[#allocation2 + $0x10a] sm:$0xff] }
 0x5c2   :  { %14585 = vmatprep.mubr.bf16.mxu1 %v4446_v58  ;;  %v4458_v58 = vpack.c.bf16 %v4419_v19, %v4418_v13  ;;  %v5417_v13 = vld [vmem:[#allocation2 + $0x112] sm:$0xff]  ;;  %v5418_v19 = vld [vmem:[#allocation2 + $0x122] sm:$0xff] }
 0x5c9   :  { %14586 = vmatmul.mubr.bf16.gmra.mrb[88].mxu1 %v4447_v31  ;;  %v4422_v31 = vld [vmem:[#allocation2 + $0x2d0] sm:$0xff] }
 0x5ca   :  { %14589 = vmatprep.mubr.bf16.mxu1 %v19010_v37  ;;  %v4453_v37 = vpack.c.bf16 %v4409_v44, %v4408_v40  ;;  %v4460_v43 = vpack.c.bf16 %v4423_v0, %v4422_v31  ;;  %v4429_v40 = vld [vmem:[#allocation2 + $0x320] sm:$0xff]  ;;  %v5422_v0 = vld [vmem:[#allocation2 + $0x152] sm:$0xff] }
 0x5cb   :  { %v5421_v31 = vld [vmem:[#allocation2 + $0x142] sm:$0xff] }
 0x5d1   :  { %14590 = vmatmul.mubr.bf16.gmra.mrb[92].mxu1 %v4449_v26 }
 0x5d2   :  { %14593 = vmatprep.mubr.bf16.mxu1 %v4450_v54  ;;  %v4424_v54 = vld [vmem:[#allocation2 + $0x2e8] sm:$0xff] }
 0x5d3   :  { %v4461_v15 = vpack.c.bf16 %v4425_v42, %v4424_v54  ;;  %v5424_v42 = vld [vmem:[#allocation2 + $0x16a] sm:$0xff] }
 0x5d9   :  { %14594 = vmatmul.mubr.bf16.gmra.mrb[96].mxu1 %v4451_v18  ;;  %v4462_v18 = vpack.c.bf16 %v4427_v34, %v4426_v29  ;;  %v5425_v29 = vld [vmem:[#allocation2 + $0x172] sm:$0xff] }
 0x5da   :  { %14597 = vmatprep.mubr.bf16.mxu1 %v4452_v7  ;;  %v4428_v7 = vld [vmem:[#allocation2 + $0x318] sm:$0xff]  ;;  %v5475_v34 = vpack.c.bf16 %v5425_v29, %v5424_v42 }
 0x5db   :  { %v4463_v44 = vpack.c.bf16 %v4429_v40, %v4428_v7  ;;  %v5430_v40 = vld [vmem:[#allocation2 + $0x1e2] sm:$0xff] }
 0x5e1   :  { %14598 = vmatmul.mubr.bf16.gmra.mrb[100].mxu1 %v4453_v37  ;;  %v5411_v37 = vld [vmem:[#allocation2 + $0xca] sm:$0xff] }
 0x5e2   :  { %14601 = vmatprep.mubr.bf16.mxu1 %v4454_v8 }
 0x5e9   :  { %14602 = vmatmul.mubr.bf16.gmra.mrb[104].mxu1 %v4455_v38  ;;  %v5415_v38 = vld [vmem:[#allocation2 + $0xfa] sm:$0xff] }
 0x5ea   :  { %14605 = vmatprep.mubr.bf16.mxu1 %v4456_v3  ;;  %v5469_v3 = vpack.c.bf16 %v5413_v51, %v5412_v22  ;;  %v5470_v60 = vpack.c.bf16 %v5415_v38, %v5414_v49  ;;  %v5456_v22 = vld [vmem:[#allocation2 + $0x31a] sm:$0xff]  ;;  %v5457_v51 = vld [vmem:[#allocation2 + $0x322] sm:$0xff]  ;;  %v5460_v38 = vld [vmem:[#allocation2 + $0x34a] sm:$0xff] }
 0x5eb   :  { %v5491_v49 = vpack.c.bf16 %v5457_v51, %v5456_v22 }
 0x5f1   :  { %14606 = vmatmul.mubr.bf16.gmra.mrb[108].mxu1 %v4457_v35  ;;  %v5419_v35 = vld [vmem:[#allocation2 + $0x12a] sm:$0xff] }
 0x5f2   :  { %14609 = vmatprep.mubr.bf16.mxu1 %v4458_v58  ;;  %v5471_v58 = vpack.c.bf16 %v5417_v13, %v5416_v63  ;;  %v5472_v1 = vpack.c.bf16 %v5419_v35, %v5418_v19 }
 0x5f9   :  { %14610 = vmatmul.mubr.bf16.gmra.mrb[112].mxu1 %v4459_v16  ;;  %v5423_v16 = vld [vmem:[#allocation2 + $0x15a] sm:$0xff] }
 0x5fa   :  { %14613 = vmatprep.mubr.bf16.mxu1 %v4460_v43  ;;  %v5473_v43 = vpack.c.bf16 %v5421_v31, %v5420_v32  ;;  %v5474_v54 = vpack.c.bf16 %v5423_v16, %v5422_v0 }
 0x601   :  { %14614 = vmatmul.mubr.bf16.gmra.mrb[116].mxu1 %v4461_v15  ;;  %v5428_v15 = vld [vmem:[#allocation2 + $0x19a] sm:$0xff] }
 0x602   :  { %14617 = vmatprep.mubr.bf16.mxu1 %v4462_v18  ;;  %v5429_v18 = vld [vmem:[#allocation2 + $0x1a2] sm:$0xff] }
 0x603   :  { %v5477_v7 = vpack.c.bf16 %v5429_v18, %v5428_v15 }
 0x609   :  { %14618 = vmatmul.mubr.bf16.gmra.mrb[120].mxu1 %v4463_v44  ;;  %v5431_v44 = vld [vmem:[#allocation2 + $0x1ea] sm:$0xff] }
 0x60a   :  { %14621 = vmatprep.mubr.bf16.mxu1 %v19028_v52  ;;  %v16717_v52 = vld [vmem:[%s24593_s2 + $0x218] sm:$0xff]  }
 0x611   :  { %14622 = vmatmul.mubr.bf16.gmra.mrb[124].mxu1 %v4449_v26  ;;  %v5410_v26 = vld [vmem:[#allocation2 + $0xc2] sm:$0xff] }
 0x612   :  { %14641 = vmatprep.mubr.bf16.mxu1 %v19031_v33  ;;  %v16718_v33 = vld [vmem:[%s24593_s2 + $0x220] sm:$0xff]   ;;  %v5468_v17 = vpack.c.bf16 %v5411_v37, %v5410_v26  ;;  %v5455_v37 = vld [vmem:[#allocation2 + $0x30a] sm:$0xff] }
 0x613   :  { %v5454_v26 = vld [vmem:[#allocation2 + $0x302] sm:$0xff] }
 0x619   :  { %14642 = vmatmul.mubr.bf16.vlgmr.msra.gmra.mrb[64].mxu1 %v19036_v23  ;;  %v16719_v23 = vld [vmem:[%s24593_s2 + $0x228] sm:$0xff]  }
 0x61a   :  { %14706 = vmatpush3.bf16.msra.mxu1 %v19233_v56  ;;  %14645 = vmatprep.mubr.bf16.mxu1 %v19043_v2  ;;  %v16720_v2 = vld [vmem:[%s24593_s2 + $0x230] sm:$0xff]  }
 0x61b   :  { %14707 = vmatprep.subr.bf16.mxu1 %v16715_v36  ;;  %v5409_v56 = vld [vmem:[#allocation2 + $0xb2] sm:$0xff] }
 0x61e   :  { %14708 = vmatpush3.bf16.msra.mxu1 %v16715_v36  ;;  %v5478_v36 = vpack.c.bf16 %v5431_v44, %v5430_v40 }
 0x61f   :  { %14709 = vmatprep.subr.bf16.mxu1 %v16716_v12 }
 0x621   :  { %14646 = vmatmul.mubr.bf16.gmra.mrb[68].mxu1 %v19048_v21  ;;  %v16721_v21 = vld [vmem:[%s24593_s2 + $0x238] sm:$0xff]  }
 0x622   :  { %14649 = vmatprep.mubr.bf16.mxu1 %v19055_v50  ;;  %14710 = vmatpush3.bf16.msra.mxu1 %v16716_v12  ;;  %v4914_v50 = vld [vmem:[#allocation2 + $0x199] sm:$0xff] }
 0x623   :  { %14711 = vmatprep.subr.bf16.mxu1 %v16717_v52  ;;  %v5432_v12 = vld [vmem:[#allocation2 + $0x1fa] sm:$0xff] }
 0x626   :  { %14712 = vmatpush3.bf16.msra.mxu1 %v16717_v52  ;;  %v5433_v52 = vld [vmem:[#allocation2 + $0x202] sm:$0xff] }
 0x627   :  { %14713 = vmatprep.subr.bf16.mxu1 %v16718_v33 }
 0x629   :  { %14650 = vmatmul.mubr.bf16.gmra.mrb[72].mxu1 %v19060_v25  ;;  %v4915_v25 = vld [vmem:[#allocation2 + $0x1a1] sm:$0xff] }
 0x62a   :  { %14653 = vmatprep.mubr.bf16.mxu1 %v19067_v6  ;;  %14714 = vmatpush3.bf16.msra.mxu1 %v16718_v33  ;;  %v4963_v6 = vpack.c.bf16 %v4915_v25, %v4914_v50  ;;  %v5434_v33 = vld [vmem:[#allocation2 + $0x212] sm:$0xff]  ;;  %v5436_v50 = vld [vmem:[#allocation2 + $0x22a] sm:$0xff] }
 0x62b   :  { %14715 = vmatprep.subr.bf16.mxu1 %v16719_v23  ;;  %v5437_v25 = vld [vmem:[#allocation2 + $0x232] sm:$0xff] }
 0x62e   :  { %14716 = vmatpush3.bf16.msra.mxu1 %v16719_v23  ;;  %v5435_v23 = vld [vmem:[#allocation2 + $0x21a] sm:$0xff] }
 0x62f   :  { %14717 = vmatprep.subr.bf16.mxu1 %v16720_v2 }
 0x631   :  { %14654 = vmatmul.mubr.bf16.gmra.mrb[76].mxu1 %v19072_v28  ;;  %v25127_v28 = vld [vmem:[#allocation28_spill] sm:$0xff] }
 0x632   :  { %14657 = vmatprep.mubr.bf16.mxu1 %v19081_v62  ;;  %14718 = vmatpush3.bf16.msra.mxu1 %v16720_v2  ;;  %v25128_v62 = vld [vmem:[#allocation30_spill] sm:$0xff]  ;;  %v5479_v2 = vpack.c.bf16 %v5433_v52, %v5432_v12 }
 0x633   :  { %14719 = vmatprep.subr.bf16.mxu1 %v16721_v21 }
 0x636   :  { %14720 = vmatpush3.bf16.msra.mxu1 %v16721_v21  ;;  %v5480_v21 = vpack.c.bf16 %v5435_v23, %v5434_v33 }
 0x639   :  { %14658 = vmatmul.mubr.bf16.gmra.mrb[80].mxu1 %v19084_v9  ;;  %v4946_v9 = vld [vmem:[#allocation2 + $0x349] sm:$0xff] }
 0x63a   :  { %14661 = vmatprep.mubr.bf16.mxu1 %v19088_v14  ;;  %v4947_v14 = vld [vmem:[#allocation2 + $0x351] sm:$0xff] }
 0x641   :  { %14662 = vmatmul.mubr.bf16.gmra.mrb[84].mxu1 %v19090_v4  ;;  %v4979_v4 = vpack.c.bf16 %v4947_v14, %v4946_v9  ;;  %v5440_v9 = vld [vmem:[#allocation2 + $0x25a] sm:$0xff]  ;;  %v5441_v14 = vld [vmem:[#allocation2 + $0x262] sm:$0xff] }
 0x642   :  { %14665 = vmatprep.mubr.bf16.mxu1 %v19094_v45  ;;  %v5398_v45 = vld [vmem:[#allocation2 + $0x32] sm:$0xff] }
 0x649   :  { %14666 = vmatmul.mubr.bf16.gmra.mrb[88].mxu1 %v19096_v5  ;;  %v5399_v5 = vld [vmem:[#allocation2 + $0x3a] sm:$0xff] }
 0x64a   :  { %14669 = vmatprep.mubr.bf16.mxu1 %v19100_v55  ;;  %v5462_v55 = vpack.c.bf16 %v5399_v5, %v5398_v45  ;;  %v5443_v45 = vld [vmem:[#allocation2 + $0x27a] sm:$0xff]  ;;  %v5483_v5 = vpack.c.bf16 %v5441_v14, %v5440_v9 }
 0x651   :  { %14670 = vmatmul.mubr.bf16.gmra.mrb[92].mxu1 %v4963_v6  ;;  %v5438_v6 = vld [vmem:[#allocation2 + $0x242] sm:$0xff] }
 0x652   :  { %14673 = vmatprep.mubr.bf16.mxu1 %v19103_v11  ;;  %v5400_v11 = vld [vmem:[#allocation2 + $0x4a] sm:$0xff] }
 0x659   :  { %14674 = vmatmul.mubr.bf16.gmra.mrb[96].mxu1 %v19105_v20  ;;  %v5401_v20 = vld [vmem:[#allocation2 + $0x52] sm:$0xff] }
 0x65a   :  { %14677 = vmatprep.mubr.bf16.mxu1 %v19109_v46  ;;  %v5402_v46 = vld [vmem:[#allocation2 + $0x62] sm:$0xff] }
 0x661   :  { %14678 = vmatmul.mubr.bf16.gmra.mrb[100].mxu1 %v19111_v41  ;;  %v5403_v41 = vld [vmem:[#allocation2 + $0x6a] sm:$0xff] }
 0x662   :  { %14681 = vmatprep.mubr.bf16.mxu1 %v19115_v30  ;;  %v5463_v30 = vpack.c.bf16 %v5401_v20, %v5400_v11  ;;  %v5444_v11 = vld [vmem:[#allocation2 + $0x28a] sm:$0xff]  ;;  %v5445_v20 = vld [vmem:[#allocation2 + $0x292] sm:$0xff] }
 0x669   :  { %14682 = vmatmul.mubr.bf16.gmra.mrb[104].mxu1 %v19117_v48  ;;  %v5464_v48 = vpack.c.bf16 %v5403_v41, %v5402_v46  ;;  %v5446_v46 = vld [vmem:[#allocation2 + $0x2a2] sm:$0xff]  ;;  %v5447_v41 = vld [vmem:[#allocation2 + $0x2aa] sm:$0xff] }
 0x66a   :  { %14685 = vmatprep.mubr.bf16.mxu1 %v19121_v10  ;;  %v5404_v10 = vld [vmem:[#allocation2 + $0x7a] sm:$0xff] }
 0x671   :  { %14686 = vmatmul.mubr.bf16.gmra.mrb[108].mxu1 %v25127_v28  ;;  %v5481_v28 = vpack.c.bf16 %v5437_v25, %v5436_v50 }
 0x672   :  { %14689 = vmatprep.mubr.bf16.mxu1 %v25128_v62 }
 0x679   :  { %14690 = vmatmul.mubr.bf16.gmra.mrb[112].mxu1 %v19129_v59  ;;  %v5407_v59 = vld [vmem:[#allocation2 + $0x9a] sm:$0xff] }
 0x67a   :  { %14693 = vmatprep.mubr.bf16.mxu1 %v19133_v53 }
 0x681   :  { %14694 = vmatmul.mubr.bf16.gmra.mrb[116].mxu1 %v19135_v24 }
 0x682   :  { %14697 = vmatprep.mubr.bf16.mxu1 %v19139_v61  ;;  %v5405_v61 = vld [vmem:[#allocation2 + $0x82] sm:$0xff] }
 0x683   :  { %v5465_v53 = vpack.c.bf16 %v5405_v61, %v5404_v10  ;;  %v5448_v10 = vld [vmem:[#allocation2 + $0x2ba] sm:$0xff]  ;;  %v5449_v61 = vld [vmem:[#allocation2 + $0x2c2] sm:$0xff] }
 0x689   :  { %14698 = vmatmul.mubr.bf16.gmra.mrb[120].mxu1 %v19141_v47  ;;  %v5406_v47 = vld [vmem:[#allocation2 + $0x92] sm:$0xff] }
 0x68a   :  { %14701 = vmatprep.mubr.bf16.mxu1 %v19145_v39  ;;  %v5466_v24 = vpack.c.bf16 %v5407_v59, %v5406_v47  ;;  %v5408_v39 = vld [vmem:[#allocation2 + $0xaa] sm:$0xff]  ;;  %v5450_v47 = vld [vmem:[#allocation2 + $0x2d2] sm:$0xff]  ;;  %v5451_v59 = vld [vmem:[#allocation2 + $0x2da] sm:$0xff] }
 0x68b   :  { %v5467_v8 = vpack.c.bf16 %v5409_v56, %v5408_v39  ;;  %v5452_v39 = vld [vmem:[#allocation2 + $0x2ea] sm:$0xff]  ;;  %v5453_v56 = vld [vmem:[#allocation2 + $0x2f2] sm:$0xff] }
 0x691   :  { %14702 = vmatmul.mubr.bf16.gmra.mrb[124].mxu1 %v4979_v4  ;;  %v5442_v4 = vld [vmem:[#allocation2 + $0x272] sm:$0xff] }
 0x692   :  { %14721 = vmatprep.mubr.bf16.mxu1 %v5462_v55  ;;  %v5484_v55 = vpack.c.bf16 %v5443_v45, %v5442_v4 }
 0x699   :  { %14722 = vmatmul.mubr.bf16.vlgmr.msra.gmra.mrb[64].mxu1 %v5463_v30  ;;  %v5485_v30 = vpack.c.bf16 %v5445_v20, %v5444_v11 }
 0x69a   :  { %14725 = vmatprep.mubr.bf16.mxu1 %v5464_v48  ;;  %v5486_v48 = vpack.c.bf16 %v5447_v41, %v5446_v46 }
 0x6a1   :  { %14726 = vmatmul.mubr.bf16.gmra.mrb[68].mxu1 %v5465_v53  ;;  %v5487_v53 = vpack.c.bf16 %v5449_v61, %v5448_v10 }
 0x6a2   :  { %14729 = vmatprep.mubr.bf16.mxu1 %v5466_v24  ;;  %v5488_v24 = vpack.c.bf16 %v5451_v59, %v5450_v47 }
 0x6a9   :  { %14730 = vmatmul.mubr.bf16.gmra.mrb[72].mxu1 %v5467_v8  ;;  %v5489_v8 = vpack.c.bf16 %v5453_v56, %v5452_v39 }
 0x6aa   :  { %14733 = vmatprep.mubr.bf16.mxu1 %v5468_v17  ;;  %v5490_v17 = vpack.c.bf16 %v5455_v37, %v5454_v26 }
 0x6b1   :  { %14734 = vmatmul.mubr.bf16.gmra.mrb[76].mxu1 %v5469_v3  ;;  %v5461_v3 = vld [vmem:[#allocation2 + $0x352] sm:$0xff] }
 0x6b2   :  { %14737 = vmatprep.mubr.bf16.mxu1 %v5470_v60  ;;  %v5493_v60 = vpack.c.bf16 %v5461_v3, %v5460_v38 }
 0x6b9   :  { %14738 = vmatmul.mubr.bf16.gmra.mrb[80].mxu1 %v5471_v58 }
 0x6ba   :  { %14741 = vmatprep.mubr.bf16.mxu1 %v5472_v1 }
 0x6c1   :  { %14742 = vmatmul.mubr.bf16.gmra.mrb[84].mxu1 %v5473_v43 }
 0x6c2   :  { %14745 = vmatprep.mubr.bf16.mxu1 %v5474_v54 }
 0x6c9   :  { %14746 = vmatmul.mubr.bf16.gmra.mrb[88].mxu1 %v5475_v34 }
 0x6ca   :  { %14749 = vmatprep.mubr.bf16.mxu1 %v19188_v27  ;;  %v5439_v27 = vld [vmem:[#allocation2 + $0x24a] sm:$0xff] }
 0x6cb   :  { %v5482_v62 = vpack.c.bf16 %v5439_v27, %v5438_v6 }
 0x6d1   :  { %14750 = vmatmul.mubr.bf16.gmra.mrb[92].mxu1 %v5477_v7 }
 0x6d2   :  { %14753 = vmatprep.mubr.bf16.mxu1 %v5478_v36 }
 0x6d9   :  { %14754 = vmatmul.mubr.bf16.gmra.mrb[96].mxu1 %v5479_v2 }
 0x6da   :  { %14757 = vmatprep.mubr.bf16.mxu1 %v5480_v21 }
 0x6e1   :  { %14758 = vmatmul.mubr.bf16.gmra.mrb[100].mxu1 %v5481_v28 }
 0x6e2   :  { %14761 = vmatprep.mubr.bf16.mxu1 %v5482_v62 }
 0x6e9   :  { %14762 = vmatmul.mubr.bf16.gmra.mrb[104].mxu1 %v5483_v5 }
 0x6ea   :  { %14765 = vmatprep.mubr.bf16.mxu1 %v5484_v55 }
 0x6f1   :  { %14766 = vmatmul.mubr.bf16.gmra.mrb[108].mxu1 %v5485_v30 }
 0x6f2   :  { %14769 = vmatprep.mubr.bf16.mxu1 %v5486_v48 }
 0x6f9   :  { %14770 = vmatmul.mubr.bf16.gmra.mrb[112].mxu1 %v5487_v53 }
 0x6fa   :  { %14773 = vmatprep.mubr.bf16.mxu1 %v5488_v24 }
 0x701   :  { %14774 = vmatmul.mubr.bf16.gmra.mrb[116].mxu1 %v5489_v8 }
 0x702   :  { %14777 = vmatprep.mubr.bf16.mxu1 %v5490_v17 }
 0x709   :  { %14778 = vmatmul.mubr.bf16.gmra.mrb[120].mxu1 %v5491_v49 }
 0x70a   :  { %14781 = vmatprep.mubr.bf16.mxu1 %v19206_v57 }
 0x711   :  { %14782 = vmatmul.mubr.bf16.gmra.mrb[124].mxu1 %v5493_v60 }
 0x76c   :  { %v19292_v63 = vpop.f32.mrb[64].mxu1 }
 0x76d   :  { %v19294_v13 = vpop.f32.mrb[65].mxu1 }
 0x76e   :  { %v19296_v19 = vpop.f32.mrb[66].mxu1 }
 0x76f   :  { %v19298_v35 = vpop.f32.mrb[67].mxu1 }
 0x770   :  { %v5914_v58 = vadd.f32 %v19298_v35, %v19294_v13 }
 0x772   :  { %v5915_v1 = vadd.f32 %v19292_v63, %v5914_v58 }
 0x774   :  { %v19303_v32 = vpop.f32.mrb[68].mxu1  ;;  %v5916_v57 = vadd.f32 %v19296_v19, %v5915_v1 }
 0x775   :  { %v19306_v31 = vpop.f32.mrb[69].mxu1 }
 0x776   :  { %v5917_v0 = vadd.f32 %v5916_v57, %v19306_v31  ;;  %v19309_v16 = vpop.f32.mrb[70].mxu1 }
 0x777   :  { %v19311_v43 = vpop.f32.mrb[71].mxu1 }
 0x778   :  { %v5918_v54 = vadd.f32 %v5917_v0, %v19311_v43 }
 0x77a   :  { %v5919_v42 = vadd.f32 %v19303_v32, %v5918_v54 }
 0x77c   :  { %v19315_v29 = vpop.f32.mrb[72].mxu1  ;;  %v5920_v34 = vadd.f32 %v19309_v16, %v5919_v42 }
 0x77d   :  { %v19318_v15 = vpop.f32.mrb[73].mxu1 }
 0x77e   :  { %v5921_v18 = vadd.f32 %v5920_v34, %v19318_v15  ;;  %v19321_v7 = vpop.f32.mrb[74].mxu1 }
 0x77f   :  { %v19323_v40 = vpop.f32.mrb[75].mxu1 }
 0x780   :  { %v5922_v44 = vadd.f32 %v5921_v18, %v19323_v40 }
 0x782   :  { %v5923_v36 = vadd.f32 %v19315_v29, %v5922_v44 }
 0x784   :  { %v19327_v12 = vpop.f32.mrb[76].mxu1  ;;  %v5924_v52 = vadd.f32 %v19321_v7, %v5923_v36 }
 0x785   :  { %v19330_v33 = vpop.f32.mrb[77].mxu1 }
 0x786   :  { %v5925_v23 = vadd.f32 %v5924_v52, %v19330_v33  ;;  %v19333_v2 = vpop.f32.mrb[78].mxu1 }
 0x787   :  { %v19335_v21 = vpop.f32.mrb[79].mxu1 }
 0x788   :  { %v5926_v50 = vadd.f32 %v5925_v23, %v19335_v21 }
 0x78a   :  { %v5927_v25 = vadd.f32 %v19327_v12, %v5926_v50 }
 0x78c   :  { %v19339_v6 = vpop.f32.mrb[80].mxu1  ;;  %v5928_v27 = vadd.f32 %v19333_v2, %v5927_v25 }
 0x78d   :  { %v19342_v28 = vpop.f32.mrb[81].mxu1 }
 0x78e   :  { %v5929_v62 = vadd.f32 %v5928_v27, %v19342_v28  ;;  %v19345_v9 = vpop.f32.mrb[82].mxu1 }
 0x78f   :  { %v19347_v14 = vpop.f32.mrb[83].mxu1 }
 0x790   :  { %v5930_v4 = vadd.f32 %v5929_v62, %v19347_v14 }
 0x792   :  { %v5931_v45 = vadd.f32 %v19339_v6, %v5930_v4 }
 0x794   :  { %v19351_v5 = vpop.f32.mrb[84].mxu1  ;;  %v5932_v55 = vadd.f32 %v19345_v9, %v5931_v45 }
 0x795   :  { %v19354_v11 = vpop.f32.mrb[85].mxu1 }
 0x796   :  { %v5933_v20 = vadd.f32 %v5932_v55, %v19354_v11  ;;  %v19357_v46 = vpop.f32.mrb[86].mxu1 }
 0x797   :  { %v19359_v41 = vpop.f32.mrb[87].mxu1 }
 0x798   :  { %v5934_v30 = vadd.f32 %v5933_v20, %v19359_v41 }
 0x79a   :  { %v5935_v48 = vadd.f32 %v19351_v5, %v5934_v30 }
 0x79c   :  { %v19363_v10 = vpop.f32.mrb[88].mxu1  ;;  %v5936_v61 = vadd.f32 %v19357_v46, %v5935_v48 }
 0x79d   :  { %v19366_v47 = vpop.f32.mrb[89].mxu1 }
 0x79e   :  { %v5937_v59 = vadd.f32 %v5936_v61, %v19366_v47  ;;  %v19369_v53 = vpop.f32.mrb[90].mxu1 }
 0x79f   :  { %v19371_v24 = vpop.f32.mrb[91].mxu1 }
 0x7a0   :  { %v5938_v39 = vadd.f32 %v5937_v59, %v19371_v24 }
 0x7a2   :  { %v5939_v56 = vadd.f32 %v19363_v10, %v5938_v39 }
 0x7a4   :  { %v19375_v26 = vpop.f32.mrb[92].mxu1  ;;  %v5940_v37 = vadd.f32 %v19369_v53, %v5939_v56 }
 0x7a5   :  { %v19378_v8 = vpop.f32.mrb[93].mxu1 }
 0x7a6   :  { %v5941_v17 = vadd.f32 %v5940_v37, %v19378_v8  ;;  %v19381_v22 = vpop.f32.mrb[94].mxu1 }
 0x7a7   :  { %v19383_v51 = vpop.f32.mrb[95].mxu1 }
 0x7a8   :  { %v5942_v49 = vadd.f32 %v5941_v17, %v19383_v51 }
 0x7aa   :  { %v5943_v38 = vadd.f32 %v19375_v26, %v5942_v49 }
 0x7ac   :  { %v19387_v3 = vpop.f32.mrb[96].mxu1  ;;  %v5944_v60 = vadd.f32 %v19381_v22, %v5943_v38 }
 0x7ad   :  { %v19390_v58 = vpop.f32.mrb[97].mxu1 }
 0x7ae   :  { %v5945_v1 = vadd.f32 %v5944_v60, %v19390_v58  ;;  %v19393_v57 = vpop.f32.mrb[98].mxu1 }
 0x7af   :  { %v19395_v0 = vpop.f32.mrb[99].mxu1 }
 0x7b0   :  { %v5946_v54 = vadd.f32 %v5945_v1, %v19395_v0 }
 0x7b2   :  { %v5947_v42 = vadd.f32 %v19387_v3, %v5946_v54 }
 0x7b4   :  { %v19399_v34 = vpop.f32.mrb[100].mxu1  ;;  %v5948_v18 = vadd.f32 %v19393_v57, %v5947_v42 }
 0x7b5   :  { %v19402_v44 = vpop.f32.mrb[101].mxu1 }
 0x7b6   :  { %v5949_v36 = vadd.f32 %v5948_v18, %v19402_v44  ;;  %v19405_v52 = vpop.f32.mrb[102].mxu1 }
 0x7b7   :  { %v19407_v23 = vpop.f32.mrb[103].mxu1 }
 0x7b8   :  { %v5950_v50 = vadd.f32 %v5949_v36, %v19407_v23 }
 0x7ba   :  { %v5951_v25 = vadd.f32 %v19399_v34, %v5950_v50 }
 0x7bc   :  { %v19411_v27 = vpop.f32.mrb[104].mxu1  ;;  %v5952_v62 = vadd.f32 %v19405_v52, %v5951_v25 }
 0x7bd   :  { %v19414_v4 = vpop.f32.mrb[105].mxu1 }
 0x7be   :  { %v5953_v45 = vadd.f32 %v5952_v62, %v19414_v4  ;;  %v19417_v55 = vpop.f32.mrb[106].mxu1 }
 0x7bf   :  { %v19419_v20 = vpop.f32.mrb[107].mxu1 }
 0x7c0   :  { %v5954_v30 = vadd.f32 %v5953_v45, %v19419_v20 }
 0x7c2   :  { %v5955_v48 = vadd.f32 %v19411_v27, %v5954_v30 }
 0x7c4   :  { %v19423_v61 = vpop.f32.mrb[108].mxu1  ;;  %v5956_v59 = vadd.f32 %v19417_v55, %v5955_v48 }
 0x7c5   :  { %v19426_v39 = vpop.f32.mrb[109].mxu1 }
 0x7c6   :  { %v5957_v56 = vadd.f32 %v5956_v59, %v19426_v39  ;;  %v19429_v37 = vpop.f32.mrb[110].mxu1 }
 0x7c7   :  { %v19431_v17 = vpop.f32.mrb[111].mxu1 }
 0x7c8   :  { %v5958_v49 = vadd.f32 %v5957_v56, %v19431_v17 }
 0x7ca   :  { %v5959_v38 = vadd.f32 %v19423_v61, %v5958_v49 }
 0x7cc   :  { %v19435_v60 = vpop.f32.mrb[112].mxu1  ;;  %v5960_v1 = vadd.f32 %v19429_v37, %v5959_v38 }
 0x7cd   :  { %25129 = vst [vmem:[#allocation32_spill] sm:$0xff] %v19435_v60  ;;  %v19438_v54 = vpop.f32.mrb[113].mxu1 }
 0x7ce   :  { %25130 = vst [vmem:[#allocation39_spill] sm:$0xff] %v19438_v54  ;;  %v5961_v42 = vadd.f32 %v5960_v1, %v19438_v54  ;;  %v19441_v18 = vpop.f32.mrb[114].mxu1 }
 0x7cf   :  { %25131 = vst [vmem:[#allocation41_spill] sm:$0xff] %v19441_v18  ;;  %v19443_v36 = vpop.f32.mrb[115].mxu1 }
 0x7d0   :  { %25132 = vst [vmem:[#allocation43_spill] sm:$0xff] %v19443_v36  ;;  %v5962_v50 = vadd.f32 %v5961_v42, %v19443_v36 }
 0x7d2   :  { %v5963_v25 = vadd.f32 %v19435_v60, %v5962_v50 }
 0x7d4   :  { %v19447_v62 = vpop.f32.mrb[116].mxu1  ;;  %v5964_v45 = vadd.f32 %v19441_v18, %v5963_v25 }
 0x7d5   :  { %25133 = vst [vmem:[#allocation44_spill] sm:$0xff] %v19447_v62  ;;  %v19450_v30 = vpop.f32.mrb[117].mxu1 }
 0x7d6   :  { %25134 = vst [vmem:[#allocation15_spill] sm:$0xff] %v19450_v30  ;;  %v5965_v48 = vadd.f32 %v5964_v45, %v19450_v30  ;;  %v19453_v59 = vpop.f32.mrb[118].mxu1 }
 0x7d7   :  { %25135 = vst [vmem:[#allocation45_spill] sm:$0xff] %v19453_v59  ;;  %v19455_v56 = vpop.f32.mrb[119].mxu1 }
 0x7d8   :  { %25136 = vst [vmem:[#allocation47_spill] sm:$0xff] %v19455_v56  ;;  %v5966_v49 = vadd.f32 %v5965_v48, %v19455_v56 }
 0x7da   :  { %v5967_v38 = vadd.f32 %v19447_v62, %v5966_v49 }
 0x7dc   :  { %v19459_v1 = vpop.f32.mrb[120].mxu1  ;;  %v5968_v42 = vadd.f32 %v19453_v59, %v5967_v38 }
 0x7dd   :  { %25137 = vst [vmem:[#allocation48_spill] sm:$0xff] %v19459_v1  ;;  %v19462_v50 = vpop.f32.mrb[121].mxu1 }
 0x7de   :  { %25138 = vst [vmem:[#allocation4_spill] sm:$0xff] %v19462_v50  ;;  %v5969_v25 = vadd.f32 %v5968_v42, %v19462_v50  ;;  %v19465_v18 = vpop.f32.mrb[122].mxu1 }
 0x7df   :  { %25139 = vst [vmem:[#allocation49_spill] sm:$0xff] %v19465_v18  ;;  %v19467_v60 = vpop.f32.mrb[123].mxu1 }
 0x7e0   :  { %25140 = vst [vmem:[#allocation6_spill] sm:$0xff] %v19467_v60  ;;  %v5970_v45 = vadd.f32 %v5969_v25, %v19467_v60 }
 0x7e2   :  { %v5971_v30 = vadd.f32 %v19459_v1, %v5970_v45 }
 0x7e4   :  { %v19471_v36 = vpop.f32.mrb[124].mxu1  ;;  %v5972_v48 = vadd.f32 %v19465_v18, %v5971_v30 }
 0x7e5   :  { %v19474_v49 = vpop.f32.mrb[125].mxu1 }
 0x7e6   :  { %25141 = vst [vmem:[#allocation3_spill] sm:$0xff] %v19474_v49  ;;  %v5973_v38 = vadd.f32 %v5972_v48, %v19474_v49  ;;  %v19477_v59 = vpop.f32.mrb[126].mxu1 }
 0x7e7   :  { %v19479_v62 = vpop.f32.mrb[127].mxu1 }
 0x7e8   :  { %v5974_v42 = vadd.f32 %v5973_v38, %v19479_v62 }
 0x7ea   :  { %v5975_v50 = vadd.f32 %v19471_v36, %v5974_v42  ;;  %v25155_v42 = vld [vmem:[#allocation41_spill] sm:$0xff] }
 0x7ec   :  { %v5976_v25 = vadd.f32 %v19477_v59, %v5975_v50  ;;  %v25153_v50 = vld [vmem:[#allocation32_spill] sm:$0xff] }
 0x7ee   :  { %v5977_v60 = vrot.slane %v5976_v25, 4 }
 0x7f0   :  { %v5978_v45 = vadd.f32 %v5977_v60, %v5976_v25  ;;  %v25157_v25 = vld [vmem:[#allocation15_spill] sm:$0xff] }
 0x7f2   :  { %v5979_v1 = vrot.slane %v5978_v45, 2 }
 0x7f4   :  { %v5980_v56 = vadd.f32 %v5979_v1, %v5978_v45  ;;  %v25151_v1 = vld [vmem:[#allocation43_spill] sm:$0xff] }
 0x7f5   :  { %v25159_v45 = vld [vmem:[#allocation47_spill] sm:$0xff] }
 0x7f6   :  { %v5981_v54 = vrot.slane %v5980_v56, 1 }
 0x7f8   :  { %v5982_v30 = vadd.f32 %v5981_v54, %v5980_v56  ;;  %v25149_v56 = vld [vmem:[#allocation39_spill] sm:$0xff] }
 0x7fa   :  { %v19484_v18 = vmul.f32 0.001953125, %v5982_v30 }
 0x7fc   :  { %v19488_v48 = vsub.f32 %v19294_v13, %v19484_v18  ;;  %v19492_v49 = vsub.f32 %v19298_v35, %v19484_v18  ;;  %v19496_v38 = vsub.f32 %v19292_v63, %v19484_v18  ;;  %v19500_v60 = vsub.f32 %v19296_v19, %v19484_v18 }
 0x7fd   :  { %v19504_v54 = vsub.f32 %v19306_v31, %v19484_v18  ;;  %v19508_v13 = vsub.f32 %v19311_v43, %v19484_v18  ;;  %v19512_v35 = vsub.f32 %v19303_v32, %v19484_v18  ;;  %v19516_v63 = vsub.f32 %v19309_v16, %v19484_v18 }
 0x7fe   :  { %25142 = vst [vmem:[#allocation5_spill] sm:$0xff] %v19488_v48  ;;  %25143 = vst [vmem:[#allocation8_spill] sm:$0xff] %v19492_v49  ;;  %v19520_v19 = vsub.f32 %v19318_v15, %v19484_v18  ;;  %v19524_v31 = vsub.f32 %v19323_v40, %v19484_v18  ;;  %v19528_v43 = vsub.f32 %v19315_v29, %v19484_v18 }
 0x7ff   :  { %25144 = vst [vmem:[#allocation51_spill] sm:$0xff] %v19496_v38  ;;  %v19532_v32 = vsub.f32 %v19321_v7, %v19484_v18  ;;  %v19536_v16 = vsub.f32 %v19330_v33, %v19484_v18  ;;  %v19540_v15 = vsub.f32 %v19335_v21, %v19484_v18  ;;  %v19544_v40 = vsub.f32 %v19327_v12, %v19484_v18 }
 0x800   :  { %v19548_v29 = vsub.f32 %v19333_v2, %v19484_v18  ;;  %v19552_v7 = vsub.f32 %v19342_v28, %v19484_v18  ;;  %v19556_v33 = vsub.f32 %v19347_v14, %v19484_v18  ;;  %v19560_v21 = vsub.f32 %v19339_v6, %v19484_v18 }
 0x801   :  { %v19564_v12 = vsub.f32 %v19345_v9, %v19484_v18  ;;  %v19568_v2 = vsub.f32 %v19354_v11, %v19484_v18  ;;  %v19572_v28 = vsub.f32 %v19359_v41, %v19484_v18  ;;  %v19576_v14 = vsub.f32 %v19351_v5, %v19484_v18 }
 0x802   :  { %v19580_v6 = vsub.f32 %v19357_v46, %v19484_v18  ;;  %v19584_v9 = vsub.f32 %v19366_v47, %v19484_v18  ;;  %v19588_v11 = vsub.f32 %v19371_v24, %v19484_v18  ;;  %v19592_v41 = vsub.f32 %v19363_v10, %v19484_v18 }
 0x803   :  { %v19596_v5 = vsub.f32 %v19369_v53, %v19484_v18  ;;  %v19600_v46 = vsub.f32 %v19378_v8, %v19484_v18  ;;  %v19604_v47 = vsub.f32 %v19383_v51, %v19484_v18  ;;  %v19608_v24 = vsub.f32 %v19375_v26, %v19484_v18 }
 0x804   :  { %v19612_v10 = vsub.f32 %v19381_v22, %v19484_v18  ;;  %v19616_v53 = vsub.f32 %v19390_v58, %v19484_v18  ;;  %v19620_v8 = vsub.f32 %v19395_v0, %v19484_v18  ;;  %v19624_v51 = vsub.f32 %v19387_v3, %v19484_v18 }
 0x805   :  { %v19628_v26 = vsub.f32 %v19393_v57, %v19484_v18  ;;  %v19632_v22 = vsub.f32 %v19402_v44, %v19484_v18  ;;  %v19636_v58 = vsub.f32 %v19407_v23, %v19484_v18  ;;  %v19640_v0 = vsub.f32 %v19399_v34, %v19484_v18 }
 0x806   :  { %v19644_v3 = vsub.f32 %v19405_v52, %v19484_v18  ;;  %v19648_v57 = vsub.f32 %v19414_v4, %v19484_v18  ;;  %v19652_v44 = vsub.f32 %v19419_v20, %v19484_v18  ;;  %v19656_v23 = vsub.f32 %v19411_v27, %v19484_v18 }
 0x807   :  { %v19660_v34 = vsub.f32 %v19417_v55, %v19484_v18  ;;  %v19664_v52 = vsub.f32 %v19426_v39, %v19484_v18  ;;  %v19668_v4 = vsub.f32 %v19431_v17, %v19484_v18  ;;  %v19672_v20 = vsub.f32 %v19423_v61, %v19484_v18 }
 0x808   :  { %v19676_v27 = vsub.f32 %v19429_v37, %v19484_v18  ;;  %v19680_v55 = vsub.f32 %v25149_v56, %v19484_v18  ;;  %v19684_v39 = vsub.f32 %v25151_v1, %v19484_v18  ;;  %v19688_v17 = vsub.f32 %v25153_v50, %v19484_v18  ;;  %v25161_v56 = vld [vmem:[#allocation44_spill] sm:$0xff] }
 0x809   :  { %25145 = vst [vmem:[#allocation10_spill] sm:$0xff] %v19660_v34  ;;  %25146 = vst [vmem:[#allocation7_spill] sm:$0xff] %v19664_v52  ;;  %v19692_v61 = vsub.f32 %v25155_v42, %v19484_v18  ;;  %v19696_v37 = vsub.f32 %v25157_v25, %v19484_v18  ;;  %v19700_v30 = vsub.f32 %v25159_v45, %v19484_v18 }
 0x80a   :  { %25147 = vst [vmem:[#allocation9_spill] sm:$0xff] %v19668_v4  ;;  %25148 = vst [vmem:[#allocation12_spill] sm:$0xff] %v19672_v20  ;;  %v19704_v1 = vsub.f32 %v25161_v56, %v19484_v18 }
 0x80b   :  { %25150 = vst [vmem:[#allocation53_spill] sm:$0xff] %v19680_v55  ;;  %25152 = vst [vmem:[#allocation14_spill] sm:$0xff] %v19684_v39  ;;  %v25163_v39 = vld [vmem:[#allocation45_spill] sm:$0xff] }
 0x80c   :  { %25154 = vst [vmem:[#allocation34_spill] sm:$0xff] %v19688_v17  ;;  %25156 = vst [vmem:[#allocation35_spill] sm:$0xff] %v19692_v61  ;;  %v19708_v50 = vsub.f32 %v25163_v39, %v19484_v18  ;;  %v25165_v17 = vld [vmem:[#allocation4_spill] sm:$0xff]  ;;  %v25167_v61 = vld [vmem:[#allocation6_spill] sm:$0xff] }
 0x80d   :  { %25158 = vst [vmem:[#allocation36_spill] sm:$0xff] %v19696_v37  ;;  %25160 = vst [vmem:[#allocation37_spill] sm:$0xff] %v19700_v30  ;;  %v19712_v42 = vsub.f32 %v25165_v17, %v19484_v18  ;;  %v19716_v25 = vsub.f32 %v25167_v61, %v19484_v18  ;;  %v25169_v37 = vld [vmem:[#allocation48_spill] sm:$0xff]  ;;  %v25171_v30 = vld [vmem:[#allocation49_spill] sm:$0xff]  ;;  %v19732_v17 = vsub.f32 %v19479_v62, %v19484_v18 }
 0x80e   :  { %25162 = vst [vmem:[#allocation16_spill] sm:$0xff] %v19704_v1  ;;  %25164 = vst [vmem:[#allocation17_spill] sm:$0xff] %v19708_v50  ;;  %v19720_v45 = vsub.f32 %v25169_v37, %v19484_v18  ;;  %v19724_v56 = vsub.f32 %v25171_v30, %v19484_v18  ;;  %v25173_v1 = vld [vmem:[#allocation3_spill] sm:$0xff]  ;;  %v19736_v61 = vsub.f32 %v19471_v36, %v19484_v18 }
 0x80f   :  { %25166 = vst [vmem:[#allocation18_spill] sm:$0xff] %v19712_v42  ;;  %25168 = vst [vmem:[#allocation20_spill] sm:$0xff] %v19716_v25  ;;  %v19728_v39 = vsub.f32 %v25173_v1, %v19484_v18  ;;  %v19740_v37 = vsub.f32 %v19477_v59, %v19484_v18  ;;  %v6048_v30 = vmul.f32 %v19488_v48, %v19488_v48 }
 0x810   :  { %25170 = vst [vmem:[#allocation11_spill] sm:$0xff] %v19720_v45  ;;  %25172 = vst [vmem:[#allocation22_spill] sm:$0xff] %v19724_v56  ;;  %v6049_v56 = vmul.f32 %v19492_v49, %v19492_v49  ;;  %v6050_v1 = vmul.f32 %v19496_v38, %v19496_v38  ;;  %v6051_v62 = vmul.f32 %v19500_v60, %v19500_v60 }
 0x811   :  { %25174 = vst [vmem:[#allocation24_spill] sm:$0xff] %v19728_v39  ;;  %25175 = vst [vmem:[#allocation26_spill] sm:$0xff] %v19732_v17  ;;  %v6052_v36 = vmul.f32 %v19504_v54, %v19504_v54  ;;  %v6053_v18 = vmul.f32 %v19508_v13, %v19508_v13  ;;  %v6054_v48 = vmul.f32 %v19512_v35, %v19512_v35 }
 0x812   :  { %25176 = vst [vmem:[#allocation27_spill] sm:$0xff] %v19736_v61  ;;  %v6112_v39 = vadd.f32 %v6049_v56, %v6048_v30  ;;  %v6055_v38 = vmul.f32 %v19516_v63, %v19516_v63  ;;  %v6056_v30 = vmul.f32 %v19520_v19, %v19520_v19 }
 0x814   :  { %v6113_v17 = vadd.f32 %v6112_v39, %v6050_v1  ;;  %v6057_v1 = vmul.f32 %v19524_v31, %v19524_v31 }
 0x816   :  { %v6114_v61 = vadd.f32 %v6113_v17, %v6051_v62  ;;  %v6058_v62 = vmul.f32 %v19528_v43, %v19528_v43 }
 0x818   :  { %v6115_v59 = vadd.f32 %v6114_v61, %v6052_v36  ;;  %v6059_v36 = vmul.f32 %v19532_v32, %v19532_v32 }
 0x81a   :  { %v6116_v49 = vadd.f32 %v6115_v59, %v6053_v18  ;;  %v6060_v59 = vmul.f32 %v19536_v16, %v19536_v16 }
 0x81c   :  { %v6117_v56 = vadd.f32 %v6116_v49, %v6054_v48  ;;  %v6061_v48 = vmul.f32 %v19540_v15, %v19540_v15 }
 0x81e   :  { %v6118_v39 = vadd.f32 %v6117_v56, %v6055_v38  ;;  %v6062_v56 = vmul.f32 %v19544_v40, %v19544_v40 }
 0x820   :  { %v6119_v17 = vadd.f32 %v6118_v39, %v6056_v30  ;;  %v6063_v39 = vmul.f32 %v19548_v29, %v19548_v29 }
 0x822   :  { %v6120_v61 = vadd.f32 %v6119_v17, %v6057_v1  ;;  %v6064_v17 = vmul.f32 %v19552_v7, %v19552_v7 }
 0x824   :  { %v6121_v18 = vadd.f32 %v6120_v61, %v6058_v62  ;;  %v6065_v61 = vmul.f32 %v19556_v33, %v19556_v33 }
 0x826   :  { %v6122_v49 = vadd.f32 %v6121_v18, %v6059_v36  ;;  %v6066_v18 = vmul.f32 %v19560_v21, %v19560_v21 }
 0x828   :  { %v6123_v38 = vadd.f32 %v6122_v49, %v6060_v59  ;;  %v6067_v49 = vmul.f32 %v19564_v12, %v19564_v12 }
 0x82a   :  { %v6124_v30 = vadd.f32 %v6123_v38, %v6061_v48  ;;  %v6068_v38 = vmul.f32 %v19568_v2, %v19568_v2 }
 0x82c   :  { %v6125_v1 = vadd.f32 %v6124_v30, %v6062_v56  ;;  %v6069_v30 = vmul.f32 %v19572_v28, %v19572_v28 }
 0x82e   :  { %v6126_v62 = vadd.f32 %v6125_v1, %v6063_v39  ;;  %v6070_v1 = vmul.f32 %v19576_v14, %v19576_v14 }
 0x830   :  { %v6127_v36 = vadd.f32 %v6126_v62, %v6064_v17  ;;  %v6071_v62 = vmul.f32 %v19580_v6, %v19580_v6 }
 0x832   :  { %v6128_v59 = vadd.f32 %v6127_v36, %v6065_v61  ;;  %v6072_v36 = vmul.f32 %v19584_v9, %v19584_v9 }
 0x834   :  { %v6129_v48 = vadd.f32 %v6128_v59, %v6066_v18  ;;  %v6073_v59 = vmul.f32 %v19588_v11, %v19588_v11 }
 0x836   :  { %v6130_v56 = vadd.f32 %v6129_v48, %v6067_v49  ;;  %v6074_v48 = vmul.f32 %v19592_v41, %v19592_v41 }
 0x838   :  { %v6131_v39 = vadd.f32 %v6130_v56, %v6068_v38  ;;  %v6075_v56 = vmul.f32 %v19596_v5, %v19596_v5 }
 0x83a   :  { %v6132_v17 = vadd.f32 %v6131_v39, %v6069_v30  ;;  %v6076_v39 = vmul.f32 %v19600_v46, %v19600_v46 }
 0x83c   :  { %v6133_v61 = vadd.f32 %v6132_v17, %v6070_v1  ;;  %v6077_v17 = vmul.f32 %v19604_v47, %v19604_v47 }
 0x83e   :  { %v6134_v18 = vadd.f32 %v6133_v61, %v6071_v62  ;;  %v6078_v61 = vmul.f32 %v19608_v24, %v19608_v24 }
 0x840   :  { %v6135_v49 = vadd.f32 %v6134_v18, %v6072_v36  ;;  %v6079_v18 = vmul.f32 %v19612_v10, %v19612_v10 }
 0x842   :  { %v6136_v38 = vadd.f32 %v6135_v49, %v6073_v59  ;;  %v6080_v49 = vmul.f32 %v19616_v53, %v19616_v53 }
 0x844   :  { %v6137_v30 = vadd.f32 %v6136_v38, %v6074_v48  ;;  %v16722_v38 = vld [vmem:[%s24591_s1] sm:$0xff]  }
 0x845   :  { %14785 = vmatprep.subr.bf16.mxu0 %v16722_v38 }
 0x846   :  { %v6138_v1 = vadd.f32 %v6137_v30, %v6075_v56  ;;  %v16723_v56 = vld [vmem:[%s24591_s1 + $0x8] sm:$0xff]   ;;  %v6081_v30 = vmul.f32 %v19620_v8, %v19620_v8  ;;  %14786 = vmatpush3.bf16.msra.mxu0 %v16722_v38 }
 0x847   :  { %14787 = vmatprep.subr.bf16.mxu0 %v16723_v56 }
 0x848   :  { %v6139_v62 = vadd.f32 %v6138_v1, %v6076_v39  ;;  %v6082_v1 = vmul.f32 %v19624_v51, %v19624_v51 }
 0x84a   :  { %v6140_v36 = vadd.f32 %v6139_v62, %v6077_v17  ;;  %v16724_v62 = vld [vmem:[%s24591_s1 + $0x10] sm:$0xff]   ;;  %14788 = vmatpush3.bf16.msra.mxu0 %v16723_v56  ;;  %v16726_v56 = vld [vmem:[%s24591_s1 + $0x20] sm:$0xff]  }
 0x84b   :  { %14789 = vmatprep.subr.bf16.mxu0 %v16724_v62 }
 0x84c   :  { %v6141_v59 = vadd.f32 %v6140_v36, %v6078_v61  ;;  %v6083_v61 = vmul.f32 %v19628_v26, %v19628_v26 }
 0x84e   :  { %v6142_v48 = vadd.f32 %v6141_v59, %v6079_v18  ;;  %v6084_v18 = vmul.f32 %v19632_v22, %v19632_v22  ;;  %14790 = vmatpush3.bf16.msra.mxu0 %v16724_v62  ;;  %v16727_v62 = vld [vmem:[%s24591_s1 + $0x28] sm:$0xff]  }
 0x850   :  { %v6143_v39 = vadd.f32 %v6142_v48, %v6080_v49  ;;  %v16725_v49 = vld [vmem:[%s24591_s1 + $0x18] sm:$0xff]   ;;  %v6085_v48 = vmul.f32 %v19636_v58, %v19636_v58 }
 0x851   :  { %14791 = vmatprep.subr.bf16.mxu0 %v16725_v49 }
 0x852   :  { %v6144_v17 = vadd.f32 %v6143_v39, %v6081_v30  ;;  %v6086_v30 = vmul.f32 %v19640_v0, %v19640_v0  ;;  %14792 = vmatpush3.bf16.msra.mxu0 %v16725_v49  ;;  %v16728_v49 = vld [vmem:[%s24591_s1 + $0x30] sm:$0xff]  }
 0x853   :  { %14793 = vmatprep.subr.bf16.mxu0 %v16726_v56 }
 0x854   :  { %v6145_v36 = vadd.f32 %v6144_v17, %v6082_v1  ;;  %v6087_v1 = vmul.f32 %v19644_v3, %v19644_v3 }
 0x856   :  { %v6146_v59 = vadd.f32 %v6145_v36, %v6083_v61  ;;  %v6088_v61 = vmul.f32 %v19648_v57, %v19648_v57  ;;  %14794 = vmatpush3.bf16.msra.mxu0 %v16726_v56  ;;  %v16729_v56 = vld [vmem:[%s24591_s1 + $0x38] sm:$0xff]  }
 0x857   :  { %14795 = vmatprep.subr.bf16.mxu0 %v16727_v62 }
 0x858   :  { %v6147_v38 = vadd.f32 %v6146_v59, %v6084_v18  ;;  %v6089_v18 = vmul.f32 %v19652_v44, %v19652_v44 }
 0x85a   :  { %v6148_v39 = vadd.f32 %v6147_v38, %v6085_v48  ;;  %v6090_v48 = vmul.f32 %v19656_v23, %v19656_v23  ;;  %14796 = vmatpush3.bf16.msra.mxu0 %v16727_v62  ;;  %v6095_v62 = vmul.f32 %v19676_v27, %v19676_v27 }
 0x85b   :  { %14797 = vmatprep.subr.bf16.mxu0 %v16728_v49 }
 0x85c   :  { %v6149_v17 = vadd.f32 %v6148_v39, %v6086_v30  ;;  %v6091_v30 = vmul.f32 %v19660_v34, %v19660_v34  ;;  %v25180_v34 = vld [vmem:[#allocation36_spill] sm:$0xff] }
 0x85e   :  { %v6150_v36 = vadd.f32 %v6149_v17, %v6087_v1  ;;  %v6092_v1 = vmul.f32 %v19664_v52, %v19664_v52  ;;  %14798 = vmatpush3.bf16.msra.mxu0 %v16728_v49 }
 0x85f   :  { %14799 = vmatprep.subr.bf16.mxu0 %v16729_v56 }
 0x860   :  { %v6151_v59 = vadd.f32 %v6150_v36, %v6088_v61  ;;  %v6093_v61 = vmul.f32 %v19668_v4, %v19668_v4 }
 0x862   :  { %v6152_v38 = vadd.f32 %v6151_v59, %v6089_v18  ;;  %v6094_v18 = vmul.f32 %v19672_v20, %v19672_v20  ;;  %14800 = vmatpush3.bf16.msra.mxu0 %v16729_v56  ;;  %v25179_v20 = vld [vmem:[#allocation35_spill] sm:$0xff] }
 0x864   :  { %v6153_v39 = vadd.f32 %v6152_v38, %v6090_v48  ;;  %v6096_v38 = vmul.f32 %v19680_v55, %v19680_v55 }
 0x866   :  { %v6154_v17 = vadd.f32 %v6153_v39, %v6091_v30  ;;  %v25177_v39 = vld [vmem:[#allocation14_spill] sm:$0xff] }
 0x867   :  { %v6097_v52 = vmul.f32 %v25177_v39, %v25177_v39 }
 0x868   :  { %v6155_v36 = vadd.f32 %v6154_v17, %v6092_v1  ;;  %v25178_v1 = vld [vmem:[#allocation34_spill] sm:$0xff] }
 0x869   :  { %v6098_v49 = vmul.f32 %v25178_v1, %v25178_v1 }
 0x86a   :  { %v6156_v59 = vadd.f32 %v6155_v36, %v6093_v61  ;;  %v6099_v61 = vmul.f32 %v25179_v20, %v25179_v20 }
 0x86c   :  { %v6157_v48 = vadd.f32 %v6156_v59, %v6094_v18  ;;  %v6100_v18 = vmul.f32 %v25180_v34, %v25180_v34  ;;  %v25181_v59 = vld [vmem:[#allocation37_spill] sm:$0xff] }
 0x86d   :  { %v6101_v55 = vmul.f32 %v25181_v59, %v25181_v59 }
 0x86e   :  { %v6158_v30 = vadd.f32 %v6157_v48, %v6095_v62  ;;  %v25182_v48 = vld [vmem:[#allocation16_spill] sm:$0xff] }
 0x86f   :  { %v6102_v39 = vmul.f32 %v25182_v48, %v25182_v48 }
 0x870   :  { %v6159_v4 = vadd.f32 %v6158_v30, %v6096_v38  ;;  %v6103_v30 = vmul.f32 %v19708_v50, %v19708_v50 }
 0x872   :  { %v6160_v17 = vadd.f32 %v6159_v4, %v6097_v52  ;;  %v6104_v4 = vmul.f32 %v19712_v42, %v19712_v42 }
 0x874   :  { %v6161_v36 = vadd.f32 %v6160_v17, %v6098_v49  ;;  %v6105_v17 = vmul.f32 %v19716_v25, %v19716_v25 }
 0x876   :  { %v6162_v56 = vadd.f32 %v6161_v36, %v6099_v61  ;;  %v6106_v36 = vmul.f32 %v19720_v45, %v19720_v45 }
 0x878   :  { %v6163_v62 = vadd.f32 %v6162_v56, %v6100_v18  ;;  %v25183_v56 = vld [vmem:[#allocation22_spill] sm:$0xff] }
 0x879   :  { %v6107_v48 = vmul.f32 %v25183_v56, %v25183_v56 }
 0x87a   :  { %v6164_v38 = vadd.f32 %v6163_v62, %v6101_v55  ;;  %v25184_v62 = vld [vmem:[#allocation24_spill] sm:$0xff] }
 0x87b   :  { %v6108_v50 = vmul.f32 %v25184_v62, %v25184_v62 }
 0x87c   :  { %v6165_v52 = vadd.f32 %v6164_v38, %v6102_v39  ;;  %v25185_v38 = vld [vmem:[#allocation26_spill] sm:$0xff] }
 0x87d   :  { %v6109_v42 = vmul.f32 %v25185_v38, %v25185_v38 }
 0x87e   :  { %v6166_v49 = vadd.f32 %v6165_v52, %v6103_v30  ;;  %v25186_v52 = vld [vmem:[#allocation27_spill] sm:$0xff] }
 0x87f   :  { %v6110_v25 = vmul.f32 %v25186_v52, %v25186_v52 }
 0x880   :  { %v6167_v61 = vadd.f32 %v6166_v49, %v6104_v4  ;;  %v6111_v49 = vmul.f32 %v19740_v37, %v19740_v37 }
 0x882   :  { %v6168_v18 = vadd.f32 %v6167_v61, %v6105_v17 }
 0x884   :  { %v6169_v55 = vadd.f32 %v6168_v18, %v6106_v36 }
 0x886   :  { %v6170_v39 = vadd.f32 %v6169_v55, %v6107_v48 }
 0x888   :  { %v6171_v30 = vadd.f32 %v6170_v39, %v6108_v50  ;;  %v5912_v50 = vld [vmem:[%s24596_s5] sm:$0x1] }
 0x88a   :  { %v6172_v4 = vadd.f32 %v6171_v30, %v6109_v42  ;;  %v25187_v30 = vld [vmem:[#allocation13_spill] sm:$0xff] }
 0x88c   :  { %v6173_v17 = vadd.f32 %v6172_v4, %v6110_v25  ;;  %v19903_v25 = vld [vmem:[%s24597_s6] ss:$0 sm:$0xff]  ;;  %v25190_v4 = vld [vmem:[#allocation8_spill] sm:$0xff] }
 0x88e   :  { %v6174_v61 = vadd.f32 %v6173_v17, %v6111_v49  ;;  %v25191_v17 = vld [vmem:[#allocation51_spill] sm:$0xff] }
 0x890   :  { %v6175_v45 = vrot.slane %v6174_v61, 4 }
 0x892   :  { %v6176_v56 = vadd.f32 %v6175_v45, %v6174_v61 }
 0x894   :  { %v6177_v36 = vrot.slane %v6176_v56, 2 }
 0x896   :  { %v6178_v18 = vadd.f32 %v6177_v36, %v6176_v56  ;;  %v25189_v56 = vld [vmem:[#allocation5_spill] sm:$0xff] }
 0x898   :  { %v6179_v59 = vrot.slane %v6178_v18, 1 }
 0x89a   :  { %v6180_v62 = vadd.f32 %v6179_v59, %v6178_v18 }
 0x89c   :  { %v6181_v48 = vmul.f32 0.001953125, %v6180_v62 }
 0x89e   :  { %v6182_v55 = vadd.f32 1e-05, %v6181_v48 }
 0x8a0   :  { %16804 = vrsqrt.f32 %v6182_v55 }
 0x8aa   :  { %v16805_v39 = vpop.eup %16804 }
 0x8ab   :  { %v6184_v42 = vmul.f32 %v16805_v39, %v5912_v50 }
 0x8ad   :  { %v19898_v52 = vrot.slane %v6184_v42, %v25187_v30  ;;  %v25206_v30 = vld [vmem:[#allocation53_spill] sm:$0xff] }
 0x8af   :  { %v6252_v45 = vmul.f32 %v19898_v52, %v25185_v38  ;;  %v19912_v62 = vmul.f32 %v19898_v52, %v25189_v56  ;;  %v19916_v49 = vmul.f32 %v19898_v52, %v25190_v4  ;;  %v6193_v61 = vmul.f32 %v19898_v52, %v25191_v17  ;;  %v25203_v56 = vld [vmem:[#allocation7_spill] sm:$0xff]  ;;  %v25204_v4 = vld [vmem:[#allocation9_spill] sm:$0xff]  ;;  %v25205_v17 = vld [vmem:[#allocation12_spill] sm:$0xff] }
 0x8b0   :  { %v6194_v36 = vmul.f32 %v19898_v52, %v19500_v60  ;;  %v6195_v38 = vmul.f32 %v19898_v52, %v19504_v54  ;;  %v6196_v18 = vmul.f32 %v19898_v52, %v19508_v13  ;;  %v6197_v48 = vmul.f32 %v19898_v52, %v19512_v35 }
 0x8b1   :  { %v19908_v59 = vadd.f32 %v19903_v25, %v6252_v45  ;;  %v6198_v55 = vmul.f32 %v19898_v52, %v19516_v63  ;;  %v6199_v50 = vmul.f32 %v19898_v52, %v19520_v19  ;;  %v6200_v39 = vmul.f32 %v19898_v52, %v19524_v31  ;;  %v25202_v45 = vld [vmem:[#allocation10_spill] sm:$0xff] }
 0x8b2   :  { %v6201_v60 = vmul.f32 %v19898_v52, %v19528_v43  ;;  %v6202_v54 = vmul.f32 %v19898_v52, %v19532_v32  ;;  %v6203_v35 = vmul.f32 %v19898_v52, %v19536_v16  ;;  %v6204_v63 = vmul.f32 %v19898_v52, %v19540_v15 }
 0x8b3   :  { %25188 = vst [vmem:[#allocation29_spill] sm:$0xff] %v19908_v59  ;;  %v19939_v13 = vmul.f32 0.1, %v19908_v59  ;;  %v6205_v19 = vmul.f32 %v19898_v52, %v19544_v40  ;;  %v6206_v31 = vmul.f32 %v19898_v52, %v19548_v29  ;;  %v6207_v43 = vmul.f32 %v19898_v52, %v19552_v7  ;;  %v25208_v59 = vld [vmem:[#allocation37_spill] sm:$0xff] }
 0x8b4   :  { %v6208_v32 = vmul.f32 %v19898_v52, %v19556_v33  ;;  %v6209_v42 = vmul.f32 %v19898_v52, %v19560_v21  ;;  %v6210_v16 = vmul.f32 %v19898_v52, %v19564_v12  ;;  %v19959_v15 = vmul.f32 %v19898_v52, %v19568_v2 }
 0x8b5   :  { %25192 = vst [vmem:[#allocation31_spill] sm:$0xff] %v19939_v13  ;;  %v19963_v40 = vmul.f32 %v19898_v52, %v19572_v28  ;;  %v19967_v29 = vmul.f32 %v19898_v52, %v19576_v14  ;;  %v19971_v7 = vmul.f32 %v19898_v52, %v19580_v6  ;;  %v19975_v33 = vmul.f32 %v19898_v52, %v19584_v9  ;;  %v25207_v13 = vld [vmem:[#allocation14_spill] sm:$0xff] }
 0x8b6   :  { %v19979_v21 = vmul.f32 %v19898_v52, %v19588_v11  ;;  %v19983_v12 = vmul.f32 %v19898_v52, %v19592_v41  ;;  %v19987_v2 = vmul.f32 %v19898_v52, %v19596_v5  ;;  %v19991_v28 = vmul.f32 %v19898_v52, %v19600_v46 }
 0x8b7   :  { %v19995_v14 = vmul.f32 %v19898_v52, %v19604_v47  ;;  %v19999_v6 = vmul.f32 %v19898_v52, %v19608_v24  ;;  %v20003_v9 = vmul.f32 %v19898_v52, %v19612_v10  ;;  %v20007_v11 = vmul.f32 %v19898_v52, %v19616_v53 }
 0x8b8   :  { %25193 = vst [vmem:[#allocation33_spill] sm:$0xff] %v19979_v21  ;;  %25194 = vst [vmem:[#allocation40_spill] sm:$0xff] %v19983_v12  ;;  %v20011_v41 = vmul.f32 %v19898_v52, %v19620_v8  ;;  %v6225_v5 = vmul.f32 %v19898_v52, %v19624_v51  ;;  %v6226_v46 = vmul.f32 %v19898_v52, %v19628_v26  ;;  %v25216_v12 = vld [vmem:[#allocation27_spill] sm:$0xff] }
 0x8b9   :  { %25195 = vst [vmem:[#allocation42_spill] sm:$0xff] %v19987_v2  ;;  %25196 = vst [vmem:[#allocation46_spill] sm:$0xff] %v19991_v28  ;;  %v6227_v47 = vmul.f32 %v19898_v52, %v19632_v22  ;;  %v6228_v24 = vmul.f32 %v19898_v52, %v19636_v58  ;;  %v6229_v10 = vmul.f32 %v19898_v52, %v19640_v0  ;;  %v25214_v28 = vld [vmem:[#allocation22_spill] sm:$0xff]  ;;  %v25215_v2 = vld [vmem:[#allocation24_spill] sm:$0xff] }
 0x8ba   :  { %25197 = vst [vmem:[#allocation50_spill] sm:$0xff] %v19995_v14  ;;  %25198 = vst [vmem:[#allocation19_spill] sm:$0xff] %v19999_v6  ;;  %v6230_v53 = vmul.f32 %v19898_v52, %v19644_v3  ;;  %v6231_v8 = vmul.f32 %v19898_v52, %v19648_v57  ;;  %v6232_v51 = vmul.f32 %v19898_v52, %v19652_v44  ;;  %v25212_v6 = vld [vmem:[#allocation20_spill] sm:$0xff]  ;;  %v25213_v14 = vld [vmem:[#allocation11_spill] sm:$0xff] }
 0x8bb   :  { %25199 = vst [vmem:[#allocation52_spill] sm:$0xff] %v20003_v9  ;;  %25200 = vst [vmem:[#allocation38_spill] sm:$0xff] %v20007_v11  ;;  %v6233_v26 = vmul.f32 %v19898_v52, %v19656_v23  ;;  %v6234_v22 = vmul.f32 %v19898_v52, %v25202_v45  ;;  %v6235_v58 = vmul.f32 %v19898_v52, %v25203_v56  ;;  %v25210_v11 = vld [vmem:[#allocation17_spill] sm:$0xff]  ;;  %v25211_v9 = vld [vmem:[#allocation18_spill] sm:$0xff] }
 0x8bc   :  { %25201 = vst [vmem:[#allocation21_spill] sm:$0xff] %v20011_v41  ;;  %v6236_v0 = vmul.f32 %v19898_v52, %v25204_v4  ;;  %v6237_v3 = vmul.f32 %v19898_v52, %v25205_v17  ;;  %v6238_v57 = vmul.f32 %v19898_v52, %v19676_v27  ;;  %v6239_v44 = vmul.f32 %v19898_v52, %v25206_v30  ;;  %v25209_v41 = vld [vmem:[#allocation16_spill] sm:$0xff] }
 0x8bd   :  { %v6240_v23 = vmul.f32 %v19898_v52, %v25207_v13  ;;  %v6241_v45 = vmul.f32 %v19898_v52, %v25178_v1  ;;  %v6242_v56 = vmul.f32 %v19898_v52, %v25179_v20  ;;  %v6243_v4 = vmul.f32 %v19898_v52, %v25180_v34 }
 0x8be   :  { %v6244_v17 = vmul.f32 %v19898_v52, %v25208_v59  ;;  %v6245_v27 = vmul.f32 %v19898_v52, %v25209_v41  ;;  %v6246_v30 = vmul.f32 %v19898_v52, %v25210_v11  ;;  %v6247_v13 = vmul.f32 %v19898_v52, %v25211_v9 }
 0x8bf   :  { %v6248_v1 = vmul.f32 %v19898_v52, %v25212_v6  ;;  %v6249_v20 = vmul.f32 %v19898_v52, %v25213_v14  ;;  %v6250_v34 = vmul.f32 %v19898_v52, %v25214_v28  ;;  %v6251_v59 = vmul.f32 %v19898_v52, %v25215_v2 }
 0x8c0   :  { %v6253_v41 = vmul.f32 %v19898_v52, %v25216_v12  ;;  %v6254_v11 = vmul.f32 %v19898_v52, %v19740_v37  ;;  %v6263_v9 = vadd.f32 %v19903_v25, %v6193_v61  ;;  %v6264_v21 = vadd.f32 %v19903_v25, %v6194_v36 }
 0x8c1   :  { %v20074_v6 = vadd.f32 %v19903_v25, %v6195_v38  ;;  %v20077_v14 = vadd.f32 %v19903_v25, %v6196_v18  ;;  %v20080_v28 = vadd.f32 %v19903_v25, %v6197_v48  ;;  %v20083_v2 = vadd.f32 %v19903_v25, %v6198_v55 }
 0x8c2   :  { %v20086_v12 = vadd.f32 %v19903_v25, %v6199_v50  ;;  %v20089_v37 = vadd.f32 %v19903_v25, %v6200_v39  ;;  %v20092_v52 = vadd.f32 %v19903_v25, %v6201_v60  ;;  %v20095_v61 = vadd.f32 %v19903_v25, %v6202_v54 }
 0x8c3   :  { %v20098_v36 = vadd.f32 %v19903_v25, %v6203_v35  ;;  %v20101_v38 = vadd.f32 %v19903_v25, %v6204_v63  ;;  %v20104_v18 = vadd.f32 %v19903_v25, %v6205_v19  ;;  %v20107_v48 = vadd.f32 %v19903_v25, %v6206_v31 }
 0x8c4   :  { %v20110_v55 = vadd.f32 %v19903_v25, %v6207_v43  ;;  %v20113_v50 = vadd.f32 %v19903_v25, %v6208_v32  ;;  %v20116_v39 = vadd.f32 %v19903_v25, %v6209_v42  ;;  %v20119_v60 = vadd.f32 %v19903_v25, %v6210_v16 }
 0x8c5   :  { %v20122_v54 = vadd.f32 %v19903_v25, %v6225_v5  ;;  %v20125_v35 = vadd.f32 %v19903_v25, %v6226_v46  ;;  %v20128_v63 = vadd.f32 %v19903_v25, %v6227_v47  ;;  %v20131_v19 = vadd.f32 %v19903_v25, %v6228_v24 }
 0x8c6   :  { %v20134_v31 = vadd.f32 %v19903_v25, %v6229_v10  ;;  %v20137_v43 = vadd.f32 %v19903_v25, %v6230_v53  ;;  %v20140_v32 = vadd.f32 %v19903_v25, %v6231_v8  ;;  %v20143_v42 = vadd.f32 %v19903_v25, %v6232_v51 }
 0x8c7   :  { %v20146_v16 = vadd.f32 %v19903_v25, %v6233_v26  ;;  %v20149_v5 = vadd.f32 %v19903_v25, %v6234_v22  ;;  %v20152_v46 = vadd.f32 %v19903_v25, %v6235_v58  ;;  %v20155_v47 = vadd.f32 %v19903_v25, %v6236_v0 }
 0x8c8   :  { %v20158_v24 = vadd.f32 %v19903_v25, %v6237_v3  ;;  %v20161_v10 = vadd.f32 %v19903_v25, %v6238_v57  ;;  %v20164_v53 = vadd.f32 %v19903_v25, %v6239_v44  ;;  %v20167_v8 = vadd.f32 %v19903_v25, %v6240_v23 }
 0x8c9   :  { %v20170_v51 = vadd.f32 %v19903_v25, %v6241_v45  ;;  %v20173_v26 = vadd.f32 %v19903_v25, %v6242_v56  ;;  %v20176_v22 = vadd.f32 %v19903_v25, %v6243_v4  ;;  %v20179_v58 = vadd.f32 %v19903_v25, %v6244_v17 }
 0x8ca   :  { %v20182_v0 = vadd.f32 %v19903_v25, %v6245_v27  ;;  %v20185_v3 = vadd.f32 %v19903_v25, %v6246_v30  ;;  %v20188_v57 = vadd.f32 %v19903_v25, %v6247_v13  ;;  %v20191_v44 = vadd.f32 %v19903_v25, %v6248_v1 }
 0x8cb   :  { %v20194_v23 = vadd.f32 %v19903_v25, %v6249_v20  ;;  %v20197_v45 = vadd.f32 %v19903_v25, %v6250_v34  ;;  %v20200_v56 = vadd.f32 %v19903_v25, %v6251_v59  ;;  %v20203_v4 = vadd.f32 %v19903_v25, %v6253_v41 }
 0x8cc   :  { %25217 = vst [vmem:[#allocation23_spill] sm:$0xff] %v20191_v44  ;;  %v20206_v17 = vadd.f32 %v19903_v25, %v6254_v11  ;;  %v6261_v27 = vadd.f32 %v19903_v25, %v19912_v62  ;;  %v6262_v30 = vadd.f32 %v19903_v25, %v19916_v49  ;;  %vm6327_vm5 = vcmp.gt.f32.partialorder %v6263_v9, 0.0 }
 0x8cd   :  { %25218 = vst [vmem:[#allocation25_spill] sm:$0xff] %v20194_v23  ;;  %25219 = vst [vmem:[#allocation28_spill] sm:$0xff] %v20197_v45  ;;  %vm6328_vm6 = vcmp.gt.f32.partialorder %v6264_v21, 0.0  ;;  %v6391_v13 = vmul.f32 0.1, %v6263_v9  ;;  %vm6329_vm2 = vcmp.gt.f32.partialorder %v20074_v6, 0.0  ;;  %v20218_v49 = vadd.f32 %v19903_v25, %v19959_v15 }
 0x8ce   :  { %25220 = vst [vmem:[#allocation30_spill] sm:$0xff] %v20200_v56  ;;  %25221 = vst [vmem:[#allocation39_spill] sm:$0xff] %v20203_v4  ;;  %vm6325_vm1 = vcmp.gt.f32.partialorder %v6261_v27, 0.0  ;;  %v6389_v1 = vmul.f32 0.1, %v6261_v27  ;;  %vm6326_vm7 = vcmp.gt.f32.partialorder %v6262_v30, 0.0  ;;  %v20222_v4 = vadd.f32 %v19903_v25, %v19963_v40 }
 0x8cf   :  { %25222 = vst [vmem:[#allocation43_spill] sm:$0xff] %v20206_v17  ;;  %v6392_v20 = vmul.f32 0.1, %v6264_v21  ;;  %v6390_v34 = vmul.f32 0.1, %v6262_v30  ;;  %v6455_v59 = vsel %vm6327_vm5, %v6263_v9, %v6391_v13  ;;  %vm6330_vm10 = vcmp.gt.f32.partialorder %v20077_v14, 0.0 }
 0x8d0   :  { %v6453_v41 = vsel %vm6325_vm1, %v6261_v27, %v6389_v1  ;;  %v6393_v62 = vmul.f32 0.1, %v20074_v6  ;;  %v6394_v17 = vmul.f32 0.1, %v20077_v14  ;;  %v20226_v9 = vadd.f32 %v19903_v25, %v19967_v29 }
 0x8d1   :  { %v6456_v11 = vsel %vm6328_vm6, %v6264_v21, %v6392_v20  ;;  %v6454_v56 = vsel %vm6326_vm7, %v6262_v30, %v6390_v34  ;;  %v20232_v1 = vadd.f32 %v19903_v25, %v19971_v7  ;;  %v20236_v15 = vadd.f32 %v19903_v25, %v19975_v33  ;;  %v25223_v20 = vld [vmem:[#allocation33_spill] sm:$0xff]  ;;  %v25224_v7 = vld [vmem:[#allocation40_spill] sm:$0xff]  ;;  %v25225_v33 = vld [vmem:[#allocation42_spill] sm:$0xff] }
 0x8d2   :  { %v6518_v45 = vpack.c.bf16 %v6456_v11, %v6455_v59  ;;  %v6517_v27 = vpack.c.bf16 %v6454_v56, %v6453_v41  ;;  %v6457_v21 = vsel %vm6329_vm2, %v20074_v6, %v6393_v62  ;;  %v6458_v13 = vsel %vm6330_vm10, %v20077_v14, %v6394_v17 }
 0x8d3   :  { %v6395_v40 = vmul.f32 0.1, %v20080_v28  ;;  %v6396_v30 = vmul.f32 0.1, %v20083_v2  ;;  %v20242_v29 = vadd.f32 %v19903_v25, %v25223_v20  ;;  %v6519_v6 = vpack.c.bf16 %v6458_v13, %v6457_v21  ;;  %v25226_v21 = vld [vmem:[#allocation46_spill] sm:$0xff] }
 0x8d4   :  { %14801 = vmatprep.mubr.bf16.mxu0 %v6517_v27  ;;  %vm6331_vm13 = vcmp.gt.f32.partialorder %v20080_v28, 0.0  ;;  %vm6332_vm4 = vcmp.gt.f32.partialorder %v20083_v2, 0.0  ;;  %v20248_v14 = vadd.f32 %v19903_v25, %v25224_v7  ;;  %v20252_v56 = vadd.f32 %v19903_v25, %v25225_v33  ;;  %v25227_v20 = vld [vmem:[#allocation50_spill] sm:$0xff] }
 0x8d5   :  { %14802 = vmatmul.mubr.bf16.vlgmr.msra.gmra.mrb[0].mxu0 %v6518_v45  ;;  %v6397_v17 = vmul.f32 0.1, %v20086_v12  ;;  %v6398_v34 = vmul.f32 0.1, %v20089_v37  ;;  %vm6333_vm8 = vcmp.gt.f32.partialorder %v20086_v12, 0.0  ;;  %vm6334_vm14 = vcmp.gt.f32.partialorder %v20089_v37, 0.0 }
 0x8d6   :  { %14805 = vmatprep.mubr.bf16.mxu0 %v6519_v6  ;;  %v6399_v59 = vmul.f32 0.1, %v20092_v52  ;;  %v6400_v41 = vmul.f32 0.1, %v20095_v61  ;;  %v6459_v11 = vsel %vm6331_vm13, %v20080_v28, %v6395_v40  ;;  %v6460_v62 = vsel %vm6332_vm4, %v20083_v2, %v6396_v30  ;;  %v25228_v30 = vld [vmem:[#allocation19_spill] sm:$0xff] }
 0x8d7   :  { %vm6335_vm11 = vcmp.gt.f32.partialorder %v20092_v52, 0.0  ;;  %vm6336_vm9 = vcmp.gt.f32.partialorder %v20095_v61, 0.0  ;;  %vm6337_vm15 = vcmp.gt.f32.partialorder %v20098_v36, 0.0  ;;  %vm6338_vm3 = vcmp.gt.f32.partialorder %v20101_v38, 0.0 }
 0x8d8   :  { %v6401_v45 = vmul.f32 0.1, %v20098_v36  ;;  %v6402_v27 = vmul.f32 0.1, %v20101_v38  ;;  %v20270_v13 = vadd.f32 %v19903_v25, %v25226_v21  ;;  %v20274_v28 = vadd.f32 %v19903_v25, %v25227_v20 }
 0x8d9   :  { %v6461_v2 = vsel %vm6333_vm8, %v20086_v12, %v6397_v17  ;;  %v6462_v40 = vsel %vm6334_vm14, %v20089_v37, %v6398_v34  ;;  %v20280_v6 = vadd.f32 %v19903_v25, %v25228_v30  ;;  %v6463_v7 = vsel %vm6335_vm11, %v20092_v52, %v6399_v59  ;;  %v25229_v12 = vld [vmem:[#allocation52_spill] sm:$0xff]  ;;  %v25230_v17 = vld [vmem:[#allocation38_spill] sm:$0xff]  ;;  %v25231_v52 = vld [vmem:[#allocation21_spill] sm:$0xff] }
 0x8da   :  { %v6464_v33 = vsel %vm6336_vm9, %v20095_v61, %v6400_v41  ;;  %v6403_v23 = vmul.f32 0.1, %v20104_v18  ;;  %v6520_v21 = vpack.c.bf16 %v6460_v62, %v6459_v11  ;;  %v6465_v44 = vsel %vm6337_vm15, %v20098_v36, %v6401_v45 }
 0x8db   :  { %v6466_v20 = vsel %vm6338_vm3, %v20101_v38, %v6402_v27  ;;  %vm6339_vm12 = vcmp.gt.f32.partialorder %v20104_v18, 0.0  ;;  %v20290_v37 = vadd.f32 %v19903_v25, %v25229_v12  ;;  %v20294_v34 = vadd.f32 %v19903_v25, %v25230_v17 }
 0x8dc   :  { %v20298_v61 = vadd.f32 %v19903_v25, %v25231_v52  ;;  %v6521_v59 = vpack.c.bf16 %v6462_v40, %v6461_v2  ;;  %v6522_v41 = vpack.c.bf16 %v6464_v33, %v6463_v7  ;;  %vm6340_vm0 = vcmp.gt.f32.partialorder %v20107_v48, 0.0 }
 0x8dd   :  { %14806 = vmatmul.mubr.bf16.gmra.mrb[4].mxu0 %v6520_v21  ;;  %v6404_v36 = vmul.f32 0.1, %v20107_v48  ;;  %vm6341_vm5 = vcmp.gt.f32.partialorder %v20110_v55, 0.0  ;;  %v6523_v38 = vpack.c.bf16 %v6466_v20, %v6465_v44  ;;  %v6467_v11 = vsel %vm6339_vm12, %v20104_v18, %v6403_v23 }
 0x8de   :  { %14809 = vmatprep.mubr.bf16.mxu0 %v6521_v59  ;;  %vm6342_vm6 = vcmp.gt.f32.partialorder %v20113_v50, 0.0  ;;  %v6405_v62 = vmul.f32 0.1, %v20110_v55  ;;  %v6406_v25 = vmul.f32 0.1, %v20113_v50  ;;  %vm6343_vm1 = vcmp.gt.f32.partialorder %v20116_v39, 0.0 }
 0x8df   :  { %vm6344_vm2 = vcmp.gt.f32.partialorder %v20119_v60, 0.0  ;;  %v6407_v45 = vmul.f32 0.1, %v20116_v39  ;;  %v6408_v27 = vmul.f32 0.1, %v20119_v60  ;;  %vm6345_vm7 = vcmp.gt.f32.partialorder %v20218_v49, 0.0 }
 0x8e0   :  { %vm6346_vm10 = vcmp.gt.f32.partialorder %v20222_v4, 0.0  ;;  %v6409_v18 = vmul.f32 0.1, %v20218_v49  ;;  %v6410_v44 = vmul.f32 0.1, %v20222_v4  ;;  %vm6347_vm13 = vcmp.gt.f32.partialorder %v20226_v9, 0.0 }
 0x8e1   :  { %vm6348_vm4 = vcmp.gt.f32.partialorder %v20232_v1, 0.0  ;;  %v6411_v23 = vmul.f32 0.1, %v20226_v9  ;;  %v6468_v2 = vsel %vm6340_vm0, %v20107_v48, %v6404_v36  ;;  %v6412_v40 = vmul.f32 0.1, %v20232_v1 }
 0x8e2   :  { %v6413_v30 = vmul.f32 0.1, %v20236_v15  ;;  %v6414_v7 = vmul.f32 0.1, %v20242_v29  ;;  %vm6349_vm8 = vcmp.gt.f32.partialorder %v20236_v15, 0.0  ;;  %vm6350_vm14 = vcmp.gt.f32.partialorder %v20242_v29, 0.0 }
 0x8e3   :  { %v6415_v33 = vmul.f32 0.1, %v20248_v14  ;;  %v6416_v21 = vmul.f32 0.1, %v20252_v56  ;;  %v6469_v20 = vsel %vm6341_vm5, %v20110_v55, %v6405_v62  ;;  %v6470_v48 = vsel %vm6342_vm6, %v20113_v50, %v6406_v25 }
 0x8e4   :  { %vm6351_vm11 = vcmp.gt.f32.partialorder %v20248_v14, 0.0  ;;  %vm6352_vm9 = vcmp.gt.f32.partialorder %v20252_v56, 0.0  ;;  %v20339_v12 = vsel %vm6343_vm1, %v20116_v39, %v6407_v45  ;;  %v20344_v17 = vsel %vm6344_vm2, %v20119_v60, %v6408_v27 }
 0x8e5   :  { %14810 = vmatmul.mubr.bf16.gmra.mrb[8].mxu0 %v6522_v41  ;;  %v20349_v55 = vsel %vm6345_vm7, %v20218_v49, %v6409_v18  ;;  %v20354_v50 = vsel %vm6346_vm10, %v20222_v4, %v6410_v44  ;;  %v20359_v39 = vsel %vm6347_vm13, %v20226_v9, %v6411_v23  ;;  %v20364_v60 = vsel %vm6348_vm4, %v20232_v1, %v6412_v40 }
 0x8e6   :  { %14813 = vmatprep.mubr.bf16.mxu0 %v6523_v38  ;;  %v20369_v49 = vsel %vm6349_vm8, %v20236_v15, %v6413_v30  ;;  %v20374_v4 = vsel %vm6350_vm14, %v20242_v29, %v6414_v7  ;;  %v6524_v52 = vpack.c.bf16 %v6468_v2, %v6467_v11  ;;  %v20377_v59 = vsel %vm6351_vm11, %v20248_v14, %v6415_v33 }
 0x8e7   :  { %v20380_v9 = vsel %vm6352_vm9, %v20252_v56, %v6416_v21  ;;  %v6417_v1 = vmul.f32 0.1, %v20270_v13  ;;  %v6525_v41 = vpack.c.bf16 %v6470_v48, %v6469_v20  ;;  %v6526_v36 = vpack.c.bf16 %v20344_v17, %v20339_v12 }
 0x8e8   :  { %vm6353_vm15 = vcmp.gt.f32.partialorder %v20270_v13, 0.0  ;;  %v6418_v15 = vmul.f32 0.1, %v20274_v28  ;;  %v6527_v29 = vpack.c.bf16 %v20354_v50, %v20349_v55  ;;  %v6528_v14 = vpack.c.bf16 %v20364_v60, %v20359_v39 }
 0x8e9   :  { %v6529_v56 = vpack.c.bf16 %v20374_v4, %v20369_v49  ;;  %vm6354_vm3 = vcmp.gt.f32.partialorder %v20274_v28, 0.0  ;;  %v6530_v38 = vpack.c.bf16 %v20380_v9, %v20377_v59  ;;  %v20397_v11 = vmul.f32 0.1, %v20280_v6 }
 0x8ea   :  { %vm6359_vm12 = vcmp.gt.f32.partialorder %v20122_v54, 0.0  ;;  %vm6360_vm0 = vcmp.gt.f32.partialorder %v20125_v35, 0.0  ;;  %v20402_v62 = vsel %vm6353_vm15, %v20270_v13, %v6417_v1  ;;  %v6423_v25 = vmul.f32 0.1, %v20122_v54 }
 0x8eb   :  { %v6424_v45 = vmul.f32 0.1, %v20125_v35  ;;  %vm6361_vm5 = vcmp.gt.f32.partialorder %v20128_v63, 0.0  ;;  %v20408_v27 = vsel %vm6354_vm3, %v20274_v28, %v6418_v15  ;;  %vm6362_vm6 = vcmp.gt.f32.partialorder %v20131_v19, 0.0 }
 0x8ec   :  { %v6425_v18 = vmul.f32 0.1, %v20128_v63  ;;  %v6426_v44 = vmul.f32 0.1, %v20131_v19  ;;  %v20414_v23 = vsel %vm6359_vm12, %v20122_v54, %v6423_v25  ;;  %vm6363_vm1 = vcmp.gt.f32.partialorder %v20134_v31, 0.0 }
 0x8ed   :  { %14814 = vmatmul.mubr.bf16.gmra.mrb[12].mxu0 %v6524_v52  ;;  %v20417_v13 = vsel %vm6360_vm0, %v20125_v35, %v6424_v45  ;;  %vm6364_vm2 = vcmp.gt.f32.partialorder %v20137_v43, 0.0  ;;  %v6427_v54 = vmul.f32 0.1, %v20134_v31  ;;  %v6428_v30 = vmul.f32 0.1, %v20137_v43 }
 0x8ee   :  { %14817 = vmatprep.mubr.bf16.mxu0 %v6525_v41  ;;  %v6534_v28 = vpack.c.bf16 %v20417_v13, %v20414_v23  ;;  %v20424_v2 = vsel %vm6361_vm5, %v20128_v63, %v6425_v18  ;;  %v20427_v40 = vsel %vm6362_vm6, %v20131_v19, %v6426_v44  ;;  %vm6365_vm7 = vcmp.gt.f32.partialorder %v20140_v32, 0.0 }
 0x8ef   :  { %v6535_v35 = vpack.c.bf16 %v20427_v40, %v20424_v2  ;;  %vm6366_vm10 = vcmp.gt.f32.partialorder %v20143_v42, 0.0  ;;  %v20436_v7 = vsel %vm6363_vm1, %v20134_v31, %v6427_v54  ;;  %v6429_v63 = vmul.f32 0.1, %v20140_v32 }
 0x8f0   :  { %v6430_v33 = vmul.f32 0.1, %v20143_v42  ;;  %vm6367_vm13 = vcmp.gt.f32.partialorder %v20146_v16, 0.0  ;;  %v20442_v19 = vsel %vm6364_vm2, %v20137_v43, %v6428_v30  ;;  %vm6368_vm4 = vcmp.gt.f32.partialorder %v20149_v5, 0.0 }
 0x8f1   :  { %v6431_v21 = vmul.f32 0.1, %v20146_v16  ;;  %v6432_v20 = vmul.f32 0.1, %v20149_v5  ;;  %v6536_v48 = vpack.c.bf16 %v20442_v19, %v20436_v7  ;;  %v20450_v31 = vsel %vm6365_vm7, %v20140_v32, %v6429_v63 }
 0x8f2   :  { %v20453_v12 = vsel %vm6366_vm10, %v20143_v42, %v6430_v33  ;;  %vm6369_vm8 = vcmp.gt.f32.partialorder %v20152_v46, 0.0  ;;  %vm6370_vm14 = vcmp.gt.f32.partialorder %v20155_v47, 0.0  ;;  %v6433_v50 = vmul.f32 0.1, %v20152_v46 }
 0x8f3   :  { %v6537_v43 = vpack.c.bf16 %v20453_v12, %v20450_v31  ;;  %v20459_v17 = vsel %vm6367_vm13, %v20146_v16, %v6431_v21  ;;  %v20462_v55 = vsel %vm6368_vm4, %v20149_v5, %v6432_v20  ;;  %v6434_v42 = vmul.f32 0.1, %v20155_v47 }
 0x8f4   :  { %v6538_v32 = vpack.c.bf16 %v20462_v55, %v20459_v17  ;;  %vm6371_vm11 = vcmp.gt.f32.partialorder %v20158_v24, 0.0  ;;  %vm6372_vm9 = vcmp.gt.f32.partialorder %v20161_v10, 0.0  ;;  %v6435_v16 = vmul.f32 0.1, %v20158_v24 }
 0x8f5   :  { %14818 = vmatmul.mubr.bf16.gmra.mrb[16].mxu0 %v6526_v36  ;;  %v6436_v52 = vmul.f32 0.1, %v20161_v10  ;;  %vm6373_vm15 = vcmp.gt.f32.partialorder %v20164_v53, 0.0  ;;  %v20475_v5 = vsel %vm6369_vm8, %v20152_v46, %v6433_v50  ;;  %v20478_v1 = vsel %vm6370_vm14, %v20155_v47, %v6434_v42  ;;  %v25234_v50 = vld [vmem:[#allocation28_spill] sm:$0xff] }
 0x8f6   :  { %14821 = vmatprep.mubr.bf16.mxu0 %v6527_v29  ;;  %vm6374_vm3 = vcmp.gt.f32.partialorder %v20167_v8, 0.0  ;;  %v6437_v41 = vmul.f32 0.1, %v20164_v53  ;;  %v6539_v36 = vpack.c.bf16 %v20478_v1, %v20475_v5  ;;  %v20485_v15 = vsel %vm6371_vm11, %v20158_v24, %v6435_v16 }
 0x8f7   :  { %v20488_v25 = vsel %vm6372_vm9, %v20161_v10, %v6436_v52  ;;  %v6438_v29 = vmul.f32 0.1, %v20167_v8  ;;  %vm6375_vm12 = vcmp.gt.f32.partialorder %v20170_v51, 0.0  ;;  %vm6376_vm0 = vcmp.gt.f32.partialorder %v20173_v26, 0.0 }
 0x8f8   :  { %v6540_v46 = vpack.c.bf16 %v20488_v25, %v20485_v15  ;;  %v20494_v47 = vsel %vm6373_vm15, %v20164_v53, %v6437_v41  ;;  %v6439_v24 = vmul.f32 0.1, %v20170_v51  ;;  %v6440_v10 = vmul.f32 0.1, %v20173_v26 }
 0x8f9   :  { %v20499_v45 = vsel %vm6374_vm3, %v20167_v8, %v6438_v29  ;;  %vm6377_vm5 = vcmp.gt.f32.partialorder %v20176_v22, 0.0  ;;  %vm6378_vm6 = vcmp.gt.f32.partialorder %v20179_v58, 0.0  ;;  %v6441_v53 = vmul.f32 0.1, %v20176_v22 }
 0x8fa   :  { %v6541_v18 = vpack.c.bf16 %v20499_v45, %v20494_v47  ;;  %v6442_v44 = vmul.f32 0.1, %v20179_v58  ;;  %v20510_v54 = vsel %vm6375_vm12, %v20170_v51, %v6439_v24  ;;  %v20513_v8 = vsel %vm6376_vm0, %v20173_v26, %v6440_v10  ;;  %v25236_v24 = vld [vmem:[#allocation29_spill] sm:$0xff] }
 0x8fb   :  { %vm6379_vm1 = vcmp.gt.f32.partialorder %v20182_v0, 0.0  ;;  %vm6380_vm2 = vcmp.gt.f32.partialorder %v20185_v3, 0.0  ;;  %v6542_v30 = vpack.c.bf16 %v20513_v8, %v20510_v54  ;;  %v20520_v63 = vsel %vm6377_vm5, %v20176_v22, %v6441_v53  ;;  %v25232_v22 = vld [vmem:[#allocation23_spill] sm:$0xff] }
 0x8fc   :  { %v20523_v33 = vsel %vm6378_vm6, %v20179_v58, %v6442_v44  ;;  %v6443_v21 = vmul.f32 0.1, %v20182_v0  ;;  %vm6355_vm7 = vcmp.gt.f32.partialorder %v20280_v6, 0.0  ;;  %v6444_v26 = vmul.f32 0.1, %v20185_v3  ;;  %v25237_v53 = vld [vmem:[#allocation31_spill] sm:$0xff] }
 0x8fd   :  { %14822 = vmatmul.mubr.bf16.gmra.mrb[20].mxu0 %v6528_v14  ;;  %v6543_v51 = vpack.c.bf16 %v20523_v33, %v20520_v63  ;;  %vm6381_vm10 = vcmp.gt.f32.partialorder %v20188_v57, 0.0  ;;  %vm6382_vm13 = vcmp.gt.f32.partialorder %v25232_v22, 0.0  ;;  %v6445_v39 = vmul.f32 0.1, %v20188_v57  ;;  %v25233_v14 = vld [vmem:[#allocation25_spill] sm:$0xff]  ;;  %v25238_v63 = vld [vmem:[#allocation39_spill] sm:$0xff] }
 0x8fe   :  { %14825 = vmatprep.mubr.bf16.mxu0 %v6529_v56  ;;  %v6507_v58 = vsel %vm6379_vm1, %v20182_v0, %v6443_v21  ;;  %v6446_v60 = vmul.f32 0.1, %v25232_v22  ;;  %vm6383_vm4 = vcmp.gt.f32.partialorder %v25233_v14, 0.0  ;;  %v6508_v20 = vsel %vm6380_vm2, %v20185_v3, %v6444_v26  ;;  %v25235_v56 = vld [vmem:[#allocation30_spill] sm:$0xff] }
 0x8ff   :  { %vm6384_vm8 = vcmp.gt.f32.partialorder %v25234_v50, 0.0  ;;  %v6447_v42 = vmul.f32 0.1, %v25233_v14  ;;  %v6448_v16 = vmul.f32 0.1, %v25234_v50  ;;  %v6544_v49 = vpack.c.bf16 %v6508_v20, %v6507_v58 }
 0x900   :  { %v6509_v4 = vsel %vm6381_vm10, %v20188_v57, %v6445_v39  ;;  %v6510_v0 = vsel %vm6382_vm13, %v25232_v22, %v6446_v60  ;;  %vm6385_vm14 = vcmp.gt.f32.partialorder %v25235_v56, 0.0  ;;  %vm6386_vm11 = vcmp.gt.f32.partialorder %v25236_v24, 0.0  ;;  %v25239_v57 = vld [vmem:[#allocation43_spill] sm:$0xff] }
 0x901   :  { %v6545_v52 = vpack.c.bf16 %v6510_v0, %v6509_v4  ;;  %v6511_v41 = vsel %vm6383_vm4, %v25233_v14, %v6447_v42  ;;  %v6512_v29 = vsel %vm6384_vm8, %v25234_v50, %v6448_v16  ;;  %v6449_v10 = vmul.f32 0.1, %v25235_v56 }
 0x902   :  { %v6546_v3 = vpack.c.bf16 %v6512_v29, %v6511_v41  ;;  %v6514_v44 = vsel %vm6386_vm11, %v25236_v24, %v25237_v53  ;;  %vm6387_vm9 = vcmp.gt.f32.partialorder %v25238_v63, 0.0  ;;  %vm6356_vm15 = vcmp.gt.f32.partialorder %v20290_v37, 0.0 }
 0x903   :  { %vm6388_vm3 = vcmp.gt.f32.partialorder %v25239_v57, 0.0  ;;  %v6451_v33 = vmul.f32 0.1, %v25238_v63  ;;  %v6452_v21 = vmul.f32 0.1, %v25239_v57  ;;  %v6531_v26 = vpack.c.bf16 %v20408_v27, %v20402_v62 }
 0x904   :  { %v6420_v22 = vmul.f32 0.1, %v20290_v37  ;;  %v6421_v58 = vmul.f32 0.1, %v20294_v34  ;;  %v6513_v39 = vsel %vm6385_vm14, %v25235_v56, %v6449_v10  ;;  %v6422_v60 = vmul.f32 0.1, %v20298_v61 }
 0x905   :  { %14826 = vmatmul.mubr.bf16.gmra.mrb[24].mxu0 %v6530_v38  ;;  %v6547_v14 = vpack.c.bf16 %v6514_v44, %v6513_v39  ;;  %v6515_v20 = vsel %vm6387_vm9, %v25238_v63, %v6451_v33  ;;  %v6516_v50 = vsel %vm6388_vm3, %v25239_v57, %v6452_v21  ;;  %vm6357_vm12 = vcmp.gt.f32.partialorder %v20294_v34, 0.0 }
 0x906   :  { %14829 = vmatprep.mubr.bf16.mxu0 %v6531_v26  ;;  %vm6358_vm0 = vcmp.gt.f32.partialorder %v20298_v61, 0.0  ;;  %v6548_v62 = vpack.c.bf16 %v6516_v50, %v6515_v20  ;;  %v6483_v27 = vsel %vm6355_vm7, %v20280_v6, %v20397_v11  ;;  %v6484_v59 = vsel %vm6356_vm15, %v20290_v37, %v6420_v22 }
 0x907   :  { %v6485_v9 = vsel %vm6357_vm12, %v20294_v34, %v6421_v58  ;;  %v6486_v38 = vsel %vm6358_vm0, %v20298_v61, %v6422_v60  ;;  %v6532_v42 = vpack.c.bf16 %v6484_v59, %v6483_v27 }
 0x908   :  { %v6533_v16 = vpack.c.bf16 %v6486_v38, %v6485_v9 }
 0x90d   :  { %14830 = vmatmul.mubr.bf16.gmra.mrb[28].mxu0 %v6532_v42 }
 0x90e   :  { %14833 = vmatprep.mubr.bf16.mxu0 %v6533_v16 }
 0x915   :  { %14834 = vmatmul.mubr.bf16.gmra.mrb[32].mxu0 %v6534_v28 }
 0x916   :  { %14837 = vmatprep.mubr.bf16.mxu0 %v6535_v35 }
 0x91d   :  { %14838 = vmatmul.mubr.bf16.gmra.mrb[36].mxu0 %v6536_v48 }
 0x91e   :  { %14841 = vmatprep.mubr.bf16.mxu0 %v6537_v43 }
 0x925   :  { %14842 = vmatmul.mubr.bf16.gmra.mrb[40].mxu0 %v6538_v32 }
 0x926   :  { %14845 = vmatprep.mubr.bf16.mxu0 %v6539_v36 }
 0x92d   :  { %14846 = vmatmul.mubr.bf16.gmra.mrb[44].mxu0 %v6540_v46 }
 0x92e   :  { %14849 = vmatprep.mubr.bf16.mxu0 %v6541_v18 }
 0x935   :  { %14850 = vmatmul.mubr.bf16.gmra.mrb[48].mxu0 %v6542_v30 }
 0x936   :  { %14853 = vmatprep.mubr.bf16.mxu0 %v6543_v51 }
 0x93d   :  { %14854 = vmatmul.mubr.bf16.gmra.mrb[52].mxu0 %v6544_v49 }
 0x93e   :  { %14857 = vmatprep.mubr.bf16.mxu0 %v6545_v52 }
 0x945   :  { %14858 = vmatmul.mubr.bf16.gmra.mrb[56].mxu0 %v6546_v3 }
 0x946   :  { %14861 = vmatprep.mubr.bf16.mxu0 %v6547_v14 }
 0x94d   :  { %14862 = vmatmul.mubr.bf16.gmra.mrb[60].mxu0 %v6548_v62 }
 0x9a8   :  { %v20613_v6 = vpop.f32.mrb[0].mxu0 }
 0x9a9   :  { %v20615_v37 = vpop.f32.mrb[1].mxu0 }
 0x9aa   :  { %v20617_v34 = vpop.f32.mrb[2].mxu0 }
 0x9ab   :  { %v20619_v61 = vpop.f32.mrb[3].mxu0 }
 0x9ac   :  { %v6904_v11 = vadd.f32 %v20619_v61, %v20615_v37 }
 0x9ae   :  { %v6905_v23 = vadd.f32 %v20613_v6, %v6904_v11 }
 0x9b0   :  { %v20624_v13 = vpop.f32.mrb[4].mxu0  ;;  %v6906_v28 = vadd.f32 %v20617_v34, %v6905_v23 }
 0x9b1   :  { %v20627_v2 = vpop.f32.mrb[5].mxu0 }
 0x9b2   :  { %v6907_v40 = vadd.f32 %v6906_v28, %v20627_v2  ;;  %v20630_v35 = vpop.f32.mrb[6].mxu0 }
 0x9b3   :  { %v20632_v7 = vpop.f32.mrb[7].mxu0 }
 0x9b4   :  { %v6908_v19 = vadd.f32 %v6907_v40, %v20632_v7 }
 0x9b6   :  { %v6909_v48 = vadd.f32 %v20624_v13, %v6908_v19 }
 0x9b8   :  { %v20636_v31 = vpop.f32.mrb[8].mxu0  ;;  %v6910_v12 = vadd.f32 %v20630_v35, %v6909_v48 }
 0x9b9   :  { %v20639_v43 = vpop.f32.mrb[9].mxu0 }
 0x9ba   :  { %v6911_v17 = vadd.f32 %v6910_v12, %v20639_v43  ;;  %v20642_v55 = vpop.f32.mrb[10].mxu0 }
 0x9bb   :  { %v20644_v32 = vpop.f32.mrb[11].mxu0 }
 0x9bc   :  { %v6912_v5 = vadd.f32 %v6911_v17, %v20644_v32 }
 0x9be   :  { %v6913_v1 = vadd.f32 %v20636_v31, %v6912_v5 }
 0x9c0   :  { %v20648_v36 = vpop.f32.mrb[12].mxu0  ;;  %v6914_v15 = vadd.f32 %v20642_v55, %v6913_v1 }
 0x9c1   :  { %v20651_v25 = vpop.f32.mrb[13].mxu0 }
 0x9c2   :  { %v6915_v46 = vadd.f32 %v6914_v15, %v20651_v25  ;;  %v20654_v47 = vpop.f32.mrb[14].mxu0 }
 0x9c3   :  { %v20656_v45 = vpop.f32.mrb[15].mxu0 }
 0x9c4   :  { %v6916_v18 = vadd.f32 %v6915_v46, %v20656_v45 }
 0x9c6   :  { %v6917_v54 = vadd.f32 %v20648_v36, %v6916_v18 }
 0x9c8   :  { %v20660_v8 = vpop.f32.mrb[16].mxu0  ;;  %v6918_v30 = vadd.f32 %v20654_v47, %v6917_v54 }
 0x9c9   :  { %v20663_v51 = vpop.f32.mrb[17].mxu0 }
 0x9ca   :  { %v6919_v49 = vadd.f32 %v6918_v30, %v20663_v51  ;;  %v20666_v4 = vpop.f32.mrb[18].mxu0 }
 0x9cb   :  { %v20668_v0 = vpop.f32.mrb[19].mxu0 }
 0x9cc   :  { %v6920_v56 = vadd.f32 %v6919_v49, %v20668_v0 }
 0x9ce   :  { %v6921_v52 = vadd.f32 %v20660_v8, %v6920_v56 }
 0x9d0   :  { %v20672_v41 = vpop.f32.mrb[20].mxu0  ;;  %v6922_v29 = vadd.f32 %v20666_v4, %v6921_v52 }
 0x9d1   :  { %v20675_v24 = vpop.f32.mrb[21].mxu0 }
 0x9d2   :  { %v6923_v3 = vadd.f32 %v6922_v29, %v20675_v24  ;;  %v20678_v10 = vpop.f32.mrb[22].mxu0 }
 0x9d3   :  { %v20680_v53 = vpop.f32.mrb[23].mxu0 }
 0x9d4   :  { %v6924_v44 = vadd.f32 %v6923_v3, %v20680_v53 }
 0x9d6   :  { %v6925_v63 = vadd.f32 %v20672_v41, %v6924_v44 }
 0x9d8   :  { %v20684_v57 = vpop.f32.mrb[24].mxu0  ;;  %v6926_v33 = vadd.f32 %v20678_v10, %v6925_v63 }
 0x9d9   :  { %v20687_v21 = vpop.f32.mrb[25].mxu0 }
 0x9da   :  { %v6927_v26 = vadd.f32 %v6926_v33, %v20687_v21  ;;  %v20690_v22 = vpop.f32.mrb[26].mxu0 }
 0x9db   :  { %v20692_v58 = vpop.f32.mrb[27].mxu0 }
 0x9dc   :  { %v6928_v39 = vadd.f32 %v6927_v26, %v20692_v58 }
 0x9de   :  { %v6929_v60 = vadd.f32 %v20684_v57, %v6928_v39 }
 0x9e0   :  { %v20696_v14 = vpop.f32.mrb[28].mxu0  ;;  %v6930_v20 = vadd.f32 %v20690_v22, %v6929_v60 }
 0x9e1   :  { %v20699_v50 = vpop.f32.mrb[29].mxu0 }
 0x9e2   :  { %v6931_v62 = vadd.f32 %v6930_v20, %v20699_v50  ;;  %v20702_v27 = vpop.f32.mrb[30].mxu0 }
 0x9e3   :  { %v20704_v59 = vpop.f32.mrb[31].mxu0 }
 0x9e4   :  { %v6932_v9 = vadd.f32 %v6931_v62, %v20704_v59 }
 0x9e6   :  { %v6933_v38 = vadd.f32 %v20696_v14, %v6932_v9 }
 0x9e8   :  { %v20708_v42 = vpop.f32.mrb[32].mxu0  ;;  %v6934_v16 = vadd.f32 %v20702_v27, %v6933_v38 }
 0x9e9   :  { %v20711_v11 = vpop.f32.mrb[33].mxu0 }
 0x9ea   :  { %v6935_v23 = vadd.f32 %v6934_v16, %v20711_v11  ;;  %v20714_v28 = vpop.f32.mrb[34].mxu0 }
 0x9eb   :  { %v20716_v40 = vpop.f32.mrb[35].mxu0 }
 0x9ec   :  { %v6936_v19 = vadd.f32 %v6935_v23, %v20716_v40 }
 0x9ee   :  { %v6937_v48 = vadd.f32 %v20708_v42, %v6936_v19 }
 0x9f0   :  { %v20720_v12 = vpop.f32.mrb[36].mxu0  ;;  %v6938_v17 = vadd.f32 %v20714_v28, %v6937_v48 }
 0x9f1   :  { %v20723_v5 = vpop.f32.mrb[37].mxu0 }
 0x9f2   :  { %v6939_v1 = vadd.f32 %v6938_v17, %v20723_v5  ;;  %v20726_v15 = vpop.f32.mrb[38].mxu0 }
 0x9f3   :  { %v20728_v46 = vpop.f32.mrb[39].mxu0 }
 0x9f4   :  { %v6940_v18 = vadd.f32 %v6939_v1, %v20728_v46 }
 0x9f6   :  { %v6941_v54 = vadd.f32 %v20720_v12, %v6940_v18 }
 0x9f8   :  { %v20732_v30 = vpop.f32.mrb[40].mxu0  ;;  %v6942_v49 = vadd.f32 %v20726_v15, %v6941_v54 }
 0x9f9   :  { %v20735_v56 = vpop.f32.mrb[41].mxu0 }
 0x9fa   :  { %v6943_v52 = vadd.f32 %v6942_v49, %v20735_v56  ;;  %v20738_v29 = vpop.f32.mrb[42].mxu0 }
 0x9fb   :  { %v20740_v3 = vpop.f32.mrb[43].mxu0 }
 0x9fc   :  { %v6944_v44 = vadd.f32 %v6943_v52, %v20740_v3 }
 0x9fe   :  { %v6945_v63 = vadd.f32 %v20732_v30, %v6944_v44 }
 0xa00   :  { %v20744_v33 = vpop.f32.mrb[44].mxu0  ;;  %v6946_v26 = vadd.f32 %v20738_v29, %v6945_v63 }
 0xa01   :  { %v20747_v39 = vpop.f32.mrb[45].mxu0 }
 0xa02   :  { %v6947_v60 = vadd.f32 %v6946_v26, %v20747_v39  ;;  %v20750_v20 = vpop.f32.mrb[46].mxu0 }
 0xa03   :  { %v20752_v62 = vpop.f32.mrb[47].mxu0 }
 0xa04   :  { %v6948_v9 = vadd.f32 %v6947_v60, %v20752_v62 }
 0xa06   :  { %v6949_v38 = vadd.f32 %v20744_v33, %v6948_v9 }
 0xa08   :  { %v20756_v16 = vpop.f32.mrb[48].mxu0  ;;  %v6950_v23 = vadd.f32 %v20750_v20, %v6949_v38 }
 0xa09   :  { %25240 = vst [vmem:[#allocation32_spill] sm:$0xff] %v20756_v16  ;;  %v20759_v19 = vpop.f32.mrb[49].mxu0 }
 0xa0a   :  { %25241 = vst [vmem:[#allocation41_spill] sm:$0xff] %v20759_v19  ;;  %v6951_v48 = vadd.f32 %v6950_v23, %v20759_v19  ;;  %v20762_v17 = vpop.f32.mrb[50].mxu0 }
 0xa0b   :  { %25242 = vst [vmem:[#allocation15_spill] sm:$0xff] %v20762_v17  ;;  %v20764_v1 = vpop.f32.mrb[51].mxu0 }
 0xa0c   :  { %25243 = vst [vmem:[#allocation47_spill] sm:$0xff] %v20764_v1  ;;  %v6952_v18 = vadd.f32 %v6951_v48, %v20764_v1 }
 0xa0e   :  { %v6953_v54 = vadd.f32 %v20756_v16, %v6952_v18 }
 0xa10   :  { %v20768_v49 = vpop.f32.mrb[52].mxu0  ;;  %v6954_v52 = vadd.f32 %v20762_v17, %v6953_v54 }
 0xa11   :  { %25244 = vst [vmem:[#allocation44_spill] sm:$0xff] %v20768_v49  ;;  %v20771_v44 = vpop.f32.mrb[53].mxu0 }
 0xa12   :  { %25245 = vst [vmem:[#allocation45_spill] sm:$0xff] %v20771_v44  ;;  %v6955_v63 = vadd.f32 %v6954_v52, %v20771_v44  ;;  %v20774_v26 = vpop.f32.mrb[54].mxu0 }
 0xa13   :  { %25246 = vst [vmem:[#allocation4_spill] sm:$0xff] %v20774_v26  ;;  %v20776_v60 = vpop.f32.mrb[55].mxu0 }
 0xa14   :  { %25247 = vst [vmem:[#allocation6_spill] sm:$0xff] %v20776_v60  ;;  %v6956_v9 = vadd.f32 %v6955_v63, %v20776_v60 }
 0xa16   :  { %v6957_v38 = vadd.f32 %v20768_v49, %v6956_v9 }
 0xa18   :  { %v20780_v23 = vpop.f32.mrb[56].mxu0  ;;  %v6958_v48 = vadd.f32 %v20774_v26, %v6957_v38 }
 0xa19   :  { %25248 = vst [vmem:[#allocation48_spill] sm:$0xff] %v20780_v23  ;;  %v20783_v18 = vpop.f32.mrb[57].mxu0 }
 0xa1a   :  { %25249 = vst [vmem:[#allocation49_spill] sm:$0xff] %v20783_v18  ;;  %v6959_v54 = vadd.f32 %v6958_v48, %v20783_v18  ;;  %v20786_v17 = vpop.f32.mrb[58].mxu0 }
 0xa1b   :  { %25250 = vst [vmem:[#allocation3_spill] sm:$0xff] %v20786_v17  ;;  %v20788_v16 = vpop.f32.mrb[59].mxu0 }
 0xa1c   :  { %25251 = vst [vmem:[#allocation34_spill] sm:$0xff] %v20788_v16  ;;  %v6960_v52 = vadd.f32 %v6959_v54, %v20788_v16 }
 0xa1e   :  { %v6961_v44 = vadd.f32 %v20780_v23, %v6960_v52 }
 0xa20   :  { %v20792_v1 = vpop.f32.mrb[60].mxu0  ;;  %v6962_v63 = vadd.f32 %v20786_v17, %v6961_v44 }
 0xa21   :  { %v20795_v9 = vpop.f32.mrb[61].mxu0 }
 0xa22   :  { %25252 = vst [vmem:[#allocation35_spill] sm:$0xff] %v20795_v9  ;;  %v6963_v38 = vadd.f32 %v6962_v63, %v20795_v9  ;;  %v20798_v26 = vpop.f32.mrb[62].mxu0 }
 0xa23   :  { %v20800_v49 = vpop.f32.mrb[63].mxu0 }
 0xa24   :  { %v6964_v48 = vadd.f32 %v6963_v38, %v20800_v49 }
 0xa26   :  { %v6965_v18 = vadd.f32 %v20792_v1, %v6964_v48  ;;  %v25276_v48 = vld [vmem:[#allocation15_spill] sm:$0xff] }
 0xa28   :  { %v6966_v54 = vadd.f32 %v20798_v26, %v6965_v18  ;;  %v25274_v18 = vld [vmem:[#allocation32_spill] sm:$0xff] }
 0xa2a   :  { %v6967_v16 = vrot.slane %v6966_v54, 4 }
 0xa2c   :  { %v6968_v52 = vadd.f32 %v6967_v16, %v6966_v54  ;;  %v25278_v54 = vld [vmem:[#allocation45_spill] sm:$0xff] }
 0xa2e   :  { %v6969_v23 = vrot.slane %v6968_v52, 2 }
 0xa30   :  { %v6970_v60 = vadd.f32 %v6969_v23, %v6968_v52  ;;  %v25272_v23 = vld [vmem:[#allocation47_spill] sm:$0xff]  ;;  %v25280_v52 = vld [vmem:[#allocation6_spill] sm:$0xff] }
 0xa32   :  { %v6971_v19 = vrot.slane %v6970_v60, 1 }
 0xa34   :  { %v6972_v44 = vadd.f32 %v6971_v19, %v6970_v60  ;;  %v25271_v60 = vld [vmem:[#allocation41_spill] sm:$0xff] }
 0xa36   :  { %v20805_v17 = vmul.f32 0.001953125, %v6972_v44 }
 0xa38   :  { %v20809_v63 = vsub.f32 %v20615_v37, %v20805_v17  ;;  %v20813_v9 = vsub.f32 %v20619_v61, %v20805_v17  ;;  %v20817_v38 = vsub.f32 %v20613_v6, %v20805_v17  ;;  %v20821_v16 = vsub.f32 %v20617_v34, %v20805_v17 }
 0xa39   :  { %v20825_v19 = vsub.f32 %v20627_v2, %v20805_v17  ;;  %v20829_v37 = vsub.f32 %v20632_v7, %v20805_v17  ;;  %v20833_v61 = vsub.f32 %v20624_v13, %v20805_v17  ;;  %v20837_v6 = vsub.f32 %v20630_v35, %v20805_v17 }
 0xa3a   :  { %25253 = vst [vmem:[#allocation36_spill] sm:$0xff] %v20809_v63  ;;  %25254 = vst [vmem:[#allocation26_spill] sm:$0xff] %v20813_v9  ;;  %v20841_v34 = vsub.f32 %v20639_v43, %v20805_v17  ;;  %v20845_v2 = vsub.f32 %v20644_v32, %v20805_v17  ;;  %v20849_v7 = vsub.f32 %v20636_v31, %v20805_v17 }
 0xa3b   :  { %25255 = vst [vmem:[#allocation5_spill] sm:$0xff] %v20817_v38  ;;  %25256 = vst [vmem:[#allocation8_spill] sm:$0xff] %v20837_v6  ;;  %v20853_v13 = vsub.f32 %v20642_v55, %v20805_v17  ;;  %v20857_v35 = vsub.f32 %v20651_v25, %v20805_v17  ;;  %v20861_v43 = vsub.f32 %v20656_v45, %v20805_v17 }
 0xa3c   :  { %25257 = vst [vmem:[#allocation51_spill] sm:$0xff] %v20841_v34  ;;  %25258 = vst [vmem:[#allocation10_spill] sm:$0xff] %v20845_v2  ;;  %v20865_v32 = vsub.f32 %v20648_v36, %v20805_v17  ;;  %v20869_v31 = vsub.f32 %v20654_v47, %v20805_v17  ;;  %v20873_v55 = vsub.f32 %v20663_v51, %v20805_v17 }
 0xa3d   :  { %25259 = vst [vmem:[#allocation7_spill] sm:$0xff] %v20849_v7  ;;  %25260 = vst [vmem:[#allocation9_spill] sm:$0xff] %v20853_v13  ;;  %v20877_v25 = vsub.f32 %v20668_v0, %v20805_v17  ;;  %v20881_v45 = vsub.f32 %v20660_v8, %v20805_v17  ;;  %v20885_v36 = vsub.f32 %v20666_v4, %v20805_v17 }
 0xa3e   :  { %25261 = vst [vmem:[#allocation12_spill] sm:$0xff] %v20857_v35  ;;  %25262 = vst [vmem:[#allocation53_spill] sm:$0xff] %v20861_v43  ;;  %v20889_v47 = vsub.f32 %v20675_v24, %v20805_v17  ;;  %v20893_v51 = vsub.f32 %v20680_v53, %v20805_v17  ;;  %v20897_v0 = vsub.f32 %v20672_v41, %v20805_v17 }
 0xa3f   :  { %25263 = vst [vmem:[#allocation14_spill] sm:$0xff] %v20865_v32  ;;  %25264 = vst [vmem:[#allocation37_spill] sm:$0xff] %v20869_v31  ;;  %v20901_v8 = vsub.f32 %v20678_v10, %v20805_v17  ;;  %v20905_v4 = vsub.f32 %v20687_v21, %v20805_v17  ;;  %v20909_v24 = vsub.f32 %v20692_v58, %v20805_v17 }
 0xa40   :  { %25265 = vst [vmem:[#allocation16_spill] sm:$0xff] %v20873_v55  ;;  %25266 = vst [vmem:[#allocation17_spill] sm:$0xff] %v20877_v25  ;;  %v20913_v53 = vsub.f32 %v20684_v57, %v20805_v17  ;;  %v20917_v41 = vsub.f32 %v20690_v22, %v20805_v17  ;;  %v20921_v10 = vsub.f32 %v20699_v50, %v20805_v17 }
 0xa41   :  { %25267 = vst [vmem:[#allocation18_spill] sm:$0xff] %v20881_v45  ;;  %25268 = vst [vmem:[#allocation20_spill] sm:$0xff] %v20885_v36  ;;  %v20925_v21 = vsub.f32 %v20704_v59, %v20805_v17  ;;  %v20929_v58 = vsub.f32 %v20696_v14, %v20805_v17  ;;  %v20933_v57 = vsub.f32 %v20702_v27, %v20805_v17 }
 0xa42   :  { %25269 = vst [vmem:[#allocation11_spill] sm:$0xff] %v20889_v47  ;;  %25270 = vst [vmem:[#allocation22_spill] sm:$0xff] %v20893_v51  ;;  %v20937_v22 = vsub.f32 %v20711_v11, %v20805_v17  ;;  %v20941_v50 = vsub.f32 %v20716_v40, %v20805_v17  ;;  %v20945_v59 = vsub.f32 %v20708_v42, %v20805_v17 }
 0xa43   :  { %v20949_v14 = vsub.f32 %v20714_v28, %v20805_v17  ;;  %v20953_v27 = vsub.f32 %v20723_v5, %v20805_v17  ;;  %v20957_v11 = vsub.f32 %v20728_v46, %v20805_v17  ;;  %v20961_v40 = vsub.f32 %v20720_v12, %v20805_v17 }
 0xa44   :  { %v20965_v42 = vsub.f32 %v20726_v15, %v20805_v17  ;;  %v20969_v28 = vsub.f32 %v20735_v56, %v20805_v17  ;;  %v20973_v5 = vsub.f32 %v20740_v3, %v20805_v17  ;;  %v20977_v46 = vsub.f32 %v20732_v30, %v20805_v17 }
 0xa45   :  { %v20981_v12 = vsub.f32 %v20738_v29, %v20805_v17  ;;  %v20985_v15 = vsub.f32 %v20747_v39, %v20805_v17  ;;  %v20989_v56 = vsub.f32 %v20752_v62, %v20805_v17  ;;  %v20993_v3 = vsub.f32 %v20744_v33, %v20805_v17 }
 0xa46   :  { %v20997_v30 = vsub.f32 %v20750_v20, %v20805_v17  ;;  %v21001_v29 = vsub.f32 %v25271_v60, %v20805_v17  ;;  %v21005_v39 = vsub.f32 %v25272_v23, %v20805_v17  ;;  %v21009_v62 = vsub.f32 %v25274_v18, %v20805_v17  ;;  %v25282_v60 = vld [vmem:[#allocation44_spill] sm:$0xff] }
 0xa47   :  { %v21013_v33 = vsub.f32 %v25276_v48, %v20805_v17  ;;  %v21017_v20 = vsub.f32 %v25278_v54, %v20805_v17  ;;  %v21021_v44 = vsub.f32 %v25280_v52, %v20805_v17  ;;  %v21025_v23 = vsub.f32 %v25282_v60, %v20805_v17 }
 0xa48   :  { %25273 = vst [vmem:[#allocation24_spill] sm:$0xff] %v21005_v39  ;;  %25275 = vst [vmem:[#allocation27_spill] sm:$0xff] %v21009_v62  ;;  %v25284_v39 = vld [vmem:[#allocation4_spill] sm:$0xff]  ;;  %v25285_v62 = vld [vmem:[#allocation49_spill] sm:$0xff] }
 0xa49   :  { %25277 = vst [vmem:[#allocation33_spill] sm:$0xff] %v21013_v33  ;;  %25279 = vst [vmem:[#allocation40_spill] sm:$0xff] %v21017_v20  ;;  %v21029_v18 = vsub.f32 %v25284_v39, %v20805_v17  ;;  %v21033_v48 = vsub.f32 %v25285_v62, %v20805_v17  ;;  %v25286_v33 = vld [vmem:[#allocation34_spill] sm:$0xff]  ;;  %v25287_v20 = vld [vmem:[#allocation48_spill] sm:$0xff]  ;;  %v21053_v62 = vsub.f32 %v20800_v49, %v20805_v17 }
 0xa4a   :  { %25281 = vst [vmem:[#allocation42_spill] sm:$0xff] %v21021_v44  ;;  %25283 = vst [vmem:[#allocation46_spill] sm:$0xff] %v21025_v23  ;;  %v21037_v54 = vsub.f32 %v25286_v33, %v20805_v17  ;;  %v21041_v52 = vsub.f32 %v25287_v20, %v20805_v17  ;;  %v25288_v44 = vld [vmem:[#allocation3_spill] sm:$0xff]  ;;  %v21057_v33 = vsub.f32 %v20792_v1, %v20805_v17 }
 0xa4b   :  { %v21045_v60 = vsub.f32 %v25288_v44, %v20805_v17  ;;  %v25290_v23 = vld [vmem:[#allocation35_spill] sm:$0xff]  ;;  %25292 = vst [vmem:[#allocation52_spill] sm:$0xff] %v21053_v62  ;;  %v21061_v20 = vsub.f32 %v20798_v26, %v20805_v17  ;;  %v7038_v44 = vmul.f32 %v20809_v63, %v20809_v63  ;;  %v7041_v49 = vmul.f32 %v20821_v16, %v20821_v16 }
 0xa4c   :  { %v21049_v39 = vsub.f32 %v25290_v23, %v20805_v17  ;;  %25293 = vst [vmem:[#allocation38_spill] sm:$0xff] %v21057_v33  ;;  %v7040_v23 = vmul.f32 %v20817_v38, %v20817_v38  ;;  %v7042_v1 = vmul.f32 %v20825_v19, %v20825_v19  ;;  %v7043_v17 = vmul.f32 %v20829_v37, %v20829_v37 }
 0xa4d   :  { %25289 = vst [vmem:[#allocation50_spill] sm:$0xff] %v21045_v60  ;;  %v7039_v60 = vmul.f32 %v20813_v9, %v20813_v9  ;;  %v7044_v63 = vmul.f32 %v20833_v61, %v20833_v61  ;;  %v7045_v38 = vmul.f32 %v20837_v6, %v20837_v6 }
 0xa4e   :  { %25291 = vst [vmem:[#allocation19_spill] sm:$0xff] %v21049_v39 }
 0xa4f   :  { %v7102_v39 = vadd.f32 %v7039_v60, %v7038_v44  ;;  %v7046_v44 = vmul.f32 %v20841_v34, %v20841_v34 }
 0xa51   :  { %v7103_v62 = vadd.f32 %v7102_v39, %v7040_v23  ;;  %v7047_v23 = vmul.f32 %v20845_v2, %v20845_v2 }
 0xa53   :  { %v7104_v33 = vadd.f32 %v7103_v62, %v7041_v49  ;;  %v7048_v49 = vmul.f32 %v20849_v7, %v20849_v7 }
 0xa55   :  { %v7105_v26 = vadd.f32 %v7104_v33, %v7042_v1  ;;  %v7049_v1 = vmul.f32 %v20853_v13, %v20853_v13 }
 0xa57   :  { %v7106_v9 = vadd.f32 %v7105_v26, %v7043_v17  ;;  %v7050_v26 = vmul.f32 %v20857_v35, %v20857_v35 }
 0xa59   :  { %v7107_v60 = vadd.f32 %v7106_v9, %v7044_v63  ;;  %v7051_v63 = vmul.f32 %v20861_v43, %v20861_v43  ;;  %v25304_v43 = vld [vmem:[#allocation38_spill] sm:$0xff] }
 0xa5b   :  { %v7108_v39 = vadd.f32 %v7107_v60, %v7045_v38  ;;  %v7052_v60 = vmul.f32 %v20865_v32, %v20865_v32 }
 0xa5d   :  { %v7109_v62 = vadd.f32 %v7108_v39, %v7046_v44  ;;  %v7053_v39 = vmul.f32 %v20869_v31, %v20869_v31 }
 0xa5f   :  { %v7110_v33 = vadd.f32 %v7109_v62, %v7047_v23  ;;  %v7054_v62 = vmul.f32 %v20873_v55, %v20873_v55 }
 0xa61   :  { %v7111_v17 = vadd.f32 %v7110_v33, %v7048_v49  ;;  %v7055_v33 = vmul.f32 %v20877_v25, %v20877_v25  ;;  %v7684_v25 = vld [vmem:[#allocation2 + $0x9] sm:$0xff] }
 0xa63   :  { %v7112_v9 = vadd.f32 %v7111_v17, %v7049_v1  ;;  %v7056_v17 = vmul.f32 %v20881_v45, %v20881_v45  ;;  %v7093_v45 = vmul.f32 %v21029_v18, %v21029_v18 }
 0xa65   :  { %v7113_v38 = vadd.f32 %v7112_v9, %v7050_v26  ;;  %v7057_v9 = vmul.f32 %v20885_v36, %v20885_v36 }
 0xa67   :  { %v7114_v44 = vadd.f32 %v7113_v38, %v7051_v63  ;;  %v7058_v38 = vmul.f32 %v20889_v47, %v20889_v47  ;;  %v25298_v47 = vld [vmem:[#allocation42_spill] sm:$0xff] }
 0xa68   :  { %v7091_v36 = vmul.f32 %v25298_v47, %v25298_v47 }
 0xa69   :  { %v7115_v23 = vadd.f32 %v7114_v44, %v7052_v60  ;;  %v7059_v44 = vmul.f32 %v20893_v51, %v20893_v51 }
 0xa6b   :  { %v7116_v49 = vadd.f32 %v7115_v23, %v7053_v39  ;;  %v7060_v23 = vmul.f32 %v20897_v0, %v20897_v0 }
 0xa6d   :  { %v7117_v1 = vadd.f32 %v7116_v49, %v7054_v62  ;;  %v7061_v49 = vmul.f32 %v20901_v8, %v20901_v8 }
 0xa6f   :  { %v7118_v26 = vadd.f32 %v7117_v1, %v7055_v33  ;;  %v7062_v1 = vmul.f32 %v20905_v4, %v20905_v4 }
 0xa71   :  { %v7119_v63 = vadd.f32 %v7118_v26, %v7056_v17  ;;  %v7063_v26 = vmul.f32 %v20909_v24, %v20909_v24 }
 0xa73   :  { %v7120_v60 = vadd.f32 %v7119_v63, %v7057_v9  ;;  %v7064_v63 = vmul.f32 %v20913_v53, %v20913_v53 }
 0xa75   :  { %v7121_v39 = vadd.f32 %v7120_v60, %v7058_v38  ;;  %v7065_v60 = vmul.f32 %v20917_v41, %v20917_v41 }
 0xa77   :  { %v7122_v62 = vadd.f32 %v7121_v39, %v7059_v44  ;;  %v7066_v39 = vmul.f32 %v20921_v10, %v20921_v10 }
 0xa79   :  { %v7123_v33 = vadd.f32 %v7122_v62, %v7060_v23  ;;  %v7067_v62 = vmul.f32 %v20925_v21, %v20925_v21 }
 0xa7b   :  { %v7124_v17 = vadd.f32 %v7123_v33, %v7061_v49  ;;  %v7068_v33 = vmul.f32 %v20929_v58, %v20929_v58 }
 0xa7d   :  { %v7125_v9 = vadd.f32 %v7124_v17, %v7062_v1  ;;  %v7069_v17 = vmul.f32 %v20933_v57, %v20933_v57 }
 0xa7f   :  { %v7126_v38 = vadd.f32 %v7125_v9, %v7063_v26  ;;  %v7070_v9 = vmul.f32 %v20937_v22, %v20937_v22 }
 0xa81   :  { %v7127_v44 = vadd.f32 %v7126_v38, %v7064_v63  ;;  %v7071_v38 = vmul.f32 %v20941_v50, %v20941_v50 }
 0xa83   :  { %v7128_v23 = vadd.f32 %v7127_v44, %v7065_v60  ;;  %v7072_v44 = vmul.f32 %v20945_v59, %v20945_v59 }
 0xa85   :  { %v7129_v49 = vadd.f32 %v7128_v23, %v7066_v39  ;;  %v7073_v23 = vmul.f32 %v20949_v14, %v20949_v14 }
 0xa87   :  { %v7130_v1 = vadd.f32 %v7129_v49, %v7067_v62  ;;  %v7074_v49 = vmul.f32 %v20953_v27, %v20953_v27 }
 0xa89   :  { %v7131_v26 = vadd.f32 %v7130_v1, %v7068_v33  ;;  %v7075_v1 = vmul.f32 %v20957_v11, %v20957_v11 }
 0xa8b   :  { %v7132_v63 = vadd.f32 %v7131_v26, %v7069_v17  ;;  %v7076_v26 = vmul.f32 %v20961_v40, %v20961_v40 }
 0xa8d   :  { %v7133_v60 = vadd.f32 %v7132_v63, %v7070_v9  ;;  %v7077_v63 = vmul.f32 %v20965_v42, %v20965_v42 }
 0xa8f   :  { %v7134_v39 = vadd.f32 %v7133_v60, %v7071_v38  ;;  %v7078_v60 = vmul.f32 %v20969_v28, %v20969_v28 }
 0xa91   :  { %v7135_v62 = vadd.f32 %v7134_v39, %v7072_v44  ;;  %v7079_v39 = vmul.f32 %v20973_v5, %v20973_v5 }
 0xa93   :  { %v7136_v33 = vadd.f32 %v7135_v62, %v7073_v23  ;;  %v16730_v62 = vld [vmem:[%s24593_s2 + $0x40] sm:$0xff]  }
 0xa94   :  { %14865 = vmatprep.subr.bf16.mxu0 %v16730_v62 }
 0xa95   :  { %v7137_v17 = vadd.f32 %v7136_v33, %v7074_v49  ;;  %v7080_v49 = vmul.f32 %v20977_v46, %v20977_v46  ;;  %14866 = vmatpush3.bf16.msra.mxu0 %v16730_v62  ;;  %v7085_v62 = vmul.f32 %v20997_v30, %v20997_v30 }
 0xa97   :  { %v7138_v9 = vadd.f32 %v7137_v17, %v7075_v1  ;;  %v7081_v1 = vmul.f32 %v20981_v12, %v20981_v12 }
 0xa99   :  { %v7139_v38 = vadd.f32 %v7138_v9, %v7076_v26  ;;  %v16731_v26 = vld [vmem:[%s24593_s2 + $0x48] sm:$0xff]   ;;  %v7082_v9 = vmul.f32 %v20985_v15, %v20985_v15 }
 0xa9a   :  { %14867 = vmatprep.subr.bf16.mxu0 %v16731_v26 }
 0xa9b   :  { %v7140_v44 = vadd.f32 %v7139_v38, %v7077_v63  ;;  %14868 = vmatpush3.bf16.msra.mxu0 %v16731_v26  ;;  %v7083_v38 = vmul.f32 %v20989_v56, %v20989_v56  ;;  %v25294_v26 = vld [vmem:[#allocation24_spill] sm:$0xff] }
 0xa9d   :  { %v7141_v23 = vadd.f32 %v7140_v44, %v7078_v60  ;;  %v16732_v44 = vld [vmem:[%s24593_s2 + $0x50] sm:$0xff]  }
 0xa9e   :  { %14869 = vmatprep.subr.bf16.mxu0 %v16732_v44 }
 0xa9f   :  { %v7142_v33 = vadd.f32 %v7141_v23, %v7079_v39  ;;  %v7084_v39 = vmul.f32 %v20993_v3, %v20993_v3  ;;  %14870 = vmatpush3.bf16.msra.mxu0 %v16732_v44 }
 0xaa1   :  { %v7143_v17 = vadd.f32 %v7142_v33, %v7080_v49  ;;  %v16733_v33 = vld [vmem:[%s24593_s2 + $0x58] sm:$0xff]  }
 0xaa2   :  { %14871 = vmatprep.subr.bf16.mxu0 %v16733_v33 }
 0xaa3   :  { %v7144_v63 = vadd.f32 %v7143_v17, %v7081_v1  ;;  %v7086_v1 = vmul.f32 %v21001_v29, %v21001_v29  ;;  %14872 = vmatpush3.bf16.msra.mxu0 %v16733_v33  ;;  %v25297_v33 = vld [vmem:[#allocation40_spill] sm:$0xff] }
 0xaa5   :  { %v7145_v60 = vadd.f32 %v7144_v63, %v7082_v9  ;;  %v7087_v9 = vmul.f32 %v25294_v26, %v25294_v26 }
 0xaa7   :  { %v7146_v23 = vadd.f32 %v7145_v60, %v7083_v38  ;;  %v16734_v38 = vld [vmem:[%s24593_s2 + $0x60] sm:$0xff]  }
 0xaa8   :  { %v25295_v60 = vld [vmem:[#allocation27_spill] sm:$0xff]  ;;  %14873 = vmatprep.subr.bf16.mxu0 %v16734_v38 }
 0xaa9   :  { %v7147_v49 = vadd.f32 %v7146_v23, %v7084_v39  ;;  %v7088_v44 = vmul.f32 %v25295_v60, %v25295_v60  ;;  %14874 = vmatpush3.bf16.msra.mxu0 %v16734_v38  ;;  %v25296_v23 = vld [vmem:[#allocation33_spill] sm:$0xff]  ;;  %v25299_v38 = vld [vmem:[#allocation46_spill] sm:$0xff] }
 0xaaa   :  { %v7089_v51 = vmul.f32 %v25296_v23, %v25296_v23 }
 0xaab   :  { %v7148_v17 = vadd.f32 %v7147_v49, %v7085_v62  ;;  %v16735_v49 = vld [vmem:[%s24593_s2 + $0x68] sm:$0xff]  }
 0xaac   :  { %14875 = vmatprep.subr.bf16.mxu0 %v16735_v49 }
 0xaad   :  { %v7149_v63 = vadd.f32 %v7148_v17, %v7086_v1  ;;  %v7090_v1 = vmul.f32 %v25297_v33, %v25297_v33  ;;  %14876 = vmatpush3.bf16.msra.mxu0 %v16735_v49  ;;  %v7094_v49 = vmul.f32 %v21033_v48, %v21033_v48 }
 0xaaf   :  { %v7150_v39 = vadd.f32 %v7149_v63, %v7087_v9  ;;  %v16736_v63 = vld [vmem:[%s24593_s2 + $0x70] sm:$0xff]  }
 0xab0   :  { %14877 = vmatprep.subr.bf16.mxu0 %v16736_v63 }
 0xab1   :  { %v7151_v62 = vadd.f32 %v7150_v39, %v7088_v44  ;;  %v7092_v44 = vmul.f32 %v25299_v38, %v25299_v38  ;;  %14878 = vmatpush3.bf16.msra.mxu0 %v16736_v63  ;;  %v21206_v63 = vld [vmem:[%s24593_s2] sm:$0xff]  }
 0xab2   :  { %25300 = vst [vmem:[#allocation21_spill] sm:$0xff] %v21206_v63 }
 0xab3   :  { %v7152_v17 = vadd.f32 %v7151_v62, %v7089_v51  ;;  %v16737_v62 = vld [vmem:[%s24593_s2 + $0x78] sm:$0xff]  }
 0xab4   :  { %14879 = vmatprep.subr.bf16.mxu0 %v16737_v62 }
 0xab5   :  { %v7153_v9 = vadd.f32 %v7152_v17, %v7090_v1  ;;  %v7683_v17 = vld [vmem:[#allocation2 + $0x1] sm:$0xff]  ;;  %14880 = vmatpush3.bf16.msra.mxu0 %v16737_v62 }
 0xab6   :  { %v7747_v55 = vpack.c.bf16 %v7684_v25, %v7683_v17  ;;  %14945 = vmatprep.subr.bf16.mxu0 %v21206_v63  ;;  %v25302_v62 = vld [vmem:[#allocation19_spill] sm:$0xff] }
 0xab7   :  { %v7154_v39 = vadd.f32 %v7153_v9, %v7091_v36  ;;  %v7095_v36 = vmul.f32 %v21037_v54, %v21037_v54  ;;  %v7098_v17 = vmul.f32 %v25302_v62, %v25302_v62 }
 0xab8   :  { %14881 = vmatprep.mubr.bf16.mxu0 %v7747_v55  ;;  %v7100_v55 = vmul.f32 %v25304_v43, %v25304_v43 }
 0xab9   :  { %v7155_v51 = vadd.f32 %v7154_v39, %v7092_v44  ;;  %v7096_v44 = vmul.f32 %v21041_v52, %v21041_v52 }
 0xabb   :  { %v7156_v1 = vadd.f32 %v7155_v51, %v7093_v45  ;;  %v25301_v45 = vld [vmem:[#allocation50_spill] sm:$0xff] }
 0xabc   :  { %v7097_v51 = vmul.f32 %v25301_v45, %v25301_v45 }
 0xabd   :  { %v7157_v9 = vadd.f32 %v7156_v1, %v7094_v49  ;;  %v25303_v1 = vld [vmem:[#allocation52_spill] sm:$0xff] }
 0xabe   :  { %v7099_v31 = vmul.f32 %v25303_v1, %v25303_v1 }
 0xabf   :  { %v7158_v39 = vadd.f32 %v7157_v9, %v7095_v36  ;;  %v7101_v36 = vmul.f32 %v21061_v20, %v21061_v20 }
 0xac1   :  { %v7159_v25 = vadd.f32 %v7158_v39, %v7096_v44 }
 0xac3   :  { %v7160_v49 = vadd.f32 %v7159_v25, %v7097_v51 }
 0xac5   :  { %v7161_v32 = vadd.f32 %v7160_v49, %v7098_v17  ;;  %v6902_v17 = vld [vmem:[%s24594_s3] sm:$0x1] }
 0xac7   :  { %v7162_v35 = vadd.f32 %v7161_v32, %v7099_v31  ;;  %v25305_v31 = vld [vmem:[#allocation13_spill] sm:$0xff] }
 0xac9   :  { %v7163_v9 = vadd.f32 %v7162_v35, %v7100_v55 }
 0xacb   :  { %v7164_v63 = vadd.f32 %v7163_v9, %v7101_v36 }
 0xacd   :  { %v7165_v13 = vrot.slane %v7164_v63, 4 }
 0xacf   :  { %v7166_v7 = vadd.f32 %v7165_v13, %v7164_v63  ;;  %v21230_v13 = vld [vmem:[%s24595_s4] ss:$0 sm:$0xff] }
 0xad1   :  { %v7167_v44 = vrot.slane %v7166_v7, 2 }
 0xad3   :  { %v7168_v39 = vadd.f32 %v7167_v44, %v7166_v7 }
 0xad5   :  { %v7169_v2 = vrot.slane %v7168_v39, 1 }
 0xad7   :  { %v7170_v34 = vadd.f32 %v7169_v2, %v7168_v39 }
 0xad9   :  { %v7171_v51 = vmul.f32 0.001953125, %v7170_v34 }
 0xadb   :  { %v7172_v25 = vadd.f32 1e-05, %v7171_v51 }
 0xadd   :  { %16806 = vrsqrt.f32 %v7172_v25 }
 0xae7   :  { %v16807_v49 = vpop.eup %16806 }
 0xae8   :  { %v7174_v32 = vmul.f32 %v16807_v49, %v6902_v17 }
 0xaea   :  { %v21225_v6 = vrot.slane %v7174_v32, %v25305_v31  ;;  %v25331_v31 = vld [vmem:[#allocation53_spill] sm:$0xff] }
 0xaec   :  { %v7242_v2 = vmul.f32 %v21225_v6, %v25303_v1  ;;  %v7203_v63 = vmul.f32 %v21225_v6, %v20897_v0  ;;  %v7204_v55 = vmul.f32 %v21225_v6, %v20901_v8  ;;  %v7205_v36 = vmul.f32 %v21225_v6, %v20905_v4 }
 0xaed   :  { %v7206_v9 = vmul.f32 %v21225_v6, %v20909_v24  ;;  %v7207_v1 = vmul.f32 %v21225_v6, %v20913_v53  ;;  %v7208_v44 = vmul.f32 %v21225_v6, %v20917_v41  ;;  %v7209_v39 = vmul.f32 %v21225_v6, %v20921_v10 }
 0xaee   :  { %v7312_v34 = vadd.f32 %v21230_v13, %v7242_v2  ;;  %v7210_v0 = vmul.f32 %v21225_v6, %v20925_v21  ;;  %v7211_v8 = vmul.f32 %v21225_v6, %v20929_v58  ;;  %v7212_v4 = vmul.f32 %v21225_v6, %v20933_v57 }
 0xaef   :  { %v7213_v24 = vmul.f32 %v21225_v6, %v20937_v22  ;;  %v7214_v53 = vmul.f32 %v21225_v6, %v20941_v50  ;;  %v7215_v41 = vmul.f32 %v21225_v6, %v20945_v59  ;;  %v7216_v10 = vmul.f32 %v21225_v6, %v20949_v14 }
 0xaf0   :  { %vm7376_vm5 = vcmp.gt.f32.partialorder %v7312_v34, 0.0  ;;  %v7440_v7 = vmul.f32 0.1, %v7312_v34  ;;  %v7217_v21 = vmul.f32 %v21225_v6, %v20953_v27  ;;  %v7218_v58 = vmul.f32 %v21225_v6, %v20957_v11 }
 0xaf1   :  { %v7219_v57 = vmul.f32 %v21225_v6, %v20961_v40  ;;  %v7220_v22 = vmul.f32 %v21225_v6, %v20965_v42  ;;  %v7221_v50 = vmul.f32 %v21225_v6, %v20969_v28  ;;  %v7222_v59 = vmul.f32 %v21225_v6, %v20973_v5 }
 0xaf2   :  { %v7504_v35 = vsel %vm7376_vm5, %v7312_v34, %v7440_v7  ;;  %v7223_v14 = vmul.f32 %v21225_v6, %v20977_v46  ;;  %v7224_v27 = vmul.f32 %v21225_v6, %v20981_v12  ;;  %v7225_v11 = vmul.f32 %v21225_v6, %v20985_v15 }
 0xaf3   :  { %7568 = vst [vmem:[#allocation2 + $0x321] sm:$0xff] %v7504_v35  ;;  %v7226_v40 = vmul.f32 %v21225_v6, %v20989_v56  ;;  %v7227_v42 = vmul.f32 %v21225_v6, %v20993_v3  ;;  %v7228_v28 = vmul.f32 %v21225_v6, %v20997_v30  ;;  %v7229_v5 = vmul.f32 %v21225_v6, %v21001_v29 }
 0xaf4   :  { %v7230_v46 = vmul.f32 %v21225_v6, %v25294_v26  ;;  %v7231_v12 = vmul.f32 %v21225_v6, %v25295_v60  ;;  %v7232_v15 = vmul.f32 %v21225_v6, %v25296_v23  ;;  %v7233_v56 = vmul.f32 %v21225_v6, %v25297_v33 }
 0xaf5   :  { %v7234_v3 = vmul.f32 %v21225_v6, %v25298_v47  ;;  %v7235_v30 = vmul.f32 %v21225_v6, %v25299_v38  ;;  %v7236_v29 = vmul.f32 %v21225_v6, %v21029_v18  ;;  %v7237_v26 = vmul.f32 %v21225_v6, %v21033_v48 }
 0xaf6   :  { %v7238_v60 = vmul.f32 %v21225_v6, %v21037_v54  ;;  %v7239_v23 = vmul.f32 %v21225_v6, %v21041_v52  ;;  %v7240_v33 = vmul.f32 %v21225_v6, %v25301_v45  ;;  %v7241_v47 = vmul.f32 %v21225_v6, %v25302_v62 }
 0xaf7   :  { %v7243_v38 = vmul.f32 %v21225_v6, %v25304_v43  ;;  %v7244_v18 = vmul.f32 %v21225_v6, %v21061_v20  ;;  %v21318_v48 = vadd.f32 %v21230_v13, %v7203_v63  ;;  %v21321_v54 = vadd.f32 %v21230_v13, %v7204_v55 }
 0xaf8   :  { %v21324_v52 = vadd.f32 %v21230_v13, %v7205_v36  ;;  %v21327_v45 = vadd.f32 %v21230_v13, %v7206_v9  ;;  %v21330_v62 = vadd.f32 %v21230_v13, %v7207_v1  ;;  %v21333_v43 = vadd.f32 %v21230_v13, %v7208_v44 }
 0xaf9   :  { %v21336_v20 = vadd.f32 %v21230_v13, %v7209_v39  ;;  %v21339_v51 = vadd.f32 %v21230_v13, %v7210_v0  ;;  %v21342_v25 = vadd.f32 %v21230_v13, %v7211_v8  ;;  %v21345_v17 = vadd.f32 %v21230_v13, %v7212_v4 }
 0xafa   :  { %v21348_v49 = vadd.f32 %v21230_v13, %v7213_v24  ;;  %v21351_v32 = vadd.f32 %v21230_v13, %v7214_v53  ;;  %v21354_v2 = vadd.f32 %v21230_v13, %v7215_v41  ;;  %v21357_v34 = vadd.f32 %v21230_v13, %v7216_v10 }
 0xafb   :  { %v21360_v7 = vadd.f32 %v21230_v13, %v7217_v21  ;;  %v21363_v35 = vadd.f32 %v21230_v13, %v7218_v58  ;;  %v21366_v63 = vadd.f32 %v21230_v13, %v7219_v57  ;;  %v21369_v55 = vadd.f32 %v21230_v13, %v7220_v22 }
 0xafc   :  { %v21372_v36 = vadd.f32 %v21230_v13, %v7221_v50  ;;  %v21375_v9 = vadd.f32 %v21230_v13, %v7222_v59  ;;  %v21378_v1 = vadd.f32 %v21230_v13, %v7223_v14  ;;  %v21381_v44 = vadd.f32 %v21230_v13, %v7224_v27 }
 0xafd   :  { %v21384_v39 = vadd.f32 %v21230_v13, %v7225_v11  ;;  %v21387_v0 = vadd.f32 %v21230_v13, %v7226_v40  ;;  %v21390_v8 = vadd.f32 %v21230_v13, %v7227_v42  ;;  %v21393_v4 = vadd.f32 %v21230_v13, %v7228_v28  ;;  %v25322_v28 = vld [vmem:[#allocation36_spill] sm:$0xff] }
 0xafe   :  { %v21396_v24 = vadd.f32 %v21230_v13, %v7229_v5  ;;  %v21399_v53 = vadd.f32 %v21230_v13, %v7230_v46  ;;  %v21402_v41 = vadd.f32 %v21230_v13, %v7231_v12  ;;  %v21405_v10 = vadd.f32 %v21230_v13, %v7232_v15  ;;  %v25323_v46 = vld [vmem:[#allocation26_spill] sm:$0xff]  ;;  %v25324_v15 = vld [vmem:[#allocation5_spill] sm:$0xff] }
 0xaff   :  { %25306 = vst [vmem:[#allocation23_spill] sm:$0xff] %v21387_v0  ;;  %v21408_v21 = vadd.f32 %v21230_v13, %v7233_v56  ;;  %v21411_v58 = vadd.f32 %v21230_v13, %v7234_v3  ;;  %v21414_v57 = vadd.f32 %v21230_v13, %v7235_v30  ;;  %v21417_v22 = vadd.f32 %v21230_v13, %v7236_v29 }
 0xb00   :  { %25307 = vst [vmem:[#allocation25_spill] sm:$0xff] %v21396_v24  ;;  %25308 = vst [vmem:[#allocation28_spill] sm:$0xff] %v21399_v53  ;;  %v21420_v50 = vadd.f32 %v21230_v13, %v7237_v26  ;;  %v21423_v59 = vadd.f32 %v21230_v13, %v7238_v60  ;;  %v21426_v14 = vadd.f32 %v21230_v13, %v7239_v23  ;;  %v25325_v60 = vld [vmem:[#allocation8_spill] sm:$0xff] }
 0xb01   :  { %25309 = vst [vmem:[#allocation30_spill] sm:$0xff] %v21402_v41  ;;  %25310 = vst [vmem:[#allocation29_spill] sm:$0xff] %v21405_v10  ;;  %v21429_v27 = vadd.f32 %v21230_v13, %v7240_v33  ;;  %v21432_v11 = vadd.f32 %v21230_v13, %v7241_v47  ;;  %v21435_v40 = vadd.f32 %v21230_v13, %v7243_v38  ;;  %v25326_v33 = vld [vmem:[#allocation51_spill] sm:$0xff]  ;;  %v25327_v38 = vld [vmem:[#allocation10_spill] sm:$0xff] }
 0xb02   :  { %25311 = vst [vmem:[#allocation31_spill] sm:$0xff] %v21408_v21  ;;  %25312 = vst [vmem:[#allocation39_spill] sm:$0xff] %v21411_v58  ;;  %v21438_v42 = vadd.f32 %v21230_v13, %v7244_v18  ;;  %v7181_v5 = vmul.f32 %v21225_v6, %v25322_v28  ;;  %v7182_v12 = vmul.f32 %v21225_v6, %v25323_v46  ;;  %v25328_v28 = vld [vmem:[#allocation7_spill] sm:$0xff]  ;;  %v25329_v46 = vld [vmem:[#allocation9_spill] sm:$0xff] }
 0xb03   :  { %25313 = vst [vmem:[#allocation43_spill] sm:$0xff] %v21414_v57  ;;  %25314 = vst [vmem:[#allocation41_spill] sm:$0xff] %v21417_v22  ;;  %v7183_v56 = vmul.f32 %v21225_v6, %v25324_v15  ;;  %v7184_v3 = vmul.f32 %v21225_v6, %v20821_v16  ;;  %v7185_v30 = vmul.f32 %v21225_v6, %v20825_v19  ;;  %v25330_v15 = vld [vmem:[#allocation12_spill] sm:$0xff]  ;;  %v25339_v22 = vld [vmem:[#allocation22_spill] sm:$0xff] }
 0xb04   :  { %25315 = vst [vmem:[#allocation47_spill] sm:$0xff] %v21420_v50  ;;  %25316 = vst [vmem:[#allocation32_spill] sm:$0xff] %v21423_v59  ;;  %v7186_v29 = vmul.f32 %v21225_v6, %v20829_v37  ;;  %v7187_v26 = vmul.f32 %v21225_v6, %v20833_v61  ;;  %v7188_v23 = vmul.f32 %v21225_v6, %v25325_v60  ;;  %v25337_v59 = vld [vmem:[#allocation20_spill] sm:$0xff]  ;;  %v25338_v50 = vld [vmem:[#allocation11_spill] sm:$0xff] }
 0xb05   :  { %25317 = vst [vmem:[#allocation15_spill] sm:$0xff] %v21426_v14  ;;  %25318 = vst [vmem:[#allocation45_spill] sm:$0xff] %v21429_v27  ;;  %v7189_v47 = vmul.f32 %v21225_v6, %v25326_v33  ;;  %v7190_v18 = vmul.f32 %v21225_v6, %v25327_v38  ;;  %v7191_v16 = vmul.f32 %v21225_v6, %v25328_v28  ;;  %v25335_v27 = vld [vmem:[#allocation17_spill] sm:$0xff]  ;;  %v25336_v14 = vld [vmem:[#allocation18_spill] sm:$0xff] }
 0xb06   :  { %25319 = vst [vmem:[#allocation6_spill] sm:$0xff] %v21432_v11  ;;  %25320 = vst [vmem:[#allocation44_spill] sm:$0xff] %v21435_v40  ;;  %v7192_v19 = vmul.f32 %v21225_v6, %v25329_v46  ;;  %v7193_v37 = vmul.f32 %v21225_v6, %v25330_v15  ;;  %v7194_v61 = vmul.f32 %v21225_v6, %v25331_v31  ;;  %v25333_v40 = vld [vmem:[#allocation37_spill] sm:$0xff]  ;;  %v25334_v11 = vld [vmem:[#allocation16_spill] sm:$0xff] }
 0xb07   :  { %25321 = vst [vmem:[#allocation4_spill] sm:$0xff] %v21438_v42  ;;  %v25332_v42 = vld [vmem:[#allocation14_spill] sm:$0xff]  ;;  %v7196_v33 = vmul.f32 %v21225_v6, %v25333_v40  ;;  %v7197_v38 = vmul.f32 %v21225_v6, %v25334_v11  ;;  %v7198_v28 = vmul.f32 %v21225_v6, %v25335_v27  ;;  %v7199_v46 = vmul.f32 %v21225_v6, %v25336_v14 }
 0xb08   :  { %v7195_v60 = vmul.f32 %v21225_v6, %v25332_v42  ;;  %v7200_v15 = vmul.f32 %v21225_v6, %v25337_v59  ;;  %v7201_v31 = vmul.f32 %v21225_v6, %v25338_v50  ;;  %v7202_v42 = vmul.f32 %v21225_v6, %v25339_v22 }
 0xb09   :  { %v7251_v40 = vadd.f32 %v21230_v13, %v7181_v5  ;;  %v7252_v57 = vadd.f32 %v21230_v13, %v7182_v12  ;;  %v7253_v11 = vadd.f32 %v21230_v13, %v7183_v56  ;;  %v7254_v27 = vadd.f32 %v21230_v13, %v7184_v3 }
 0xb0a   :  { %v7255_v58 = vadd.f32 %v21230_v13, %v7185_v30  ;;  %v21490_v14 = vadd.f32 %v21230_v13, %v7186_v29  ;;  %v21493_v59 = vadd.f32 %v21230_v13, %v7187_v26  ;;  %v21496_v50 = vadd.f32 %v21230_v13, %v7188_v23 }
 0xb0b   :  { %v21499_v6 = vadd.f32 %v21230_v13, %v7189_v47  ;;  %v21502_v22 = vadd.f32 %v21230_v13, %v7190_v18  ;;  %v21505_v5 = vadd.f32 %v21230_v13, %v7191_v16  ;;  %v21508_v12 = vadd.f32 %v21230_v13, %v7192_v19 }
 0xb0c   :  { %v21511_v56 = vadd.f32 %v21230_v13, %v7193_v37  ;;  %v21514_v3 = vadd.f32 %v21230_v13, %v7194_v61  ;;  %v21517_v30 = vadd.f32 %v21230_v13, %v7195_v60  ;;  %v21520_v29 = vadd.f32 %v21230_v13, %v7196_v33 }
 0xb0d   :  { %v21523_v26 = vadd.f32 %v21230_v13, %v7197_v38  ;;  %v21526_v23 = vadd.f32 %v21230_v13, %v7198_v28  ;;  %v21529_v47 = vadd.f32 %v21230_v13, %v7199_v46  ;;  %v21532_v18 = vadd.f32 %v21230_v13, %v7200_v15 }
 0xb0e   :  { %v21535_v16 = vadd.f32 %v21230_v13, %v7201_v31  ;;  %vm7315_vm6 = vcmp.gt.f32.partialorder %v7251_v40, 0.0  ;;  %vm7316_vm1 = vcmp.gt.f32.partialorder %v7252_v57, 0.0  ;;  %vm7317_vm2 = vcmp.gt.f32.partialorder %v7253_v11, 0.0 }
 0xb0f   :  { %vm7318_vm7 = vcmp.gt.f32.partialorder %v7254_v27, 0.0  ;;  %vm7319_vm10 = vcmp.gt.f32.partialorder %v7255_v58, 0.0  ;;  %vm7320_vm13 = vcmp.gt.f32.partialorder %v21490_v14, 0.0  ;;  %vm7321_vm4 = vcmp.gt.f32.partialorder %v21493_v59, 0.0 }
 0xb10   :  { %vm7322_vm8 = vcmp.gt.f32.partialorder %v21496_v50, 0.0  ;;  %vm7323_vm14 = vcmp.gt.f32.partialorder %v21499_v6, 0.0  ;;  %vm7324_vm11 = vcmp.gt.f32.partialorder %v21502_v22, 0.0  ;;  %v7379_v19 = vmul.f32 0.1, %v7251_v40 }
 0xb11   :  { %v7380_v37 = vmul.f32 0.1, %v7252_v57  ;;  %v21543_v61 = vadd.f32 %v21230_v13, %v7202_v42  ;;  %vm7325_vm9 = vcmp.gt.f32.partialorder %v21505_v5, 0.0  ;;  %v7381_v60 = vmul.f32 0.1, %v7253_v11 }
 0xb12   :  { %v7382_v33 = vmul.f32 0.1, %v7254_v27  ;;  %v7383_v38 = vmul.f32 0.1, %v7255_v58  ;;  %vm7326_vm15 = vcmp.gt.f32.partialorder %v21508_v12, 0.0  ;;  %v21551_v31 = vsel %vm7315_vm6, %v7251_v40, %v7379_v19 }
 0xb13   :  { %v7384_v28 = vmul.f32 0.1, %v21490_v14  ;;  %v7385_v46 = vmul.f32 0.1, %v21493_v59  ;;  %v7386_v15 = vmul.f32 0.1, %v21496_v50  ;;  %v21560_v10 = vsel %vm7316_vm1, %v7252_v57, %v7380_v37 }
 0xb14   :  { %25340 = vst [vmem:[#allocation49_spill] sm:$0xff] %v21551_v31  ;;  %vm7327_vm3 = vcmp.gt.f32.partialorder %v21511_v56, 0.0  ;;  %v7387_v13 = vmul.f32 0.1, %v21499_v6  ;;  %v7388_v42 = vmul.f32 0.1, %v21502_v22  ;;  %v21574_v53 = vsel %vm7317_vm2, %v7253_v11, %v7381_v60 }
 0xb15   :  { %v21557_v21 = vmul.f32 0.1, %v21505_v5  ;;  %25341 = vst [vmem:[#allocation34_spill] sm:$0xff] %v21560_v10  ;;  %7507 = vst [vmem:[#allocation2 + $0x19] sm:$0xff] %v21551_v31  ;;  %vm7328_vm12 = vcmp.gt.f32.partialorder %v21514_v3, 0.0  ;;  %vm7329_vm0 = vcmp.gt.f32.partialorder %v21517_v30, 0.0  ;;  %v21588_v24 = vsel %vm7318_vm7, %v7254_v27, %v7382_v33 }
 0xb16   :  { %v21565_v41 = vmul.f32 0.1, %v21508_v12  ;;  %v21568_v40 = vmul.f32 0.1, %v21511_v56  ;;  %v21571_v19 = vmul.f32 0.1, %v21514_v3 }
 0xb17   :  { %25342 = vst [vmem:[#allocation48_spill] sm:$0xff] %v21574_v53  ;;  %7508 = vst [vmem:[#allocation2 + $0x21] sm:$0xff] %v21560_v10  ;;  %v21579_v57 = vmul.f32 0.1, %v21517_v30  ;;  %v21582_v37 = vmul.f32 0.1, %v21520_v29 }
 0xb18   :  { %v21585_v31 = vmul.f32 0.1, %v21523_v26  ;;  %25344 = vst [vmem:[#allocation35_spill] sm:$0xff] %v21588_v24  ;;  %7509 = vst [vmem:[#allocation2 + $0x31] sm:$0xff] %v21574_v53  ;;  %vm7330_vm5 = vcmp.gt.f32.partialorder %v21520_v29, 0.0  ;;  %vm7331_vm6 = vcmp.gt.f32.partialorder %v21523_v26, 0.0 }
 0xb19   :  { %25343 = vst [vmem:[#allocation3_spill] sm:$0xff] %v21582_v37  ;;  %v21593_v11 = vmul.f32 0.1, %v21526_v23  ;;  %v21596_v60 = vmul.f32 0.1, %v21529_v47  ;;  %v21602_v37 = vsel %vm7319_vm10, %v7255_v58, %v7383_v38  ;;  %7510 = vst [vmem:[#allocation2 + $0x39] sm:$0xff] %v21588_v24 }
 0xb1a   :  { %v21599_v10 = vmul.f32 0.1, %v21532_v18  ;;  %25346 = vst [vmem:[#allocation27_spill] sm:$0xff] %v21602_v37  ;;  %v21607_v27 = vmul.f32 0.1, %v21535_v16  ;;  %7511 = vst [vmem:[#allocation2 + $0x49] sm:$0xff] %v21602_v37 }
 0xb1b   :  { %v21610_v33 = vmul.f32 0.1, %v21543_v61  ;;  %v21613_v53 = vmul.f32 0.1, %v21318_v48  ;;  %vm7332_vm1 = vcmp.gt.f32.partialorder %v21526_v23, 0.0  ;;  %vm7333_vm2 = vcmp.gt.f32.partialorder %v21529_v47, 0.0 }
 0xb1c   :  { %25345 = vst [vmem:[#allocation24_spill] sm:$0xff] %v21599_v10  ;;  %v21618_v10 = vsel %vm7320_vm13, %v21490_v14, %v7384_v28  ;;  %v21623_v58 = vmul.f32 0.1, %v21321_v54  ;;  %v21626_v38 = vmul.f32 0.1, %v21324_v52  ;;  %vm7334_vm7 = vcmp.gt.f32.partialorder %v21532_v18, 0.0 }
 0xb1d   :  { %25347 = vst [vmem:[#allocation33_spill] sm:$0xff] %v21613_v53  ;;  %25348 = vst [vmem:[#allocation40_spill] sm:$0xff] %v21618_v10  ;;  %v21629_v24 = vmul.f32 0.1, %v21327_v45  ;;  %v21634_v53 = vsel %vm7321_vm4, %v21493_v59, %v7385_v46  ;;  %v21639_v14 = vmul.f32 0.1, %v21330_v62 }
 0xb1e   :  { %25350 = vst [vmem:[#allocation46_spill] sm:$0xff] %v21634_v53  ;;  %7512 = vst [vmem:[#allocation2 + $0x51] sm:$0xff] %v21618_v10  ;;  %v21642_v28 = vmul.f32 0.1, %v21333_v43  ;;  %v21645_v37 = vmul.f32 0.1, %v21336_v20 }
 0xb1f   :  { %25349 = vst [vmem:[#allocation42_spill] sm:$0xff] %v21629_v24  ;;  %v21650_v24 = vsel %vm7322_vm8, %v21496_v50, %v7386_v15  ;;  %7513 = vst [vmem:[#allocation2 + $0x61] sm:$0xff] %v21634_v53  ;;  %v21657_v59 = vmul.f32 0.1, %v21339_v51  ;;  %v21660_v46 = vmul.f32 0.1, %v21342_v25  ;;  %v21668_v50 = vsel %vm7323_vm14, %v21499_v6, %v7387_v13 }
 0xb20   :  { %25351 = vst [vmem:[#allocation50_spill] sm:$0xff] %v21650_v24  ;;  %v21663_v10 = vmul.f32 0.1, %v21345_v17  ;;  %25353 = vst [vmem:[#allocation52_spill] sm:$0xff] %v21668_v50  ;;  %vm7337_vm4 = vcmp.gt.f32.partialorder %v21318_v48, 0.0  ;;  %v21687_v6 = vsel %vm7324_vm11, %v21502_v22, %v7388_v42  ;;  %vm7341_vm14 = vcmp.gt.f32.partialorder %v21330_v62, 0.0 }
 0xb21   :  { %7514 = vst [vmem:[#allocation2 + $0x69] sm:$0xff] %v21650_v24  ;;  %v21676_v15 = vmul.f32 0.1, %v21348_v49  ;;  %v21679_v53 = vmul.f32 0.1, %v21351_v32  ;;  %25355 = vst [vmem:[#allocation36_spill] sm:$0xff] %v21687_v6  ;;  %v21707_v22 = vsel %vm7325_vm9, %v21505_v5, %v21557_v21  ;;  %v21727_v21 = vsel %vm7326_vm15, %v21508_v12, %v21565_v41 }
 0xb22   :  { %25352 = vst [vmem:[#allocation19_spill] sm:$0xff] %v21663_v10  ;;  %v21682_v10 = vmul.f32 0.1, %v21354_v2  ;;  %7515 = vst [vmem:[#allocation2 + $0x79] sm:$0xff] %v21668_v50  ;;  %v21695_v13 = vmul.f32 0.1, %v21357_v34  ;;  %v21747_v41 = vsel %vm7327_vm3, %v21511_v56, %v21568_v40  ;;  %v21767_v56 = vsel %vm7328_vm12, %v21514_v3, %v21571_v19 }
 0xb23   :  { %v21698_v24 = vmul.f32 0.1, %v21360_v7  ;;  %25357 = vst [vmem:[#allocation5_spill] sm:$0xff] %v21707_v22  ;;  %7516 = vst [vmem:[#allocation2 + $0x81] sm:$0xff] %v21687_v6  ;;  %vm7345_vm11 = vcmp.gt.f32.partialorder %v21342_v25, 0.0  ;;  %vm7349_vm9 = vcmp.gt.f32.partialorder %v21354_v2, 0.0  ;;  %v21787_v3 = vsel %vm7329_vm0, %v21517_v30, %v21579_v57 }
 0xb24   :  { %25354 = vst [vmem:[#allocation38_spill] sm:$0xff] %v21682_v10  ;;  %v21701_v10 = vmul.f32 0.1, %v21363_v35  ;;  %v21715_v42 = vmul.f32 0.1, %v21366_v63  ;;  %25359 = vst [vmem:[#allocation51_spill] sm:$0xff] %v21727_v21 }
 0xb25   :  { %v21718_v50 = vmul.f32 0.1, %v21369_v55  ;;  %7517 = vst [vmem:[#allocation2 + $0x91] sm:$0xff] %v21707_v22  ;;  %v21735_v5 = vmul.f32 0.1, %v21375_v9  ;;  %25361 = vst [vmem:[#allocation7_spill] sm:$0xff] %v21747_v41 }
 0xb26   :  { %25356 = vst [vmem:[#allocation26_spill] sm:$0xff] %v21701_v10  ;;  %v21721_v10 = vmul.f32 0.1, %v21372_v36  ;;  %v21738_v6 = vmul.f32 0.1, %v21378_v1  ;;  %7518 = vst [vmem:[#allocation2 + $0x99] sm:$0xff] %v21727_v21 }
 0xb27   :  { %vm7353_vm15 = vcmp.gt.f32.partialorder %v21366_v63, 0.0  ;;  %v21755_v12 = vmul.f32 0.1, %v21384_v39  ;;  %v21758_v22 = vmul.f32 0.1, %v21387_v0  ;;  %25365 = vst [vmem:[#allocation14_spill] sm:$0xff] %v21767_v56 }
 0xb28   :  { %25358 = vst [vmem:[#allocation8_spill] sm:$0xff] %v21721_v10  ;;  %v21741_v10 = vmul.f32 0.1, %v21381_v44  ;;  %7519 = vst [vmem:[#allocation2 + $0xa9] sm:$0xff] %v21747_v41  ;;  %vm7357_vm3 = vcmp.gt.f32.partialorder %v21378_v1, 0.0  ;;  %v25367_v21 = vld [vmem:[#allocation25_spill] sm:$0xff] }
 0xb29   :  { %25362 = vst [vmem:[#allocation9_spill] sm:$0xff] %v21755_v12  ;;  %25363 = vst [vmem:[#allocation12_spill] sm:$0xff] %v21758_v22  ;;  %v21775_v40 = vmul.f32 0.1, %v21393_v4  ;;  %v25369_v22 = vld [vmem:[#allocation28_spill] sm:$0xff]  ;;  %vm7361_vm12 = vcmp.gt.f32.partialorder %v21390_v8, 0.0 }
 0xb2a   :  { %25360 = vst [vmem:[#allocation10_spill] sm:$0xff] %v21741_v10  ;;  %v21761_v10 = vmul.f32 0.1, %v21390_v8  ;;  %v21781_v12 = vmul.f32 0.1, %v25369_v22  ;;  %25371 = vst [vmem:[#allocation18_spill] sm:$0xff] %v21787_v3 }
 0xb2b   :  { %25366 = vst [vmem:[#allocation37_spill] sm:$0xff] %v21775_v40  ;;  %7520 = vst [vmem:[#allocation2 + $0xb1] sm:$0xff] %v21767_v56  ;;  %v25372_v19 = vld [vmem:[#allocation30_spill] sm:$0xff]  ;;  %v25376_v40 = vld [vmem:[#allocation31_spill] sm:$0xff]  ;;  %vm25397_vm8 = vcmp.gt.f32.partialorder %v21535_v16, 0.0 }
 0xb2c   :  { %25364 = vst [vmem:[#allocation53_spill] sm:$0xff] %v21761_v10  ;;  %v21778_v10 = vmul.f32 0.1, %v25367_v21  ;;  %25370 = vst [vmem:[#allocation17_spill] sm:$0xff] %v21781_v12  ;;  %v21795_v41 = vmul.f32 0.1, %v25372_v19 }
 0xb2d   :  { %v25374_v12 = vld [vmem:[#allocation29_spill] sm:$0xff]  ;;  %v21801_v0 = vmul.f32 0.1, %v25376_v40  ;;  %v25378_v30 = vld [vmem:[#allocation3_spill] sm:$0xff]  ;;  %7521 = vst [vmem:[#allocation2 + $0xc1] sm:$0xff] %v21787_v3  ;;  %vm7365_vm0 = vcmp.gt.f32.partialorder %v25372_v19, 0.0 }
 0xb2e   :  { %25368 = vst [vmem:[#allocation16_spill] sm:$0xff] %v21778_v10  ;;  %25373 = vst [vmem:[#allocation20_spill] sm:$0xff] %v21795_v41  ;;  %v21798_v10 = vmul.f32 0.1, %v25374_v12  ;;  %v21807_v57 = vsel %vm7330_vm5, %v21520_v29, %v25378_v30  ;;  %v25380_v56 = vld [vmem:[#allocation39_spill] sm:$0xff]  ;;  %v25384_v22 = vld [vmem:[#allocation41_spill] sm:$0xff]  ;;  %v21827_v29 = vsel %vm7331_vm6, %v21523_v26, %v21585_v31  ;;  %v21847_v26 = vsel %vm7332_vm1, %v21526_v23, %v21593_v11 }
 0xb2f   :  { %25377 = vst [vmem:[#allocation22_spill] sm:$0xff] %v21801_v0  ;;  %25379 = vst [vmem:[#allocation30_spill] sm:$0xff] %v21807_v57  ;;  %v25382_v0 = vld [vmem:[#allocation43_spill] sm:$0xff]  ;;  %v21821_v21 = vmul.f32 0.1, %v25384_v22  ;;  %v25388_v3 = vld [vmem:[#allocation32_spill] sm:$0xff]  ;;  %v21867_v23 = vsel %vm7333_vm2, %v21529_v47, %v21596_v60 }
 0xb30   :  { %25375 = vst [vmem:[#allocation11_spill] sm:$0xff] %v21798_v10  ;;  %v21815_v10 = vmul.f32 0.1, %v25380_v56  ;;  %v21818_v41 = vmul.f32 0.1, %v25382_v0  ;;  %25386 = vst [vmem:[#allocation43_spill] sm:$0xff] %v21827_v29 }
 0xb31   :  { %25385 = vst [vmem:[#allocation3_spill] sm:$0xff] %v21821_v21  ;;  %7522 = vst [vmem:[#allocation2 + $0xc9] sm:$0xff] %v21807_v57  ;;  %vm7369_vm5 = vcmp.gt.f32.partialorder %v25382_v0, 0.0  ;;  %v25387_v30 = vld [vmem:[#allocation47_spill] sm:$0xff]  ;;  %v21838_v21 = vmul.f32 0.1, %v25388_v3 }
 0xb32   :  { %25381 = vst [vmem:[#allocation29_spill] sm:$0xff] %v21815_v10  ;;  %25383 = vst [vmem:[#allocation31_spill] sm:$0xff] %v21818_v41  ;;  %v21835_v41 = vmul.f32 0.1, %v25387_v30  ;;  %v25390_v56 = vld [vmem:[#allocation15_spill] sm:$0xff]  ;;  %v25392_v31 = vld [vmem:[#allocation45_spill] sm:$0xff] }
 0xb33   :  { %25389 = vst [vmem:[#allocation41_spill] sm:$0xff] %v21838_v21  ;;  %v21841_v10 = vmul.f32 0.1, %v25390_v56  ;;  %7523 = vst [vmem:[#allocation2 + $0xd9] sm:$0xff] %v21827_v29  ;;  %vm7373_vm6 = vcmp.gt.f32.partialorder %v25390_v56, 0.0  ;;  %vm7374_vm10 = vcmp.gt.f32.partialorder %v25392_v31, 0.0 }
 0xb34   :  { %v25393_v57 = vld [vmem:[#allocation6_spill] sm:$0xff]  ;;  %v25394_v30 = vld [vmem:[#allocation44_spill] sm:$0xff]  ;;  %v21855_v3 = vmul.f32 0.1, %v25392_v31  ;;  %7524 = vst [vmem:[#allocation2 + $0xe1] sm:$0xff] %v21847_v26  ;;  %vm25398_vm2 = vcmp.gt.f32.partialorder %v21543_v61, 0.0 }
 0xb35   :  { %25391 = vst [vmem:[#allocation15_spill] sm:$0xff] %v21841_v10  ;;  %vm7375_vm13 = vcmp.gt.f32.partialorder %v25393_v57, 0.0  ;;  %v21858_v10 = vmul.f32 0.1, %v25393_v57  ;;  %v21861_v21 = vmul.f32 0.1, %v25394_v30  ;;  %v21884_v30 = vsel %vm25397_vm8, %v21535_v16, %v21607_v27 }
 0xb36   :  { %v25395_v11 = vld [vmem:[#allocation4_spill] sm:$0xff]  ;;  %v21890_v47 = vsel %vm25398_vm2, %v21543_v61, %v21610_v33  ;;  %7525 = vst [vmem:[#allocation2 + $0xf1] sm:$0xff] %v21867_v23  ;;  %v25399_v60 = vld [vmem:[#allocation33_spill] sm:$0xff]  ;;  %vm25401_vm8 = vcmp.gt.f32.partialorder %v21324_v52, 0.0  ;;  %v25402_v27 = vld [vmem:[#allocation42_spill] sm:$0xff]  ;;  %vm25403_vm2 = vcmp.gt.f32.partialorder %v21327_v45, 0.0 }
 0xb37   :  { %vm7378_vm1 = vcmp.gt.f32.partialorder %v25395_v11, 0.0  ;;  %v21872_v29 = vmul.f32 0.1, %v25395_v11  ;;  %v25396_v31 = vld [vmem:[#allocation24_spill] sm:$0xff]  ;;  %v21909_v61 = vsel %vm25401_vm8, %v21324_v52, %v21626_v38  ;;  %v21915_v33 = vsel %vm25403_vm2, %v21327_v45, %v25402_v27  ;;  %7527 = vst [vmem:[#allocation2 + $0x109] sm:$0xff] %v21884_v30  ;;  %7528 = vst [vmem:[#allocation2 + $0x111] sm:$0xff] %v21890_v47 }
 0xb38   :  { %v21878_v57 = vsel %vm7334_vm7, %v21532_v18, %v25396_v31  ;;  %v21897_v18 = vsel %vm7337_vm4, %v21318_v48, %v25399_v60  ;;  %vm25400_vm7 = vcmp.gt.f32.partialorder %v21321_v54, 0.0  ;;  %v21924_v48 = vsel %vm7341_vm14, %v21330_v62, %v21639_v14  ;;  %7531 = vst [vmem:[#allocation2 + $0x139] sm:$0xff] %v21909_v61  ;;  %7532 = vst [vmem:[#allocation2 + $0x141] sm:$0xff] %v21915_v33  ;;  %v25424_v14 = vld [vmem:[#allocation12_spill] sm:$0xff]  ;;  %v25437_v31 = vld [vmem:[#allocation11_spill] sm:$0xff] }
 0xb39   :  { %v21903_v16 = vsel %vm25400_vm7, %v21321_v54, %v21623_v58  ;;  %7526 = vst [vmem:[#allocation2 + $0xf9] sm:$0xff] %v21878_v57  ;;  %vm25404_vm4 = vcmp.gt.f32.partialorder %v21333_v43, 0.0  ;;  %vm25405_vm7 = vcmp.gt.f32.partialorder %v21336_v20, 0.0  ;;  %vm25406_vm8 = vcmp.gt.f32.partialorder %v21339_v51, 0.0  ;;  %7529 = vst [vmem:[#allocation2 + $0x121] sm:$0xff] %v21897_v18  ;;  %v25439_v27 = vld [vmem:[#allocation22_spill] sm:$0xff] }
 0xb3a   :  { %v21930_v54 = vsel %vm25404_vm4, %v21333_v43, %v21642_v28  ;;  %v21936_v52 = vsel %vm25405_vm7, %v21336_v20, %v21645_v37  ;;  %v21942_v45 = vsel %vm25406_vm8, %v21339_v51, %v21657_v59  ;;  %7530 = vst [vmem:[#allocation2 + $0x129] sm:$0xff] %v21903_v16  ;;  %v7473_v62 = vsel %vm7345_vm11, %v21342_v25, %v21660_v46  ;;  %v25407_v43 = vld [vmem:[#allocation19_spill] sm:$0xff]  ;;  %v25411_v25 = vld [vmem:[#allocation38_spill] sm:$0xff] }
 0xb3b   :  { %vm25408_vm14 = vcmp.gt.f32.partialorder %v21345_v17, 0.0  ;;  %vm25409_vm2 = vcmp.gt.f32.partialorder %v21348_v49, 0.0  ;;  %vm25410_vm4 = vcmp.gt.f32.partialorder %v21351_v32, 0.0  ;;  %7533 = vst [vmem:[#allocation2 + $0x151] sm:$0xff] %v21924_v48  ;;  %7534 = vst [vmem:[#allocation2 + $0x159] sm:$0xff] %v21930_v54  ;;  %vm25412_vm11 = vcmp.gt.f32.partialorder %v21357_v34, 0.0 }
 0xb3c   :  { %v7474_v20 = vsel %vm25408_vm14, %v21345_v17, %v25407_v43  ;;  %v21960_v51 = vsel %vm25409_vm2, %v21348_v49, %v21676_v15  ;;  %v21966_v37 = vsel %vm25410_vm4, %v21351_v32, %v21679_v53  ;;  %7535 = vst [vmem:[#allocation2 + $0x169] sm:$0xff] %v21936_v52  ;;  %7536 = vst [vmem:[#allocation2 + $0x171] sm:$0xff] %v21942_v45  ;;  %vm25413_vm7 = vcmp.gt.f32.partialorder %v21360_v7, 0.0  ;;  %v25414_v53 = vld [vmem:[#allocation26_spill] sm:$0xff]  ;;  %v25425_v28 = vld [vmem:[#allocation23_spill] sm:$0xff] }
 0xb3d   :  { %v21976_v17 = vsel %vm7349_vm9, %v21354_v2, %v25411_v25  ;;  %v21982_v49 = vsel %vm25412_vm11, %v21357_v34, %v21695_v13  ;;  %v21988_v32 = vsel %vm25413_vm7, %v21360_v7, %v21698_v24  ;;  %vm25415_vm8 = vcmp.gt.f32.partialorder %v21363_v35, 0.0  ;;  %7537 = vst [vmem:[#allocation2 + $0x181] sm:$0xff] %v7473_v62  ;;  %7538 = vst [vmem:[#allocation2 + $0x189] sm:$0xff] %v7474_v20  ;;  %v25417_v7 = vld [vmem:[#allocation8_spill] sm:$0xff]  ;;  %v25431_v15 = vld [vmem:[#allocation25_spill] sm:$0xff] }
 0xb3e   :  { %v21994_v58 = vsel %vm25415_vm8, %v21363_v35, %v25414_v53  ;;  %7539 = vst [vmem:[#allocation2 + $0x1c9] sm:$0xff] %v21960_v51  ;;  %7540 = vst [vmem:[#allocation2 + $0x1d1] sm:$0xff] %v21966_v37  ;;  %v22002_v2 = vsel %vm7353_vm15, %v21366_v63, %v21715_v42  ;;  %vm25416_vm9 = vcmp.gt.f32.partialorder %v21369_v55, 0.0  ;;  %vm25418_vm14 = vcmp.gt.f32.partialorder %v21372_v36, 0.0  ;;  %v25433_v13 = vld [vmem:[#allocation17_spill] sm:$0xff]  ;;  %v25434_v42 = vld [vmem:[#allocation28_spill] sm:$0xff] }
 0xb3f   :  { %v22008_v34 = vsel %vm25416_vm9, %v21369_v55, %v21718_v50  ;;  %v22014_v35 = vsel %vm25418_vm14, %v21372_v36, %v25417_v7  ;;  %vm25419_vm2 = vcmp.gt.f32.partialorder %v21375_v9, 0.0  ;;  %7541 = vst [vmem:[#allocation2 + $0x1e1] sm:$0xff] %v21976_v17  ;;  %7542 = vst [vmem:[#allocation2 + $0x1e9] sm:$0xff] %v21982_v49  ;;  %v22030_v63 = vsel %vm7357_vm3, %v21378_v1, %v21738_v6  ;;  %v25420_v55 = vld [vmem:[#allocation10_spill] sm:$0xff]  ;;  %v25427_v1 = vld [vmem:[#allocation53_spill] sm:$0xff] }
 0xb40   :  { %v22020_v24 = vsel %vm25419_vm2, %v21375_v9, %v21735_v5  ;;  %7543 = vst [vmem:[#allocation2 + $0x1f9] sm:$0xff] %v21988_v32  ;;  %7544 = vst [vmem:[#allocation2 + $0x201] sm:$0xff] %v21994_v58  ;;  %vm25421_vm15 = vcmp.gt.f32.partialorder %v21381_v44, 0.0  ;;  %v25422_v9 = vld [vmem:[#allocation9_spill] sm:$0xff]  ;;  %vm25423_vm4 = vcmp.gt.f32.partialorder %v21384_v39, 0.0  ;;  %vm25426_vm11 = vcmp.gt.f32.partialorder %v25425_v28, 0.0 }
 0xb41   :  { %v22036_v36 = vsel %vm25421_vm15, %v21381_v44, %v25420_v55  ;;  %v22042_v38 = vsel %vm25423_vm4, %v21384_v39, %v25422_v9  ;;  %v22048_v59 = vsel %vm25426_vm11, %v25425_v28, %v25424_v14  ;;  %7545 = vst [vmem:[#allocation2 + $0x211] sm:$0xff] %v22002_v2  ;;  %7546 = vst [vmem:[#allocation2 + $0x219] sm:$0xff] %v22008_v34  ;;  %v25428_v39 = vld [vmem:[#allocation37_spill] sm:$0xff]  ;;  %vm25429_vm3 = vcmp.gt.f32.partialorder %v21393_v4, 0.0  ;;  %v25430_v50 = vld [vmem:[#allocation16_spill] sm:$0xff] }
 0xb42   :  { %7547 = vst [vmem:[#allocation2 + $0x229] sm:$0xff] %v22014_v35  ;;  %7548 = vst [vmem:[#allocation2 + $0x231] sm:$0xff] %v22020_v24  ;;  %v22058_v44 = vsel %vm7361_vm12, %v21390_v8, %v25427_v1  ;;  %v22064_v46 = vsel %vm25429_vm3, %v21393_v4, %v25428_v39  ;;  %vm25432_vm7 = vcmp.gt.f32.partialorder %v25431_v15, 0.0  ;;  %vm25435_vm8 = vcmp.gt.f32.partialorder %v25434_v42, 0.0  ;;  %v25436_v8 = vld [vmem:[#allocation20_spill] sm:$0xff]  ;;  %v25441_v43 = vld [vmem:[#allocation29_spill] sm:$0xff] }
 0xb43   :  { %v22070_v6 = vsel %vm25432_vm7, %v25431_v15, %v25430_v50  ;;  %v22076_v5 = vsel %vm25435_vm8, %v25434_v42, %v25433_v13  ;;  %7549 = vst [vmem:[#allocation2 + $0x241] sm:$0xff] %v22030_v63  ;;  %7550 = vst [vmem:[#allocation2 + $0x249] sm:$0xff] %v22036_v36  ;;  %v22086_v4 = vsel %vm7365_vm0, %v25372_v19, %v25436_v8  ;;  %vm25438_vm12 = vcmp.gt.f32.partialorder %v25374_v12, 0.0  ;;  %v25442_v20 = vld [vmem:[#allocation39_spill] sm:$0xff]  ;;  %v25449_v9 = vld [vmem:[#allocation41_spill] sm:$0xff] }
 0xb44   :  { %7551 = vst [vmem:[#allocation2 + $0x259] sm:$0xff] %v22042_v38  ;;  %7552 = vst [vmem:[#allocation2 + $0x261] sm:$0xff] %v22048_v59  ;;  %v22092_v60 = vsel %vm25438_vm12, %v25374_v12, %v25437_v31  ;;  %vm25440_vm9 = vcmp.gt.f32.partialorder %v25376_v40, 0.0  ;;  %vm25443_vm14 = vcmp.gt.f32.partialorder %v25442_v20, 0.0  ;;  %v25444_v12 = vld [vmem:[#allocation31_spill] sm:$0xff]  ;;  %vm25446_vm0 = vcmp.gt.f32.partialorder %v25384_v22, 0.0 }
 0xb45   :  { %v22098_v62 = vsel %vm25440_vm9, %v25376_v40, %v25439_v27  ;;  %v22104_v25 = vsel %vm25443_vm14, %v25442_v20, %v25441_v43  ;;  %7553 = vst [vmem:[#allocation2 + $0x271] sm:$0xff] %v22058_v44  ;;  %7554 = vst [vmem:[#allocation2 + $0x279] sm:$0xff] %v22064_v46  ;;  %v22114_v40 = vsel %vm7369_vm5, %v25382_v0, %v25444_v12  ;;  %v25445_v19 = vld [vmem:[#allocation3_spill] sm:$0xff]  ;;  %v25450_v14 = vld [vmem:[#allocation32_spill] sm:$0xff] }
 0xb46   :  { %7555 = vst [vmem:[#allocation2 + $0x289] sm:$0xff] %v22070_v6  ;;  %7556 = vst [vmem:[#allocation2 + $0x291] sm:$0xff] %v22076_v5  ;;  %v22120_v53 = vsel %vm25446_vm0, %v25384_v22, %v25445_v19  ;;  %v25447_v7 = vld [vmem:[#allocation47_spill] sm:$0xff]  ;;  %vm25451_vm15 = vcmp.gt.f32.partialorder %v25450_v14, 0.0  ;;  %v25454_v39 = vld [vmem:[#allocation6_spill] sm:$0xff]  ;;  %v7759_v43 = vpack.c.bf16 %v21903_v16, %v21897_v18  ;;  %v7760_v20 = vpack.c.bf16 %v21915_v33, %v21909_v61 }
 0xb47   :  { %vm25448_vm2 = vcmp.gt.f32.partialorder %v25447_v7, 0.0  ;;  %v22132_v28 = vsel %vm25451_vm15, %v25450_v14, %v25449_v9  ;;  %7557 = vst [vmem:[#allocation2 + $0x2a1] sm:$0xff] %v22086_v4  ;;  %7558 = vst [vmem:[#allocation2 + $0x2a9] sm:$0xff] %v22092_v60  ;;  %v25452_v0 = vld [vmem:[#allocation15_spill] sm:$0xff]  ;;  %v22154_v50 = vsel %vm7375_vm13, %v25454_v39, %v21858_v10  ;;  %v25455_v15 = vld [vmem:[#allocation44_spill] sm:$0xff]  ;;  %v7761_v12 = vpack.c.bf16 %v21930_v54, %v21924_v48 }
 0xb48   :  { %v22126_v55 = vsel %vm25448_vm2, %v25447_v7, %v21835_v41  ;;  %7559 = vst [vmem:[#allocation2 + $0x2b9] sm:$0xff] %v22098_v62  ;;  %7560 = vst [vmem:[#allocation2 + $0x2c1] sm:$0xff] %v22104_v25  ;;  %v22142_v22 = vsel %vm7373_vm6, %v25390_v56, %v25452_v0  ;;  %v25453_v41 = vld [vmem:[#allocation45_spill] sm:$0xff]  ;;  %vm25456_vm5 = vcmp.gt.f32.partialorder %v25455_v15, 0.0  ;;  %v7506_v56 = vsel %vm7378_vm1, %v25395_v11, %v21872_v29  ;;  %v25459_v42 = vld [vmem:[#allocation48_spill] sm:$0xff] }
 0xb49   :  { %v22148_v1 = vsel %vm7374_vm10, %v25453_v41, %v21855_v3  ;;  %v7505_v13 = vsel %vm25456_vm5, %v25455_v15, %v21861_v21  ;;  %7561 = vst [vmem:[#allocation2 + $0x2d1] sm:$0xff] %v22114_v40  ;;  %7562 = vst [vmem:[#allocation2 + $0x2d9] sm:$0xff] %v22120_v53  ;;  %v25457_v10 = vld [vmem:[#allocation49_spill] sm:$0xff]  ;;  %v25458_v21 = vld [vmem:[#allocation34_spill] sm:$0xff]  ;;  %v7757_v29 = vpack.c.bf16 %v21878_v57, %v21867_v23 }
 0xb4a   :  { %7563 = vst [vmem:[#allocation2 + $0x2e9] sm:$0xff] %v22126_v55  ;;  %7564 = vst [vmem:[#allocation2 + $0x2f1] sm:$0xff] %v22132_v28  ;;  %v7748_v3 = vpack.c.bf16 %v25458_v21, %v25457_v10  ;;  %v25460_v8 = vld [vmem:[#allocation35_spill] sm:$0xff]  ;;  %v16739_v27 = vld [vmem:[%s24593_s2 + $0x8] sm:$0xff]   ;;  %v7762_v57 = vpack.c.bf16 %v21942_v45, %v21936_v52  ;;  %v7764_v23 = vpack.c.bf16 %v21966_v37, %v21960_v51 }
 0xb4b   :  { %7569 = vst [vmem:[#allocation2 + $0x331] sm:$0xff] %v7505_v13  ;;  %7565 = vst [vmem:[#allocation2 + $0x301] sm:$0xff] %v22142_v22  ;;  %v7749_v31 = vpack.c.bf16 %v25460_v8, %v25459_v42  ;;  %v25461_v11 = vld [vmem:[#allocation21_spill] sm:$0xff]  ;;  %v7765_v18 = vpack.c.bf16 %v21982_v49, %v21976_v17  ;;  %v7766_v16 = vpack.c.bf16 %v21994_v58, %v21988_v32  ;;  %v25462_v58 = vld [vmem:[#allocation27_spill] sm:$0xff] }
 0xb4c   :  { %7566 = vst [vmem:[#allocation2 + $0x309] sm:$0xff] %v22148_v1  ;;  %7567 = vst [vmem:[#allocation2 + $0x319] sm:$0xff] %v22154_v50  ;;  %14882 = vmatmul.mubr.bf16.vlgmr.msra.gmra.mrb[64].mxu0 %v7748_v3  ;;  %v16740_v19 = vld [vmem:[%s24593_s2 + $0x10] sm:$0xff]   ;;  %v7767_v61 = vpack.c.bf16 %v22008_v34, %v22002_v2  ;;  %v7768_v33 = vpack.c.bf16 %v22020_v24, %v22014_v35  ;;  %v7769_v48 = vpack.c.bf16 %v22036_v36, %v22030_v63  ;;  %v25463_v2 = vld [vmem:[#allocation40_spill] sm:$0xff] }
 0xb4d   :  { %7570 = vst [vmem:[#allocation2 + $0x339] sm:$0xff] %v7506_v56  ;;  %14946 = vmatpush3.bf16.msra.mxu0 %v25461_v11  ;;  %14885 = vmatprep.mubr.bf16.mxu0 %v7749_v31  ;;  %v7770_v54 = vpack.c.bf16 %v22048_v59, %v22042_v38  ;;  %v7771_v52 = vpack.c.bf16 %v22064_v46, %v22058_v44  ;;  %v16741_v35 = vld [vmem:[%s24593_s2 + $0x18] sm:$0xff]   ;;  %v16742_v38 = vld [vmem:[%s24593_s2 + $0x20] sm:$0xff]   ;;  %v25466_v59 = vld [vmem:[#allocation52_spill] sm:$0xff] }
 0xb4e   :  { %14947 = vmatprep.subr.bf16.mxu0 %v16739_v27  ;;  %v7772_v45 = vpack.c.bf16 %v22076_v5, %v22070_v6  ;;  %v7773_v51 = vpack.c.bf16 %v22092_v60, %v22086_v4  ;;  %v7774_v37 = vpack.c.bf16 %v22104_v25, %v22098_v62  ;;  %v7775_v17 = vpack.c.bf16 %v22120_v53, %v22114_v40  ;;  %v25464_v24 = vld [vmem:[#allocation46_spill] sm:$0xff]  ;;  %v25467_v44 = vld [vmem:[#allocation36_spill] sm:$0xff]  ;;  %v25468_v5 = vld [vmem:[#allocation5_spill] sm:$0xff] }
 0xb4f   :  { %v7776_v49 = vpack.c.bf16 %v22132_v28, %v22126_v55  ;;  %v7777_v32 = vpack.c.bf16 %v22148_v1, %v22142_v22  ;;  %v7750_v34 = vpack.c.bf16 %v25463_v2, %v25462_v58  ;;  %v25465_v63 = vld [vmem:[#allocation50_spill] sm:$0xff]  ;;  %v7752_v46 = vpack.c.bf16 %v25467_v44, %v25466_v59  ;;  %v16743_v6 = vld [vmem:[%s24593_s2 + $0x28] sm:$0xff]   ;;  %v25469_v4 = vld [vmem:[#allocation51_spill] sm:$0xff] }
 0xb50   :  { %v7751_v36 = vpack.c.bf16 %v25465_v63, %v25464_v24  ;;  %v7753_v60 = vpack.c.bf16 %v25469_v4, %v25468_v5  ;;  %v16744_v62 = vld [vmem:[%s24593_s2 + $0x30] sm:$0xff]   ;;  %v25470_v25 = vld [vmem:[#allocation7_spill] sm:$0xff]  ;;  %v25471_v40 = vld [vmem:[#allocation14_spill] sm:$0xff]  ;;  %v7758_v41 = vpack.c.bf16 %v21890_v47, %v21884_v30 }
 0xb51   :  { %14948 = vmatpush3.bf16.msra.mxu0 %v16739_v27  ;;  %v7754_v53 = vpack.c.bf16 %v25471_v40, %v25470_v25  ;;  %v16745_v7 = vld [vmem:[%s24593_s2 + $0x38] sm:$0xff]   ;;  %v16746_v28 = vld [vmem:[%s24593_s2 + $0x80] sm:$0xff]   ;;  %v7575_v21 = vld [vmem:[#allocation2 + $0x30] sm:$0xff] }
 0xb52   :  { %14949 = vmatprep.subr.bf16.mxu0 %v16740_v19  ;;  %v25472_v55 = vld [vmem:[#allocation18_spill] sm:$0xff]  ;;  %v25474_v0 = vld [vmem:[#allocation43_spill] sm:$0xff]  ;;  %v16747_v8 = vld [vmem:[%s24593_s2 + $0x88] sm:$0xff]  }
 0xb53   :  { %v25473_v9 = vld [vmem:[#allocation30_spill] sm:$0xff]  ;;  %v7756_v22 = vpack.c.bf16 %v21847_v26, %v25474_v0  ;;  %v7746_v30 = vld [vmem:[#allocation2 + $0x321] sm:$0xff]  ;;  %v7591_v24 = vld [vmem:[#allocation2 + $0xf0] sm:$0xff] }
 0xb54   :  { %14886 = vmatmul.mubr.bf16.gmra.mrb[68].mxu0 %v7750_v34  ;;  %v7755_v14 = vpack.c.bf16 %v25473_v9, %v25472_v55  ;;  %v7715_v1 = vld [vmem:[#allocation2 + $0x1b1] sm:$0xff]  ;;  %v7716_v39 = vld [vmem:[#allocation2 + $0x1b9] sm:$0xff]  ;;  %v7778_v13 = vpack.c.bf16 %v7746_v30, %v22154_v50  ;;  %v7577_v27 = vld [vmem:[#allocation2 + $0x48] sm:$0xff] }
 0xb55   :  { %14889 = vmatprep.mubr.bf16.mxu0 %v7751_v36  ;;  %14950 = vmatpush3.bf16.msra.mxu0 %v16740_v19  ;;  %v7763_v15 = vpack.c.bf16 %v7716_v39, %v7715_v1  ;;  %v16812_v26 = vld [vmem:[#allocation2] sm:$0xff]  ;;  %v7573_v56 = vld [vmem:[#allocation2 + $0x18] sm:$0xff]  ;;  %v16748_v50 = vld [vmem:[%s24593_s2 + $0x90] sm:$0xff]  }
 0xb56   :  { %14951 = vmatprep.subr.bf16.mxu0 %v16741_v35  ;;  %v22254_v47 = vpack.c.bf16 %v16812_v26, %v16812_v26  ;;  %v7574_v10 = vld [vmem:[#allocation2 + $0x20] sm:$0xff]  ;;  %v7576_v3 = vld [vmem:[#allocation2 + $0x38] sm:$0xff]  ;;  %v7593_v59 = vld [vmem:[#allocation2 + $0x108] sm:$0xff] }
 0xb57   :  { %v22258_v42 = vpack.c.bf16 %v7574_v10, %v7573_v56  ;;  %v22263_v31 = vpack.c.bf16 %v7576_v3, %v7575_v21  ;;  %v7579_v11 = vld [vmem:[#allocation2 + $0x60] sm:$0xff]  ;;  %v7589_v34 = vld [vmem:[#allocation2 + $0xd8] sm:$0xff]  ;;  %v7594_v44 = vld [vmem:[#allocation2 + $0x110] sm:$0xff] }
 0xb58   :  { %v22306_v2 = vld [vmem:[%s24593_s2 + $0xc0] sm:$0xff]   ;;  %v7592_v63 = vld [vmem:[#allocation2 + $0xf8] sm:$0xff]  ;;  %v22315_v5 = vpack.c.bf16 %v7594_v44, %v7593_v59  ;;  %v7599_v25 = vld [vmem:[#allocation2 + $0x150] sm:$0xff] }
 0xb59   :  { %14952 = vmatpush3.bf16.msra.mxu0 %v16741_v35  ;;  %v7590_v35 = vld [vmem:[#allocation2 + $0xe0] sm:$0xff]  ;;  %v7600_v40 = vld [vmem:[#allocation2 + $0x158] sm:$0xff]  ;;  %v7601_v55 = vld [vmem:[#allocation2 + $0x168] sm:$0xff] }
 0xb5a   :  { %14953 = vmatprep.subr.bf16.mxu0 %v16742_v38  ;;  %v22308_v36 = vpack.c.bf16 %v7590_v35, %v7589_v34  ;;  %v7602_v9 = vld [vmem:[#allocation2 + $0x170] sm:$0xff]  ;;  %v7610_v30 = vld [vmem:[#allocation2 + $0x200] sm:$0xff]  ;;  %v7632_v44 = vld [vmem:[#allocation2 + $0x308] sm:$0xff] }
 0xb5b   :  { %v7606_v0 = vld [vmem:[#allocation2 + $0x1d0] sm:$0xff]  ;;  %v7615_v3 = vld [vmem:[#allocation2 + $0x240] sm:$0xff] }
 0xb5c   :  { %14890 = vmatmul.mubr.bf16.gmra.mrb[72].mxu0 %v7752_v46  ;;  %v7595_v46 = vld [vmem:[#allocation2 + $0x120] sm:$0xff]  ;;  %v7611_v26 = vld [vmem:[#allocation2 + $0x210] sm:$0xff] }
 0xb5d   :  { %14893 = vmatprep.mubr.bf16.mxu0 %v7753_v60  ;;  %14954 = vmatpush3.bf16.msra.mxu0 %v16742_v38  ;;  %v22311_v38 = vpack.c.bf16 %v7592_v63, %v7591_v24  ;;  %v7597_v60 = vld [vmem:[#allocation2 + $0x138] sm:$0xff]  ;;  %v7614_v21 = vld [vmem:[#allocation2 + $0x230] sm:$0xff]  ;;  %v7629_v24 = vld [vmem:[#allocation2 + $0x2e8] sm:$0xff] }
 0xb5e   :  { %14955 = vmatprep.subr.bf16.mxu0 %v16743_v6  ;;  %v7630_v63 = vld [vmem:[#allocation2 + $0x2f0] sm:$0xff]  ;;  %v7631_v59 = vld [vmem:[#allocation2 + $0x300] sm:$0xff] }
 0xb61   :  { %14956 = vmatpush3.bf16.msra.mxu0 %v16743_v6  ;;  %v7596_v6 = vld [vmem:[#allocation2 + $0x128] sm:$0xff] }
 0xb62   :  { %14957 = vmatprep.subr.bf16.mxu0 %v16744_v62  ;;  %v22317_v4 = vpack.c.bf16 %v7596_v6, %v7595_v46  ;;  %v22367_v46 = vpack.c.bf16 %v7630_v63, %v7629_v24  ;;  %v22369_v6 = vpack.c.bf16 %v7632_v44, %v7631_v59  ;;  %v8484_v24 = vld [vmem:[#allocation2 + $0xb2] sm:$0xff]  ;;  %v8485_v63 = vld [vmem:[#allocation2 + $0xc2] sm:$0xff]  ;;  %v8486_v59 = vld [vmem:[#allocation2 + $0xca] sm:$0xff] }
 0xb64   :  { %14894 = vmatmul.mubr.bf16.gmra.mrb[76].mxu0 %v7754_v53 }
 0xb65   :  { %14897 = vmatprep.mubr.bf16.mxu0 %v7755_v14  ;;  %14958 = vmatpush3.bf16.msra.mxu0 %v16744_v62  ;;  %v7598_v62 = vld [vmem:[#allocation2 + $0x140] sm:$0xff]  ;;  %v22327_v14 = vpack.c.bf16 %v7602_v9, %v7601_v55 }
 0xb66   :  { %14959 = vmatprep.subr.bf16.mxu0 %v16745_v7  ;;  %v22321_v53 = vpack.c.bf16 %v7598_v62, %v7597_v60  ;;  %v8469_v60 = vld [vmem:[#allocation2 + $0x2] sm:$0xff]  ;;  %v8470_v62 = vld [vmem:[#allocation2 + $0xa] sm:$0xff] }
 0xb67   :  { %v8533_v55 = vpack.c.bf16 %v8470_v62, %v8469_v60  ;;  %v16761_v60 = vld [vmem:[%s24593_s2 + $0xf8] sm:$0xff]   ;;  %v22418_v62 = vpack.c.bf16 %v8486_v59, %v8485_v63 }
 0xb69   :  { %14960 = vmatpush3.bf16.msra.mxu0 %v16745_v7  ;;  %v22323_v7 = vpack.c.bf16 %v7600_v40, %v7599_v25  ;;  %v7633_v25 = vld [vmem:[#allocation2 + $0x318] sm:$0xff]  ;;  %v7634_v40 = vld [vmem:[#allocation2 + $0x320] sm:$0xff] }
 0xb6a   :  { %15025 = vmatprep.subr.bf16.mxu0 %v16746_v28  ;;  %v22373_v9 = vpack.c.bf16 %v7634_v40, %v7633_v25  ;;  %v22425_v25 = vld [vmem:[%s24593_s2 + $0x100] sm:$0xff]  }
 0xb6b   :  { %v8487_v40 = vld [vmem:[#allocation2 + $0xda] sm:$0xff] }
 0xb6c   :  { %14898 = vmatmul.mubr.bf16.gmra.mrb[80].mxu0 %v7756_v22  ;;  %v7607_v22 = vld [vmem:[#allocation2 + $0x1e0] sm:$0xff] }
 0xb6d   :  { %14901 = vmatprep.mubr.bf16.mxu0 %v7757_v29  ;;  %v7578_v29 = vld [vmem:[#allocation2 + $0x50] sm:$0xff] }
 0xb74   :  { %14902 = vmatmul.mubr.bf16.gmra.mrb[84].mxu0 %v7758_v41  ;;  %v7608_v41 = vld [vmem:[#allocation2 + $0x1e8] sm:$0xff] }
 0xb75   :  { %14905 = vmatprep.mubr.bf16.mxu0 %v7759_v43  ;;  %v7580_v43 = vld [vmem:[#allocation2 + $0x68] sm:$0xff]  ;;  %v22333_v39 = vpack.c.bf16 %v7608_v41, %v7607_v22  ;;  %v8473_v22 = vld [vmem:[#allocation2 + $0x32] sm:$0xff]  ;;  %v8474_v41 = vld [vmem:[#allocation2 + $0x3a] sm:$0xff] }
 0xb76   :  { %v22275_v19 = vpack.c.bf16 %v7580_v43, %v7579_v11  ;;  %v7618_v11 = vld [vmem:[#allocation2 + $0x260] sm:$0xff]  ;;  %v7619_v43 = vld [vmem:[#allocation2 + $0x270] sm:$0xff] }
 0xb7c   :  { %14906 = vmatmul.mubr.bf16.gmra.mrb[88].mxu0 %v7760_v20  ;;  %v22270_v20 = vpack.c.bf16 %v7578_v29, %v7577_v27  ;;  %v7617_v29 = vld [vmem:[#allocation2 + $0x258] sm:$0xff] }
 0xb7d   :  { %14909 = vmatprep.mubr.bf16.mxu0 %v7761_v12  ;;  %v16749_v12 = vld [vmem:[%s24593_s2 + $0x98] sm:$0xff]  }
 0xb84   :  { %14910 = vmatmul.mubr.bf16.gmra.mrb[92].mxu0 %v7762_v57  ;;  %v16750_v57 = vld [vmem:[%s24593_s2 + $0xa0] sm:$0xff]  }
 0xb85   :  { %14913 = vmatprep.mubr.bf16.mxu0 %v7763_v15  ;;  %v7609_v15 = vld [vmem:[#allocation2 + $0x1f8] sm:$0xff] }
 0xb86   :  { %v22337_v56 = vpack.c.bf16 %v7610_v30, %v7609_v15  ;;  %v16755_v30 = vld [vmem:[%s24593_s2 + $0xc8] sm:$0xff]  }
 0xb8c   :  { %14914 = vmatmul.mubr.bf16.gmra.mrb[96].mxu0 %v7764_v23  ;;  %v7581_v23 = vld [vmem:[#allocation2 + $0x78] sm:$0xff] }
 0xb8d   :  { %14917 = vmatprep.mubr.bf16.mxu0 %v7765_v18  ;;  %v7582_v18 = vld [vmem:[#allocation2 + $0x80] sm:$0xff] }
 0xb94   :  { %14918 = vmatmul.mubr.bf16.gmra.mrb[100].mxu0 %v7766_v16  ;;  %v7583_v16 = vld [vmem:[#allocation2 + $0x90] sm:$0xff] }
 0xb95   :  { %14921 = vmatprep.mubr.bf16.mxu0 %v7767_v61  ;;  %v7584_v61 = vld [vmem:[#allocation2 + $0x98] sm:$0xff] }
 0xb9c   :  { %14922 = vmatmul.mubr.bf16.gmra.mrb[104].mxu0 %v7768_v33  ;;  %v22282_v33 = vpack.c.bf16 %v7582_v18, %v7581_v23  ;;  %v7621_v18 = vld [vmem:[#allocation2 + $0x288] sm:$0xff] }
 0xb9d   :  { %14925 = vmatprep.mubr.bf16.mxu0 %v7769_v48  ;;  %v16751_v48 = vld [vmem:[%s24593_s2 + $0xa8] sm:$0xff]  }
 0xba4   :  { %14926 = vmatmul.mubr.bf16.gmra.mrb[108].mxu0 %v7770_v54  ;;  %v22287_v54 = vpack.c.bf16 %v7584_v61, %v7583_v16  ;;  %v7622_v16 = vld [vmem:[#allocation2 + $0x290] sm:$0xff]  ;;  %v7623_v61 = vld [vmem:[#allocation2 + $0x2a0] sm:$0xff] }
 0xba5   :  { %14929 = vmatprep.mubr.bf16.mxu0 %v7771_v52  ;;  %v16752_v52 = vld [vmem:[%s24593_s2 + $0xb0] sm:$0xff]  }
 0xbac   :  { %14930 = vmatmul.mubr.bf16.gmra.mrb[112].mxu0 %v7772_v45  ;;  %v7585_v45 = vld [vmem:[#allocation2 + $0xa8] sm:$0xff] }
 0xbad   :  { %14933 = vmatprep.mubr.bf16.mxu0 %v7773_v51  ;;  %v7586_v51 = vld [vmem:[#allocation2 + $0xb0] sm:$0xff] }
 0xbb4   :  { %14934 = vmatmul.mubr.bf16.gmra.mrb[116].mxu0 %v7774_v37  ;;  %v7587_v37 = vld [vmem:[#allocation2 + $0xc0] sm:$0xff] }
 0xbb5   :  { %14937 = vmatprep.mubr.bf16.mxu0 %v7775_v17  ;;  %v7588_v17 = vld [vmem:[#allocation2 + $0xc8] sm:$0xff] }
 0xbb6   :  { %v22299_v58 = vpack.c.bf16 %v7588_v17, %v7587_v37  ;;  %v7626_v37 = vld [vmem:[#allocation2 + $0x2c0] sm:$0xff]  ;;  %v7627_v17 = vld [vmem:[#allocation2 + $0x2d0] sm:$0xff] }
 0xbbc   :  { %14938 = vmatmul.mubr.bf16.gmra.mrb[120].mxu0 %v7776_v49  ;;  %v22294_v49 = vpack.c.bf16 %v7586_v51, %v7585_v45  ;;  %v7625_v51 = vld [vmem:[#allocation2 + $0x2b8] sm:$0xff] }
 0xbbd   :  { %14941 = vmatprep.mubr.bf16.mxu0 %v7777_v32  ;;  %v16753_v32 = vld [vmem:[%s24593_s2 + $0xb8] sm:$0xff]   ;;  %v22361_v34 = vpack.c.bf16 %v7626_v37, %v7625_v51  ;;  %v16759_v51 = vld [vmem:[%s24593_s2 + $0xe8] sm:$0xff]  }
 0xbc4   :  { %14942 = vmatmul.mubr.bf16.gmra.mrb[124].mxu0 %v7778_v13  ;;  %v7612_v13 = vld [vmem:[#allocation2 + $0x218] sm:$0xff] }
 0xbc5   :  { %14961 = vmatprep.mubr.bf16.mxu0 %v22254_v47  ;;  %v22339_v10 = vpack.c.bf16 %v7612_v13, %v7611_v26  ;;  %v22381_v26 = vpack.c.bf16 %v8474_v41, %v8473_v22  ;;  %v16756_v13 = vld [vmem:[%s24593_s2 + $0xd0] sm:$0xff]  }
 0xbcc   :  { %14962 = vmatmul.mubr.bf16.vlgmr.msra.gmra.mrb[64].mxu0 %v22258_v42 }
 0xbcd   :  { %15026 = vmatpush3.bf16.msra.mxu0 %v16746_v28  ;;  %14965 = vmatprep.mubr.bf16.mxu0 %v22263_v31  ;;  %v7605_v28 = vld [vmem:[#allocation2 + $0x1c8] sm:$0xff] }
 0xbce   :  { %15027 = vmatprep.subr.bf16.mxu0 %v16747_v8  ;;  %v22331_v1 = vpack.c.bf16 %v7606_v0, %v7605_v28  ;;  %v8471_v28 = vld [vmem:[#allocation2 + $0x1a] sm:$0xff]  ;;  %v8472_v0 = vld [vmem:[#allocation2 + $0x22] sm:$0xff] }
 0xbcf   :  { %v22376_v15 = vpack.c.bf16 %v8472_v0, %v8471_v28  ;;  %v8489_v28 = vld [vmem:[#allocation2 + $0xf2] sm:$0xff]  ;;  %v8490_v0 = vld [vmem:[#allocation2 + $0xfa] sm:$0xff] }
 0xbd0   :  { %v22430_v41 = vpack.c.bf16 %v8490_v0, %v8489_v28  ;;  %v8506_v28 = vld [vmem:[#allocation2 + $0x1ea] sm:$0xff] }
 0xbd1   :  { %15028 = vmatpush3.bf16.msra.mxu0 %v16747_v8  ;;  %v7616_v8 = vld [vmem:[#allocation2 + $0x248] sm:$0xff] }
 0xbd2   :  { %15029 = vmatprep.subr.bf16.mxu0 %v16748_v50  ;;  %v22345_v27 = vpack.c.bf16 %v7616_v8, %v7615_v3  ;;  %v8477_v3 = vld [vmem:[#allocation2 + $0x62] sm:$0xff]  ;;  %v8478_v8 = vld [vmem:[#allocation2 + $0x6a] sm:$0xff] }
 0xbd4   :  { %14966 = vmatmul.mubr.bf16.gmra.mrb[68].mxu0 %v22270_v20 }
 0xbd5   :  { %14969 = vmatprep.mubr.bf16.mxu0 %v22275_v19  ;;  %15030 = vmatpush3.bf16.msra.mxu0 %v16748_v50 }
 0xbd6   :  { %15031 = vmatprep.subr.bf16.mxu0 %v16749_v12 }
 0xbd9   :  { %15032 = vmatpush3.bf16.msra.mxu0 %v16749_v12  ;;  %v7620_v12 = vld [vmem:[#allocation2 + $0x278] sm:$0xff] }
 0xbda   :  { %15033 = vmatprep.subr.bf16.mxu0 %v16750_v57  ;;  %v22351_v23 = vpack.c.bf16 %v7620_v12, %v7619_v43  ;;  %v16758_v43 = vld [vmem:[%s24593_s2 + $0xe0] sm:$0xff]  }
 0xbdb   :  { %v8479_v12 = vld [vmem:[#allocation2 + $0x7a] sm:$0xff] }
 0xbdc   :  { %14970 = vmatmul.mubr.bf16.gmra.mrb[72].mxu0 %v22282_v33 }
 0xbdd   :  { %14973 = vmatprep.mubr.bf16.mxu0 %v22287_v54  ;;  %15034 = vmatpush3.bf16.msra.mxu0 %v16750_v57  ;;  %v22349_v57 = vpack.c.bf16 %v7618_v11, %v7617_v29  ;;  %v16757_v11 = vld [vmem:[%s24593_s2 + $0xd8] sm:$0xff]  }
 0xbde   :  { %15035 = vmatprep.subr.bf16.mxu0 %v16751_v48 }
 0xbe1   :  { %15036 = vmatpush3.bf16.msra.mxu0 %v16751_v48  ;;  %v7624_v48 = vld [vmem:[#allocation2 + $0x2a8] sm:$0xff] }
 0xbe2   :  { %15037 = vmatprep.subr.bf16.mxu0 %v16752_v52  ;;  %v22357_v45 = vpack.c.bf16 %v7624_v48, %v7623_v61  ;;  %v8482_v61 = vld [vmem:[#allocation2 + $0x9a] sm:$0xff] }
 0xbe4   :  { %14974 = vmatmul.mubr.bf16.gmra.mrb[76].mxu0 %v22294_v49 }
 0xbe5   :  { %14977 = vmatprep.mubr.bf16.mxu0 %v22299_v58  ;;  %15038 = vmatpush3.bf16.msra.mxu0 %v16752_v52  ;;  %v22355_v52 = vpack.c.bf16 %v7622_v16, %v7621_v18  ;;  %v8480_v18 = vld [vmem:[#allocation2 + $0x82] sm:$0xff]  ;;  %v8481_v16 = vld [vmem:[#allocation2 + $0x92] sm:$0xff] }
 0xbe6   :  { %15039 = vmatprep.subr.bf16.mxu0 %v16753_v32  ;;  %v22401_v48 = vpack.c.bf16 %v8480_v18, %v8479_v12  ;;  %v22406_v37 = vpack.c.bf16 %v8482_v61, %v8481_v16  ;;  %v8497_v12 = vld [vmem:[#allocation2 + $0x152] sm:$0xff]  ;;  %v8498_v18 = vld [vmem:[#allocation2 + $0x15a] sm:$0xff] }
 0xbe7   :  { %v22442_v61 = vpack.c.bf16 %v8498_v18, %v8497_v12  ;;  %v8511_v18 = vld [vmem:[#allocation2 + $0x22a] sm:$0xff] }
 0xbe9   :  { %15040 = vmatpush3.bf16.msra.mxu0 %v16753_v32  ;;  %v7628_v32 = vld [vmem:[#allocation2 + $0x2d8] sm:$0xff] }
 0xbea   :  { %15105 = vmatprep.subr.bf16.mxu0 %v22306_v2  ;;  %v22363_v35 = vpack.c.bf16 %v7628_v32, %v7627_v17  ;;  %v16760_v17 = vld [vmem:[%s24593_s2 + $0xf0] sm:$0xff]  }
 0xbeb   :  { %v8483_v32 = vld [vmem:[#allocation2 + $0xaa] sm:$0xff] }
 0xbec   :  { %14978 = vmatmul.mubr.bf16.gmra.mrb[80].mxu0 %v22308_v36  ;;  %v22413_v44 = vpack.c.bf16 %v8484_v24, %v8483_v32  ;;  %v8499_v32 = vld [vmem:[#allocation2 + $0x16a] sm:$0xff]  ;;  %v8500_v24 = vld [vmem:[#allocation2 + $0x172] sm:$0xff] }
 0xbed   :  { %14981 = vmatprep.mubr.bf16.mxu0 %v22311_v38  ;;  %v22446_v59 = vpack.c.bf16 %v8500_v24, %v8499_v32  ;;  %v8514_v32 = vld [vmem:[#allocation2 + $0x24a] sm:$0xff] }
 0xbf4   :  { %14982 = vmatmul.mubr.bf16.gmra.mrb[84].mxu0 %v22315_v5 }
 0xbf5   :  { %14985 = vmatprep.mubr.bf16.mxu0 %v22317_v4 }
 0xbfc   :  { %14986 = vmatmul.mubr.bf16.gmra.mrb[88].mxu0 %v22321_v53 }
 0xbfd   :  { %14989 = vmatprep.mubr.bf16.mxu0 %v22323_v7 }
 0xc04   :  { %14990 = vmatmul.mubr.bf16.gmra.mrb[92].mxu0 %v22327_v14 }
 0xc05   :  { %14993 = vmatprep.mubr.bf16.mxu0 %v22254_v47  ;;  %v7613_v47 = vld [vmem:[#allocation2 + $0x228] sm:$0xff] }
 0xc06   :  { %v22343_v50 = vpack.c.bf16 %v7614_v21, %v7613_v47  ;;  %v8475_v47 = vld [vmem:[#allocation2 + $0x4a] sm:$0xff]  ;;  %v8476_v21 = vld [vmem:[#allocation2 + $0x52] sm:$0xff] }
 0xc07   :  { %v22389_v29 = vpack.c.bf16 %v8476_v21, %v8475_v47  ;;  %v8493_v47 = vld [vmem:[#allocation2 + $0x122] sm:$0xff]  ;;  %v8494_v21 = vld [vmem:[#allocation2 + $0x12a] sm:$0xff] }
 0xc0c   :  { %14994 = vmatmul.mubr.bf16.gmra.mrb[96].mxu0 %v22331_v1 }
 0xc0d   :  { %14997 = vmatprep.mubr.bf16.mxu0 %v22333_v39 }
 0xc14   :  { %14998 = vmatmul.mubr.bf16.gmra.mrb[100].mxu0 %v22337_v56 }
 0xc15   :  { %15001 = vmatprep.mubr.bf16.mxu0 %v22339_v10 }
 0xc1c   :  { %15002 = vmatmul.mubr.bf16.gmra.mrb[104].mxu0 %v22343_v50 }
 0xc1d   :  { %15005 = vmatprep.mubr.bf16.mxu0 %v22345_v27 }
 0xc24   :  { %15006 = vmatmul.mubr.bf16.gmra.mrb[108].mxu0 %v22349_v57 }
 0xc25   :  { %15009 = vmatprep.mubr.bf16.mxu0 %v22351_v23 }
 0xc2c   :  { %15010 = vmatmul.mubr.bf16.gmra.mrb[112].mxu0 %v22355_v52 }
 0xc2d   :  { %15013 = vmatprep.mubr.bf16.mxu0 %v22357_v45 }
 0xc34   :  { %15014 = vmatmul.mubr.bf16.gmra.mrb[116].mxu0 %v22361_v34 }
 0xc35   :  { %15017 = vmatprep.mubr.bf16.mxu0 %v22363_v35 }
 0xc3c   :  { %15018 = vmatmul.mubr.bf16.gmra.mrb[120].mxu0 %v22367_v46 }
 0xc3d   :  { %15021 = vmatprep.mubr.bf16.mxu0 %v22369_v6 }
 0xc44   :  { %15022 = vmatmul.mubr.bf16.gmra.mrb[124].mxu0 %v22373_v9 }
 0xc45   :  { %15041 = vmatprep.mubr.bf16.mxu0 %v8533_v55  ;;  %v8488_v55 = vld [vmem:[#allocation2 + $0xe2] sm:$0xff] }
 0xc46   :  { %v22427_v22 = vpack.c.bf16 %v8488_v55, %v8487_v40  ;;  %v8504_v40 = vld [vmem:[#allocation2 + $0x1d2] sm:$0xff]  ;;  %v8505_v55 = vld [vmem:[#allocation2 + $0x1e2] sm:$0xff] }
 0xc4c   :  { %15042 = vmatmul.mubr.bf16.vlgmr.msra.gmra.mrb[64].mxu0 %v22376_v15 }
 0xc4d   :  { %15106 = vmatpush3.bf16.msra.mxu0 %v22306_v2  ;;  %15045 = vmatprep.mubr.bf16.mxu0 %v22381_v26  ;;  %v22394_v2 = vpack.c.bf16 %v8478_v8, %v8477_v3  ;;  %v22436_v8 = vpack.c.bf16 %v8494_v21, %v8493_v47  ;;  %v8508_v47 = vld [vmem:[#allocation2 + $0x202] sm:$0xff]  ;;  %v8509_v21 = vld [vmem:[#allocation2 + $0x212] sm:$0xff] }
 0xc4e   :  { %15107 = vmatprep.subr.bf16.mxu0 %v16755_v30 }
 0xc51   :  { %15108 = vmatpush3.bf16.msra.mxu0 %v16755_v30  ;;  %v8491_v30 = vld [vmem:[#allocation2 + $0x10a] sm:$0xff] }
 0xc52   :  { %15109 = vmatprep.subr.bf16.mxu0 %v16756_v13 }
 0xc54   :  { %15046 = vmatmul.mubr.bf16.gmra.mrb[68].mxu0 %v22389_v29 }
 0xc55   :  { %15049 = vmatprep.mubr.bf16.mxu0 %v22394_v2  ;;  %15110 = vmatpush3.bf16.msra.mxu0 %v16756_v13  ;;  %v8492_v13 = vld [vmem:[#allocation2 + $0x112] sm:$0xff] }
 0xc56   :  { %15111 = vmatprep.subr.bf16.mxu0 %v16757_v11  ;;  %v22434_v3 = vpack.c.bf16 %v8492_v13, %v8491_v30  ;;  %v22451_v30 = vpack.c.bf16 %v8506_v28, %v8505_v55  ;;  %v8507_v13 = vld [vmem:[#allocation2 + $0x1fa] sm:$0xff]  ;;  %v8517_v55 = vld [vmem:[#allocation2 + $0x272] sm:$0xff] }
 0xc57   :  { %v8518_v28 = vld [vmem:[#allocation2 + $0x27a] sm:$0xff] }
 0xc59   :  { %15112 = vmatpush3.bf16.msra.mxu0 %v16757_v11  ;;  %v8495_v11 = vld [vmem:[#allocation2 + $0x13a] sm:$0xff] }
 0xc5a   :  { %15113 = vmatprep.subr.bf16.mxu0 %v16758_v43 }
 0xc5c   :  { %15050 = vmatmul.mubr.bf16.gmra.mrb[72].mxu0 %v22401_v48 }
 0xc5d   :  { %15053 = vmatprep.mubr.bf16.mxu0 %v22406_v37  ;;  %15114 = vmatpush3.bf16.msra.mxu0 %v16758_v43  ;;  %v8496_v43 = vld [vmem:[#allocation2 + $0x142] sm:$0xff] }
 0xc5e   :  { %15115 = vmatprep.subr.bf16.mxu0 %v16759_v51  ;;  %v22440_v16 = vpack.c.bf16 %v8496_v43, %v8495_v11  ;;  %v8510_v11 = vld [vmem:[#allocation2 + $0x21a] sm:$0xff]  ;;  %v22455_v43 = vpack.c.bf16 %v8508_v47, %v8507_v13  ;;  %v22469_v47 = vpack.c.bf16 %v8518_v28, %v8517_v55  ;;  %v8525_v55 = vld [vmem:[#allocation2 + $0x2d2] sm:$0xff] }
 0xc5f   :  { %v22457_v12 = vpack.c.bf16 %v8510_v11, %v8509_v21  ;;  %v8519_v21 = vld [vmem:[#allocation2 + $0x28a] sm:$0xff]  ;;  %v8520_v11 = vld [vmem:[#allocation2 + $0x292] sm:$0xff]  ;;  %v8526_v28 = vld [vmem:[#allocation2 + $0x2da] sm:$0xff] }
 0xc60   :  { %25477 = vst [vmem:[#allocation33_spill] sm:$0xff] %v22469_v47 }
 0xc61   :  { %15116 = vmatpush3.bf16.msra.mxu0 %v16759_v51  ;;  %v8501_v51 = vld [vmem:[#allocation2 + $0x1b2] sm:$0xff] }
 0xc62   :  { %15117 = vmatprep.subr.bf16.mxu0 %v16760_v17 }
 0xc64   :  { %15054 = vmatmul.mubr.bf16.gmra.mrb[76].mxu0 %v22413_v44 }
 0xc65   :  { %15057 = vmatprep.mubr.bf16.mxu0 %v22418_v62  ;;  %15118 = vmatpush3.bf16.msra.mxu0 %v16760_v17  ;;  %v8502_v17 = vld [vmem:[#allocation2 + $0x1ba] sm:$0xff] }
 0xc66   :  { %15119 = vmatprep.subr.bf16.mxu0 %v16761_v60  ;;  %v8549_v63 = vpack.c.bf16 %v8502_v17, %v8501_v51  ;;  %v8512_v51 = vld [vmem:[#allocation2 + $0x232] sm:$0xff]  ;;  %v8513_v17 = vld [vmem:[#allocation2 + $0x242] sm:$0xff] }
 0xc67   :  { %v22461_v24 = vpack.c.bf16 %v8512_v51, %v8511_v18  ;;  %v8521_v18 = vld [vmem:[#allocation2 + $0x2a2] sm:$0xff]  ;;  %v8522_v51 = vld [vmem:[#allocation2 + $0x2aa] sm:$0xff] }
 0xc69   :  { %15120 = vmatpush3.bf16.msra.mxu0 %v16761_v60  ;;  %v8503_v60 = vld [vmem:[#allocation2 + $0x1ca] sm:$0xff] }
 0xc6a   :  { %15185 = vmatprep.subr.bf16.mxu0 %v22425_v25  ;;  %v22449_v0 = vpack.c.bf16 %v8504_v40, %v8503_v60  ;;  %v8515_v60 = vld [vmem:[#allocation2 + $0x25a] sm:$0xff]  ;;  %v8516_v40 = vld [vmem:[#allocation2 + $0x262] sm:$0xff] }
 0xc6b   :  { %v22467_v13 = vpack.c.bf16 %v8516_v40, %v8515_v60  ;;  %v8523_v60 = vld [vmem:[#allocation2 + $0x2ba] sm:$0xff]  ;;  %v8524_v40 = vld [vmem:[#allocation2 + $0x2c2] sm:$0xff] }
 0xc6c   :  { %15058 = vmatmul.mubr.bf16.gmra.mrb[80].mxu0 %v22427_v22 }
 0xc6d   :  { %15061 = vmatprep.mubr.bf16.mxu0 %v22430_v41  ;;  %25476 = vst [vmem:[#allocation24_spill] sm:$0xff] %v22467_v13 }
 0xc74   :  { %15062 = vmatmul.mubr.bf16.gmra.mrb[84].mxu0 %v22434_v3 }
 0xc75   :  { %15065 = vmatprep.mubr.bf16.mxu0 %v22436_v8 }
 0xc7c   :  { %15066 = vmatmul.mubr.bf16.gmra.mrb[88].mxu0 %v22440_v16 }
 0xc7d   :  { %15069 = vmatprep.mubr.bf16.mxu0 %v22442_v61 }
 0xc84   :  { %15070 = vmatmul.mubr.bf16.gmra.mrb[92].mxu0 %v22446_v59 }
 0xc85   :  { %15073 = vmatprep.mubr.bf16.mxu0 %v8549_v63  ;;  %v22463_v63 = vpack.c.bf16 %v8514_v32, %v8513_v17  ;;  %v22473_v17 = vpack.c.bf16 %v8520_v11, %v8519_v21  ;;  %v22475_v32 = vpack.c.bf16 %v8522_v51, %v8521_v18  ;;  %v8527_v21 = vld [vmem:[#allocation2 + $0x2ea] sm:$0xff]  ;;  %v8528_v11 = vld [vmem:[#allocation2 + $0x2f2] sm:$0xff]  ;;  %v8529_v18 = vld [vmem:[#allocation2 + $0x302] sm:$0xff] }
 0xc86   :  { %v8530_v51 = vld [vmem:[#allocation2 + $0x30a] sm:$0xff] }
 0xc87   :  { %25475 = vst [vmem:[#allocation4_spill] sm:$0xff] %v22463_v63  ;;  %25478 = vst [vmem:[#allocation42_spill] sm:$0xff] %v22473_v17 }
 0xc8c   :  { %15074 = vmatmul.mubr.bf16.gmra.mrb[96].mxu0 %v22449_v0 }
 0xc8d   :  { %15077 = vmatprep.mubr.bf16.mxu0 %v22451_v30 }
 0xc94   :  { %15078 = vmatmul.mubr.bf16.gmra.mrb[100].mxu0 %v22455_v43 }
 0xc95   :  { %15081 = vmatprep.mubr.bf16.mxu0 %v22457_v12 }
 0xc9c   :  { %15082 = vmatmul.mubr.bf16.gmra.mrb[104].mxu0 %v22461_v24 }
 0xc9d   :  { %15085 = vmatprep.mubr.bf16.mxu0 %v22463_v63  ;;  %v22479_v63 = vpack.c.bf16 %v8524_v40, %v8523_v60  ;;  %v8531_v60 = vld [vmem:[#allocation2 + $0x31a] sm:$0xff]  ;;  %v8532_v40 = vld [vmem:[#allocation2 + $0x322] sm:$0xff] }
 0xca4   :  { %15086 = vmatmul.mubr.bf16.gmra.mrb[108].mxu0 %v22467_v13  ;;  %v22481_v13 = vpack.c.bf16 %v8526_v28, %v8525_v55  ;;  %v22491_v55 = vpack.c.bf16 %v8532_v40, %v8531_v60  ;;  %v16763_v28 = vld [vmem:[%s24593_s2 + $0x108] sm:$0xff]   ;;  %v9508_v60 = vld [vmem:[#allocation2 + $0xb1] sm:$0xff] }
 0xca5   :  { %15089 = vmatprep.mubr.bf16.mxu0 %v22469_v47  ;;  %v22485_v47 = vpack.c.bf16 %v8528_v11, %v8527_v21  ;;  %v16764_v21 = vld [vmem:[%s24593_s2 + $0x110] sm:$0xff]  }
 0xca6   :  { %v9505_v11 = vld [vmem:[#allocation2 + $0x91] sm:$0xff] }
 0xcac   :  { %15090 = vmatmul.mubr.bf16.gmra.mrb[112].mxu0 %v22473_v17  ;;  %v22487_v17 = vpack.c.bf16 %v8530_v51, %v8529_v18  ;;  %v9506_v18 = vld [vmem:[#allocation2 + $0x99] sm:$0xff]  ;;  %v9507_v51 = vld [vmem:[#allocation2 + $0xa9] sm:$0xff] }
 0xcad   :  { %15093 = vmatprep.mubr.bf16.mxu0 %v22475_v32  ;;  %v22579_v40 = vpack.c.bf16 %v9506_v18, %v9505_v11 }
 0xcb4   :  { %15094 = vmatmul.mubr.bf16.gmra.mrb[116].mxu0 %v22479_v63 }
 0xcb5   :  { %15097 = vmatprep.mubr.bf16.mxu0 %v22481_v13 }
 0xcbc   :  { %15098 = vmatmul.mubr.bf16.gmra.mrb[120].mxu0 %v22485_v47 }
 0xcbd   :  { %15101 = vmatprep.mubr.bf16.mxu0 %v22487_v17 }
 0xcc4   :  { %15102 = vmatmul.mubr.bf16.gmra.mrb[124].mxu0 %v22491_v55 }
 0xcc5   :  { %15121 = vmatprep.mubr.bf16.mxu0 %v22258_v42  ;;  %v16765_v42 = vld [vmem:[%s24593_s2 + $0x118] sm:$0xff]  }
 0xccc   :  { %15122 = vmatmul.mubr.bf16.vlgmr.msra.gmra.mrb[64].mxu0 %v22263_v31  ;;  %v16766_v31 = vld [vmem:[%s24593_s2 + $0x120] sm:$0xff]  }
 0xccd   :  { %15186 = vmatpush3.bf16.msra.mxu0 %v22425_v25  ;;  %15125 = vmatprep.mubr.bf16.mxu0 %v22270_v20  ;;  %v16767_v20 = vld [vmem:[%s24593_s2 + $0x128] sm:$0xff]   ;;  %v16774_v25 = vld [vmem:[%s24593_s2 + $0x160] sm:$0xff]  }
 0xcce   :  { %15187 = vmatprep.subr.bf16.mxu0 %v16763_v28 }
 0xcd1   :  { %15188 = vmatpush3.bf16.msra.mxu0 %v16763_v28  ;;  %v16775_v28 = vld [vmem:[%s24593_s2 + $0x168] sm:$0xff]  }
 0xcd2   :  { %15189 = vmatprep.subr.bf16.mxu0 %v16764_v21 }
 0xcd4   :  { %15126 = vmatmul.mubr.bf16.gmra.mrb[68].mxu0 %v22275_v19  ;;  %v16768_v19 = vld [vmem:[%s24593_s2 + $0x130] sm:$0xff]  }
 0xcd5   :  { %15129 = vmatprep.mubr.bf16.mxu0 %v22282_v33  ;;  %15190 = vmatpush3.bf16.msra.mxu0 %v16764_v21  ;;  %v16769_v33 = vld [vmem:[%s24593_s2 + $0x138] sm:$0xff]   ;;  %v22584_v21 = vpack.c.bf16 %v9508_v60, %v9507_v51  ;;  %v9525_v51 = vld [vmem:[#allocation2 + $0x181] sm:$0xff]  ;;  %v9526_v60 = vld [vmem:[#allocation2 + $0x189] sm:$0xff] }
 0xcd6   :  { %15191 = vmatprep.subr.bf16.mxu0 %v16765_v42 }
 0xcd9   :  { %15192 = vmatpush3.bf16.msra.mxu0 %v16765_v42  ;;  %v16776_v42 = vld [vmem:[%s24593_s2 + $0x170] sm:$0xff]  }
 0xcda   :  { %15193 = vmatprep.subr.bf16.mxu0 %v16766_v31 }
 0xcdc   :  { %15130 = vmatmul.mubr.bf16.gmra.mrb[72].mxu0 %v22287_v54  ;;  %v16770_v54 = vld [vmem:[%s24593_s2 + $0x140] sm:$0xff]  }
 0xcdd   :  { %15133 = vmatprep.mubr.bf16.mxu0 %v22294_v49  ;;  %15194 = vmatpush3.bf16.msra.mxu0 %v16766_v31  ;;  %v9012_v49 = vld [vmem:[#allocation2 + $0x180] sm:$0xff] }
 0xcde   :  { %15195 = vmatprep.subr.bf16.mxu0 %v16767_v20  ;;  %v9509_v31 = vld [vmem:[#allocation2 + $0xc1] sm:$0xff] }
 0xce1   :  { %15196 = vmatpush3.bf16.msra.mxu0 %v16767_v20  ;;  %v9510_v20 = vld [vmem:[#allocation2 + $0xc9] sm:$0xff] }
 0xce2   :  { %15197 = vmatprep.subr.bf16.mxu0 %v16768_v19 }
 0xce4   :  { %15134 = vmatmul.mubr.bf16.gmra.mrb[76].mxu0 %v22299_v58  ;;  %v9013_v58 = vld [vmem:[#allocation2 + $0x188] sm:$0xff] }
 0xce5   :  { %15137 = vmatprep.mubr.bf16.mxu0 %v22308_v36  ;;  %15198 = vmatpush3.bf16.msra.mxu0 %v16768_v19  ;;  %v22534_v36 = vpack.c.bf16 %v9013_v58, %v9012_v49  ;;  %v9511_v19 = vld [vmem:[#allocation2 + $0xd9] sm:$0xff] }
 0xce6   :  { %15199 = vmatprep.subr.bf16.mxu0 %v16769_v33  ;;  %v16777_v49 = vld [vmem:[%s24593_s2 + $0x178] sm:$0xff]  }
 0xce9   :  { %15200 = vmatpush3.bf16.msra.mxu0 %v16769_v33  ;;  %v9512_v33 = vld [vmem:[#allocation2 + $0xe1] sm:$0xff] }
 0xcea   :  { %15265 = vmatprep.subr.bf16.mxu0 %v16770_v54  ;;  %v22596_v58 = vpack.c.bf16 %v9512_v33, %v9511_v19  ;;  %v9529_v19 = vld [vmem:[#allocation2 + $0x1e1] sm:$0xff]  ;;  %v9530_v33 = vld [vmem:[#allocation2 + $0x1e9] sm:$0xff] }
 0xcec   :  { %15138 = vmatmul.mubr.bf16.gmra.mrb[80].mxu0 %v22311_v38  ;;  %v9044_v38 = vld [vmem:[#allocation2 + $0x330] sm:$0xff] }
 0xced   :  { %15141 = vmatprep.mubr.bf16.mxu0 %v22315_v5  ;;  %v9045_v5 = vld [vmem:[#allocation2 + $0x338] sm:$0xff] }
 0xcf4   :  { %15142 = vmatmul.mubr.bf16.gmra.mrb[84].mxu0 %v22317_v4  ;;  %v9495_v4 = vld [vmem:[#allocation2 + $0x19] sm:$0xff] }
 0xcf5   :  { %15145 = vmatprep.mubr.bf16.mxu0 %v22321_v53  ;;  %v9496_v53 = vld [vmem:[#allocation2 + $0x21] sm:$0xff] }
 0xcfc   :  { %15146 = vmatmul.mubr.bf16.gmra.mrb[88].mxu0 %v22323_v7  ;;  %v22552_v7 = vpack.c.bf16 %v9045_v5, %v9044_v38  ;;  %v22603_v38 = vld [vmem:[%s24593_s2 + $0x180] sm:$0xff]   ;;  %v9513_v5 = vld [vmem:[#allocation2 + $0xf1] sm:$0xff] }
 0xcfd   :  { %15149 = vmatprep.mubr.bf16.mxu0 %v22327_v14  ;;  %v9559_v14 = vpack.c.bf16 %v9496_v53, %v9495_v4  ;;  %v9514_v4 = vld [vmem:[#allocation2 + $0xf9] sm:$0xff]  ;;  %v9515_v53 = vld [vmem:[#allocation2 + $0x109] sm:$0xff] }
 0xd04   :  { %15150 = vmatmul.mubr.bf16.gmra.mrb[92].mxu0 %v22534_v36 }
 0xd05   :  { %15153 = vmatprep.mubr.bf16.mxu0 %v22331_v1  ;;  %v9497_v1 = vld [vmem:[#allocation2 + $0x31] sm:$0xff] }
 0xd0c   :  { %15154 = vmatmul.mubr.bf16.gmra.mrb[96].mxu0 %v22333_v39  ;;  %v9498_v39 = vld [vmem:[#allocation2 + $0x39] sm:$0xff] }
 0xd0d   :  { %15157 = vmatprep.mubr.bf16.mxu0 %v22337_v56  ;;  %v9499_v56 = vld [vmem:[#allocation2 + $0x49] sm:$0xff] }
 0xd14   :  { %15158 = vmatmul.mubr.bf16.gmra.mrb[100].mxu0 %v22339_v10  ;;  %v9500_v10 = vld [vmem:[#allocation2 + $0x51] sm:$0xff] }
 0xd15   :  { %15161 = vmatprep.mubr.bf16.mxu0 %v22343_v50  ;;  %v22555_v50 = vpack.c.bf16 %v9498_v39, %v9497_v1  ;;  %v22605_v1 = vpack.c.bf16 %v9514_v4, %v9513_v5  ;;  %v9532_v5 = vld [vmem:[#allocation2 + $0x201] sm:$0xff]  ;;  %v22627_v4 = vpack.c.bf16 %v9530_v33, %v9529_v19  ;;  %v9543_v19 = vld [vmem:[#allocation2 + $0x289] sm:$0xff]  ;;  %v9544_v33 = vld [vmem:[#allocation2 + $0x291] sm:$0xff] }
 0xd1c   :  { %15162 = vmatmul.mubr.bf16.gmra.mrb[104].mxu0 %v22345_v27  ;;  %v16771_v27 = vld [vmem:[%s24593_s2 + $0x148] sm:$0xff]  }
 0xd1d   :  { %15165 = vmatprep.mubr.bf16.mxu0 %v22349_v57  ;;  %v22560_v57 = vpack.c.bf16 %v9500_v10, %v9499_v56  ;;  %v9517_v56 = vld [vmem:[#allocation2 + $0x121] sm:$0xff]  ;;  %v9518_v10 = vld [vmem:[#allocation2 + $0x129] sm:$0xff] }
 0xd24   :  { %15166 = vmatmul.mubr.bf16.gmra.mrb[108].mxu0 %v22351_v23  ;;  %v16772_v23 = vld [vmem:[%s24593_s2 + $0x150] sm:$0xff]  }
 0xd25   :  { %15169 = vmatprep.mubr.bf16.mxu0 %v22355_v52  ;;  %v9501_v52 = vld [vmem:[#allocation2 + $0x61] sm:$0xff] }
 0xd2c   :  { %15170 = vmatmul.mubr.bf16.gmra.mrb[112].mxu0 %v22357_v45  ;;  %v9502_v45 = vld [vmem:[#allocation2 + $0x69] sm:$0xff] }
 0xd2d   :  { %15173 = vmatprep.mubr.bf16.mxu0 %v22361_v34  ;;  %v9503_v34 = vld [vmem:[#allocation2 + $0x79] sm:$0xff] }
 0xd34   :  { %15174 = vmatmul.mubr.bf16.gmra.mrb[116].mxu0 %v22363_v35  ;;  %v9504_v35 = vld [vmem:[#allocation2 + $0x81] sm:$0xff] }
 0xd35   :  { %15177 = vmatprep.mubr.bf16.mxu0 %v22367_v46  ;;  %v22567_v46 = vpack.c.bf16 %v9502_v45, %v9501_v52  ;;  %v22612_v52 = vpack.c.bf16 %v9518_v10, %v9517_v56  ;;  %v9534_v56 = vld [vmem:[#allocation2 + $0x219] sm:$0xff]  ;;  %v9535_v10 = vld [vmem:[#allocation2 + $0x229] sm:$0xff] }
 0xd3c   :  { %15178 = vmatmul.mubr.bf16.gmra.mrb[120].mxu0 %v22369_v6  ;;  %v16773_v6 = vld [vmem:[%s24593_s2 + $0x158] sm:$0xff]  }
 0xd3d   :  { %15181 = vmatprep.mubr.bf16.mxu0 %v22373_v9  ;;  %v22572_v9 = vpack.c.bf16 %v9504_v35, %v9503_v34  ;;  %v9521_v34 = vld [vmem:[#allocation2 + $0x151] sm:$0xff]  ;;  %v9522_v35 = vld [vmem:[#allocation2 + $0x159] sm:$0xff] }
 0xd3e   :  { %v22618_v11 = vpack.c.bf16 %v9522_v35, %v9521_v34  ;;  %v9537_v35 = vld [vmem:[#allocation2 + $0x241] sm:$0xff] }
 0xd44   :  { %15182 = vmatmul.mubr.bf16.gmra.mrb[124].mxu0 %v22552_v7 }
 0xd45   :  { %15201 = vmatprep.mubr.bf16.mxu0 %v9559_v14  ;;  %v9516_v14 = vld [vmem:[#allocation2 + $0x111] sm:$0xff] }
 0xd46   :  { %v22608_v39 = vpack.c.bf16 %v9516_v14, %v9515_v53  ;;  %v9533_v14 = vld [vmem:[#allocation2 + $0x211] sm:$0xff] }
 0xd4c   :  { %15202 = vmatmul.mubr.bf16.vlgmr.msra.gmra.mrb[64].mxu0 %v22555_v50 }
 0xd4d   :  { %15266 = vmatpush3.bf16.msra.mxu0 %v16770_v54  ;;  %15205 = vmatprep.mubr.bf16.mxu0 %v22560_v57  ;;  %v22591_v54 = vpack.c.bf16 %v9510_v20, %v9509_v31  ;;  %v22624_v31 = vpack.c.bf16 %v9526_v60, %v9525_v51  ;;  %v9540_v51 = vld [vmem:[#allocation2 + $0x261] sm:$0xff] }
 0xd4e   :  { %15267 = vmatprep.subr.bf16.mxu0 %v16771_v27 }
 0xd51   :  { %15268 = vmatpush3.bf16.msra.mxu0 %v16771_v27  ;;  %v9519_v27 = vld [vmem:[#allocation2 + $0x139] sm:$0xff] }
 0xd52   :  { %15269 = vmatprep.subr.bf16.mxu0 %v16772_v23 }
 0xd54   :  { %15206 = vmatmul.mubr.bf16.gmra.mrb[68].mxu0 %v22567_v46 }
 0xd55   :  { %15209 = vmatprep.mubr.bf16.mxu0 %v22572_v9  ;;  %15270 = vmatpush3.bf16.msra.mxu0 %v16772_v23  ;;  %v9520_v23 = vld [vmem:[#allocation2 + $0x141] sm:$0xff] }
 0xd56   :  { %15271 = vmatprep.subr.bf16.mxu0 %v16773_v6  ;;  %v22614_v45 = vpack.c.bf16 %v9520_v23, %v9519_v27  ;;  %v9536_v27 = vld [vmem:[#allocation2 + $0x231] sm:$0xff]  ;;  %v22633_v23 = vpack.c.bf16 %v9534_v56, %v9533_v14  ;;  %v9545_v14 = vld [vmem:[#allocation2 + $0x2a1] sm:$0xff]  ;;  %v9546_v56 = vld [vmem:[#allocation2 + $0x2a9] sm:$0xff] }
 0xd57   :  { %v22635_v34 = vpack.c.bf16 %v9536_v27, %v9535_v10  ;;  %v9547_v10 = vld [vmem:[#allocation2 + $0x2b9] sm:$0xff]  ;;  %v9548_v27 = vld [vmem:[#allocation2 + $0x2c1] sm:$0xff] }
 0xd59   :  { %15272 = vmatpush3.bf16.msra.mxu0 %v16773_v6  ;;  %v9523_v6 = vld [vmem:[#allocation2 + $0x169] sm:$0xff] }
 0xd5a   :  { %15273 = vmatprep.subr.bf16.mxu0 %v16774_v25 }
 0xd5c   :  { %15210 = vmatmul.mubr.bf16.gmra.mrb[72].mxu0 %v22579_v40 }
 0xd5d   :  { %15213 = vmatprep.mubr.bf16.mxu0 %v22584_v21  ;;  %15274 = vmatpush3.bf16.msra.mxu0 %v16774_v25  ;;  %v9524_v25 = vld [vmem:[#allocation2 + $0x171] sm:$0xff] }
 0xd5e   :  { %15275 = vmatprep.subr.bf16.mxu0 %v16775_v28  ;;  %v22620_v18 = vpack.c.bf16 %v9524_v25, %v9523_v6  ;;  %v9538_v6 = vld [vmem:[#allocation2 + $0x249] sm:$0xff]  ;;  %v9539_v25 = vld [vmem:[#allocation2 + $0x259] sm:$0xff] }
 0xd5f   :  { %v22639_v60 = vpack.c.bf16 %v9538_v6, %v9537_v35  ;;  %v22651_v35 = vpack.c.bf16 %v9546_v56, %v9545_v14  ;;  %v22653_v6 = vpack.c.bf16 %v9548_v27, %v9547_v10  ;;  %v9553_v14 = vld [vmem:[#allocation2 + $0x301] sm:$0xff]  ;;  %v9554_v56 = vld [vmem:[#allocation2 + $0x309] sm:$0xff]  ;;  %v9555_v10 = vld [vmem:[#allocation2 + $0x319] sm:$0xff] }
 0xd60   :  { %v9556_v27 = vld [vmem:[#allocation2 + $0x321] sm:$0xff] }
 0xd61   :  { %15276 = vmatpush3.bf16.msra.mxu0 %v16775_v28  ;;  %v9527_v28 = vld [vmem:[#allocation2 + $0x1c9] sm:$0xff]  ;;  %25480 = vst [vmem:[#allocation38_spill] sm:$0xff] %v22651_v35 }
 0xd62   :  { %15277 = vmatprep.subr.bf16.mxu0 %v16776_v42 }
 0xd64   :  { %15214 = vmatmul.mubr.bf16.gmra.mrb[76].mxu0 %v22591_v54 }
 0xd65   :  { %15217 = vmatprep.mubr.bf16.mxu0 %v22596_v58  ;;  %15278 = vmatpush3.bf16.msra.mxu0 %v16776_v42  ;;  %v9528_v42 = vld [vmem:[#allocation2 + $0x1d1] sm:$0xff] }
 0xd66   :  { %15279 = vmatprep.subr.bf16.mxu0 %v16777_v49  ;;  %v9575_v20 = vpack.c.bf16 %v9528_v42, %v9527_v28  ;;  %v22641_v28 = vpack.c.bf16 %v9540_v51, %v9539_v25  ;;  %v9541_v42 = vld [vmem:[#allocation2 + $0x271] sm:$0xff]  ;;  %v9550_v51 = vld [vmem:[#allocation2 + $0x2d9] sm:$0xff] }
 0xd67   :  { %v9549_v25 = vld [vmem:[#allocation2 + $0x2d1] sm:$0xff] }
 0xd69   :  { %15280 = vmatpush3.bf16.msra.mxu0 %v16777_v49  ;;  %v9531_v49 = vld [vmem:[#allocation2 + $0x1f9] sm:$0xff] }
 0xd6a   :  { %15345 = vmatprep.subr.bf16.mxu0 %v22603_v38  ;;  %v22629_v53 = vpack.c.bf16 %v9532_v5, %v9531_v49  ;;  %v22647_v5 = vpack.c.bf16 %v9544_v33, %v9543_v19  ;;  %v22657_v19 = vpack.c.bf16 %v9550_v51, %v9549_v25  ;;  %v9557_v25 = vld [vmem:[#allocation2 + $0x331] sm:$0xff]  ;;  %v9558_v51 = vld [vmem:[#allocation2 + $0x339] sm:$0xff] }
 0xd6c   :  { %15218 = vmatmul.mubr.bf16.gmra.mrb[80].mxu0 %v22605_v1  ;;  %25479 = vst [vmem:[#allocation19_spill] sm:$0xff] %v22647_v5 }
 0xd6d   :  { %15221 = vmatprep.mubr.bf16.mxu0 %v22608_v39 }
 0xd74   :  { %15222 = vmatmul.mubr.bf16.gmra.mrb[84].mxu0 %v22612_v52 }
 0xd75   :  { %15225 = vmatprep.mubr.bf16.mxu0 %v22614_v45 }
 0xd7c   :  { %15226 = vmatmul.mubr.bf16.gmra.mrb[88].mxu0 %v22618_v11 }
 0xd7d   :  { %15229 = vmatprep.mubr.bf16.mxu0 %v22620_v18 }
 0xd84   :  { %15230 = vmatmul.mubr.bf16.gmra.mrb[92].mxu0 %v22624_v31 }
 0xd85   :  { %15233 = vmatprep.mubr.bf16.mxu0 %v9575_v20  ;;  %v9542_v20 = vld [vmem:[#allocation2 + $0x279] sm:$0xff] }
 0xd86   :  { %v22645_v49 = vpack.c.bf16 %v9542_v20, %v9541_v42  ;;  %v9551_v42 = vld [vmem:[#allocation2 + $0x2e9] sm:$0xff]  ;;  %v9552_v20 = vld [vmem:[#allocation2 + $0x2f1] sm:$0xff] }
 0xd87   :  { %v22659_v33 = vpack.c.bf16 %v9552_v20, %v9551_v42  ;;  %v22669_v42 = vpack.c.bf16 %v9558_v51, %v9557_v25  ;;  %v16779_v20 = vld [vmem:[%s24593_s2 + $0x188] sm:$0xff]   ;;  %v10530_v25 = vld [vmem:[#allocation2 + $0x98] sm:$0xff] }
 0xd8c   :  { %15234 = vmatmul.mubr.bf16.gmra.mrb[96].mxu0 %v22627_v4 }
 0xd8d   :  { %15237 = vmatprep.mubr.bf16.mxu0 %v22629_v53 }
 0xd94   :  { %15238 = vmatmul.mubr.bf16.gmra.mrb[100].mxu0 %v22633_v23 }
 0xd95   :  { %15241 = vmatprep.mubr.bf16.mxu0 %v22635_v34 }
 0xd9c   :  { %15242 = vmatmul.mubr.bf16.gmra.mrb[104].mxu0 %v22639_v60 }
 0xd9d   :  { %15245 = vmatprep.mubr.bf16.mxu0 %v22641_v28 }
 0xda4   :  { %15246 = vmatmul.mubr.bf16.gmra.mrb[108].mxu0 %v22645_v49 }
 0xda5   :  { %15249 = vmatprep.mubr.bf16.mxu0 %v22647_v5  ;;  %v22663_v5 = vpack.c.bf16 %v9554_v56, %v9553_v14  ;;  %v16780_v14 = vld [vmem:[%s24593_s2 + $0x190] sm:$0xff]   ;;  %v10527_v56 = vld [vmem:[#allocation2 + $0x78] sm:$0xff] }
 0xdac   :  { %15250 = vmatmul.mubr.bf16.gmra.mrb[112].mxu0 %v22651_v35  ;;  %v22665_v35 = vpack.c.bf16 %v9556_v27, %v9555_v10  ;;  %v10528_v10 = vld [vmem:[#allocation2 + $0x80] sm:$0xff]  ;;  %v10529_v27 = vld [vmem:[#allocation2 + $0x90] sm:$0xff] }
 0xdad   :  { %15253 = vmatprep.mubr.bf16.mxu0 %v22653_v6  ;;  %v10588_v51 = vpack.c.bf16 %v10528_v10, %v10527_v56  ;;  %v10545_v56 = vld [vmem:[#allocation2 + $0x150] sm:$0xff]  ;;  %v10546_v10 = vld [vmem:[#allocation2 + $0x158] sm:$0xff] }
 0xdb4   :  { %15254 = vmatmul.mubr.bf16.gmra.mrb[116].mxu0 %v22657_v19 }
 0xdb5   :  { %15257 = vmatprep.mubr.bf16.mxu0 %v22659_v33 }
 0xdbc   :  { %15258 = vmatmul.mubr.bf16.gmra.mrb[120].mxu0 %v22663_v5 }
 0xdbd   :  { %15261 = vmatprep.mubr.bf16.mxu0 %v22665_v35 }
 0xdc4   :  { %15262 = vmatmul.mubr.bf16.gmra.mrb[124].mxu0 %v22669_v42 }
 0xdc5   :  { %15281 = vmatprep.mubr.bf16.mxu0 %v22376_v15  ;;  %v16781_v15 = vld [vmem:[%s24593_s2 + $0x198] sm:$0xff]  }
 0xdcc   :  { %15282 = vmatmul.mubr.bf16.vlgmr.msra.gmra.mrb[64].mxu0 %v22381_v26  ;;  %v16782_v26 = vld [vmem:[%s24593_s2 + $0x1a0] sm:$0xff]  }
 0xdcd   :  { %15346 = vmatpush3.bf16.msra.mxu0 %v22603_v38  ;;  %15285 = vmatprep.mubr.bf16.mxu0 %v22389_v29  ;;  %v16783_v29 = vld [vmem:[%s24593_s2 + $0x1a8] sm:$0xff]  }
 0xdce   :  { %15347 = vmatprep.subr.bf16.mxu0 %v16779_v20 }
 0xdd1   :  { %15348 = vmatpush3.bf16.msra.mxu0 %v16779_v20  ;;  %v16789_v20 = vld [vmem:[%s24593_s2 + $0x1d8] sm:$0xff]  }
 0xdd2   :  { %15349 = vmatprep.subr.bf16.mxu0 %v16780_v14 }
 0xdd4   :  { %15286 = vmatmul.mubr.bf16.gmra.mrb[68].mxu0 %v22394_v2  ;;  %v16784_v2 = vld [vmem:[%s24593_s2 + $0x1b0] sm:$0xff]  }
 0xdd5   :  { %15289 = vmatprep.mubr.bf16.mxu0 %v22401_v48  ;;  %15350 = vmatpush3.bf16.msra.mxu0 %v16780_v14  ;;  %v16785_v48 = vld [vmem:[%s24593_s2 + $0x1b8] sm:$0xff]   ;;  %v10589_v14 = vpack.c.bf16 %v10530_v25, %v10529_v27  ;;  %v10597_v25 = vpack.c.bf16 %v10546_v10, %v10545_v56  ;;  %v10569_v56 = vld [vmem:[#allocation2 + $0x2a0] sm:$0xff]  ;;  %v10570_v10 = vld [vmem:[#allocation2 + $0x2a8] sm:$0xff] }
 0xdd6   :  { %15351 = vmatprep.subr.bf16.mxu0 %v16781_v15 }
 0xdd9   :  { %15352 = vmatpush3.bf16.msra.mxu0 %v16781_v15  ;;  %v16790_v15 = vld [vmem:[%s24593_s2 + $0x1e0] sm:$0xff]  }
 0xdda   :  { %15353 = vmatprep.subr.bf16.mxu0 %v16782_v26 }
 0xddc   :  { %15290 = vmatmul.mubr.bf16.gmra.mrb[72].mxu0 %v22406_v37  ;;  %v16786_v37 = vld [vmem:[%s24593_s2 + $0x1c0] sm:$0xff]  }
 0xddd   :  { %15293 = vmatprep.mubr.bf16.mxu0 %v22413_v44  ;;  %15354 = vmatpush3.bf16.msra.mxu0 %v16782_v26  ;;  %v10038_v44 = vld [vmem:[#allocation2 + $0x182] sm:$0xff] }
 0xdde   :  { %15355 = vmatprep.subr.bf16.mxu0 %v16783_v29  ;;  %v10531_v26 = vld [vmem:[#allocation2 + $0xa8] sm:$0xff] }
 0xde1   :  { %15356 = vmatpush3.bf16.msra.mxu0 %v16783_v29  ;;  %v10532_v29 = vld [vmem:[#allocation2 + $0xb0] sm:$0xff] }
 0xde2   :  { %15357 = vmatprep.subr.bf16.mxu0 %v16784_v2 }
 0xde4   :  { %15294 = vmatmul.mubr.bf16.gmra.mrb[76].mxu0 %v22418_v62  ;;  %v10039_v62 = vld [vmem:[#allocation2 + $0x18a] sm:$0xff] }
 0xde5   :  { %15297 = vmatprep.mubr.bf16.mxu0 %v22427_v22  ;;  %15358 = vmatpush3.bf16.msra.mxu0 %v16784_v2  ;;  %v22712_v22 = vpack.c.bf16 %v10039_v62, %v10038_v44  ;;  %v10533_v2 = vld [vmem:[#allocation2 + $0xc0] sm:$0xff]  ;;  %v16791_v44 = vld [vmem:[%s24593_s2 + $0x1e8] sm:$0xff]  }
 0xde6   :  { %15359 = vmatprep.subr.bf16.mxu0 %v16785_v48 }
 0xde9   :  { %15360 = vmatpush3.bf16.msra.mxu0 %v16785_v48  ;;  %v10534_v48 = vld [vmem:[#allocation2 + $0xc8] sm:$0xff] }
 0xdea   :  { %15425 = vmatprep.subr.bf16.mxu0 %v16786_v37  ;;  %v10591_v62 = vpack.c.bf16 %v10534_v48, %v10533_v2  ;;  %v10554_v2 = vld [vmem:[#allocation2 + $0x1e8] sm:$0xff] }
 0xdec   :  { %15298 = vmatmul.mubr.bf16.gmra.mrb[80].mxu0 %v22430_v41  ;;  %v25481_v41 = vld [vmem:[#allocation4_spill] sm:$0xff] }
 0xded   :  { %15301 = vmatprep.mubr.bf16.mxu0 %v22434_v3  ;;  %v25482_v3 = vld [vmem:[#allocation24_spill] sm:$0xff] }
 0xdf4   :  { %15302 = vmatmul.mubr.bf16.gmra.mrb[84].mxu0 %v22436_v8  ;;  %v25483_v8 = vld [vmem:[#allocation33_spill] sm:$0xff] }
 0xdf5   :  { %15305 = vmatprep.mubr.bf16.mxu0 %v22440_v16  ;;  %v25484_v16 = vld [vmem:[#allocation42_spill] sm:$0xff] }
 0xdfc   :  { %15306 = vmatmul.mubr.bf16.gmra.mrb[88].mxu0 %v22442_v61  ;;  %v10070_v61 = vld [vmem:[#allocation2 + $0x332] sm:$0xff] }
 0xdfd   :  { %15309 = vmatprep.mubr.bf16.mxu0 %v22446_v59  ;;  %v10071_v59 = vld [vmem:[#allocation2 + $0x33a] sm:$0xff] }
 0xe04   :  { %15310 = vmatmul.mubr.bf16.gmra.mrb[92].mxu0 %v22712_v22 }
 0xe05   :  { %15313 = vmatprep.mubr.bf16.mxu0 %v22449_v0  ;;  %v10521_v0 = vld [vmem:[#allocation2 + $0x30] sm:$0xff] }
 0xe0c   :  { %15314 = vmatmul.mubr.bf16.gmra.mrb[96].mxu0 %v22451_v30  ;;  %v10522_v30 = vld [vmem:[#allocation2 + $0x38] sm:$0xff] }
 0xe0d   :  { %15317 = vmatprep.mubr.bf16.mxu0 %v22455_v43  ;;  %v22730_v43 = vpack.c.bf16 %v10071_v59, %v10070_v61  ;;  %v10538_v61 = vld [vmem:[#allocation2 + $0xf8] sm:$0xff] }
 0xe14   :  { %15318 = vmatmul.mubr.bf16.gmra.mrb[100].mxu0 %v22457_v12  ;;  %v10585_v12 = vpack.c.bf16 %v10522_v30, %v10521_v0  ;;  %v16793_v0 = vld [vmem:[%s24593_s2 + $0x1f8] sm:$0xff]  }
 0xe15   :  { %15321 = vmatprep.mubr.bf16.mxu0 %v22461_v24  ;;  %v10523_v24 = vld [vmem:[#allocation2 + $0x48] sm:$0xff] }
 0xe1c   :  { %15322 = vmatmul.mubr.bf16.gmra.mrb[104].mxu0 %v25481_v41  ;;  %v16792_v41 = vld [vmem:[%s24593_s2 + $0x1f0] sm:$0xff]  }
 0xe1d   :  { %15325 = vmatprep.mubr.bf16.mxu0 %v25482_v3  ;;  %v10535_v3 = vld [vmem:[#allocation2 + $0xd8] sm:$0xff] }
 0xe24   :  { %15326 = vmatmul.mubr.bf16.gmra.mrb[108].mxu0 %v25483_v8  ;;  %v10536_v8 = vld [vmem:[#allocation2 + $0xe0] sm:$0xff] }
 0xe25   :  { %15329 = vmatprep.mubr.bf16.mxu0 %v25484_v16  ;;  %v10537_v16 = vld [vmem:[#allocation2 + $0xf0] sm:$0xff]  ;;  %v10592_v59 = vpack.c.bf16 %v10536_v8, %v10535_v3 }
 0xe26   :  { %v10593_v30 = vpack.c.bf16 %v10538_v61, %v10537_v16  ;;  %v10559_v16 = vld [vmem:[#allocation2 + $0x228] sm:$0xff]  ;;  %v10560_v61 = vld [vmem:[#allocation2 + $0x230] sm:$0xff] }
 0xe2c   :  { %15330 = vmatmul.mubr.bf16.gmra.mrb[112].mxu0 %v22475_v32  ;;  %v10525_v32 = vld [vmem:[#allocation2 + $0x60] sm:$0xff] }
 0xe2d   :  { %15333 = vmatprep.mubr.bf16.mxu0 %v22479_v63  ;;  %v10524_v63 = vld [vmem:[#allocation2 + $0x50] sm:$0xff] }
 0xe2e   :  { %v10586_v38 = vpack.c.bf16 %v10524_v63, %v10523_v24  ;;  %v10539_v24 = vld [vmem:[#allocation2 + $0x108] sm:$0xff]  ;;  %v10540_v63 = vld [vmem:[#allocation2 + $0x110] sm:$0xff] }
 0xe34   :  { %15334 = vmatmul.mubr.bf16.gmra.mrb[116].mxu0 %v22481_v13  ;;  %v10526_v13 = vld [vmem:[#allocation2 + $0x68] sm:$0xff] }
 0xe35   :  { %15337 = vmatprep.mubr.bf16.mxu0 %v22485_v47  ;;  %v16787_v47 = vld [vmem:[%s24593_s2 + $0x1c8] sm:$0xff]  }
 0xe3c   :  { %15338 = vmatmul.mubr.bf16.gmra.mrb[120].mxu0 %v22487_v17  ;;  %v10587_v17 = vpack.c.bf16 %v10526_v13, %v10525_v32  ;;  %v10541_v32 = vld [vmem:[#allocation2 + $0x120] sm:$0xff]  ;;  %v10542_v13 = vld [vmem:[#allocation2 + $0x128] sm:$0xff] }
 0xe3d   :  { %15341 = vmatprep.mubr.bf16.mxu0 %v22491_v55  ;;  %v16788_v55 = vld [vmem:[%s24593_s2 + $0x1d0] sm:$0xff]  }
 0xe44   :  { %15342 = vmatmul.mubr.bf16.gmra.mrb[124].mxu0 %v22730_v43 }
 0xe45   :  { %15361 = vmatprep.mubr.bf16.mxu0 %v10585_v12  ;;  %v22757_v12 = vld [vmem:[%s24593_s2 + $0x200] sm:$0xff]  }
 0xe4c   :  { %15362 = vmatmul.mubr.bf16.vlgmr.msra.gmra.mrb[64].mxu0 %v10586_v38  ;;  %v10594_v38 = vpack.c.bf16 %v10540_v63, %v10539_v24  ;;  %v10563_v24 = vld [vmem:[#allocation2 + $0x258] sm:$0xff]  ;;  %v10564_v63 = vld [vmem:[#allocation2 + $0x260] sm:$0xff] }
 0xe4d   :  { %15426 = vmatpush3.bf16.msra.mxu0 %v16786_v37  ;;  %15365 = vmatprep.mubr.bf16.mxu0 %v10587_v17  ;;  %v10590_v37 = vpack.c.bf16 %v10532_v29, %v10531_v26  ;;  %v10543_v17 = vld [vmem:[#allocation2 + $0x138] sm:$0xff]  ;;  %v10553_v29 = vld [vmem:[#allocation2 + $0x1e0] sm:$0xff] }
 0xe4e   :  { %15427 = vmatprep.subr.bf16.mxu0 %v16787_v47  ;;  %v10601_v48 = vpack.c.bf16 %v10554_v2, %v10553_v29 }
 0xe51   :  { %15428 = vmatpush3.bf16.msra.mxu0 %v16787_v47  ;;  %v10595_v47 = vpack.c.bf16 %v10542_v13, %v10541_v32  ;;  %v10565_v32 = vld [vmem:[#allocation2 + $0x270] sm:$0xff]  ;;  %v10566_v13 = vld [vmem:[#allocation2 + $0x278] sm:$0xff] }
 0xe52   :  { %15429 = vmatprep.subr.bf16.mxu0 %v16788_v55 }
 0xe54   :  { %15366 = vmatmul.mubr.bf16.gmra.mrb[68].mxu0 %v10588_v51  ;;  %v10547_v51 = vld [vmem:[#allocation2 + $0x168] sm:$0xff] }
 0xe55   :  { %15369 = vmatprep.mubr.bf16.mxu0 %v10589_v14  ;;  %15430 = vmatpush3.bf16.msra.mxu0 %v16788_v55  ;;  %v10544_v55 = vld [vmem:[#allocation2 + $0x140] sm:$0xff] }
 0xe56   :  { %15431 = vmatprep.subr.bf16.mxu0 %v16789_v20  ;;  %v10596_v27 = vpack.c.bf16 %v10544_v55, %v10543_v17  ;;  %v10567_v17 = vld [vmem:[#allocation2 + $0x288] sm:$0xff]  ;;  %v10568_v55 = vld [vmem:[#allocation2 + $0x290] sm:$0xff] }
 0xe59   :  { %15432 = vmatpush3.bf16.msra.mxu0 %v16789_v20  ;;  %v10548_v20 = vld [vmem:[#allocation2 + $0x170] sm:$0xff] }
 0xe5a   :  { %15433 = vmatprep.subr.bf16.mxu0 %v16790_v15  ;;  %v10598_v14 = vpack.c.bf16 %v10548_v20, %v10547_v51  ;;  %v10571_v51 = vld [vmem:[#allocation2 + $0x2b8] sm:$0xff]  ;;  %v10572_v20 = vld [vmem:[#allocation2 + $0x2c0] sm:$0xff] }
 0xe5b   :  { %v10610_v29 = vpack.c.bf16 %v10572_v20, %v10571_v51  ;;  %v11569_v20 = vld [vmem:[#allocation2 + $0x13a] sm:$0xff] }
 0xe5c   :  { %15370 = vmatmul.mubr.bf16.gmra.mrb[72].mxu0 %v10590_v37  ;;  %v10555_v37 = vld [vmem:[#allocation2 + $0x1f8] sm:$0xff] }
 0xe5d   :  { %15373 = vmatprep.mubr.bf16.mxu0 %v10591_v62  ;;  %15434 = vmatpush3.bf16.msra.mxu0 %v16790_v15  ;;  %v16813_v15 = vld [vmem:[#allocation2] sm:$0xff]  ;;  %v10557_v62 = vld [vmem:[#allocation2 + $0x210] sm:$0xff] }
 0xe5e   :  { %15435 = vmatprep.subr.bf16.mxu0 %v16791_v44  ;;  %v10600_v26 = vpack.c.bf16 %v16813_v15, %v16813_v15  ;;  %v10574_v15 = vld [vmem:[#allocation2 + $0x2d8] sm:$0xff] }
 0xe61   :  { %15436 = vmatpush3.bf16.msra.mxu0 %v16791_v44  ;;  %v10556_v44 = vld [vmem:[#allocation2 + $0x200] sm:$0xff] }
 0xe62   :  { %15437 = vmatprep.subr.bf16.mxu0 %v16792_v41  ;;  %v10602_v3 = vpack.c.bf16 %v10556_v44, %v10555_v37  ;;  %v10576_v37 = vld [vmem:[#allocation2 + $0x2f0] sm:$0xff]  ;;  %v10577_v44 = vld [vmem:[#allocation2 + $0x300] sm:$0xff] }
 0xe64   :  { %15374 = vmatmul.mubr.bf16.gmra.mrb[76].mxu0 %v10592_v59  ;;  %v10561_v59 = vld [vmem:[#allocation2 + $0x240] sm:$0xff] }
 0xe65   :  { %15377 = vmatprep.mubr.bf16.mxu0 %v10593_v30  ;;  %15438 = vmatpush3.bf16.msra.mxu0 %v16792_v41  ;;  %v10558_v41 = vld [vmem:[#allocation2 + $0x218] sm:$0xff] }
 0xe66   :  { %15439 = vmatprep.subr.bf16.mxu0 %v16793_v0  ;;  %v10603_v8 = vpack.c.bf16 %v10558_v41, %v10557_v62  ;;  %v10578_v62 = vld [vmem:[#allocation2 + $0x308] sm:$0xff] }
 0xe69   :  { %15440 = vmatpush3.bf16.msra.mxu0 %v16793_v0  ;;  %v10562_v0 = vld [vmem:[#allocation2 + $0x248] sm:$0xff] }
 0xe6a   :  { %15505 = vmatprep.subr.bf16.mxu0 %v22757_v12  ;;  %v10605_v30 = vpack.c.bf16 %v10562_v0, %v10561_v59  ;;  %v16795_v59 = vld [vmem:[%s24593_s2 + $0x208] sm:$0xff]   ;;  %v16796_v0 = vld [vmem:[%s24593_s2 + $0x210] sm:$0xff]  }
 0xe6c   :  { %15378 = vmatmul.mubr.bf16.gmra.mrb[80].mxu0 %v10594_v38  ;;  %v10606_v38 = vpack.c.bf16 %v10564_v63, %v10563_v24  ;;  %v11561_v63 = vld [vmem:[#allocation2 + $0xda] sm:$0xff] }
 0xe6d   :  { %15381 = vmatprep.mubr.bf16.mxu0 %v10595_v47  ;;  %v10607_v47 = vpack.c.bf16 %v10566_v13, %v10565_v32  ;;  %v11562_v32 = vld [vmem:[#allocation2 + $0xe2] sm:$0xff]  ;;  %v11563_v13 = vld [vmem:[#allocation2 + $0xf2] sm:$0xff] }
 0xe74   :  { %15382 = vmatmul.mubr.bf16.gmra.mrb[84].mxu0 %v10596_v27  ;;  %v10608_v27 = vpack.c.bf16 %v10568_v55, %v10567_v17  ;;  %v11565_v55 = vld [vmem:[#allocation2 + $0x10a] sm:$0xff] }
 0xe75   :  { %15385 = vmatprep.mubr.bf16.mxu0 %v10597_v25  ;;  %v10609_v25 = vpack.c.bf16 %v10570_v10, %v10569_v56  ;;  %v11566_v56 = vld [vmem:[#allocation2 + $0x112] sm:$0xff]  ;;  %v11567_v10 = vld [vmem:[#allocation2 + $0x122] sm:$0xff] }
 0xe7c   :  { %15386 = vmatmul.mubr.bf16.gmra.mrb[88].mxu0 %v10598_v14  ;;  %v10573_v14 = vld [vmem:[#allocation2 + $0x2d0] sm:$0xff] }
 0xe7d   :  { %15389 = vmatprep.mubr.bf16.mxu0 %v22534_v36  ;;  %v10604_v36 = vpack.c.bf16 %v10560_v61, %v10559_v16  ;;  %v10611_v2 = vpack.c.bf16 %v10574_v15, %v10573_v14  ;;  %v10580_v16 = vld [vmem:[#allocation2 + $0x320] sm:$0xff]  ;;  %v11571_v15 = vld [vmem:[#allocation2 + $0x152] sm:$0xff] }
 0xe7e   :  { %v11570_v14 = vld [vmem:[#allocation2 + $0x142] sm:$0xff] }
 0xe84   :  { %15390 = vmatmul.mubr.bf16.gmra.mrb[92].mxu0 %v10600_v26 }
 0xe85   :  { %15393 = vmatprep.mubr.bf16.mxu0 %v10601_v48  ;;  %v10575_v48 = vld [vmem:[#allocation2 + $0x2e8] sm:$0xff] }
 0xe86   :  { %v10612_v41 = vpack.c.bf16 %v10576_v37, %v10575_v48  ;;  %v11573_v37 = vld [vmem:[#allocation2 + $0x16a] sm:$0xff] }
 0xe8c   :  { %15394 = vmatmul.mubr.bf16.gmra.mrb[96].mxu0 %v10602_v3  ;;  %v10613_v3 = vpack.c.bf16 %v10578_v62, %v10577_v44  ;;  %v11574_v44 = vld [vmem:[#allocation2 + $0x172] sm:$0xff] }
 0xe8d   :  { %15397 = vmatprep.mubr.bf16.mxu0 %v10603_v8  ;;  %v10579_v8 = vld [vmem:[#allocation2 + $0x318] sm:$0xff]  ;;  %v11624_v62 = vpack.c.bf16 %v11574_v44, %v11573_v37 }
 0xe8e   :  { %v10614_v61 = vpack.c.bf16 %v10580_v16, %v10579_v8  ;;  %v11579_v16 = vld [vmem:[#allocation2 + $0x1e2] sm:$0xff] }
 0xe94   :  { %15398 = vmatmul.mubr.bf16.gmra.mrb[100].mxu0 %v10604_v36  ;;  %v11560_v36 = vld [vmem:[#allocation2 + $0xca] sm:$0xff] }
 0xe95   :  { %15401 = vmatprep.mubr.bf16.mxu0 %v10605_v30 }
 0xe9c   :  { %15402 = vmatmul.mubr.bf16.gmra.mrb[104].mxu0 %v10606_v38  ;;  %v11564_v38 = vld [vmem:[#allocation2 + $0xfa] sm:$0xff] }
 0xe9d   :  { %15405 = vmatprep.mubr.bf16.mxu0 %v10607_v47  ;;  %v11618_v47 = vpack.c.bf16 %v11562_v32, %v11561_v63  ;;  %v11619_v17 = vpack.c.bf16 %v11564_v38, %v11563_v13  ;;  %v11605_v63 = vld [vmem:[#allocation2 + $0x31a] sm:$0xff]  ;;  %v11606_v32 = vld [vmem:[#allocation2 + $0x322] sm:$0xff]  ;;  %v11609_v38 = vld [vmem:[#allocation2 + $0x34a] sm:$0xff] }
 0xe9e   :  { %v11640_v13 = vpack.c.bf16 %v11606_v32, %v11605_v63 }
 0xea4   :  { %15406 = vmatmul.mubr.bf16.gmra.mrb[108].mxu0 %v10608_v27  ;;  %v11568_v27 = vld [vmem:[#allocation2 + $0x12a] sm:$0xff] }
 0xea5   :  { %15409 = vmatprep.mubr.bf16.mxu0 %v10609_v25  ;;  %v11620_v25 = vpack.c.bf16 %v11566_v56, %v11565_v55  ;;  %v11621_v51 = vpack.c.bf16 %v11568_v27, %v11567_v10 }
 0xeac   :  { %15410 = vmatmul.mubr.bf16.gmra.mrb[112].mxu0 %v10610_v29  ;;  %v11572_v29 = vld [vmem:[#allocation2 + $0x15a] sm:$0xff] }
 0xead   :  { %15413 = vmatprep.mubr.bf16.mxu0 %v10611_v2  ;;  %v11622_v2 = vpack.c.bf16 %v11570_v14, %v11569_v20  ;;  %v11623_v48 = vpack.c.bf16 %v11572_v29, %v11571_v15 }
 0xeb4   :  { %15414 = vmatmul.mubr.bf16.gmra.mrb[116].mxu0 %v10612_v41  ;;  %v11577_v41 = vld [vmem:[#allocation2 + $0x19a] sm:$0xff] }
 0xeb5   :  { %15417 = vmatprep.mubr.bf16.mxu0 %v10613_v3  ;;  %v11578_v3 = vld [vmem:[#allocation2 + $0x1a2] sm:$0xff] }
 0xeb6   :  { %v11626_v8 = vpack.c.bf16 %v11578_v3, %v11577_v41 }
 0xebc   :  { %15418 = vmatmul.mubr.bf16.gmra.mrb[120].mxu0 %v10614_v61  ;;  %v11580_v61 = vld [vmem:[#allocation2 + $0x1ea] sm:$0xff] }
 0xebd   :  { %15421 = vmatprep.mubr.bf16.mxu0 %v22552_v7  ;;  %v16797_v7 = vld [vmem:[%s24593_s2 + $0x218] sm:$0xff]  }
 0xec4   :  { %15422 = vmatmul.mubr.bf16.gmra.mrb[124].mxu0 %v10600_v26  ;;  %v11559_v26 = vld [vmem:[#allocation2 + $0xc2] sm:$0xff] }
 0xec5   :  { %15441 = vmatprep.mubr.bf16.mxu0 %v22555_v50  ;;  %v16798_v50 = vld [vmem:[%s24593_s2 + $0x220] sm:$0xff]   ;;  %v11617_v24 = vpack.c.bf16 %v11560_v36, %v11559_v26  ;;  %v11604_v36 = vld [vmem:[#allocation2 + $0x30a] sm:$0xff] }
 0xec6   :  { %v11603_v26 = vld [vmem:[#allocation2 + $0x302] sm:$0xff] }
 0xecc   :  { %15442 = vmatmul.mubr.bf16.vlgmr.msra.gmra.mrb[64].mxu0 %v22560_v57  ;;  %v16799_v57 = vld [vmem:[%s24593_s2 + $0x228] sm:$0xff]  }
 0xecd   :  { %15506 = vmatpush3.bf16.msra.mxu0 %v22757_v12  ;;  %15445 = vmatprep.mubr.bf16.mxu0 %v22567_v46  ;;  %v16800_v46 = vld [vmem:[%s24593_s2 + $0x230] sm:$0xff]  }
 0xece   :  { %15507 = vmatprep.subr.bf16.mxu0 %v16795_v59  ;;  %v11558_v12 = vld [vmem:[#allocation2 + $0xb2] sm:$0xff] }
 0xed1   :  { %15508 = vmatpush3.bf16.msra.mxu0 %v16795_v59  ;;  %v11627_v59 = vpack.c.bf16 %v11580_v61, %v11579_v16 }
 0xed2   :  { %15509 = vmatprep.subr.bf16.mxu0 %v16796_v0 }
 0xed4   :  { %15446 = vmatmul.mubr.bf16.gmra.mrb[68].mxu0 %v22572_v9  ;;  %v16801_v9 = vld [vmem:[%s24593_s2 + $0x238] sm:$0xff]  }
 0xed5   :  { %15449 = vmatprep.mubr.bf16.mxu0 %v22579_v40  ;;  %15510 = vmatpush3.bf16.msra.mxu0 %v16796_v0  ;;  %v11064_v40 = vld [vmem:[#allocation2 + $0x199] sm:$0xff] }
 0xed6   :  { %15511 = vmatprep.subr.bf16.mxu0 %v16797_v7  ;;  %v11581_v0 = vld [vmem:[#allocation2 + $0x1fa] sm:$0xff] }
 0xed9   :  { %15512 = vmatpush3.bf16.msra.mxu0 %v16797_v7  ;;  %v11582_v7 = vld [vmem:[#allocation2 + $0x202] sm:$0xff] }
 0xeda   :  { %15513 = vmatprep.subr.bf16.mxu0 %v16798_v50 }
 0xedc   :  { %15450 = vmatmul.mubr.bf16.gmra.mrb[72].mxu0 %v22584_v21  ;;  %v11065_v21 = vld [vmem:[#allocation2 + $0x1a1] sm:$0xff] }
 0xedd   :  { %15453 = vmatprep.mubr.bf16.mxu0 %v22591_v54  ;;  %15514 = vmatpush3.bf16.msra.mxu0 %v16798_v50  ;;  %v11113_v54 = vpack.c.bf16 %v11065_v21, %v11064_v40  ;;  %v11583_v50 = vld [vmem:[#allocation2 + $0x212] sm:$0xff]  ;;  %v11585_v40 = vld [vmem:[#allocation2 + $0x22a] sm:$0xff] }
 0xede   :  { %15515 = vmatprep.subr.bf16.mxu0 %v16799_v57  ;;  %v11586_v21 = vld [vmem:[#allocation2 + $0x232] sm:$0xff] }
 0xee1   :  { %15516 = vmatpush3.bf16.msra.mxu0 %v16799_v57  ;;  %v11584_v57 = vld [vmem:[#allocation2 + $0x21a] sm:$0xff] }
 0xee2   :  { %15517 = vmatprep.subr.bf16.mxu0 %v16800_v46 }
 0xee4   :  { %15454 = vmatmul.mubr.bf16.gmra.mrb[76].mxu0 %v22596_v58  ;;  %v25485_v58 = vld [vmem:[#allocation19_spill] sm:$0xff] }
 0xee5   :  { %15457 = vmatprep.mubr.bf16.mxu0 %v22605_v1  ;;  %15518 = vmatpush3.bf16.msra.mxu0 %v16800_v46  ;;  %v25486_v1 = vld [vmem:[#allocation38_spill] sm:$0xff]  ;;  %v11628_v46 = vpack.c.bf16 %v11582_v7, %v11581_v0 }
 0xee6   :  { %15519 = vmatprep.subr.bf16.mxu0 %v16801_v9 }
 0xee9   :  { %15520 = vmatpush3.bf16.msra.mxu0 %v16801_v9  ;;  %v11629_v9 = vpack.c.bf16 %v11584_v57, %v11583_v50 }
 0xeec   :  { %15458 = vmatmul.mubr.bf16.gmra.mrb[80].mxu0 %v22608_v39  ;;  %v11096_v39 = vld [vmem:[#allocation2 + $0x349] sm:$0xff] }
 0xeed   :  { %15461 = vmatprep.mubr.bf16.mxu0 %v22612_v52  ;;  %v11097_v52 = vld [vmem:[#allocation2 + $0x351] sm:$0xff] }
 0xef4   :  { %15462 = vmatmul.mubr.bf16.gmra.mrb[84].mxu0 %v22614_v45  ;;  %v11129_v45 = vpack.c.bf16 %v11097_v52, %v11096_v39  ;;  %v11589_v39 = vld [vmem:[#allocation2 + $0x25a] sm:$0xff]  ;;  %v11590_v52 = vld [vmem:[#allocation2 + $0x262] sm:$0xff] }
 0xef5   :  { %15465 = vmatprep.mubr.bf16.mxu0 %v22618_v11  ;;  %v11547_v11 = vld [vmem:[#allocation2 + $0x32] sm:$0xff] }
 0xefc   :  { %15466 = vmatmul.mubr.bf16.gmra.mrb[88].mxu0 %v22620_v18  ;;  %v11548_v18 = vld [vmem:[#allocation2 + $0x3a] sm:$0xff] }
 0xefd   :  { %15469 = vmatprep.mubr.bf16.mxu0 %v22624_v31  ;;  %v11611_v31 = vpack.c.bf16 %v11548_v18, %v11547_v11  ;;  %v11592_v11 = vld [vmem:[#allocation2 + $0x27a] sm:$0xff]  ;;  %v11632_v18 = vpack.c.bf16 %v11590_v52, %v11589_v39 }
 0xf04   :  { %15470 = vmatmul.mubr.bf16.gmra.mrb[92].mxu0 %v11113_v54  ;;  %v11587_v54 = vld [vmem:[#allocation2 + $0x242] sm:$0xff] }
 0xf05   :  { %15473 = vmatprep.mubr.bf16.mxu0 %v22627_v4  ;;  %v11549_v4 = vld [vmem:[#allocation2 + $0x4a] sm:$0xff] }
 0xf0c   :  { %15474 = vmatmul.mubr.bf16.gmra.mrb[96].mxu0 %v22629_v53  ;;  %v11550_v53 = vld [vmem:[#allocation2 + $0x52] sm:$0xff] }
 0xf0d   :  { %15477 = vmatprep.mubr.bf16.mxu0 %v22633_v23  ;;  %v11551_v23 = vld [vmem:[#allocation2 + $0x62] sm:$0xff] }
 0xf14   :  { %15478 = vmatmul.mubr.bf16.gmra.mrb[100].mxu0 %v22635_v34  ;;  %v11552_v34 = vld [vmem:[#allocation2 + $0x6a] sm:$0xff] }
 0xf15   :  { %15481 = vmatprep.mubr.bf16.mxu0 %v22639_v60  ;;  %v11612_v60 = vpack.c.bf16 %v11550_v53, %v11549_v4  ;;  %v11593_v4 = vld [vmem:[#allocation2 + $0x28a] sm:$0xff]  ;;  %v11594_v53 = vld [vmem:[#allocation2 + $0x292] sm:$0xff] }
 0xf1c   :  { %15482 = vmatmul.mubr.bf16.gmra.mrb[104].mxu0 %v22641_v28  ;;  %v11613_v28 = vpack.c.bf16 %v11552_v34, %v11551_v23  ;;  %v11595_v23 = vld [vmem:[#allocation2 + $0x2a2] sm:$0xff]  ;;  %v11596_v34 = vld [vmem:[#allocation2 + $0x2aa] sm:$0xff] }
 0xf1d   :  { %15485 = vmatprep.mubr.bf16.mxu0 %v22645_v49  ;;  %v11553_v49 = vld [vmem:[#allocation2 + $0x7a] sm:$0xff] }
 0xf24   :  { %15486 = vmatmul.mubr.bf16.gmra.mrb[108].mxu0 %v25485_v58  ;;  %v11630_v58 = vpack.c.bf16 %v11586_v21, %v11585_v40 }
 0xf25   :  { %15489 = vmatprep.mubr.bf16.mxu0 %v25486_v1 }
 0xf2c   :  { %15490 = vmatmul.mubr.bf16.gmra.mrb[112].mxu0 %v22653_v6  ;;  %v11556_v6 = vld [vmem:[#allocation2 + $0x9a] sm:$0xff] }
 0xf2d   :  { %15493 = vmatprep.mubr.bf16.mxu0 %v22657_v19 }
 0xf34   :  { %15494 = vmatmul.mubr.bf16.gmra.mrb[116].mxu0 %v22659_v33 }
 0xf35   :  { %15497 = vmatprep.mubr.bf16.mxu0 %v22663_v5  ;;  %v11554_v5 = vld [vmem:[#allocation2 + $0x82] sm:$0xff] }
 0xf36   :  { %v11614_v19 = vpack.c.bf16 %v11554_v5, %v11553_v49  ;;  %v11597_v49 = vld [vmem:[#allocation2 + $0x2ba] sm:$0xff]  ;;  %v11598_v5 = vld [vmem:[#allocation2 + $0x2c2] sm:$0xff] }
 0xf3c   :  { %15498 = vmatmul.mubr.bf16.gmra.mrb[120].mxu0 %v22665_v35  ;;  %v11555_v35 = vld [vmem:[#allocation2 + $0x92] sm:$0xff] }
 0xf3d   :  { %15501 = vmatprep.mubr.bf16.mxu0 %v22669_v42  ;;  %v11615_v33 = vpack.c.bf16 %v11556_v6, %v11555_v35  ;;  %v11557_v42 = vld [vmem:[#allocation2 + $0xaa] sm:$0xff]  ;;  %v11599_v35 = vld [vmem:[#allocation2 + $0x2d2] sm:$0xff]  ;;  %v11600_v6 = vld [vmem:[#allocation2 + $0x2da] sm:$0xff] }
 0xf3e   :  { %v11616_v30 = vpack.c.bf16 %v11558_v12, %v11557_v42  ;;  %v11601_v42 = vld [vmem:[#allocation2 + $0x2ea] sm:$0xff]  ;;  %v11602_v12 = vld [vmem:[#allocation2 + $0x2f2] sm:$0xff] }
 0xf44   :  { %15502 = vmatmul.mubr.bf16.gmra.mrb[124].mxu0 %v11129_v45  ;;  %v11591_v45 = vld [vmem:[#allocation2 + $0x272] sm:$0xff] }
 0xf45   :  { %15521 = vmatprep.mubr.bf16.mxu0 %v11611_v31  ;;  %v11633_v31 = vpack.c.bf16 %v11592_v11, %v11591_v45 }
 0xf4c   :  { %15522 = vmatmul.mubr.bf16.vlgmr.msra.gmra.mrb[64].mxu0 %v11612_v60  ;;  %v11634_v60 = vpack.c.bf16 %v11594_v53, %v11593_v4 }
 0xf4d   :  { %15525 = vmatprep.mubr.bf16.mxu0 %v11613_v28  ;;  %v11635_v28 = vpack.c.bf16 %v11596_v34, %v11595_v23 }
 0xf54   :  { %15526 = vmatmul.mubr.bf16.gmra.mrb[68].mxu0 %v11614_v19  ;;  %v11636_v19 = vpack.c.bf16 %v11598_v5, %v11597_v49 }
 0xf55   :  { %15529 = vmatprep.mubr.bf16.mxu0 %v11615_v33  ;;  %v11637_v33 = vpack.c.bf16 %v11600_v6, %v11599_v35 }
 0xf5c   :  { %15530 = vmatmul.mubr.bf16.gmra.mrb[72].mxu0 %v11616_v30  ;;  %v11638_v30 = vpack.c.bf16 %v11602_v12, %v11601_v42 }
 0xf5d   :  { %15533 = vmatprep.mubr.bf16.mxu0 %v11617_v24  ;;  %v11639_v24 = vpack.c.bf16 %v11604_v36, %v11603_v26 }
 0xf64   :  { %15534 = vmatmul.mubr.bf16.gmra.mrb[76].mxu0 %v11618_v47  ;;  %v11610_v47 = vld [vmem:[#allocation2 + $0x352] sm:$0xff] }
 0xf65   :  { %15537 = vmatprep.mubr.bf16.mxu0 %v11619_v17  ;;  %v11642_v17 = vpack.c.bf16 %v11610_v47, %v11609_v38 }
 0xf6c   :  { %15538 = vmatmul.mubr.bf16.gmra.mrb[80].mxu0 %v11620_v25 }
 0xf6d   :  { %15541 = vmatprep.mubr.bf16.mxu0 %v11621_v51 }
 0xf74   :  { %15542 = vmatmul.mubr.bf16.gmra.mrb[84].mxu0 %v11622_v2 }
 0xf75   :  { %15545 = vmatprep.mubr.bf16.mxu0 %v11623_v48 }
 0xf7c   :  { %15546 = vmatmul.mubr.bf16.gmra.mrb[88].mxu0 %v11624_v62 }
 0xf7d   :  { %15549 = vmatprep.mubr.bf16.mxu0 %v22712_v22  ;;  %v11588_v22 = vld [vmem:[#allocation2 + $0x24a] sm:$0xff] }
 0xf7e   :  { %v11631_v1 = vpack.c.bf16 %v11588_v22, %v11587_v54 }
 0xf84   :  { %15550 = vmatmul.mubr.bf16.gmra.mrb[92].mxu0 %v11626_v8 }
 0xf85   :  { %15553 = vmatprep.mubr.bf16.mxu0 %v11627_v59 }
 0xf8c   :  { %15554 = vmatmul.mubr.bf16.gmra.mrb[96].mxu0 %v11628_v46 }
 0xf8d   :  { %15557 = vmatprep.mubr.bf16.mxu0 %v11629_v9 }
 0xf94   :  { %15558 = vmatmul.mubr.bf16.gmra.mrb[100].mxu0 %v11630_v58 }
 0xf95   :  { %15561 = vmatprep.mubr.bf16.mxu0 %v11631_v1 }
 0xf9c   :  { %15562 = vmatmul.mubr.bf16.gmra.mrb[104].mxu0 %v11632_v18 }
 0xf9d   :  { %15565 = vmatprep.mubr.bf16.mxu0 %v11633_v31 }
 0xfa4   :  { %15566 = vmatmul.mubr.bf16.gmra.mrb[108].mxu0 %v11634_v60 }
 0xfa5   :  { %15569 = vmatprep.mubr.bf16.mxu0 %v11635_v28 }
 0xfac   :  { %15570 = vmatmul.mubr.bf16.gmra.mrb[112].mxu0 %v11636_v19 }
 0xfad   :  { %15573 = vmatprep.mubr.bf16.mxu0 %v11637_v33 }
 0xfb4   :  { %15574 = vmatmul.mubr.bf16.gmra.mrb[116].mxu0 %v11638_v30 }
 0xfb5   :  { %15577 = vmatprep.mubr.bf16.mxu0 %v11639_v24 }
 0xfbc   :  { %15578 = vmatmul.mubr.bf16.gmra.mrb[120].mxu0 %v11640_v13 }
 0xfbd   :  { %15581 = vmatprep.mubr.bf16.mxu0 %v22730_v43 }
 0xfc4   :  { %15582 = vmatmul.mubr.bf16.gmra.mrb[124].mxu0 %v11642_v17 }
0x101f   :  { %v22816_v55 = vpop.f32.mrb[64].mxu0 }
0x1020   :  { %v22818_v56 = vpop.f32.mrb[65].mxu0 }
0x1021   :  { %v22820_v10 = vpop.f32.mrb[66].mxu0 }
0x1022   :  { %v22822_v27 = vpop.f32.mrb[67].mxu0 }
0x1023   :  { %v12062_v25 = vadd.f32 %v22822_v27, %v22818_v56 }
0x1025   :  { %v12063_v51 = vadd.f32 %v22816_v55, %v12062_v25 }
0x1027   :  { %v22827_v20 = vpop.f32.mrb[68].mxu0  ;;  %v12064_v43 = vadd.f32 %v22820_v10, %v12063_v51 }
0x1028   :  { %v22830_v14 = vpop.f32.mrb[69].mxu0 }
0x1029   :  { %v12065_v15 = vadd.f32 %v12064_v43, %v22830_v14  ;;  %v22833_v29 = vpop.f32.mrb[70].mxu0 }
0x102a   :  { %v22835_v2 = vpop.f32.mrb[71].mxu0 }
0x102b   :  { %v12066_v48 = vadd.f32 %v12065_v15, %v22835_v2 }
0x102d   :  { %v12067_v37 = vadd.f32 %v22827_v20, %v12066_v48 }
0x102f   :  { %v22839_v44 = vpop.f32.mrb[72].mxu0  ;;  %v12068_v62 = vadd.f32 %v22833_v29, %v12067_v37 }
0x1030   :  { %v22842_v41 = vpop.f32.mrb[73].mxu0 }
0x1031   :  { %v12069_v3 = vadd.f32 %v12068_v62, %v22842_v41  ;;  %v22845_v8 = vpop.f32.mrb[74].mxu0 }
0x1032   :  { %v22847_v16 = vpop.f32.mrb[75].mxu0 }
0x1033   :  { %v12070_v61 = vadd.f32 %v12069_v3, %v22847_v16 }
0x1035   :  { %v12071_v59 = vadd.f32 %v22839_v44, %v12070_v61 }
0x1037   :  { %v22851_v0 = vpop.f32.mrb[76].mxu0  ;;  %v12072_v7 = vadd.f32 %v22845_v8, %v12071_v59 }
0x1038   :  { %v22854_v50 = vpop.f32.mrb[77].mxu0 }
0x1039   :  { %v12073_v57 = vadd.f32 %v12072_v7, %v22854_v50  ;;  %v22857_v46 = vpop.f32.mrb[78].mxu0 }
0x103a   :  { %v22859_v9 = vpop.f32.mrb[79].mxu0 }
0x103b   :  { %v12074_v40 = vadd.f32 %v12073_v57, %v22859_v9 }
0x103d   :  { %v12075_v21 = vadd.f32 %v22851_v0, %v12074_v40 }
0x103f   :  { %v22863_v54 = vpop.f32.mrb[80].mxu0  ;;  %v12076_v22 = vadd.f32 %v22857_v46, %v12075_v21 }
0x1040   :  { %v22866_v58 = vpop.f32.mrb[81].mxu0 }
0x1041   :  { %v12077_v1 = vadd.f32 %v12076_v22, %v22866_v58  ;;  %v22869_v39 = vpop.f32.mrb[82].mxu0 }
0x1042   :  { %v22871_v52 = vpop.f32.mrb[83].mxu0 }
0x1043   :  { %v12078_v45 = vadd.f32 %v12077_v1, %v22871_v52 }
0x1045   :  { %v12079_v11 = vadd.f32 %v22863_v54, %v12078_v45 }
0x1047   :  { %v22875_v18 = vpop.f32.mrb[84].mxu0  ;;  %v12080_v31 = vadd.f32 %v22869_v39, %v12079_v11 }
0x1048   :  { %v22878_v4 = vpop.f32.mrb[85].mxu0 }
0x1049   :  { %v12081_v53 = vadd.f32 %v12080_v31, %v22878_v4  ;;  %v22881_v23 = vpop.f32.mrb[86].mxu0 }
0x104a   :  { %v22883_v34 = vpop.f32.mrb[87].mxu0 }
0x104b   :  { %v12082_v60 = vadd.f32 %v12081_v53, %v22883_v34 }
0x104d   :  { %v12083_v28 = vadd.f32 %v22875_v18, %v12082_v60 }
0x104f   :  { %v22887_v49 = vpop.f32.mrb[88].mxu0  ;;  %v12084_v5 = vadd.f32 %v22881_v23, %v12083_v28 }
0x1050   :  { %v22890_v35 = vpop.f32.mrb[89].mxu0 }
0x1051   :  { %v12085_v6 = vadd.f32 %v12084_v5, %v22890_v35  ;;  %v22893_v19 = vpop.f32.mrb[90].mxu0 }
0x1052   :  { %v22895_v33 = vpop.f32.mrb[91].mxu0 }
0x1053   :  { %v12086_v42 = vadd.f32 %v12085_v6, %v22895_v33 }
0x1055   :  { %v12087_v12 = vadd.f32 %v22887_v49, %v12086_v42 }
0x1057   :  { %v22899_v26 = vpop.f32.mrb[92].mxu0  ;;  %v12088_v36 = vadd.f32 %v22893_v19, %v12087_v12 }
0x1058   :  { %v22902_v30 = vpop.f32.mrb[93].mxu0 }
0x1059   :  { %v12089_v24 = vadd.f32 %v12088_v36, %v22902_v30  ;;  %v22905_v63 = vpop.f32.mrb[94].mxu0 }
0x105a   :  { %v22907_v32 = vpop.f32.mrb[95].mxu0 }
0x105b   :  { %v12090_v13 = vadd.f32 %v12089_v24, %v22907_v32 }
0x105d   :  { %v12091_v38 = vadd.f32 %v22899_v26, %v12090_v13 }
0x105f   :  { %v22911_v47 = vpop.f32.mrb[96].mxu0  ;;  %v12092_v17 = vadd.f32 %v22905_v63, %v12091_v38 }
0x1060   :  { %v22914_v25 = vpop.f32.mrb[97].mxu0 }
0x1061   :  { %v12093_v51 = vadd.f32 %v12092_v17, %v22914_v25  ;;  %v22917_v43 = vpop.f32.mrb[98].mxu0 }
0x1062   :  { %v22919_v15 = vpop.f32.mrb[99].mxu0 }
0x1063   :  { %v12094_v48 = vadd.f32 %v12093_v51, %v22919_v15 }
0x1065   :  { %v12095_v37 = vadd.f32 %v22911_v47, %v12094_v48 }
0x1067   :  { %v22923_v62 = vpop.f32.mrb[100].mxu0  ;;  %v12096_v3 = vadd.f32 %v22917_v43, %v12095_v37 }
0x1068   :  { %v22926_v61 = vpop.f32.mrb[101].mxu0 }
0x1069   :  { %v12097_v59 = vadd.f32 %v12096_v3, %v22926_v61  ;;  %v22929_v7 = vpop.f32.mrb[102].mxu0 }
0x106a   :  { %v22931_v57 = vpop.f32.mrb[103].mxu0 }
0x106b   :  { %v12098_v40 = vadd.f32 %v12097_v59, %v22931_v57 }
0x106d   :  { %v12099_v21 = vadd.f32 %v22923_v62, %v12098_v40 }
0x106f   :  { %v22935_v22 = vpop.f32.mrb[104].mxu0  ;;  %v12100_v1 = vadd.f32 %v22929_v7, %v12099_v21 }
0x1070   :  { %v22938_v45 = vpop.f32.mrb[105].mxu0 }
0x1071   :  { %v12101_v11 = vadd.f32 %v12100_v1, %v22938_v45  ;;  %v22941_v31 = vpop.f32.mrb[106].mxu0 }
0x1072   :  { %v22943_v53 = vpop.f32.mrb[107].mxu0 }
0x1073   :  { %v12102_v60 = vadd.f32 %v12101_v11, %v22943_v53 }
0x1075   :  { %v12103_v28 = vadd.f32 %v22935_v22, %v12102_v60 }
0x1077   :  { %v22947_v5 = vpop.f32.mrb[108].mxu0  ;;  %v12104_v6 = vadd.f32 %v22941_v31, %v12103_v28 }
0x1078   :  { %v22950_v42 = vpop.f32.mrb[109].mxu0 }
0x1079   :  { %v12105_v12 = vadd.f32 %v12104_v6, %v22950_v42  ;;  %v22953_v36 = vpop.f32.mrb[110].mxu0 }
0x107a   :  { %v22955_v24 = vpop.f32.mrb[111].mxu0 }
0x107b   :  { %v12106_v13 = vadd.f32 %v12105_v12, %v22955_v24 }
0x107d   :  { %v12107_v38 = vadd.f32 %v22947_v5, %v12106_v13 }
0x107f   :  { %v22959_v17 = vpop.f32.mrb[112].mxu0  ;;  %v12108_v51 = vadd.f32 %v22953_v36, %v12107_v38 }
0x1080   :  { %25487 = vst [vmem:[#allocation26_spill] sm:$0xff] %v22959_v17  ;;  %v22962_v48 = vpop.f32.mrb[113].mxu0 }
0x1081   :  { %25488 = vst [vmem:[#allocation8_spill] sm:$0xff] %v22962_v48  ;;  %v12109_v37 = vadd.f32 %v12108_v51, %v22962_v48  ;;  %v22965_v3 = vpop.f32.mrb[114].mxu0 }
0x1082   :  { %25489 = vst [vmem:[#allocation10_spill] sm:$0xff] %v22965_v3  ;;  %v22967_v59 = vpop.f32.mrb[115].mxu0 }
0x1083   :  { %25490 = vst [vmem:[#allocation9_spill] sm:$0xff] %v22967_v59  ;;  %v12110_v40 = vadd.f32 %v12109_v37, %v22967_v59 }
0x1085   :  { %v12111_v21 = vadd.f32 %v22959_v17, %v12110_v40 }
0x1087   :  { %v22971_v1 = vpop.f32.mrb[116].mxu0  ;;  %v12112_v11 = vadd.f32 %v22965_v3, %v12111_v21 }
0x1088   :  { %25491 = vst [vmem:[#allocation12_spill] sm:$0xff] %v22971_v1  ;;  %v22974_v60 = vpop.f32.mrb[117].mxu0 }
0x1089   :  { %25492 = vst [vmem:[#allocation23_spill] sm:$0xff] %v22974_v60  ;;  %v12113_v28 = vadd.f32 %v12112_v11, %v22974_v60  ;;  %v22977_v6 = vpop.f32.mrb[118].mxu0 }
0x108a   :  { %25493 = vst [vmem:[#allocation53_spill] sm:$0xff] %v22977_v6  ;;  %v22979_v12 = vpop.f32.mrb[119].mxu0 }
0x108b   :  { %25494 = vst [vmem:[#allocation37_spill] sm:$0xff] %v22979_v12  ;;  %v12114_v13 = vadd.f32 %v12113_v28, %v22979_v12 }
0x108d   :  { %v12115_v38 = vadd.f32 %v22971_v1, %v12114_v13 }
0x108f   :  { %v22983_v51 = vpop.f32.mrb[120].mxu0  ;;  %v12116_v37 = vadd.f32 %v22977_v6, %v12115_v38 }
0x1090   :  { %25495 = vst [vmem:[#allocation16_spill] sm:$0xff] %v22983_v51  ;;  %v22986_v40 = vpop.f32.mrb[121].mxu0 }
0x1091   :  { %25496 = vst [vmem:[#allocation25_spill] sm:$0xff] %v22986_v40  ;;  %v12117_v21 = vadd.f32 %v12116_v37, %v22986_v40  ;;  %v22989_v3 = vpop.f32.mrb[122].mxu0 }
0x1092   :  { %25497 = vst [vmem:[#allocation17_spill] sm:$0xff] %v22989_v3  ;;  %v22991_v17 = vpop.f32.mrb[123].mxu0 }
0x1093   :  { %25498 = vst [vmem:[#allocation28_spill] sm:$0xff] %v22991_v17  ;;  %v12118_v11 = vadd.f32 %v12117_v21, %v22991_v17 }
0x1095   :  { %v12119_v60 = vadd.f32 %v22983_v51, %v12118_v11 }
0x1097   :  { %v22995_v59 = vpop.f32.mrb[124].mxu0  ;;  %v12120_v28 = vadd.f32 %v22989_v3, %v12119_v60 }
0x1098   :  { %v22998_v13 = vpop.f32.mrb[125].mxu0 }
0x1099   :  { %25499 = vst [vmem:[#allocation20_spill] sm:$0xff] %v22998_v13  ;;  %v12121_v38 = vadd.f32 %v12120_v28, %v22998_v13  ;;  %v23001_v6 = vpop.f32.mrb[126].mxu0 }
0x109a   :  { %v23003_v1 = vpop.f32.mrb[127].mxu0 }
0x109b   :  { %v12122_v37 = vadd.f32 %v12121_v38, %v23003_v1 }
0x109d   :  { %v12123_v40 = vadd.f32 %v22995_v59, %v12122_v37  ;;  %v25513_v37 = vld [vmem:[#allocation10_spill] sm:$0xff] }
0x109f   :  { %v12124_v21 = vadd.f32 %v23001_v6, %v12123_v40  ;;  %v25511_v40 = vld [vmem:[#allocation26_spill] sm:$0xff] }
0x10a1   :  { %v12125_v17 = vrot.slane %v12124_v21, 4 }
0x10a3   :  { %v12126_v11 = vadd.f32 %v12125_v17, %v12124_v21  ;;  %v25515_v21 = vld [vmem:[#allocation23_spill] sm:$0xff] }
0x10a5   :  { %v12127_v51 = vrot.slane %v12126_v11, 2 }
0x10a7   :  { %v12128_v12 = vadd.f32 %v12127_v51, %v12126_v11  ;;  %v25509_v51 = vld [vmem:[#allocation9_spill] sm:$0xff] }
0x10a8   :  { %v25517_v11 = vld [vmem:[#allocation37_spill] sm:$0xff] }
0x10a9   :  { %v12129_v48 = vrot.slane %v12128_v12, 1 }
0x10ab   :  { %v12130_v60 = vadd.f32 %v12129_v48, %v12128_v12  ;;  %v25507_v12 = vld [vmem:[#allocation8_spill] sm:$0xff] }
0x10ad   :  { %v23008_v3 = vmul.f32 0.001953125, %v12130_v60 }
0x10af   :  { %v23012_v28 = vsub.f32 %v22818_v56, %v23008_v3  ;;  %v23016_v13 = vsub.f32 %v22822_v27, %v23008_v3  ;;  %v23020_v38 = vsub.f32 %v22816_v55, %v23008_v3  ;;  %v23024_v17 = vsub.f32 %v22820_v10, %v23008_v3 }
0x10b0   :  { %v23028_v48 = vsub.f32 %v22830_v14, %v23008_v3  ;;  %v23032_v56 = vsub.f32 %v22835_v2, %v23008_v3  ;;  %v23036_v27 = vsub.f32 %v22827_v20, %v23008_v3  ;;  %v23040_v55 = vsub.f32 %v22833_v29, %v23008_v3 }
0x10b1   :  { %25500 = vst [vmem:[#allocation11_spill] sm:$0xff] %v23012_v28  ;;  %25501 = vst [vmem:[#allocation22_spill] sm:$0xff] %v23016_v13  ;;  %v23044_v10 = vsub.f32 %v22842_v41, %v23008_v3  ;;  %v23048_v14 = vsub.f32 %v22847_v16, %v23008_v3  ;;  %v23052_v2 = vsub.f32 %v22839_v44, %v23008_v3 }
0x10b2   :  { %25502 = vst [vmem:[#allocation29_spill] sm:$0xff] %v23020_v38  ;;  %v23056_v20 = vsub.f32 %v22845_v8, %v23008_v3  ;;  %v23060_v29 = vsub.f32 %v22854_v50, %v23008_v3  ;;  %v23064_v41 = vsub.f32 %v22859_v9, %v23008_v3  ;;  %v23068_v16 = vsub.f32 %v22851_v0, %v23008_v3 }
0x10b3   :  { %v23072_v44 = vsub.f32 %v22857_v46, %v23008_v3  ;;  %v23076_v8 = vsub.f32 %v22866_v58, %v23008_v3  ;;  %v23080_v50 = vsub.f32 %v22871_v52, %v23008_v3  ;;  %v23084_v9 = vsub.f32 %v22863_v54, %v23008_v3 }
0x10b4   :  { %v23088_v0 = vsub.f32 %v22869_v39, %v23008_v3  ;;  %v23092_v46 = vsub.f32 %v22878_v4, %v23008_v3  ;;  %v23096_v58 = vsub.f32 %v22883_v34, %v23008_v3  ;;  %v23100_v52 = vsub.f32 %v22875_v18, %v23008_v3 }
0x10b5   :  { %v23104_v54 = vsub.f32 %v22881_v23, %v23008_v3  ;;  %v23108_v39 = vsub.f32 %v22890_v35, %v23008_v3  ;;  %v23112_v4 = vsub.f32 %v22895_v33, %v23008_v3  ;;  %v23116_v34 = vsub.f32 %v22887_v49, %v23008_v3 }
0x10b6   :  { %v23120_v18 = vsub.f32 %v22893_v19, %v23008_v3  ;;  %v23124_v23 = vsub.f32 %v22902_v30, %v23008_v3  ;;  %v23128_v35 = vsub.f32 %v22907_v32, %v23008_v3  ;;  %v23132_v33 = vsub.f32 %v22899_v26, %v23008_v3 }
0x10b7   :  { %v23136_v49 = vsub.f32 %v22905_v63, %v23008_v3  ;;  %v23140_v19 = vsub.f32 %v22914_v25, %v23008_v3  ;;  %v23144_v30 = vsub.f32 %v22919_v15, %v23008_v3  ;;  %v23148_v32 = vsub.f32 %v22911_v47, %v23008_v3 }
0x10b8   :  { %v23152_v26 = vsub.f32 %v22917_v43, %v23008_v3  ;;  %v23156_v63 = vsub.f32 %v22926_v61, %v23008_v3  ;;  %v23160_v25 = vsub.f32 %v22931_v57, %v23008_v3  ;;  %v23164_v15 = vsub.f32 %v22923_v62, %v23008_v3 }
0x10b9   :  { %v23168_v47 = vsub.f32 %v22929_v7, %v23008_v3  ;;  %v23172_v43 = vsub.f32 %v22938_v45, %v23008_v3  ;;  %v23176_v61 = vsub.f32 %v22943_v53, %v23008_v3  ;;  %v23180_v57 = vsub.f32 %v22935_v22, %v23008_v3 }
0x10ba   :  { %v23184_v62 = vsub.f32 %v22941_v31, %v23008_v3  ;;  %v23188_v7 = vsub.f32 %v22950_v42, %v23008_v3  ;;  %v23192_v45 = vsub.f32 %v22955_v24, %v23008_v3  ;;  %v23196_v53 = vsub.f32 %v22947_v5, %v23008_v3 }
0x10bb   :  { %v23200_v22 = vsub.f32 %v22953_v36, %v23008_v3  ;;  %v23204_v31 = vsub.f32 %v25507_v12, %v23008_v3  ;;  %v23208_v42 = vsub.f32 %v25509_v51, %v23008_v3  ;;  %v23212_v24 = vsub.f32 %v25511_v40, %v23008_v3  ;;  %v25519_v12 = vld [vmem:[#allocation12_spill] sm:$0xff] }
0x10bc   :  { %25503 = vst [vmem:[#allocation39_spill] sm:$0xff] %v23188_v7  ;;  %25504 = vst [vmem:[#allocation31_spill] sm:$0xff] %v23192_v45  ;;  %v23216_v5 = vsub.f32 %v25513_v37, %v23008_v3  ;;  %v23220_v36 = vsub.f32 %v25515_v21, %v23008_v3  ;;  %v23224_v60 = vsub.f32 %v25517_v11, %v23008_v3 }
0x10bd   :  { %25505 = vst [vmem:[#allocation3_spill] sm:$0xff] %v23196_v53  ;;  %25506 = vst [vmem:[#allocation47_spill] sm:$0xff] %v23200_v22  ;;  %v23228_v51 = vsub.f32 %v25519_v12, %v23008_v3 }
0x10be   :  { %25508 = vst [vmem:[#allocation41_spill] sm:$0xff] %v23204_v31  ;;  %25510 = vst [vmem:[#allocation32_spill] sm:$0xff] %v23208_v42  ;;  %v25521_v42 = vld [vmem:[#allocation53_spill] sm:$0xff] }
0x10bf   :  { %25512 = vst [vmem:[#allocation15_spill] sm:$0xff] %v23212_v24  ;;  %25514 = vst [vmem:[#allocation45_spill] sm:$0xff] %v23216_v5  ;;  %v23232_v40 = vsub.f32 %v25521_v42, %v23008_v3  ;;  %v25523_v24 = vld [vmem:[#allocation25_spill] sm:$0xff]  ;;  %v25525_v5 = vld [vmem:[#allocation28_spill] sm:$0xff] }
0x10c0   :  { %25516 = vst [vmem:[#allocation6_spill] sm:$0xff] %v23220_v36  ;;  %25518 = vst [vmem:[#allocation44_spill] sm:$0xff] %v23224_v60  ;;  %v23236_v37 = vsub.f32 %v25523_v24, %v23008_v3  ;;  %v23240_v21 = vsub.f32 %v25525_v5, %v23008_v3  ;;  %v25527_v36 = vld [vmem:[#allocation16_spill] sm:$0xff]  ;;  %v25529_v60 = vld [vmem:[#allocation17_spill] sm:$0xff]  ;;  %v23256_v24 = vsub.f32 %v23003_v1, %v23008_v3 }
0x10c1   :  { %25520 = vst [vmem:[#allocation49_spill] sm:$0xff] %v23228_v51  ;;  %25522 = vst [vmem:[#allocation34_spill] sm:$0xff] %v23232_v40  ;;  %v23244_v11 = vsub.f32 %v25527_v36, %v23008_v3  ;;  %v23248_v12 = vsub.f32 %v25529_v60, %v23008_v3  ;;  %v25531_v51 = vld [vmem:[#allocation20_spill] sm:$0xff]  ;;  %v23260_v5 = vsub.f32 %v22995_v59, %v23008_v3 }
0x10c2   :  { %25524 = vst [vmem:[#allocation48_spill] sm:$0xff] %v23236_v37  ;;  %25526 = vst [vmem:[#allocation35_spill] sm:$0xff] %v23240_v21  ;;  %v23252_v42 = vsub.f32 %v25531_v51, %v23008_v3  ;;  %v23264_v36 = vsub.f32 %v23001_v6, %v23008_v3  ;;  %v12196_v60 = vmul.f32 %v23012_v28, %v23012_v28 }
0x10c3   :  { %25528 = vst [vmem:[#allocation21_spill] sm:$0xff] %v23244_v11  ;;  %25530 = vst [vmem:[#allocation27_spill] sm:$0xff] %v23248_v12  ;;  %v12197_v12 = vmul.f32 %v23016_v13, %v23016_v13  ;;  %v12198_v51 = vmul.f32 %v23020_v38, %v23020_v38  ;;  %v12199_v1 = vmul.f32 %v23024_v17, %v23024_v17 }
0x10c4   :  { %25532 = vst [vmem:[#allocation40_spill] sm:$0xff] %v23252_v42  ;;  %25533 = vst [vmem:[#allocation46_spill] sm:$0xff] %v23256_v24  ;;  %v12200_v59 = vmul.f32 %v23028_v48, %v23028_v48  ;;  %v12201_v3 = vmul.f32 %v23032_v56, %v23032_v56  ;;  %v12202_v28 = vmul.f32 %v23036_v27, %v23036_v27 }
0x10c5   :  { %25534 = vst [vmem:[#allocation50_spill] sm:$0xff] %v23260_v5  ;;  %v12260_v42 = vadd.f32 %v12197_v12, %v12196_v60  ;;  %v12203_v38 = vmul.f32 %v23040_v55, %v23040_v55  ;;  %v12204_v60 = vmul.f32 %v23044_v10, %v23044_v10 }
0x10c7   :  { %v12261_v24 = vadd.f32 %v12260_v42, %v12198_v51  ;;  %v12205_v51 = vmul.f32 %v23048_v14, %v23048_v14 }
0x10c9   :  { %v12262_v5 = vadd.f32 %v12261_v24, %v12199_v1  ;;  %v12206_v1 = vmul.f32 %v23052_v2, %v23052_v2 }
0x10cb   :  { %v12263_v6 = vadd.f32 %v12262_v5, %v12200_v59  ;;  %v12207_v59 = vmul.f32 %v23056_v20, %v23056_v20 }
0x10cd   :  { %v12264_v13 = vadd.f32 %v12263_v6, %v12201_v3  ;;  %v12208_v6 = vmul.f32 %v23060_v29, %v23060_v29 }
0x10cf   :  { %v12265_v12 = vadd.f32 %v12264_v13, %v12202_v28  ;;  %v12209_v28 = vmul.f32 %v23064_v41, %v23064_v41 }
0x10d1   :  { %v12266_v42 = vadd.f32 %v12265_v12, %v12203_v38  ;;  %v12210_v12 = vmul.f32 %v23068_v16, %v23068_v16 }
0x10d3   :  { %v12267_v24 = vadd.f32 %v12266_v42, %v12204_v60  ;;  %v12211_v42 = vmul.f32 %v23072_v44, %v23072_v44 }
0x10d5   :  { %v12268_v5 = vadd.f32 %v12267_v24, %v12205_v51  ;;  %v12212_v24 = vmul.f32 %v23076_v8, %v23076_v8 }
0x10d7   :  { %v12269_v3 = vadd.f32 %v12268_v5, %v12206_v1  ;;  %v12213_v5 = vmul.f32 %v23080_v50, %v23080_v50 }
0x10d9   :  { %v12270_v13 = vadd.f32 %v12269_v3, %v12207_v59  ;;  %v12214_v3 = vmul.f32 %v23084_v9, %v23084_v9 }
0x10db   :  { %v12271_v38 = vadd.f32 %v12270_v13, %v12208_v6  ;;  %v12215_v13 = vmul.f32 %v23088_v0, %v23088_v0 }
0x10dd   :  { %v12272_v60 = vadd.f32 %v12271_v38, %v12209_v28  ;;  %v12216_v38 = vmul.f32 %v23092_v46, %v23092_v46 }
0x10df   :  { %v12273_v51 = vadd.f32 %v12272_v60, %v12210_v12  ;;  %v12217_v60 = vmul.f32 %v23096_v58, %v23096_v58 }
0x10e1   :  { %v12274_v1 = vadd.f32 %v12273_v51, %v12211_v42  ;;  %v12218_v51 = vmul.f32 %v23100_v52, %v23100_v52 }
0x10e3   :  { %v12275_v59 = vadd.f32 %v12274_v1, %v12212_v24  ;;  %v12219_v1 = vmul.f32 %v23104_v54, %v23104_v54 }
0x10e5   :  { %v12276_v6 = vadd.f32 %v12275_v59, %v12213_v5  ;;  %v12220_v59 = vmul.f32 %v23108_v39, %v23108_v39 }
0x10e7   :  { %v12277_v28 = vadd.f32 %v12276_v6, %v12214_v3  ;;  %v12221_v6 = vmul.f32 %v23112_v4, %v23112_v4 }
0x10e9   :  { %v12278_v12 = vadd.f32 %v12277_v28, %v12215_v13  ;;  %v12222_v28 = vmul.f32 %v23116_v34, %v23116_v34 }
0x10eb   :  { %v12279_v42 = vadd.f32 %v12278_v12, %v12216_v38  ;;  %v12223_v12 = vmul.f32 %v23120_v18, %v23120_v18 }
0x10ed   :  { %v12280_v24 = vadd.f32 %v12279_v42, %v12217_v60  ;;  %v12224_v42 = vmul.f32 %v23124_v23, %v23124_v23 }
0x10ef   :  { %v12281_v5 = vadd.f32 %v12280_v24, %v12218_v51  ;;  %v12225_v24 = vmul.f32 %v23128_v35, %v23128_v35 }
0x10f1   :  { %v12282_v3 = vadd.f32 %v12281_v5, %v12219_v1  ;;  %v12226_v5 = vmul.f32 %v23132_v33, %v23132_v33 }
0x10f3   :  { %v12283_v13 = vadd.f32 %v12282_v3, %v12220_v59  ;;  %v12227_v3 = vmul.f32 %v23136_v49, %v23136_v49 }
0x10f5   :  { %v12284_v38 = vadd.f32 %v12283_v13, %v12221_v6  ;;  %v12228_v13 = vmul.f32 %v23140_v19, %v23140_v19 }
0x10f7   :  { %v12285_v60 = vadd.f32 %v12284_v38, %v12222_v28  ;;  %v12229_v38 = vmul.f32 %v23144_v30, %v23144_v30 }
0x10f9   :  { %v12286_v51 = vadd.f32 %v12285_v60, %v12223_v12  ;;  %v12230_v60 = vmul.f32 %v23148_v32, %v23148_v32 }
0x10fb   :  { %v12287_v1 = vadd.f32 %v12286_v51, %v12224_v42  ;;  %v12231_v51 = vmul.f32 %v23152_v26, %v23152_v26 }
0x10fd   :  { %v12288_v59 = vadd.f32 %v12287_v1, %v12225_v24  ;;  %v12232_v1 = vmul.f32 %v23156_v63, %v23156_v63 }
0x10ff   :  { %v12289_v6 = vadd.f32 %v12288_v59, %v12226_v5  ;;  %v12233_v59 = vmul.f32 %v23160_v25, %v23160_v25 }
0x1101   :  { %v12290_v28 = vadd.f32 %v12289_v6, %v12227_v3  ;;  %v12234_v6 = vmul.f32 %v23164_v15, %v23164_v15 }
0x1103   :  { %v12291_v12 = vadd.f32 %v12290_v28, %v12228_v13  ;;  %v12235_v28 = vmul.f32 %v23168_v47, %v23168_v47 }
0x1105   :  { %v12292_v42 = vadd.f32 %v12291_v12, %v12229_v38  ;;  %v12236_v12 = vmul.f32 %v23172_v43, %v23172_v43 }
0x1107   :  { %v12293_v24 = vadd.f32 %v12292_v42, %v12230_v60  ;;  %v12237_v42 = vmul.f32 %v23176_v61, %v23176_v61 }
0x1109   :  { %v12294_v5 = vadd.f32 %v12293_v24, %v12231_v51  ;;  %v12238_v24 = vmul.f32 %v23180_v57, %v23180_v57 }
0x110b   :  { %v12295_v3 = vadd.f32 %v12294_v5, %v12232_v1  ;;  %v12239_v5 = vmul.f32 %v23184_v62, %v23184_v62 }
0x110d   :  { %v12296_v13 = vadd.f32 %v12295_v3, %v12233_v59  ;;  %v12240_v3 = vmul.f32 %v23188_v7, %v23188_v7 }
0x110f   :  { %v12297_v38 = vadd.f32 %v12296_v13, %v12234_v6  ;;  %v12241_v13 = vmul.f32 %v23192_v45, %v23192_v45 }
0x1111   :  { %v12298_v60 = vadd.f32 %v12297_v38, %v12235_v28  ;;  %v12242_v38 = vmul.f32 %v23196_v53, %v23196_v53 }
0x1113   :  { %v12299_v51 = vadd.f32 %v12298_v60, %v12236_v12  ;;  %v12243_v60 = vmul.f32 %v23200_v22, %v23200_v22 }
0x1115   :  { %v12300_v1 = vadd.f32 %v12299_v51, %v12237_v42  ;;  %v12244_v51 = vmul.f32 %v23204_v31, %v23204_v31 }
0x1117   :  { %v12301_v59 = vadd.f32 %v12300_v1, %v12238_v24  ;;  %v25535_v1 = vld [vmem:[#allocation32_spill] sm:$0xff] }
0x1118   :  { %v12245_v7 = vmul.f32 %v25535_v1, %v25535_v1 }
0x1119   :  { %v12302_v6 = vadd.f32 %v12301_v59, %v12239_v5  ;;  %v25536_v59 = vld [vmem:[#allocation15_spill] sm:$0xff] }
0x111a   :  { %v12246_v45 = vmul.f32 %v25536_v59, %v25536_v59 }
0x111b   :  { %v12303_v28 = vadd.f32 %v12302_v6, %v12240_v3  ;;  %v25537_v6 = vld [vmem:[#allocation45_spill] sm:$0xff] }
0x111c   :  { %v12247_v53 = vmul.f32 %v25537_v6, %v25537_v6 }
0x111d   :  { %v12304_v12 = vadd.f32 %v12303_v28, %v12241_v13  ;;  %v25538_v28 = vld [vmem:[#allocation6_spill] sm:$0xff] }
0x111e   :  { %v12248_v22 = vmul.f32 %v25538_v28, %v25538_v28 }
0x111f   :  { %v12305_v42 = vadd.f32 %v12304_v12, %v12242_v38  ;;  %v25539_v12 = vld [vmem:[#allocation44_spill] sm:$0xff] }
0x1120   :  { %v12249_v31 = vmul.f32 %v25539_v12, %v25539_v12 }
0x1121   :  { %v12306_v24 = vadd.f32 %v12305_v42, %v12243_v60  ;;  %v25540_v42 = vld [vmem:[#allocation49_spill] sm:$0xff] }
0x1122   :  { %v12250_v1 = vmul.f32 %v25540_v42, %v25540_v42 }
0x1123   :  { %v12307_v5 = vadd.f32 %v12306_v24, %v12244_v51  ;;  %v12251_v24 = vmul.f32 %v23232_v40, %v23232_v40 }
0x1125   :  { %v12308_v3 = vadd.f32 %v12307_v5, %v12245_v7  ;;  %v12252_v5 = vmul.f32 %v23236_v37, %v23236_v37 }
0x1127   :  { %v12309_v13 = vadd.f32 %v12308_v3, %v12246_v45  ;;  %v12253_v3 = vmul.f32 %v23240_v21, %v23240_v21 }
0x1129   :  { %v12310_v38 = vadd.f32 %v12309_v13, %v12247_v53  ;;  %v12254_v13 = vmul.f32 %v23244_v11, %v23244_v11 }
0x112b   :  { %v12311_v60 = vadd.f32 %v12310_v38, %v12248_v22  ;;  %v25541_v38 = vld [vmem:[#allocation27_spill] sm:$0xff] }
0x112c   :  { %v12255_v42 = vmul.f32 %v25541_v38, %v25541_v38 }
0x112d   :  { %v12312_v51 = vadd.f32 %v12311_v60, %v12249_v31  ;;  %v25542_v60 = vld [vmem:[#allocation40_spill] sm:$0xff] }
0x112e   :  { %v12256_v40 = vmul.f32 %v25542_v60, %v25542_v60 }
0x112f   :  { %v12313_v7 = vadd.f32 %v12312_v51, %v12250_v1  ;;  %v25543_v51 = vld [vmem:[#allocation46_spill] sm:$0xff] }
0x1130   :  { %v12257_v37 = vmul.f32 %v25543_v51, %v25543_v51 }
0x1131   :  { %v12314_v45 = vadd.f32 %v12313_v7, %v12251_v24  ;;  %v25544_v7 = vld [vmem:[#allocation50_spill] sm:$0xff] }
0x1132   :  { %v12258_v21 = vmul.f32 %v25544_v7, %v25544_v7 }
0x1133   :  { %v12315_v53 = vadd.f32 %v12314_v45, %v12252_v5  ;;  %v12259_v45 = vmul.f32 %v23264_v36, %v23264_v36 }
0x1135   :  { %v12316_v22 = vadd.f32 %v12315_v53, %v12253_v3 }
0x1137   :  { %v12317_v31 = vadd.f32 %v12316_v22, %v12254_v13 }
0x1139   :  { %v12318_v1 = vadd.f32 %v12317_v31, %v12255_v42 }
0x113b   :  { %v12319_v24 = vadd.f32 %v12318_v1, %v12256_v40  ;;  %v12060_v40 = vld [vmem:[%s24596_s5] sm:$0x1]  ;;  %v25545_v1 = vld [vmem:[#allocation13_spill] sm:$0xff] }
0x113d   :  { %v12320_v5 = vadd.f32 %v12319_v24, %v12257_v37 }
0x113f   :  { %v12321_v3 = vadd.f32 %v12320_v5, %v12258_v21  ;;  %v25546_v21 = vld [vmem:[#allocation11_spill] sm:$0xff] }
0x1141   :  { %v12322_v53 = vadd.f32 %v12321_v3, %v12259_v45 }
0x1143   :  { %v12323_v11 = vrot.slane %v12322_v53, 4 }
0x1145   :  { %v12324_v38 = vadd.f32 %v12323_v11, %v12322_v53  ;;  %v25547_v11 = vld [vmem:[#allocation22_spill] sm:$0xff] }
0x1147   :  { %v12325_v13 = vrot.slane %v12324_v38, 2 }
0x1149   :  { %v12326_v22 = vadd.f32 %v12325_v13, %v12324_v38 }
0x114b   :  { %v12327_v12 = vrot.slane %v12326_v22, 1 }
0x114d   :  { %v12328_v60 = vadd.f32 %v12327_v12, %v12326_v22  ;;  %v25548_v12 = vld [vmem:[#allocation29_spill] sm:$0xff]  ;;  %v25549_v22 = vld [vmem:[#allocation39_spill] sm:$0xff] }
0x114f   :  { %v12329_v42 = vmul.f32 0.001953125, %v12328_v60 }
0x1151   :  { %v12330_v31 = vadd.f32 1e-05, %v12329_v42  ;;  %v25550_v42 = vld [vmem:[#allocation31_spill] sm:$0xff] }
0x1153   :  { %16808 = vrsqrt.f32 %v12330_v31  ;;  %v25551_v31 = vld [vmem:[#allocation3_spill] sm:$0xff] }
0x115d   :  { %v16809_v51 = vpop.eup %16808 }
0x115e   :  { %v12332_v37 = vmul.f32 %v16809_v51, %v12060_v40  ;;  %v25552_v40 = vld [vmem:[#allocation47_spill] sm:$0xff] }
0x1160   :  { %v23398_v24 = vrot.slane %v12332_v37, %v25545_v1  ;;  %v25553_v37 = vld [vmem:[#allocation41_spill] sm:$0xff]  ;;  %v25554_v1 = vld [vmem:[#allocation32_spill] sm:$0xff] }
0x1162   :  { %v23402_v5 = vmul.f32 %v23398_v24, %v25546_v21  ;;  %v23406_v38 = vmul.f32 %v23398_v24, %v25547_v11  ;;  %v23410_v60 = vmul.f32 %v23398_v24, %v25548_v12  ;;  %v23414_v45 = vmul.f32 %v23398_v24, %v23024_v17  ;;  %v23607_v12 = vld [vmem:[%s24597_s6] ss:$0 sm:$0xff] }
0x1163   :  { %v23418_v51 = vmul.f32 %v23398_v24, %v23028_v48  ;;  %v23422_v3 = vmul.f32 %v23398_v24, %v23032_v56  ;;  %v23426_v53 = vmul.f32 %v23398_v24, %v23036_v27  ;;  %v23430_v13 = vmul.f32 %v23398_v24, %v23040_v55 }
0x1164   :  { %v23434_v17 = vmul.f32 %v23398_v24, %v23044_v10  ;;  %v23438_v48 = vmul.f32 %v23398_v24, %v23048_v14  ;;  %v23442_v56 = vmul.f32 %v23398_v24, %v23052_v2  ;;  %v23446_v27 = vmul.f32 %v23398_v24, %v23056_v20 }
0x1165   :  { %v23450_v55 = vmul.f32 %v23398_v24, %v23060_v29  ;;  %v23454_v10 = vmul.f32 %v23398_v24, %v23064_v41  ;;  %v23458_v14 = vmul.f32 %v23398_v24, %v23068_v16  ;;  %v23462_v2 = vmul.f32 %v23398_v24, %v23072_v44 }
0x1166   :  { %v23466_v20 = vmul.f32 %v23398_v24, %v23076_v8  ;;  %v23470_v29 = vmul.f32 %v23398_v24, %v23080_v50  ;;  %v23474_v41 = vmul.f32 %v23398_v24, %v23084_v9  ;;  %v23478_v16 = vmul.f32 %v23398_v24, %v23088_v0 }
0x1167   :  { %v23482_v44 = vmul.f32 %v23398_v24, %v23092_v46  ;;  %v23486_v8 = vmul.f32 %v23398_v24, %v23096_v58  ;;  %v23490_v50 = vmul.f32 %v23398_v24, %v23100_v52  ;;  %v23494_v9 = vmul.f32 %v23398_v24, %v23104_v54 }
0x1168   :  { %v23498_v0 = vmul.f32 %v23398_v24, %v23108_v39  ;;  %v23502_v46 = vmul.f32 %v23398_v24, %v23112_v4  ;;  %v23506_v58 = vmul.f32 %v23398_v24, %v23116_v34  ;;  %v23510_v52 = vmul.f32 %v23398_v24, %v23120_v18 }
0x1169   :  { %v23514_v54 = vmul.f32 %v23398_v24, %v23124_v23  ;;  %v23518_v39 = vmul.f32 %v23398_v24, %v23128_v35  ;;  %v23522_v4 = vmul.f32 %v23398_v24, %v23132_v33  ;;  %v23526_v34 = vmul.f32 %v23398_v24, %v23136_v49 }
0x116a   :  { %v23530_v18 = vmul.f32 %v23398_v24, %v23140_v19  ;;  %v23534_v23 = vmul.f32 %v23398_v24, %v23144_v30  ;;  %v23538_v35 = vmul.f32 %v23398_v24, %v23148_v32  ;;  %v23542_v33 = vmul.f32 %v23398_v24, %v23152_v26 }
0x116b   :  { %v23546_v49 = vmul.f32 %v23398_v24, %v23156_v63  ;;  %v23550_v19 = vmul.f32 %v23398_v24, %v23160_v25  ;;  %v23554_v30 = vmul.f32 %v23398_v24, %v23164_v15  ;;  %v23558_v32 = vmul.f32 %v23398_v24, %v23168_v47 }
0x116c   :  { %v23562_v26 = vmul.f32 %v23398_v24, %v23172_v43  ;;  %v23566_v63 = vmul.f32 %v23398_v24, %v23176_v61  ;;  %v23570_v25 = vmul.f32 %v23398_v24, %v23180_v57  ;;  %v23574_v15 = vmul.f32 %v23398_v24, %v23184_v62 }
0x116d   :  { %v23578_v47 = vmul.f32 %v23398_v24, %v25549_v22  ;;  %v23582_v43 = vmul.f32 %v23398_v24, %v25550_v42  ;;  %v23586_v61 = vmul.f32 %v23398_v24, %v25551_v31  ;;  %v23590_v57 = vmul.f32 %v23398_v24, %v25552_v40  ;;  %v25559_v31 = vld [vmem:[#allocation44_spill] sm:$0xff] }
0x116e   :  { %v23594_v62 = vmul.f32 %v23398_v24, %v25553_v37  ;;  %v23598_v21 = vmul.f32 %v23398_v24, %v25554_v1  ;;  %v23602_v11 = vmul.f32 %v23398_v24, %v25536_v59  ;;  %v23611_v22 = vmul.f32 %v23398_v24, %v25537_v6  ;;  %v25561_v37 = vld [vmem:[#allocation49_spill] sm:$0xff]  ;;  %v25563_v1 = vld [vmem:[#allocation34_spill] sm:$0xff] }
0x116f   :  { %v23615_v42 = vmul.f32 %v23398_v24, %v25538_v28  ;;  %v23619_v40 = vmul.f32 %v23398_v24, %v25559_v31  ;;  %v23623_v59 = vmul.f32 %v23398_v24, %v25561_v37 }
0x1170   :  { %25555 = vst [vmem:[#allocation52_spill] sm:$0xff] %v23598_v21  ;;  %25556 = vst [vmem:[#allocation36_spill] sm:$0xff] %v23602_v11  ;;  %v23627_v11 = vmul.f32 %v23398_v24, %v25563_v1  ;;  %v25565_v21 = vld [vmem:[#allocation48_spill] sm:$0xff] }
0x1171   :  { %25557 = vst [vmem:[#allocation5_spill] sm:$0xff] %v23611_v22  ;;  %25558 = vst [vmem:[#allocation51_spill] sm:$0xff] %v23615_v42  ;;  %v23631_v6 = vmul.f32 %v23398_v24, %v25565_v21  ;;  %v25566_v22 = vld [vmem:[#allocation35_spill] sm:$0xff]  ;;  %v25567_v42 = vld [vmem:[#allocation21_spill] sm:$0xff] }
0x1172   :  { %25560 = vst [vmem:[#allocation7_spill] sm:$0xff] %v23619_v40  ;;  %25562 = vst [vmem:[#allocation14_spill] sm:$0xff] %v23623_v59  ;;  %v23635_v28 = vmul.f32 %v23398_v24, %v25566_v22  ;;  %v23639_v31 = vmul.f32 %v23398_v24, %v25567_v42  ;;  %v25568_v40 = vld [vmem:[#allocation27_spill] sm:$0xff]  ;;  %v25569_v59 = vld [vmem:[#allocation40_spill] sm:$0xff]  ;;  %v23655_v22 = vmul.f32 %v23398_v24, %v25544_v7 }
0x1173   :  { %25564 = vst [vmem:[#allocation18_spill] sm:$0xff] %v23627_v11  ;;  %v23643_v37 = vmul.f32 %v23398_v24, %v25568_v40  ;;  %v23647_v1 = vmul.f32 %v23398_v24, %v25569_v59  ;;  %v25570_v11 = vld [vmem:[#allocation46_spill] sm:$0xff]  ;;  %v23659_v42 = vmul.f32 %v23398_v24, %v23264_v36  ;;  %v23663_v40 = vadd.f32 %v23607_v12, %v23402_v5 }
0x1174   :  { %v23651_v21 = vmul.f32 %v23398_v24, %v25570_v11  ;;  %v23667_v59 = vadd.f32 %v23607_v12, %v23406_v38  ;;  %v23671_v11 = vadd.f32 %v23607_v12, %v23410_v60  ;;  %v23675_v7 = vadd.f32 %v23607_v12, %v23414_v45 }
0x1175   :  { %v23679_v36 = vadd.f32 %v23607_v12, %v23418_v51  ;;  %v23683_v24 = vadd.f32 %v23607_v12, %v23422_v3  ;;  %v23687_v5 = vadd.f32 %v23607_v12, %v23426_v53  ;;  %v23691_v38 = vadd.f32 %v23607_v12, %v23430_v13 }
0x1176   :  { %v23695_v60 = vadd.f32 %v23607_v12, %v23434_v17  ;;  %v23699_v45 = vadd.f32 %v23607_v12, %v23438_v48  ;;  %v23703_v51 = vadd.f32 %v23607_v12, %v23442_v56  ;;  %v23707_v3 = vadd.f32 %v23607_v12, %v23446_v27 }
0x1177   :  { %v23711_v53 = vadd.f32 %v23607_v12, %v23450_v55  ;;  %v23715_v13 = vadd.f32 %v23607_v12, %v23454_v10  ;;  %v23719_v17 = vadd.f32 %v23607_v12, %v23458_v14  ;;  %v23723_v48 = vadd.f32 %v23607_v12, %v23462_v2 }
0x1178   :  { %v23727_v56 = vadd.f32 %v23607_v12, %v23466_v20  ;;  %v23731_v27 = vadd.f32 %v23607_v12, %v23470_v29  ;;  %v23735_v55 = vadd.f32 %v23607_v12, %v23474_v41  ;;  %v23739_v10 = vadd.f32 %v23607_v12, %v23478_v16 }
0x1179   :  { %v23743_v14 = vadd.f32 %v23607_v12, %v23482_v44  ;;  %v23747_v2 = vadd.f32 %v23607_v12, %v23486_v8  ;;  %v23751_v20 = vadd.f32 %v23607_v12, %v23490_v50  ;;  %v23755_v29 = vadd.f32 %v23607_v12, %v23494_v9 }
0x117a   :  { %v23759_v41 = vadd.f32 %v23607_v12, %v23498_v0  ;;  %v23763_v16 = vadd.f32 %v23607_v12, %v23502_v46  ;;  %v23767_v44 = vadd.f32 %v23607_v12, %v23506_v58  ;;  %v23771_v8 = vadd.f32 %v23607_v12, %v23510_v52 }
0x117b   :  { %v23775_v50 = vadd.f32 %v23607_v12, %v23514_v54  ;;  %v23779_v9 = vadd.f32 %v23607_v12, %v23518_v39  ;;  %v23783_v0 = vadd.f32 %v23607_v12, %v23522_v4  ;;  %v23787_v46 = vadd.f32 %v23607_v12, %v23526_v34 }
0x117c   :  { %v23791_v58 = vadd.f32 %v23607_v12, %v23530_v18  ;;  %v23795_v52 = vadd.f32 %v23607_v12, %v23534_v23  ;;  %v23799_v54 = vadd.f32 %v23607_v12, %v23538_v35  ;;  %v23803_v39 = vadd.f32 %v23607_v12, %v23542_v33 }
0x117d   :  { %v23807_v4 = vadd.f32 %v23607_v12, %v23546_v49  ;;  %v23811_v34 = vadd.f32 %v23607_v12, %v23550_v19  ;;  %v23815_v18 = vadd.f32 %v23607_v12, %v23554_v30  ;;  %v23819_v23 = vadd.f32 %v23607_v12, %v23558_v32 }
0x117e   :  { %v23823_v35 = vadd.f32 %v23607_v12, %v23562_v26  ;;  %v23827_v33 = vadd.f32 %v23607_v12, %v23566_v63  ;;  %v23831_v49 = vadd.f32 %v23607_v12, %v23570_v25  ;;  %v23835_v19 = vadd.f32 %v23607_v12, %v23574_v15  ;;  %v25576_v15 = vld [vmem:[#allocation52_spill] sm:$0xff] }
0x117f   :  { %v23839_v30 = vadd.f32 %v23607_v12, %v23578_v47  ;;  %v23843_v32 = vadd.f32 %v23607_v12, %v23582_v43  ;;  %v23847_v26 = vadd.f32 %v23607_v12, %v23586_v61  ;;  %v23851_v63 = vadd.f32 %v23607_v12, %v23590_v57 }
0x1180   :  { %v23855_v25 = vadd.f32 %v23607_v12, %v23594_v62  ;;  %v23859_v47 = vadd.f32 %v23607_v12, %v25576_v15  ;;  %vm12473_vm10 = vcmp.gt.f32.partialorder %v23663_v40, 0.0  ;;  %vm12474_vm13 = vcmp.gt.f32.partialorder %v23667_v59, 0.0 }
0x1181   :  { %25571 = vst [vmem:[#allocation30_spill] sm:$0xff] %v23839_v30  ;;  %25572 = vst [vmem:[#allocation43_spill] sm:$0xff] %v23843_v32  ;;  %v25578_v30 = vld [vmem:[#allocation36_spill] sm:$0xff]  ;;  %v25579_v32 = vld [vmem:[#allocation5_spill] sm:$0xff]  ;;  %vm12475_vm6 = vcmp.gt.f32.partialorder %v23671_v11, 0.0  ;;  %vm12476_vm1 = vcmp.gt.f32.partialorder %v23675_v7, 0.0 }
0x1182   :  { %25573 = vst [vmem:[#allocation4_spill] sm:$0xff] %v23847_v26  ;;  %25574 = vst [vmem:[#allocation24_spill] sm:$0xff] %v23851_v63  ;;  %v23863_v43 = vadd.f32 %v23607_v12, %v25578_v30  ;;  %v23867_v61 = vadd.f32 %v23607_v12, %v25579_v32  ;;  %v25580_v26 = vld [vmem:[#allocation51_spill] sm:$0xff]  ;;  %v23887_v32 = vadd.f32 %v23607_v12, %v23631_v6  ;;  %vm12477_vm4 = vcmp.gt.f32.partialorder %v23679_v36, 0.0 }
0x1183   :  { %25575 = vst [vmem:[#allocation33_spill] sm:$0xff] %v23855_v25  ;;  %25577 = vst [vmem:[#allocation42_spill] sm:$0xff] %v23859_v47  ;;  %v23871_v57 = vadd.f32 %v23607_v12, %v25580_v26  ;;  %v25581_v63 = vld [vmem:[#allocation7_spill] sm:$0xff]  ;;  %v25583_v25 = vld [vmem:[#allocation14_spill] sm:$0xff]  ;;  %v23891_v26 = vadd.f32 %v23607_v12, %v23635_v28  ;;  %v23907_v6 = vadd.f32 %v23607_v12, %v23651_v21  ;;  %vm12478_vm11 = vcmp.gt.f32.partialorder %v23683_v24, 0.0 }
0x1184   :  { %v23875_v62 = vadd.f32 %v23607_v12, %v25581_v63  ;;  %v23879_v15 = vadd.f32 %v23607_v12, %v25583_v25  ;;  %v25585_v47 = vld [vmem:[#allocation18_spill] sm:$0xff]  ;;  %25587 = vst [vmem:[#allocation9_spill] sm:$0xff] %v23887_v32  ;;  %v23895_v63 = vadd.f32 %v23607_v12, %v23639_v31  ;;  %v23899_v25 = vadd.f32 %v23607_v12, %v23643_v37 }
0x1185   :  { %v23883_v30 = vadd.f32 %v23607_v12, %v25585_v47  ;;  %25588 = vst [vmem:[#allocation26_spill] sm:$0xff] %v23891_v26  ;;  %v23903_v47 = vadd.f32 %v23607_v12, %v23647_v1  ;;  %25592 = vst [vmem:[#allocation12_spill] sm:$0xff] %v23907_v6  ;;  %vm12479_vm3 = vcmp.gt.f32.partialorder %v23687_v5, 0.0  ;;  %vm12480_vm7 = vcmp.gt.f32.partialorder %v23691_v38, 0.0 }
0x1186   :  { %25582 = vst [vmem:[#allocation19_spill] sm:$0xff] %v23875_v62  ;;  %25584 = vst [vmem:[#allocation38_spill] sm:$0xff] %v23879_v15  ;;  %vm12481_vm8 = vcmp.gt.f32.partialorder %v23695_v60, 0.0  ;;  %v23920_v28 = vadd.f32 %v23607_v12, %v23655_v22  ;;  %vm12482_vm12 = vcmp.gt.f32.partialorder %v23699_v45, 0.0  ;;  %v12537_v31 = vmul.f32 0.1, %v23663_v40 }
0x1187   :  { %25586 = vst [vmem:[#allocation8_spill] sm:$0xff] %v23883_v30  ;;  %25589 = vst [vmem:[#allocation10_spill] sm:$0xff] %v23895_v63  ;;  %v12538_v37 = vmul.f32 0.1, %v23667_v59  ;;  %v12539_v1 = vmul.f32 0.1, %v23671_v11  ;;  %v23928_v21 = vadd.f32 %v23607_v12, %v23659_v42 }
0x1188   :  { %25590 = vst [vmem:[#allocation23_spill] sm:$0xff] %v23899_v25  ;;  %25591 = vst [vmem:[#allocation37_spill] sm:$0xff] %v23903_v47  ;;  %vm12483_vm9 = vcmp.gt.f32.partialorder %v23703_v51, 0.0  ;;  %v12540_v6 = vmul.f32 0.1, %v23675_v7  ;;  %vm12484_vm14 = vcmp.gt.f32.partialorder %v23707_v3, 0.0  ;;  %v12601_v12 = vsel %vm12473_vm10, %v23663_v40, %v12537_v31 }
0x1189   :  { %25593 = vst [vmem:[#allocation53_spill] sm:$0xff] %v23920_v28  ;;  %25594 = vst [vmem:[#allocation25_spill] sm:$0xff] %v23928_v21  ;;  %v12541_v47 = vmul.f32 0.1, %v23679_v36  ;;  %v12542_v22 = vmul.f32 0.1, %v23683_v24  ;;  %v12602_v32 = vsel %vm12474_vm13, %v23667_v59, %v12538_v37  ;;  %v12603_v15 = vsel %vm12475_vm6, %v23671_v11, %v12539_v1 }
0x118a   :  { %v12543_v28 = vmul.f32 0.1, %v23687_v5  ;;  %v12544_v25 = vmul.f32 0.1, %v23691_v38  ;;  %v12545_v63 = vmul.f32 0.1, %v23695_v60  ;;  %12665 = vst [vmem:[%s24598_s7] sm:$0xff] %v12601_v12  ;;  %v12604_v62 = vsel %vm12476_vm1, %v23675_v7, %v12540_v6 }
0x118b   :  { %vm12485_vm0 = vcmp.gt.f32.partialorder %v23711_v53, 0.0  ;;  %v12546_v42 = vmul.f32 0.1, %v23699_v45  ;;  %v23944_v21 = vmul.f32 0.1, %v23703_v51  ;;  %vm12486_vm2 = vcmp.gt.f32.partialorder %v23715_v13, 0.0 }
0x118c   :  { %v23947_v26 = vmul.f32 0.1, %v23707_v3  ;;  %v23957_v40 = vmul.f32 0.1, %v23711_v53  ;;  %v23960_v31 = vmul.f32 0.1, %v23715_v13 }
0x118d   :  { %v23963_v30 = vmul.f32 0.1, %v23719_v17  ;;  %12666 = vst [vmem:[%s24598_s7 + $0x8] sm:$0xff] %v12602_v32  ;;  %vm12487_vm15 = vcmp.gt.f32.partialorder %v23719_v17, 0.0  ;;  %v23973_v59 = vmul.f32 0.1, %v23723_v48 }
0x118e   :  { %v23976_v37 = vmul.f32 0.1, %v23727_v56  ;;  %v23979_v12 = vmul.f32 0.1, %v23731_v27  ;;  %12667 = vst [vmem:[%s24598_s7 + $0x10] sm:$0xff] %v12603_v15  ;;  %vm12488_vm5 = vcmp.gt.f32.partialorder %v23723_v48, 0.0 }
0x118f   :  { %v23989_v11 = vmul.f32 0.1, %v23735_v55  ;;  %v23992_v32 = vmul.f32 0.1, %v23739_v10  ;;  %v23995_v1 = vmul.f32 0.1, %v23743_v14 }
0x1190   :  { %25595 = vst [vmem:[#allocation28_spill] sm:$0xff] %v23979_v12  ;;  %v12605_v12 = vsel %vm12477_vm4, %v23679_v36, %v12541_v47  ;;  %12668 = vst [vmem:[%s24598_s7 + $0x18] sm:$0xff] %v12604_v62  ;;  %vm12489_vm10 = vcmp.gt.f32.partialorder %v23727_v56, 0.0  ;;  %v24005_v7 = vmul.f32 0.1, %v23747_v2  ;;  %vm12490_vm13 = vcmp.gt.f32.partialorder %v23731_v27, 0.0 }
0x1191   :  { %25596 = vst [vmem:[#allocation16_spill] sm:$0xff] %v23995_v1  ;;  %v24008_v15 = vmul.f32 0.1, %v23751_v20  ;;  %v24011_v6 = vmul.f32 0.1, %v23755_v29  ;;  %v12606_v1 = vsel %vm12478_vm11, %v23683_v24, %v12542_v22  ;;  %12669 = vst [vmem:[%s24598_s7 + $0x20] sm:$0xff] %v12605_v12 }
0x1192   :  { %v24021_v36 = vmul.f32 0.1, %v23759_v41  ;;  %v24024_v62 = vmul.f32 0.1, %v23763_v16  ;;  %v24027_v47 = vmul.f32 0.1, %v23767_v44 }
0x1193   :  { %25597 = vst [vmem:[#allocation17_spill] sm:$0xff] %v24011_v6  ;;  %v12607_v6 = vsel %vm12479_vm3, %v23687_v5, %v12543_v28  ;;  %12670 = vst [vmem:[%s24598_s7 + $0x28] sm:$0xff] %v12606_v1  ;;  %vm12491_vm6 = vcmp.gt.f32.partialorder %v23735_v55, 0.0  ;;  %v24037_v24 = vmul.f32 0.1, %v23771_v8  ;;  %vm12492_vm1 = vcmp.gt.f32.partialorder %v23739_v10, 0.0 }
0x1194   :  { %25598 = vst [vmem:[#allocation20_spill] sm:$0xff] %v24027_v47  ;;  %v24040_v22 = vmul.f32 0.1, %v23775_v50  ;;  %v24043_v12 = vmul.f32 0.1, %v23779_v9  ;;  %v12608_v47 = vsel %vm12480_vm7, %v23691_v38, %v12544_v25  ;;  %12671 = vst [vmem:[%s24598_s7 + $0x30] sm:$0xff] %v12607_v6  ;;  %v12609_v38 = vsel %vm12481_vm8, %v23695_v60, %v12545_v63 }
0x1195   :  { %v24055_v5 = vmul.f32 0.1, %v23783_v0  ;;  %v24058_v28 = vmul.f32 0.1, %v23787_v46  ;;  %v24061_v1 = vmul.f32 0.1, %v23791_v58  ;;  %v12610_v63 = vsel %vm12482_vm12, %v23699_v45, %v12546_v42 }
0x1196   :  { %12672 = vst [vmem:[%s24598_s7 + $0x38] sm:$0xff] %v12608_v47  ;;  %vm12495_vm3 = vcmp.gt.f32.partialorder %v23751_v20, 0.0  ;;  %v24074_v25 = vmul.f32 0.1, %v23795_v52  ;;  %v24077_v6 = vmul.f32 0.1, %v23799_v54  ;;  %v12611_v42 = vsel %vm12483_vm9, %v23703_v51, %v23944_v21 }
0x1197   :  { %v24080_v60 = vmul.f32 0.1, %v23803_v39  ;;  %12673 = vst [vmem:[%s24598_s7 + $0x40] sm:$0xff] %v12609_v38  ;;  %vm12499_vm8 = vcmp.gt.f32.partialorder %v23767_v44, 0.0  ;;  %v24093_v47 = vmul.f32 0.1, %v23807_v4  ;;  %v12612_v21 = vsel %vm12484_vm14, %v23707_v3, %v23947_v26 }
0x1198   :  { %v24099_v45 = vmul.f32 0.1, %v23815_v18  ;;  %12674 = vst [vmem:[%s24598_s7 + $0x48] sm:$0xff] %v12610_v63  ;;  %vm12503_vm12 = vcmp.gt.f32.partialorder %v23783_v0, 0.0  ;;  %v24113_v38 = vmul.f32 0.1, %v23819_v23  ;;  %v12613_v26 = vsel %vm12485_vm0, %v23711_v53, %v23957_v40 }
0x1199   :  { %25599 = vst [vmem:[#allocation15_spill] sm:$0xff] %v24080_v60  ;;  %v24096_v60 = vmul.f32 0.1, %v23811_v34  ;;  %v24119_v51 = vmul.f32 0.1, %v23827_v33  ;;  %12675 = vst [vmem:[%s24598_s7 + $0x50] sm:$0xff] %v12611_v42  ;;  %v12614_v40 = vsel %vm12486_vm2, %v23715_v13, %v23960_v31  ;;  %v12615_v31 = vsel %vm12487_vm15, %v23719_v17, %v23963_v30 }
0x119a   :  { %25600 = vst [vmem:[#allocation45_spill] sm:$0xff] %v24099_v45  ;;  %25601 = vst [vmem:[#allocation6_spill] sm:$0xff] %v24113_v38  ;;  %v24116_v45 = vmul.f32 0.1, %v23823_v35  ;;  %vm12507_vm9 = vcmp.gt.f32.partialorder %v23799_v54, 0.0  ;;  %vm12511_vm14 = vcmp.gt.f32.partialorder %v23815_v18, 0.0  ;;  %v12616_v30 = vsel %vm12488_vm5, %v23723_v48, %v23973_v59 }
0x119b   :  { %25603 = vst [vmem:[#allocation13_spill] sm:$0xff] %v24119_v51  ;;  %v24133_v63 = vmul.f32 0.1, %v23831_v49  ;;  %v24136_v51 = vmul.f32 0.1, %v23835_v19  ;;  %12676 = vst [vmem:[%s24598_s7 + $0x58] sm:$0xff] %v12612_v21  ;;  %v12617_v59 = vsel %vm12489_vm10, %v23727_v56, %v23976_v37 }
0x119c   :  { %25602 = vst [vmem:[#allocation50_spill] sm:$0xff] %v24116_v45  ;;  %v25606_v45 = vld [vmem:[#allocation30_spill] sm:$0xff]  ;;  %v25608_v42 = vld [vmem:[#allocation43_spill] sm:$0xff]  ;;  %v25612_v38 = vld [vmem:[#allocation24_spill] sm:$0xff]  ;;  %vm12515_vm0 = vcmp.gt.f32.partialorder %v23831_v49, 0.0  ;;  %vm12523_vm15 = vcmp.gt.f32.partialorder %v23863_v43, 0.0 }
0x119d   :  { %25604 = vst [vmem:[#allocation11_spill] sm:$0xff] %v24133_v63  ;;  %25605 = vst [vmem:[#allocation22_spill] sm:$0xff] %v24136_v51  ;;  %v24139_v3 = vmul.f32 0.1, %v25606_v45  ;;  %v24153_v51 = vmul.f32 0.1, %v25608_v42 }
0x119e   :  { %v24159_v53 = vmul.f32 0.1, %v25612_v38  ;;  %12677 = vst [vmem:[%s24598_s7 + $0x60] sm:$0xff] %v12613_v26  ;;  %v25614_v21 = vld [vmem:[#allocation33_spill] sm:$0xff]  ;;  %v24179_v13 = vmul.f32 0.1, %v23863_v43 }
0x119f   :  { %25607 = vst [vmem:[#allocation29_spill] sm:$0xff] %v24139_v3  ;;  %25609 = vst [vmem:[#allocation39_spill] sm:$0xff] %v24153_v51  ;;  %v25610_v3 = vld [vmem:[#allocation4_spill] sm:$0xff]  ;;  %v24193_v26 = vmul.f32 0.1, %v23867_v61  ;;  %vm25642_vm11 = vcmp.gt.f32.partialorder %v23747_v2, 0.0 }
0x11a0   :  { %v24156_v63 = vmul.f32 0.1, %v25610_v3  ;;  %25613 = vst [vmem:[#allocation3_spill] sm:$0xff] %v24159_v53  ;;  %v25615_v53 = vld [vmem:[#allocation42_spill] sm:$0xff]  ;;  %25617 = vst [vmem:[#allocation41_spill] sm:$0xff] %v24179_v13  ;;  %vm12519_vm2 = vcmp.gt.f32.partialorder %v25610_v3, 0.0 }
0x11a1   :  { %v24176_v51 = vmul.f32 0.1, %v25615_v53  ;;  %12678 = vst [vmem:[%s24598_s7 + $0x68] sm:$0xff] %v12614_v40  ;;  %25618 = vst [vmem:[#allocation32_spill] sm:$0xff] %v24193_v26  ;;  %v24196_v13 = vmul.f32 0.1, %v23871_v57 }
0x11a2   :  { %25611 = vst [vmem:[#allocation31_spill] sm:$0xff] %v24156_v63  ;;  %v24173_v63 = vmul.f32 0.1, %v25614_v21  ;;  %12679 = vst [vmem:[%s24598_s7 + $0x70] sm:$0xff] %v12615_v31  ;;  %v25622_v40 = vld [vmem:[#allocation38_spill] sm:$0xff]  ;;  %v25626_v53 = vld [vmem:[#allocation9_spill] sm:$0xff] }
0x11a3   :  { %25616 = vst [vmem:[#allocation47_spill] sm:$0xff] %v24176_v51  ;;  %25619 = vst [vmem:[#allocation44_spill] sm:$0xff] %v24196_v13  ;;  %v25620_v51 = vld [vmem:[#allocation19_spill] sm:$0xff]  ;;  %v24213_v13 = vmul.f32 0.1, %v25622_v40  ;;  %vm12527_vm5 = vcmp.gt.f32.partialorder %v25622_v40, 0.0 }
0x11a4   :  { %v24199_v17 = vmul.f32 0.1, %v25620_v51  ;;  %v24219_v48 = vmul.f32 0.1, %v25626_v53  ;;  %12680 = vst [vmem:[%s24598_s7 + $0x78] sm:$0xff] %v12616_v30  ;;  %v25628_v31 = vld [vmem:[#allocation26_spill] sm:$0xff] }
0x11a5   :  { %25623 = vst [vmem:[#allocation34_spill] sm:$0xff] %v24213_v13  ;;  %v25632_v51 = vld [vmem:[#allocation23_spill] sm:$0xff]  ;;  %v25634_v37 = vld [vmem:[#allocation28_spill] sm:$0xff]  ;;  %12681 = vst [vmem:[%s24598_s7 + $0x80] sm:$0xff] %v12617_v59  ;;  %v12619_v59 = vsel %vm12491_vm6, %v23735_v55, %v23989_v11  ;;  %vm25641_vm6 = vcmp.gt.f32.partialorder %v23743_v14, 0.0  ;;  %v12622_v11 = vsel %vm25642_vm11, %v23747_v2, %v24005_v7  ;;  %vm25646_vm11 = vcmp.gt.f32.partialorder %v23763_v16, 0.0 }
0x11a6   :  { %25621 = vst [vmem:[#allocation49_spill] sm:$0xff] %v24199_v17  ;;  %v25624_v17 = vld [vmem:[#allocation8_spill] sm:$0xff]  ;;  %25627 = vst [vmem:[#allocation35_spill] sm:$0xff] %v24219_v48  ;;  %v25630_v48 = vld [vmem:[#allocation10_spill] sm:$0xff]  ;;  %v24239_v56 = vmul.f32 0.1, %v25632_v51  ;;  %v12618_v30 = vsel %vm12490_vm13, %v23731_v27, %v25634_v37  ;;  %v12626_v2 = vsel %vm25646_vm11, %v23763_v16, %v24024_v62 }
0x11a7   :  { %v24216_v26 = vmul.f32 0.1, %v25624_v17  ;;  %v24236_v13 = vmul.f32 0.1, %v25630_v48  ;;  %vm12531_vm10 = vcmp.gt.f32.partialorder %v25630_v48, 0.0  ;;  %vm12532_vm4 = vcmp.gt.f32.partialorder %v25632_v51, 0.0 }
0x11a8   :  { %25633 = vst [vmem:[#allocation40_spill] sm:$0xff] %v24239_v56  ;;  %v25637_v53 = vld [vmem:[#allocation53_spill] sm:$0xff]  ;;  %12682 = vst [vmem:[%s24598_s7 + $0x88] sm:$0xff] %v12618_v30  ;;  %v12623_v30 = vsel %vm12495_vm3, %v23751_v20, %v24008_v15  ;;  %v25647_v20 = vld [vmem:[#allocation20_spill] sm:$0xff]  ;;  %vm25648_vm3 = vcmp.gt.f32.partialorder %v23771_v8, 0.0  ;;  %vm25652_vm11 = vcmp.gt.f32.partialorder %v23791_v58, 0.0 }
0x11a9   :  { %25625 = vst [vmem:[#allocation48_spill] sm:$0xff] %v24216_v26  ;;  %v24233_v26 = vmul.f32 0.1, %v25628_v31  ;;  %25631 = vst [vmem:[#allocation27_spill] sm:$0xff] %v24236_v13  ;;  %v25635_v31 = vld [vmem:[#allocation37_spill] sm:$0xff]  ;;  %vm12535_vm13 = vcmp.gt.f32.partialorder %v25637_v53, 0.0 }
0x11aa   :  { %v24253_v13 = vmul.f32 0.1, %v25635_v31  ;;  %v24259_v27 = vmul.f32 0.1, %v25637_v53  ;;  %v25639_v37 = vld [vmem:[#allocation25_spill] sm:$0xff]  ;;  %12683 = vst [vmem:[%s24598_s7 + $0x90] sm:$0xff] %v12619_v59 }
0x11ab   :  { %25629 = vst [vmem:[#allocation21_spill] sm:$0xff] %v24233_v26  ;;  %v25636_v26 = vld [vmem:[#allocation12_spill] sm:$0xff]  ;;  %vm12536_vm7 = vcmp.gt.f32.partialorder %v25639_v37, 0.0  ;;  %v24271_v31 = vmul.f32 0.1, %v25639_v37  ;;  %12686 = vst [vmem:[%s24598_s7 + $0xa8] sm:$0xff] %v12622_v11 }
0x11ac   :  { %v24256_v56 = vmul.f32 0.1, %v25636_v26  ;;  %25638 = vst [vmem:[#allocation46_spill] sm:$0xff] %v24259_v27  ;;  %v12620_v27 = vsel %vm12492_vm1, %v23739_v10, %v23992_v32  ;;  %v25640_v26 = vld [vmem:[#allocation16_spill] sm:$0xff]  ;;  %v25643_v10 = vld [vmem:[#allocation17_spill] sm:$0xff]  ;;  %vm25644_vm1 = vcmp.gt.f32.partialorder %v23755_v29, 0.0 }
0x11ad   :  { %v12621_v55 = vsel %vm25641_vm6, %v23743_v14, %v25640_v26  ;;  %v12624_v32 = vsel %vm25644_vm1, %v23755_v29, %v25643_v10  ;;  %vm25645_vm6 = vcmp.gt.f32.partialorder %v23759_v41, 0.0  ;;  %12684 = vst [vmem:[%s24598_s7 + $0x98] sm:$0xff] %v12620_v27  ;;  %v12627_v29 = vsel %vm12499_vm8, %v23767_v44, %v25647_v20  ;;  %12687 = vst [vmem:[%s24598_s7 + $0xb0] sm:$0xff] %v12623_v30  ;;  %v25682_v26 = vld [vmem:[#allocation44_spill] sm:$0xff]  ;;  %v25684_v59 = vld [vmem:[#allocation49_spill] sm:$0xff] }
0x11ae   :  { %v12625_v14 = vsel %vm25645_vm6, %v23759_v41, %v24021_v36  ;;  %12685 = vst [vmem:[%s24598_s7 + $0xa0] sm:$0xff] %v12621_v55  ;;  %v12628_v41 = vsel %vm25648_vm3, %v23771_v8, %v24037_v24  ;;  %vm25649_vm1 = vcmp.gt.f32.partialorder %v23775_v50, 0.0  ;;  %vm25650_vm6 = vcmp.gt.f32.partialorder %v23779_v9, 0.0  ;;  %12688 = vst [vmem:[%s24598_s7 + $0xb8] sm:$0xff] %v12624_v32  ;;  %v25661_v36 = vld [vmem:[#allocation50_spill] sm:$0xff]  ;;  %v25663_v24 = vld [vmem:[#allocation13_spill] sm:$0xff] }
0x11af   :  { %v12629_v16 = vsel %vm25649_vm1, %v23775_v50, %v24040_v22  ;;  %v12630_v7 = vsel %vm25650_vm6, %v23779_v9, %v24043_v12  ;;  %12689 = vst [vmem:[%s24598_s7 + $0xc0] sm:$0xff] %v12625_v14  ;;  %12690 = vst [vmem:[%s24598_s7 + $0xc8] sm:$0xff] %v12626_v2  ;;  %v12631_v44 = vsel %vm12503_vm12, %v23783_v0, %v24055_v5  ;;  %vm25651_vm8 = vcmp.gt.f32.partialorder %v23787_v46, 0.0  ;;  %v25668_v12 = vld [vmem:[#allocation29_spill] sm:$0xff]  ;;  %v25685_v55 = vld [vmem:[#allocation19_spill] sm:$0xff] }
0x11b0   :  { %v12632_v8 = vsel %vm25651_vm8, %v23787_v46, %v24058_v28  ;;  %v12633_v50 = vsel %vm25652_vm11, %v23791_v58, %v24061_v1  ;;  %vm25653_vm3 = vcmp.gt.f32.partialorder %v23795_v52, 0.0  ;;  %12691 = vst [vmem:[%s24598_s7 + $0xd0] sm:$0xff] %v12627_v29  ;;  %12692 = vst [vmem:[%s24598_s7 + $0xd8] sm:$0xff] %v12628_v41  ;;  %v12635_v0 = vsel %vm12507_vm9, %v23799_v54, %v24077_v6  ;;  %v25654_v46 = vld [vmem:[#allocation15_spill] sm:$0xff]  ;;  %v25658_v54 = vld [vmem:[#allocation45_spill] sm:$0xff] }
0x11b1   :  { %v12634_v9 = vsel %vm25653_vm3, %v23795_v52, %v24074_v25  ;;  %12693 = vst [vmem:[%s24598_s7 + $0xe0] sm:$0xff] %v12629_v16  ;;  %12694 = vst [vmem:[%s24598_s7 + $0xe8] sm:$0xff] %v12630_v7  ;;  %vm25655_vm12 = vcmp.gt.f32.partialorder %v23803_v39, 0.0  ;;  %vm25656_vm1 = vcmp.gt.f32.partialorder %v23807_v4, 0.0  ;;  %vm25657_vm6 = vcmp.gt.f32.partialorder %v23811_v34, 0.0  ;;  %v25670_v28 = vld [vmem:[#allocation39_spill] sm:$0xff] }
0x11b2   :  { %v12636_v58 = vsel %vm25655_vm12, %v23803_v39, %v25654_v46  ;;  %v12637_v52 = vsel %vm25656_vm1, %v23807_v4, %v24093_v47  ;;  %v12638_v15 = vsel %vm25657_vm6, %v23811_v34, %v24096_v60  ;;  %12695 = vst [vmem:[%s24598_s7 + $0xf0] sm:$0xff] %v12631_v44  ;;  %12696 = vst [vmem:[%s24598_s7 + $0xf8] sm:$0xff] %v12632_v8  ;;  %v25659_v4 = vld [vmem:[#allocation6_spill] sm:$0xff]  ;;  %vm25660_vm9 = vcmp.gt.f32.partialorder %v23819_v23, 0.0  ;;  %v25673_v25 = vld [vmem:[#allocation3_spill] sm:$0xff] }
0x11b3   :  { %12697 = vst [vmem:[%s24598_s7 + $0x100] sm:$0xff] %v12633_v50  ;;  %12698 = vst [vmem:[%s24598_s7 + $0x108] sm:$0xff] %v12634_v9  ;;  %v12639_v39 = vsel %vm12511_vm14, %v23815_v18, %v25658_v54  ;;  %v12640_v34 = vsel %vm25660_vm9, %v23819_v23, %v25659_v4  ;;  %vm25662_vm8 = vcmp.gt.f32.partialorder %v23823_v35, 0.0  ;;  %vm25664_vm11 = vcmp.gt.f32.partialorder %v23827_v33, 0.0  ;;  %v25665_v18 = vld [vmem:[#allocation11_spill] sm:$0xff]  ;;  %v25691_v32 = vld [vmem:[#allocation9_spill] sm:$0xff] }
0x11b4   :  { %v12641_v62 = vsel %vm25662_vm8, %v23823_v35, %v25661_v36  ;;  %v12642_v22 = vsel %vm25664_vm11, %v23827_v33, %v25663_v24  ;;  %12699 = vst [vmem:[%s24598_s7 + $0x110] sm:$0xff] %v12635_v0  ;;  %12700 = vst [vmem:[%s24598_s7 + $0x118] sm:$0xff] %v12636_v58  ;;  %v12643_v23 = vsel %vm12515_vm0, %v23831_v49, %v25665_v18  ;;  %v25666_v35 = vld [vmem:[#allocation22_spill] sm:$0xff]  ;;  %vm25667_vm14 = vcmp.gt.f32.partialorder %v23835_v19, 0.0  ;;  %v25672_v49 = vld [vmem:[#allocation31_spill] sm:$0xff] }
0x11b5   :  { %12701 = vst [vmem:[%s24598_s7 + $0x120] sm:$0xff] %v12637_v52  ;;  %12702 = vst [vmem:[%s24598_s7 + $0x128] sm:$0xff] %v12638_v15  ;;  %v12644_v33 = vsel %vm25667_vm14, %v23835_v19, %v25666_v35  ;;  %vm25669_vm3 = vcmp.gt.f32.partialorder %v25606_v45, 0.0  ;;  %vm25671_vm12 = vcmp.gt.f32.partialorder %v25608_v42, 0.0  ;;  %v12647_v19 = vsel %vm12519_vm2, %v25610_v3, %v25672_v49  ;;  %v25676_v47 = vld [vmem:[#allocation47_spill] sm:$0xff]  ;;  %v25680_v3 = vld [vmem:[#allocation32_spill] sm:$0xff] }
0x11b6   :  { %v12645_v5 = vsel %vm25669_vm3, %v25606_v45, %v25668_v12  ;;  %v12646_v1 = vsel %vm25671_vm12, %v25608_v42, %v25670_v28  ;;  %12703 = vst [vmem:[%s24598_s7 + $0x130] sm:$0xff] %v12639_v39  ;;  %12704 = vst [vmem:[%s24598_s7 + $0x138] sm:$0xff] %v12640_v34  ;;  %vm25674_vm0 = vcmp.gt.f32.partialorder %v25612_v38, 0.0  ;;  %vm25675_vm1 = vcmp.gt.f32.partialorder %v25614_v21, 0.0  ;;  %v25677_v45 = vld [vmem:[#allocation42_spill] sm:$0xff]  ;;  %v25690_v10 = vld [vmem:[#allocation35_spill] sm:$0xff] }
0x11b7   :  { %12705 = vst [vmem:[%s24598_s7 + $0x140] sm:$0xff] %v12641_v62  ;;  %12706 = vst [vmem:[%s24598_s7 + $0x148] sm:$0xff] %v12642_v22  ;;  %v12648_v6 = vsel %vm25674_vm0, %v25612_v38, %v25673_v25  ;;  %v12649_v60 = vsel %vm25675_vm1, %v25614_v21, %v24173_v63  ;;  %vm25678_vm6 = vcmp.gt.f32.partialorder %v25677_v45, 0.0  ;;  %v25679_v38 = vld [vmem:[#allocation41_spill] sm:$0xff]  ;;  %vm25681_vm2 = vcmp.gt.f32.partialorder %v23867_v61, 0.0  ;;  %v25694_v20 = vld [vmem:[#allocation26_spill] sm:$0xff] }
0x11b8   :  { %v12650_v42 = vsel %vm25678_vm6, %v25677_v45, %v25676_v47  ;;  %12707 = vst [vmem:[%s24598_s7 + $0x150] sm:$0xff] %v12643_v23  ;;  %12708 = vst [vmem:[%s24598_s7 + $0x158] sm:$0xff] %v12644_v33  ;;  %v12651_v63 = vsel %vm12523_vm15, %v23863_v43, %v25679_v38  ;;  %v12652_v21 = vsel %vm25681_vm2, %v23867_v61, %v25680_v3  ;;  %vm25683_vm9 = vcmp.gt.f32.partialorder %v23871_v57, 0.0  ;;  %v25687_v43 = vld [vmem:[#allocation34_spill] sm:$0xff]  ;;  %v25693_v2 = vld [vmem:[#allocation21_spill] sm:$0xff] }
0x11b9   :  { %12709 = vst [vmem:[%s24598_s7 + $0x160] sm:$0xff] %v12645_v5  ;;  %12710 = vst [vmem:[%s24598_s7 + $0x168] sm:$0xff] %v12646_v1  ;;  %v12653_v27 = vsel %vm25683_vm9, %v23871_v57, %v25682_v26  ;;  %vm25686_vm8 = vcmp.gt.f32.partialorder %v25685_v55, 0.0  ;;  %v12655_v61 = vsel %vm12527_vm5, %v25622_v40, %v25687_v43  ;;  %v25688_v57 = vld [vmem:[#allocation48_spill] sm:$0xff]  ;;  %vm25689_vm15 = vcmp.gt.f32.partialorder %v25624_v17, 0.0  ;;  %v25698_v7 = vld [vmem:[#allocation37_spill] sm:$0xff] }
0x11ba   :  { %v12654_v11 = vsel %vm25686_vm8, %v25685_v55, %v25684_v59  ;;  %12711 = vst [vmem:[%s24598_s7 + $0x170] sm:$0xff] %v12647_v19  ;;  %12712 = vst [vmem:[%s24598_s7 + $0x178] sm:$0xff] %v12648_v6  ;;  %v12656_v30 = vsel %vm25689_vm15, %v25624_v17, %v25688_v57  ;;  %vm25692_vm11 = vcmp.gt.f32.partialorder %v25691_v32, 0.0  ;;  %vm25695_vm14 = vcmp.gt.f32.partialorder %v25694_v20, 0.0  ;;  %v25696_v17 = vld [vmem:[#allocation27_spill] sm:$0xff]  ;;  %v25697_v41 = vld [vmem:[#allocation40_spill] sm:$0xff] }
0x11bb   :  { %12713 = vst [vmem:[%s24598_s7 + $0x180] sm:$0xff] %v12649_v60  ;;  %12714 = vst [vmem:[%s24598_s7 + $0x188] sm:$0xff] %v12650_v42  ;;  %v12657_v14 = vsel %vm25692_vm11, %v25691_v32, %v25690_v10  ;;  %v12658_v29 = vsel %vm25695_vm14, %v25694_v20, %v25693_v2  ;;  %v12659_v40 = vsel %vm12531_vm10, %v25630_v48, %v25696_v17  ;;  %vm25699_vm5 = vcmp.gt.f32.partialorder %v25698_v7, 0.0  ;;  %v25700_v8 = vld [vmem:[#allocation12_spill] sm:$0xff] }
0x11bc   :  { %12715 = vst [vmem:[%s24598_s7 + $0x190] sm:$0xff] %v12651_v63  ;;  %12716 = vst [vmem:[%s24598_s7 + $0x198] sm:$0xff] %v12652_v21  ;;  %v12660_v16 = vsel %vm12532_vm4, %v25632_v51, %v25697_v41  ;;  %v12661_v44 = vsel %vm25699_vm5, %v25698_v7, %v24253_v13  ;;  %vm25701_vm3 = vcmp.gt.f32.partialorder %v25700_v8, 0.0  ;;  %v25702_v51 = vld [vmem:[#allocation46_spill] sm:$0xff]  ;;  %v12664_v48 = vsel %vm12536_vm7, %v25639_v37, %v24271_v31 }
0x11bd   :  { %12717 = vst [vmem:[%s24598_s7 + $0x1a0] sm:$0xff] %v12653_v27  ;;  %12718 = vst [vmem:[%s24598_s7 + $0x1a8] sm:$0xff] %v12654_v11  ;;  %v12662_v50 = vsel %vm25701_vm3, %v25700_v8, %v24256_v56  ;;  %v12663_v13 = vsel %vm12535_vm13, %v25637_v53, %v25702_v51 }
0x11be   :  { %12719 = vst [vmem:[%s24598_s7 + $0x1b0] sm:$0xff] %v12655_v61  ;;  %12720 = vst [vmem:[%s24598_s7 + $0x1b8] sm:$0xff] %v12656_v30 }
0x11bf   :  { %12721 = vst [vmem:[%s24598_s7 + $0x1c0] sm:$0xff] %v12657_v14  ;;  %12722 = vst [vmem:[%s24598_s7 + $0x1c8] sm:$0xff] %v12658_v29 }
0x11c0   :  { %12723 = vst [vmem:[%s24598_s7 + $0x1d0] sm:$0xff] %v12659_v40  ;;  %12724 = vst [vmem:[%s24598_s7 + $0x1d8] sm:$0xff] %v12660_v16 }
0x11c1   :  { %12725 = vst [vmem:[%s24598_s7 + $0x1e0] sm:$0xff] %v12661_v44  ;;  %12726 = vst [vmem:[%s24598_s7 + $0x1e8] sm:$0xff] %v12662_v50 }
0x11c2   :  { %12727 = vst [vmem:[%s24598_s7 + $0x1f0] sm:$0xff] %v12663_v13  ;;  %12728 = vst [vmem:[%s24598_s7 + $0x1f8] sm:$0xff] %v12664_v48 }

</bundles_post_ra>
